<compile_context>
chip_gen: v6e
topology: v6e:2x2x1
jax: 0.10.0
libtpu: 0.0.40
codegen_flags: <defaults>
</compile_context>

<pallas_src>
import functools

import jax
import jax.numpy as jnp
from jax.experimental import pallas as pl
from jax.experimental.pallas import tpu as pltpu

KERNEL_SIZE = 7
PAD = KERNEL_SIZE // 2
LANE = 128


def _round_up(n, m):
    return ((n + m - 1) // m) * m


def _pick_halo_block(tile_h):
    """Smallest divisor of tile_h that is >= PAD (halo DMA block height)."""
    for hb in range(PAD, tile_h + 1):
        if tile_h % hb == 0:
            return hb
    return tile_h


def gated_cnn_block_kernel(
    x_top_ref, x_cur_ref, x_bot_ref,
    ln_w_ref, ln_b_ref,
    w1_gic_ref, b1_gic_ref, w1_c_ref, b1_c_ref,
    wc_ref, bc_ref,
    w2_i_ref, w2_c_ref, b2_ref,
    out_ref,
    *, dim, real_w):
    t = pl.program_id(1)
    nt = pl.num_programs(1)

    _, tile_h, Wp, Dp = x_cur_ref.shape
    hb = x_top_ref.shape[1]
    Cp = w1_c_ref.shape[1]
    ICp = w2_i_ref.shape[0]
    pad_d = Dp - dim
    inv_d = 1.0 / dim

    ln_w = ln_w_ref[...]            # (1, Dp) f32, zero beyond `dim`
    ln_b = ln_b_ref[...]

    def layer_norm(x3d):
        # Centered two-pass variance.  Zero-padded channels contribute
        # (Dp - dim) * mean^2 to sum(xc^2); subtract it exactly.
        mean = jnp.sum(x3d, axis=-1, keepdims=True) * inv_d
        xc = x3d - mean
        var = (jnp.sum(xc * xc, axis=-1, keepdims=True)
               - pad_d * mean * mean) * inv_d
        inv_std = jax.lax.rsqrt(var + 1e-6)
        return (xc * inv_std) * ln_w + ln_b          # pads stay exactly zero

    # ---- LayerNorm: centre rows + 3-row halos (each row normalized once) ----
    xn_cur = layer_norm(x_cur_ref[0].astype(jnp.float32)).astype(jnp.bfloat16)
    xn_top = layer_norm(
        x_top_ref[0, hb - PAD:, :, :].astype(jnp.float32)).astype(jnp.bfloat16)
    xn_bot = layer_norm(
        x_bot_ref[0, :PAD, :, :].astype(jnp.float32)).astype(jnp.bfloat16)
    xn_all = jnp.concatenate([xn_top, xn_cur, xn_bot], axis=0)  # (tile_h+6,Wp,Dp)

    n_rows = tile_h * Wp
    n_rows_all = (tile_h + 2 * PAD) * Wp

    # ---- conv-channel projection over ALL rows: one MXU dot --------------
    c_all = jnp.dot(xn_all.reshape(n_rows_all, Dp), w1_c_ref[...],
                    preferred_element_type=jnp.float32) + b1_c_ref[...]
    c_all = c_all.reshape(tile_h + 2 * PAD, Wp, Cp)

    # rows outside the image see zeros (Conv2d padding=3 semantics)
    row = jax.lax.broadcasted_iota(jnp.int32, (tile_h + 2 * PAD, 1, 1), 0)
    row_valid = ((row >= PAD) | (t > 0)) & ((row < PAD + tile_h) | (t < nt - 1))
    c_all = jnp.where(row_valid, c_all, 0.0)

    # ---- fused [g_i | g_c | i] projection for the centre rows: one dot ----
    y = jnp.dot(xn_cur.reshape(n_rows, Dp), w1_gic_ref[...],
                preferred_element_type=jnp.float32) + b1_gic_ref[...]
    g_i = y[:, :ICp]
    g_c = y[:, ICp:ICp + Cp]
    i_p = y[:, ICp + Cp:]

    # ---- depthwise 7x7 conv: 7 sublane rolls + boundary mask, 49 FMAs ------
    # (kept in f32 for v5e portability; on v6e/v7x a bf16-VALU MAC with f32
    #  per-kh accumulation roughly halves the binding VALU cost)
    wc = wc_ref[...]                                   # (7, 7, Cp) f32
    acc = jnp.broadcast_to(bc_ref[...].reshape(1, 1, Cp),
                           (tile_h, Wp, Cp)).astype(jnp.float32)
    col = jax.lax.broadcasted_iota(jnp.int32, (1, Wp, 1), 1)
    for kw in range(KERNEL_SIZE):
        d = kw - PAD                                   # -3 .. 3
        shifted = pltpu.roll(c_all, (-d) % Wp, axis=1)  # shifted[:, w] = c_all[:, w+d]
        col_valid = (col + d >= 0) & (col + d < real_w)
        shifted = jnp.where(col_valid, shifted, 0.0)
        for kh in range(KERNEL_SIZE):
            acc = acc + shifted[kh:kh + tile_h] * wc[kh, kw].reshape(1, 1, Cp)
    conv_out = acc.reshape(n_rows, Cp)

    # ---- gate (tanh-GELU on the EUP), split fc2, residual -------------------
    gated_i = (jax.nn.gelu(g_i, approximate=True) * i_p).astype(jnp.bfloat16)
    gated_c = (jax.nn.gelu(g_c, approximate=True) * conv_out).astype(jnp.bfloat16)
    out = jnp.dot(gated_i, w2_i_ref[...], preferred_element_type=jnp.float32)
    out = out + jnp.dot(gated_c, w2_c_ref[...], preferred_element_type=jnp.float32)
    out = out + b2_ref[...]
    out = out + x_cur_ref[0].reshape(n_rows, Dp).astype(jnp.float32)
    out_ref[...] = out.reshape(1, tile_h, Wp, Dp).astype(out_ref.dtype)


def prepare_params(params, *, dim, hidden, conv_channels):
    """One-time weight prep (hoisted out of the per-call path): channel split,
    lane padding, bf16 cast of the MXU weights."""
    ln_w, ln_b, w1, b1, wc, bc, w2, b2 = params
    ic = hidden - conv_channels
    Dp = _round_up(dim, LANE)
    ICp = _round_up(ic, LANE)
    Cp = _round_up(conv_channels, LANE)

    def pad_vec(a, n):
        a = jnp.asarray(a, jnp.float32).reshape(-1)
        return jnp.pad(a, (0, n - a.shape[0]))

    def pad_mat(a, r, c):
        a = jnp.asarray(a, jnp.float32)
        return jnp.pad(a, ((0, r - a.shape[0]), (0, c - a.shape[1])))

    w1 = jnp.asarray(w1, jnp.float32)
    w1_gic = jnp.concatenate([
        pad_mat(w1[:, :ic], Dp, ICp),                 # g_i
        pad_mat(w1[:, ic:hidden], Dp, Cp),            # g_c
        pad_mat(w1[:, hidden:hidden + ic], Dp, ICp),  # i
    ], axis=1).astype(jnp.bfloat16)
    w1_c = pad_mat(w1[:, hidden + ic:], Dp, Cp).astype(jnp.bfloat16)

    b1 = jnp.asarray(b1, jnp.float32).reshape(-1)
    b1_gic = jnp.concatenate([
        pad_vec(b1[:ic], ICp), pad_vec(b1[ic:hidden], Cp),
        pad_vec(b1[hidden:hidden + ic], ICp)]).reshape(1, -1)
    b1_c = pad_vec(b1[hidden + ic:], Cp).reshape(1, -1)

    w2 = jnp.asarray(w2, jnp.float32)
    w2_i = pad_mat(w2[:ic], ICp, Dp).astype(jnp.bfloat16)
    w2_c = pad_mat(w2[ic:], Cp, Dp).astype(jnp.bfloat16)
    b2_p = pad_vec(b2, Dp).reshape(1, -1)

    ln_w_p = pad_vec(ln_w, Dp).reshape(1, -1)
    ln_b_p = pad_vec(ln_b, Dp).reshape(1, -1)
    wc_p = jnp.pad(jnp.asarray(wc, jnp.float32),
                   ((0, 0), (0, 0), (0, Cp - conv_channels)))
    bc_p = pad_vec(bc, Cp).reshape(1, -1)

    return dict(ln_w=ln_w_p, ln_b=ln_b_p,
                w1_gic=w1_gic, b1_gic=b1_gic, w1_c=w1_c, b1_c=b1_c,
                wc=wc_p, bc=bc_p, w2_i=w2_i, w2_c=w2_c, b2=b2_p,
                dim=dim, dpad=Dp, icp=ICp, cp=Cp)


def gated_cnn_block_padded(xp, prep, *, real_w, tile_h=8):
    """xp: (B, H, Wp, Dp) lane-padded NHWC (zero channel pads, Wp % 8 == 0).
    Returns (B, H, Wp, Dp) in the same padded layout (padded channels stay 0)."""
    B, H, Wp, Dp = xp.shape
    if H % tile_h != 0:
        tile_h = H                      # small-stage (14x14 / 7x7) fallback
    nt = H // tile_h
    hb = _pick_halo_block(tile_h)       # halo DMA block height (>= 3, | tile_h)
    r = tile_h // hb
    n_hblk = H // hb

    ICp, Cp = prep["icp"], prep["cp"]
    GICp = 2 * ICp + Cp

    try:
        cap = pltpu.get_tpu_info().vmem_capacity_bytes
        vmem_limit = min(int(cap) * 3 // 4, 100 * 1024 * 1024)
    except Exception:
        vmem_limit = 48 * 1024 * 1024

    kernel = functools.partial(gated_cnn_block_kernel,
                               dim=prep["dim"], real_w=real_w)

    x_block = (1, tile_h, Wp, Dp)
    halo_block = (1, hb, Wp, Dp)
    c2 = lambda b, t: (0, 0)
    c3 = lambda b, t: (0, 0, 0)

    # Constant-index weight blocks could additionally use
    # pipeline_mode=pl.Buffered(1) to halve their VMEM footprint on v7x.
    out = pl.pallas_call(
        kernel,
        out_shape=jax.ShapeDtypeStruct((B, H, Wp, Dp), xp.dtype),
        grid=(B, nt),
        in_specs=[
            # top halo: last hb rows of the previous tile (clamped, masked in-kernel)
            pl.BlockSpec(halo_block, lambda b, t: (b, jnp.maximum(t * r - 1, 0), 0, 0)),
            # current tile
            pl.BlockSpec(x_block, lambda b, t: (b, t, 0, 0)),
            # bottom halo: first hb rows of the next tile (clamped, masked in-kernel)
            pl.BlockSpec(halo_block,
                         lambda b, t: (b, jnp.minimum((t + 1) * r, n_hblk - 1), 0, 0)),
            pl.BlockSpec((1, Dp), c2),       # ln_w
            pl.BlockSpec((1, Dp), c2),       # ln_b
            pl.BlockSpec((Dp, GICp), c2),    # w1_gic  [g_i | g_c | i]
            pl.BlockSpec((1, GICp), c2),     # b1_gic
            pl.BlockSpec((Dp, Cp), c2),      # w1_c
            pl.BlockSpec((1, Cp), c2),       # b1_c
            pl.BlockSpec((KERNEL_SIZE, KERNEL_SIZE, Cp), c3),  # wc
            pl.BlockSpec((1, Cp), c2),       # bc
            pl.BlockSpec((ICp, Dp), c2),     # w2_i
            pl.BlockSpec((Cp, Dp), c2),      # w2_c
            pl.BlockSpec((1, Dp), c2),       # b2
        ],
        out_specs=pl.BlockSpec(x_block, lambda b, t: (b, t, 0, 0)),
        compiler_params=pltpu.CompilerParams(
            dimension_semantics=("parallel", "parallel"),
            vmem_limit_bytes=vmem_limit),
    )(xp, xp, xp,
      prep["ln_w"], prep["ln_b"],
      prep["w1_gic"], prep["b1_gic"], prep["w1_c"], prep["b1_c"],
      prep["wc"], prep["bc"],
      prep["w2_i"], prep["w2_c"], prep["b2"])
    return out


def gated_cnn_block(x, params, *, hidden, conv_channels, tile_h=8):
    """Convenience wrapper for a single unpadded call.  In a stacked model,
    call prepare_params once and keep activations in the padded layout."""
    B, H, W, D = x.shape
    prep = prepare_params(params, dim=D, hidden=hidden,
                          conv_channels=conv_channels)
    Wp = _round_up(W, 8)
    xp = jnp.pad(x, ((0, 0), (0, 0), (0, Wp - W), (0, prep["dpad"] - D)))
    out = gated_cnn_block_padded(xp, prep, real_w=W, tile_h=tile_h)
    return out[:, :, :W, :D]


def reference(x, params, *, hidden, conv_channels):
    """Pure-JAX (f32) reference mirroring the PyTorch forward."""
    ln_w, ln_b, w1, b1, wc, bc, w2, b2 = params
    shortcut = x
    mean = jnp.mean(x, axis=-1, keepdims=True)
    var = jnp.mean((x - mean) ** 2, axis=-1, keepdims=True)
    xn = (x - mean) / jnp.sqrt(var + 1e-6) * ln_w + ln_b
    y = xn @ w1 + b1
    ic = hidden - conv_channels
    g = y[..., :hidden]
    i_part = y[..., hidden:hidden + ic]
    c = y[..., hidden + ic:]
    c_nchw = jnp.transpose(c, (0, 3, 1, 2))
    w_oihw = jnp.transpose(wc, (2, 0, 1))[:, None, :, :]   # (C, 1, 7, 7)
    conv = jax.lax.conv_general_dilated(
        c_nchw, w_oihw, window_strides=(1, 1),
        padding=[(PAD, PAD), (PAD, PAD)],
        feature_group_count=conv_channels,
        dimension_numbers=("NCHW", "OIHW", "NCHW"))
    conv = jnp.transpose(conv, (0, 2, 3, 1)) + bc
    gated = jax.nn.gelu(g, approximate=False) * jnp.concatenate([i_part, conv], axis=-1)
    out = gated @ w2 + b2
    return out + shortcut


if __name__ == "__main__":
    # dim=48 -> hidden=int(8/3*48)=128, conv_ratio=1.0 -> conv_channels=48.
    # H=16 with tile_h=8 gives two row tiles per image (exercises the halos).
    B, H, W, D = 2, 16, 16, 48
    hidden = int((8 / 3) * D)          # 128
    conv_channels = int(1.0 * D)       # 48

    key = jax.random.PRNGKey(0)
    kx, k1, k2, k3, k4, k5, k6 = jax.random.split(key, 7)

    x = jax.random.normal(kx, (B, H, W, D), jnp.float32)

    # round matmul weights to bf16 once so the bf16-MXU kernel and the f32
    # reference share identical weight values
    rb = lambda a: a.astype(jnp.bfloat16).astype(jnp.float32)
    ln_w = jnp.ones((D,), jnp.float32)
    ln_b = jnp.zeros((D,), jnp.float32)
    w1 = rb(0.05 * jax.random.normal(k1, (D, 2 * hidden), jnp.float32))
    b1 = 0.05 * jax.random.normal(k2, (2 * hidden,), jnp.float32)
    wc = 0.05 * jax.random.normal(k3, (KERNEL_SIZE, KERNEL_SIZE, conv_channels),
                                  jnp.float32)
    bc = 0.05 * jax.random.normal(k4, (conv_channels,), jnp.float32)
    w2 = rb(0.05 * jax.random.normal(k5, (hidden, D), jnp.float32))
    b2 = 0.05 * jax.random.normal(k6, (D,), jnp.float32)
    params = (ln_w, ln_b, w1, b1, wc, bc, w2, b2)

    # Hoisted, one-time parameter prep + padded activation layout (as it would
    # be done once at the model boundary in a stacked network).
    prep = prepare_params(params, dim=D, hidden=hidden,
                          conv_channels=conv_channels)
    Wp = _round_up(W, 8)
    xp = jnp.pad(x, ((0, 0), (0, 0), (0, Wp - W), (0, prep["dpad"] - D)))

    out_padded = gated_cnn_block_padded(xp, prep, real_w=W, tile_h=8)
    out_padded = jax.block_until_ready(out_padded)
    out = out_padded[:, :, :W, :D]

    ref = reference(x, params, hidden=hidden, conv_channels=conv_channels)
    assert out.shape == (B, H, W, D)
    err = float(jnp.max(jnp.abs(out - ref)))
    assert jnp.allclose(out, ref, rtol=2e-2, atol=2e-2), err

    print("KERNEL_OK")
</pallas_src>

<mosaic_0001>
module attributes {stable_mosaic.version = 11 : i64} {
  func.func @gated_cnn_block_kernel(%arg0: i32, %arg1: i32, %arg2: memref<1x4x16x128xf32, #tpu.memory_space<vmem>>, %arg3: memref<1x8x16x128xf32, #tpu.memory_space<vmem>>, %arg4: memref<1x4x16x128xf32, #tpu.memory_space<vmem>>, %arg5: memref<1x128xf32, #tpu.memory_space<vmem>>, %arg6: memref<1x128xf32, #tpu.memory_space<vmem>>, %arg7: memref<128x384xbf16, #tpu.memory_space<vmem>>, %arg8: memref<1x384xf32, #tpu.memory_space<vmem>>, %arg9: memref<128x128xbf16, #tpu.memory_space<vmem>>, %arg10: memref<1x128xf32, #tpu.memory_space<vmem>>, %arg11: memref<7x7x128xf32, #tpu.memory_space<vmem>>, %arg12: memref<1x128xf32, #tpu.memory_space<vmem>>, %arg13: memref<128x128xbf16, #tpu.memory_space<vmem>>, %arg14: memref<128x128xbf16, #tpu.memory_space<vmem>>, %arg15: memref<1x128xf32, #tpu.memory_space<vmem>>, %arg16: memref<1x8x16x128xf32, #tpu.memory_space<vmem>>) attributes {dimension_semantics = [#tpu.dimension_semantics<parallel>, #tpu.dimension_semantics<parallel>], iteration_bounds = array<i64: 2, 2>, scalar_prefetch = 0 : i64, scratch_operands = 0 : i64, tpu.core_type = #tpu.core_type<tc>, window_params = [{transform_indices = @transform_0, window_bounds = array<i64: 1, 4, 16, 128>}, {transform_indices = @transform_1, window_bounds = array<i64: 1, 8, 16, 128>}, {transform_indices = @transform_2, window_bounds = array<i64: 1, 4, 16, 128>}, {pipeline_mode = #tpu.pipeline_mode<synchronous>, transform_indices = @transform_3, window_bounds = array<i64: 1, 128>}, {pipeline_mode = #tpu.pipeline_mode<synchronous>, transform_indices = @transform_4, window_bounds = array<i64: 1, 128>}, {pipeline_mode = #tpu.pipeline_mode<synchronous>, transform_indices = @transform_5, window_bounds = array<i64: 128, 384>}, {pipeline_mode = #tpu.pipeline_mode<synchronous>, transform_indices = @transform_6, window_bounds = array<i64: 1, 384>}, {pipeline_mode = #tpu.pipeline_mode<synchronous>, transform_indices = @transform_7, window_bounds = array<i64: 128, 128>}, {pipeline_mode = #tpu.pipeline_mode<synchronous>, transform_indices = @transform_8, window_bounds = array<i64: 1, 128>}, {pipeline_mode = #tpu.pipeline_mode<synchronous>, transform_indices = @transform_9, window_bounds = array<i64: 7, 7, 128>}, {pipeline_mode = #tpu.pipeline_mode<synchronous>, transform_indices = @transform_10, window_bounds = array<i64: 1, 128>}, {pipeline_mode = #tpu.pipeline_mode<synchronous>, transform_indices = @transform_11, window_bounds = array<i64: 128, 128>}, {pipeline_mode = #tpu.pipeline_mode<synchronous>, transform_indices = @transform_12, window_bounds = array<i64: 128, 128>}, {pipeline_mode = #tpu.pipeline_mode<synchronous>, transform_indices = @transform_13, window_bounds = array<i64: 1, 128>}, {transform_indices = @transform_14, window_bounds = array<i64: 1, 8, 16, 128>}]} {
    %c0 = arith.constant 0 : index
    %c0_0 = arith.constant 0 : index
    %0 = vector.load %arg5[%c0, %c0_0] : memref<1x128xf32, #tpu.memory_space<vmem>>, vector<1x128xf32>
    %c0_1 = arith.constant 0 : index
    %c0_2 = arith.constant 0 : index
    %1 = vector.load %arg6[%c0_1, %c0_2] : memref<1x128xf32, #tpu.memory_space<vmem>>, vector<1x128xf32>
    %c0_3 = arith.constant 0 : index
    %c0_4 = arith.constant 0 : index
    %c0_5 = arith.constant 0 : index
    %c0_6 = arith.constant 0 : index
    %2 = vector.load %arg3[%c0_3, %c0_4, %c0_5, %c0_6] : memref<1x8x16x128xf32, #tpu.memory_space<vmem>>, vector<1x8x16x128xf32>
    %3 = vector.shape_cast %2 : vector<1x8x16x128xf32> to vector<8x16x128xf32>
    %cst = arith.constant dense<0.000000e+00> : vector<8x16xf32>
    %4 = vector.multi_reduction <add>, %3, %cst [2] : vector<8x16x128xf32> to vector<8x16xf32>
    %5 = vector.shape_cast %4 : vector<8x16xf32> to vector<8x16x1xf32>
    %cst_7 = arith.constant 0.020833334 : f32
    %6 = vector.broadcast %cst_7 : f32 to vector<8x16x1xf32>
    %7 = arith.mulf %5, %6 : vector<8x16x1xf32>
    %8 = vector.broadcast %7 : vector<8x16x1xf32> to vector<8x16x128xf32>
    %9 = arith.subf %3, %8 : vector<8x16x128xf32>
    %10 = arith.mulf %9, %9 : vector<8x16x128xf32>
    %cst_8 = arith.constant dense<0.000000e+00> : vector<8x16xf32>
    %11 = vector.multi_reduction <add>, %10, %cst_8 [2] : vector<8x16x128xf32> to vector<8x16xf32>
    %12 = vector.shape_cast %11 : vector<8x16xf32> to vector<8x16x1xf32>
    %cst_9 = arith.constant 8.000000e+01 : f32
    %13 = vector.broadcast %cst_9 : f32 to vector<8x16x1xf32>
    %14 = arith.mulf %13, %7 : vector<8x16x1xf32>
    %15 = arith.mulf %14, %7 : vector<8x16x1xf32>
    %16 = arith.subf %12, %15 : vector<8x16x1xf32>
    %cst_10 = arith.constant 0.020833334 : f32
    %17 = vector.broadcast %cst_10 : f32 to vector<8x16x1xf32>
    %18 = arith.mulf %16, %17 : vector<8x16x1xf32>
    %cst_11 = arith.constant 9.99999997E-7 : f32
    %19 = vector.broadcast %cst_11 : f32 to vector<8x16x1xf32>
    %20 = arith.addf %18, %19 : vector<8x16x1xf32>
    %21 = math.rsqrt %20 : vector<8x16x1xf32>
    %22 = vector.broadcast %21 : vector<8x16x1xf32> to vector<8x16x128xf32>
    %23 = arith.mulf %9, %22 : vector<8x16x128xf32>
    %24 = vector.shape_cast %0 : vector<1x128xf32> to vector<1x1x128xf32>
    %25 = vector.broadcast %24 : vector<1x1x128xf32> to vector<8x16x128xf32>
    %26 = arith.mulf %23, %25 : vector<8x16x128xf32>
    %27 = vector.shape_cast %1 : vector<1x128xf32> to vector<1x1x128xf32>
    %28 = vector.broadcast %27 : vector<1x1x128xf32> to vector<8x16x128xf32>
    %29 = arith.addf %26, %28 : vector<8x16x128xf32>
    %30 = arith.truncf %29 : vector<8x16x128xf32> to vector<8x16x128xbf16>
    %c0_12 = arith.constant 0 : index
    %c1 = arith.constant 1 : index
    %c0_13 = arith.constant 0 : index
    %c0_14 = arith.constant 0 : index
    %31 = vector.load %arg2[%c0_12, %c1, %c0_13, %c0_14] : memref<1x4x16x128xf32, #tpu.memory_space<vmem>>, vector<1x3x16x128xf32>
    %32 = vector.shape_cast %31 : vector<1x3x16x128xf32> to vector<3x16x128xf32>
    %cst_15 = arith.constant dense<0.000000e+00> : vector<3x16xf32>
    %33 = vector.multi_reduction <add>, %32, %cst_15 [2] : vector<3x16x128xf32> to vector<3x16xf32>
    %34 = vector.shape_cast %33 : vector<3x16xf32> to vector<3x16x1xf32>
    %cst_16 = arith.constant 0.020833334 : f32
    %35 = vector.broadcast %cst_16 : f32 to vector<3x16x1xf32>
    %36 = arith.mulf %34, %35 : vector<3x16x1xf32>
    %37 = vector.broadcast %36 : vector<3x16x1xf32> to vector<3x16x128xf32>
    %38 = arith.subf %32, %37 : vector<3x16x128xf32>
    %39 = arith.mulf %38, %38 : vector<3x16x128xf32>
    %cst_17 = arith.constant dense<0.000000e+00> : vector<3x16xf32>
    %40 = vector.multi_reduction <add>, %39, %cst_17 [2] : vector<3x16x128xf32> to vector<3x16xf32>
    %41 = vector.shape_cast %40 : vector<3x16xf32> to vector<3x16x1xf32>
    %cst_18 = arith.constant 8.000000e+01 : f32
    %42 = vector.broadcast %cst_18 : f32 to vector<3x16x1xf32>
    %43 = arith.mulf %42, %36 : vector<3x16x1xf32>
    %44 = arith.mulf %43, %36 : vector<3x16x1xf32>
    %45 = arith.subf %41, %44 : vector<3x16x1xf32>
    %cst_19 = arith.constant 0.020833334 : f32
    %46 = vector.broadcast %cst_19 : f32 to vector<3x16x1xf32>
    %47 = arith.mulf %45, %46 : vector<3x16x1xf32>
    %cst_20 = arith.constant 9.99999997E-7 : f32
    %48 = vector.broadcast %cst_20 : f32 to vector<3x16x1xf32>
    %49 = arith.addf %47, %48 : vector<3x16x1xf32>
    %50 = math.rsqrt %49 : vector<3x16x1xf32>
    %51 = vector.broadcast %50 : vector<3x16x1xf32> to vector<3x16x128xf32>
    %52 = arith.mulf %38, %51 : vector<3x16x128xf32>
    %53 = vector.shape_cast %0 : vector<1x128xf32> to vector<1x1x128xf32>
    %54 = vector.broadcast %53 : vector<1x1x128xf32> to vector<3x16x128xf32>
    %55 = arith.mulf %52, %54 : vector<3x16x128xf32>
    %56 = vector.shape_cast %1 : vector<1x128xf32> to vector<1x1x128xf32>
    %57 = vector.broadcast %56 : vector<1x1x128xf32> to vector<3x16x128xf32>
    %58 = arith.addf %55, %57 : vector<3x16x128xf32>
    %59 = arith.truncf %58 : vector<3x16x128xf32> to vector<3x16x128xbf16>
    %c0_21 = arith.constant 0 : index
    %c0_22 = arith.constant 0 : index
    %c0_23 = arith.constant 0 : index
    %c0_24 = arith.constant 0 : index
    %60 = vector.load %arg4[%c0_21, %c0_22, %c0_23, %c0_24] : memref<1x4x16x128xf32, #tpu.memory_space<vmem>>, vector<1x3x16x128xf32>
    %61 = vector.shape_cast %60 : vector<1x3x16x128xf32> to vector<3x16x128xf32>
    %cst_25 = arith.constant dense<0.000000e+00> : vector<3x16xf32>
    %62 = vector.multi_reduction <add>, %61, %cst_25 [2] : vector<3x16x128xf32> to vector<3x16xf32>
    %63 = vector.shape_cast %62 : vector<3x16xf32> to vector<3x16x1xf32>
    %cst_26 = arith.constant 0.020833334 : f32
    %64 = vector.broadcast %cst_26 : f32 to vector<3x16x1xf32>
    %65 = arith.mulf %63, %64 : vector<3x16x1xf32>
    %66 = vector.broadcast %65 : vector<3x16x1xf32> to vector<3x16x128xf32>
    %67 = arith.subf %61, %66 : vector<3x16x128xf32>
    %68 = arith.mulf %67, %67 : vector<3x16x128xf32>
    %cst_27 = arith.constant dense<0.000000e+00> : vector<3x16xf32>
    %69 = vector.multi_reduction <add>, %68, %cst_27 [2] : vector<3x16x128xf32> to vector<3x16xf32>
    %70 = vector.shape_cast %69 : vector<3x16xf32> to vector<3x16x1xf32>
    %cst_28 = arith.constant 8.000000e+01 : f32
    %71 = vector.broadcast %cst_28 : f32 to vector<3x16x1xf32>
    %72 = arith.mulf %71, %65 : vector<3x16x1xf32>
    %73 = arith.mulf %72, %65 : vector<3x16x1xf32>
    %74 = arith.subf %70, %73 : vector<3x16x1xf32>
    %cst_29 = arith.constant 0.020833334 : f32
    %75 = vector.broadcast %cst_29 : f32 to vector<3x16x1xf32>
    %76 = arith.mulf %74, %75 : vector<3x16x1xf32>
    %cst_30 = arith.constant 9.99999997E-7 : f32
    %77 = vector.broadcast %cst_30 : f32 to vector<3x16x1xf32>
    %78 = arith.addf %76, %77 : vector<3x16x1xf32>
    %79 = math.rsqrt %78 : vector<3x16x1xf32>
    %80 = vector.broadcast %79 : vector<3x16x1xf32> to vector<3x16x128xf32>
    %81 = arith.mulf %67, %80 : vector<3x16x128xf32>
    %82 = vector.shape_cast %0 : vector<1x128xf32> to vector<1x1x128xf32>
    %83 = vector.broadcast %82 : vector<1x1x128xf32> to vector<3x16x128xf32>
    %84 = arith.mulf %81, %83 : vector<3x16x128xf32>
    %85 = vector.shape_cast %1 : vector<1x128xf32> to vector<1x1x128xf32>
    %86 = vector.broadcast %85 : vector<1x1x128xf32> to vector<3x16x128xf32>
    %87 = arith.addf %84, %86 : vector<3x16x128xf32>
    %88 = arith.truncf %87 : vector<3x16x128xf32> to vector<3x16x128xbf16>
    %89 = tpu.concatenate %59, %30, %88 in 0 : vector<3x16x128xbf16>, vector<8x16x128xbf16>, vector<3x16x128xbf16> -> vector<14x16x128xbf16>
    %90 = vector.shape_cast %89 : vector<14x16x128xbf16> to vector<224x128xbf16>
    %c0_31 = arith.constant 0 : index
    %c0_32 = arith.constant 0 : index
    %91 = vector.load %arg9[%c0_31, %c0_32] : memref<128x128xbf16, #tpu.memory_space<vmem>>, vector<128x128xbf16>
    %cst_33 = arith.constant dense<0.000000e+00> : vector<224x128xf32>
    %92 = tpu.matmul %90, %91, %cst_33 {dimension_numbers = #tpu.dot_dimension_numbers<[1], [0], [0], [1], [0, 0, 1, 1], [], []>} : vector<224x128xbf16>, vector<128x128xbf16>, vector<224x128xf32> -> vector<224x128xf32>
    %c0_34 = arith.constant 0 : index
    %c0_35 = arith.constant 0 : index
    %93 = vector.load %arg10[%c0_34, %c0_35] : memref<1x128xf32, #tpu.memory_space<vmem>>, vector<1x128xf32>
    %94 = vector.broadcast %93 : vector<1x128xf32> to vector<224x128xf32>
    %95 = arith.addf %92, %94 : vector<224x128xf32>
    %96 = vector.shape_cast %95 : vector<224x128xf32> to vector<14x16x128xf32>
    %97 = tpu.iota {dimensions = array<i32: 0>} : vector<14x1x1xi32>
    %c3_i32 = arith.constant 3 : i32
    %98 = vector.broadcast %c3_i32 : i32 to vector<14x1x1xi32>
    %99 = arith.cmpi sge, %97, %98 : vector<14x1x1xi32>
    %c0_i32 = arith.constant 0 : i32
    %100 = arith.cmpi sgt, %arg1, %c0_i32 : i32
    %101 = vector.broadcast %100 : i1 to vector<14x1x1xi1>
    %102 = arith.ori %99, %101 : vector<14x1x1xi1>
    %c11_i32 = arith.constant 11 : i32
    %103 = vector.broadcast %c11_i32 : i32 to vector<14x1x1xi32>
    %104 = arith.cmpi slt, %97, %103 : vector<14x1x1xi32>
    %c1_i32 = arith.constant 1 : i32
    %105 = arith.cmpi slt, %arg1, %c1_i32 : i32
    %106 = vector.broadcast %105 : i1 to vector<14x1x1xi1>
    %107 = arith.ori %104, %106 : vector<14x1x1xi1>
    %108 = arith.andi %102, %107 : vector<14x1x1xi1>
    %cst_36 = arith.constant 0.000000e+00 : f32
    %109 = vector.shape_cast %108 : vector<14x1x1xi1> to vector<14x1x1xi1>
    %110 = vector.broadcast %109 : vector<14x1x1xi1> to vector<14x16x128xi1>
    %111 = vector.broadcast %cst_36 : f32 to vector<14x16x128xf32>
    %112 = arith.select %110, %96, %111 : vector<14x16x128xi1>, vector<14x16x128xf32>
    %113 = vector.shape_cast %30 : vector<8x16x128xbf16> to vector<128x128xbf16>
    %c0_37 = arith.constant 0 : index
    %c0_38 = arith.constant 0 : index
    %114 = vector.load %arg7[%c0_37, %c0_38] : memref<128x384xbf16, #tpu.memory_space<vmem>>, vector<128x384xbf16>
    %cst_39 = arith.constant dense<0.000000e+00> : vector<128x384xf32>
    %115 = tpu.matmul %113, %114, %cst_39 {dimension_numbers = #tpu.dot_dimension_numbers<[1], [0], [0], [1], [0, 0, 1, 1], [], []>} : vector<128x128xbf16>, vector<128x384xbf16>, vector<128x384xf32> -> vector<128x384xf32>
    %c0_40 = arith.constant 0 : index
    %c0_41 = arith.constant 0 : index
    %116 = vector.load %arg8[%c0_40, %c0_41] : memref<1x384xf32, #tpu.memory_space<vmem>>, vector<1x384xf32>
    %117 = vector.broadcast %116 : vector<1x384xf32> to vector<128x384xf32>
    %118 = arith.addf %115, %117 : vector<128x384xf32>
    %119 = vector.extract_strided_slice %118 {offsets = [0, 0], sizes = [128, 128], strides = [1, 1]} : vector<128x384xf32> to vector<128x128xf32>
    %120 = vector.extract_strided_slice %118 {offsets = [0, 128], sizes = [128, 128], strides = [1, 1]} : vector<128x384xf32> to vector<128x128xf32>
    %121 = vector.extract_strided_slice %118 {offsets = [0, 256], sizes = [128, 128], strides = [1, 1]} : vector<128x384xf32> to vector<128x128xf32>
    %c0_42 = arith.constant 0 : index
    %c0_43 = arith.constant 0 : index
    %c0_44 = arith.constant 0 : index
    %122 = vector.load %arg11[%c0_42, %c0_43, %c0_44] : memref<7x7x128xf32, #tpu.memory_space<vmem>>, vector<7x7x128xf32>
    %c0_45 = arith.constant 0 : index
    %c0_46 = arith.constant 0 : index
    %123 = vector.load %arg12[%c0_45, %c0_46] : memref<1x128xf32, #tpu.memory_space<vmem>>, vector<1x128xf32>
    %124 = vector.shape_cast %123 : vector<1x128xf32> to vector<1x1x128xf32>
    %125 = vector.shape_cast %124 : vector<1x1x128xf32> to vector<1x1x128xf32>
    %126 = vector.broadcast %125 : vector<1x1x128xf32> to vector<8x16x128xf32>
    %127 = tpu.iota {dimensions = array<i32: 1>} : vector<1x16x1xi32>
    %c3_i32_47 = arith.constant 3 : i32
    %128 = tpu.dynamic_rotate %112 by %c3_i32_47 dim 1 : vector<14x16x128xf32>, i32 -> vector<14x16x128xf32>
    %c-3_i32 = arith.constant -3 : i32
    %129 = vector.broadcast %c-3_i32 : i32 to vector<1x16x1xi32>
    %130 = arith.addi %127, %129 : vector<1x16x1xi32>
    %c0_i32_48 = arith.constant 0 : i32
    %131 = vector.broadcast %c0_i32_48 : i32 to vector<1x16x1xi32>
    %132 = arith.cmpi sge, %130, %131 : vector<1x16x1xi32>
    %c-3_i32_49 = arith.constant -3 : i32
    %133 = vector.broadcast %c-3_i32_49 : i32 to vector<1x16x1xi32>
    %134 = arith.addi %127, %133 : vector<1x16x1xi32>
    %c16_i32 = arith.constant 16 : i32
    %135 = vector.broadcast %c16_i32 : i32 to vector<1x16x1xi32>
    %136 = arith.cmpi slt, %134, %135 : vector<1x16x1xi32>
    %137 = arith.andi %132, %136 : vector<1x16x1xi1>
    %cst_50 = arith.constant 0.000000e+00 : f32
    %138 = vector.shape_cast %137 : vector<1x16x1xi1> to vector<1x16x1xi1>
    %139 = vector.broadcast %138 : vector<1x16x1xi1> to vector<14x16x128xi1>
    %140 = vector.broadcast %cst_50 : f32 to vector<14x16x128xf32>
    %141 = arith.select %139, %128, %140 : vector<14x16x128xi1>, vector<14x16x128xf32>
    %142 = vector.extract_strided_slice %141 {offsets = [0, 0, 0], sizes = [8, 16, 128], strides = [1, 1, 1]} : vector<14x16x128xf32> to vector<8x16x128xf32>
    %143 = vector.extract_strided_slice %122 {offsets = [0, 0, 0], sizes = [1, 1, 128], strides = [1, 1, 1]} : vector<7x7x128xf32> to vector<1x1x128xf32>
    %144 = vector.shape_cast %143 : vector<1x1x128xf32> to vector<128xf32>
    %145 = vector.shape_cast %144 : vector<128xf32> to vector<1x1x128xf32>
    %146 = vector.broadcast %145 : vector<1x1x128xf32> to vector<8x16x128xf32>
    %147 = arith.mulf %142, %146 : vector<8x16x128xf32>
    %148 = arith.addf %126, %147 : vector<8x16x128xf32>
    %149 = vector.extract_strided_slice %141 {offsets = [1, 0, 0], sizes = [8, 16, 128], strides = [1, 1, 1]} : vector<14x16x128xf32> to vector<8x16x128xf32>
    %150 = vector.extract_strided_slice %122 {offsets = [1, 0, 0], sizes = [1, 1, 128], strides = [1, 1, 1]} : vector<7x7x128xf32> to vector<1x1x128xf32>
    %151 = vector.shape_cast %150 : vector<1x1x128xf32> to vector<128xf32>
    %152 = vector.shape_cast %151 : vector<128xf32> to vector<1x1x128xf32>
    %153 = vector.broadcast %152 : vector<1x1x128xf32> to vector<8x16x128xf32>
    %154 = arith.mulf %149, %153 : vector<8x16x128xf32>
    %155 = arith.addf %148, %154 : vector<8x16x128xf32>
    %156 = vector.extract_strided_slice %141 {offsets = [2, 0, 0], sizes = [8, 16, 128], strides = [1, 1, 1]} : vector<14x16x128xf32> to vector<8x16x128xf32>
    %157 = vector.extract_strided_slice %122 {offsets = [2, 0, 0], sizes = [1, 1, 128], strides = [1, 1, 1]} : vector<7x7x128xf32> to vector<1x1x128xf32>
    %158 = vector.shape_cast %157 : vector<1x1x128xf32> to vector<128xf32>
    %159 = vector.shape_cast %158 : vector<128xf32> to vector<1x1x128xf32>
    %160 = vector.broadcast %159 : vector<1x1x128xf32> to vector<8x16x128xf32>
    %161 = arith.mulf %156, %160 : vector<8x16x128xf32>
    %162 = arith.addf %155, %161 : vector<8x16x128xf32>
    %163 = vector.extract_strided_slice %141 {offsets = [3, 0, 0], sizes = [8, 16, 128], strides = [1, 1, 1]} : vector<14x16x128xf32> to vector<8x16x128xf32>
    %164 = vector.extract_strided_slice %122 {offsets = [3, 0, 0], sizes = [1, 1, 128], strides = [1, 1, 1]} : vector<7x7x128xf32> to vector<1x1x128xf32>
    %165 = vector.shape_cast %164 : vector<1x1x128xf32> to vector<128xf32>
    %166 = vector.shape_cast %165 : vector<128xf32> to vector<1x1x128xf32>
    %167 = vector.broadcast %166 : vector<1x1x128xf32> to vector<8x16x128xf32>
    %168 = arith.mulf %163, %167 : vector<8x16x128xf32>
    %169 = arith.addf %162, %168 : vector<8x16x128xf32>
    %170 = vector.extract_strided_slice %141 {offsets = [4, 0, 0], sizes = [8, 16, 128], strides = [1, 1, 1]} : vector<14x16x128xf32> to vector<8x16x128xf32>
    %171 = vector.extract_strided_slice %122 {offsets = [4, 0, 0], sizes = [1, 1, 128], strides = [1, 1, 1]} : vector<7x7x128xf32> to vector<1x1x128xf32>
    %172 = vector.shape_cast %171 : vector<1x1x128xf32> to vector<128xf32>
    %173 = vector.shape_cast %172 : vector<128xf32> to vector<1x1x128xf32>
    %174 = vector.broadcast %173 : vector<1x1x128xf32> to vector<8x16x128xf32>
    %175 = arith.mulf %170, %174 : vector<8x16x128xf32>
    %176 = arith.addf %169, %175 : vector<8x16x128xf32>
    %177 = vector.extract_strided_slice %141 {offsets = [5, 0, 0], sizes = [8, 16, 128], strides = [1, 1, 1]} : vector<14x16x128xf32> to vector<8x16x128xf32>
    %178 = vector.extract_strided_slice %122 {offsets = [5, 0, 0], sizes = [1, 1, 128], strides = [1, 1, 1]} : vector<7x7x128xf32> to vector<1x1x128xf32>
    %179 = vector.shape_cast %178 : vector<1x1x128xf32> to vector<128xf32>
    %180 = vector.shape_cast %179 : vector<128xf32> to vector<1x1x128xf32>
    %181 = vector.broadcast %180 : vector<1x1x128xf32> to vector<8x16x128xf32>
    %182 = arith.mulf %177, %181 : vector<8x16x128xf32>
    %183 = arith.addf %176, %182 : vector<8x16x128xf32>
    %184 = vector.extract_strided_slice %141 {offsets = [6, 0, 0], sizes = [8, 16, 128], strides = [1, 1, 1]} : vector<14x16x128xf32> to vector<8x16x128xf32>
    %185 = vector.extract_strided_slice %122 {offsets = [6, 0, 0], sizes = [1, 1, 128], strides = [1, 1, 1]} : vector<7x7x128xf32> to vector<1x1x128xf32>
    %186 = vector.shape_cast %185 : vector<1x1x128xf32> to vector<128xf32>
    %187 = vector.shape_cast %186 : vector<128xf32> to vector<1x1x128xf32>
    %188 = vector.broadcast %187 : vector<1x1x128xf32> to vector<8x16x128xf32>
    %189 = arith.mulf %184, %188 : vector<8x16x128xf32>
    %190 = arith.addf %183, %189 : vector<8x16x128xf32>
    %c2_i32 = arith.constant 2 : i32
    %191 = tpu.dynamic_rotate %112 by %c2_i32 dim 1 : vector<14x16x128xf32>, i32 -> vector<14x16x128xf32>
    %c-2_i32 = arith.constant -2 : i32
    %192 = vector.broadcast %c-2_i32 : i32 to vector<1x16x1xi32>
    %193 = arith.addi %127, %192 : vector<1x16x1xi32>
    %c0_i32_51 = arith.constant 0 : i32
    %194 = vector.broadcast %c0_i32_51 : i32 to vector<1x16x1xi32>
    %195 = arith.cmpi sge, %193, %194 : vector<1x16x1xi32>
    %c-2_i32_52 = arith.constant -2 : i32
    %196 = vector.broadcast %c-2_i32_52 : i32 to vector<1x16x1xi32>
    %197 = arith.addi %127, %196 : vector<1x16x1xi32>
    %c16_i32_53 = arith.constant 16 : i32
    %198 = vector.broadcast %c16_i32_53 : i32 to vector<1x16x1xi32>
    %199 = arith.cmpi slt, %197, %198 : vector<1x16x1xi32>
    %200 = arith.andi %195, %199 : vector<1x16x1xi1>
    %cst_54 = arith.constant 0.000000e+00 : f32
    %201 = vector.shape_cast %200 : vector<1x16x1xi1> to vector<1x16x1xi1>
    %202 = vector.broadcast %201 : vector<1x16x1xi1> to vector<14x16x128xi1>
    %203 = vector.broadcast %cst_54 : f32 to vector<14x16x128xf32>
    %204 = arith.select %202, %191, %203 : vector<14x16x128xi1>, vector<14x16x128xf32>
    %205 = vector.extract_strided_slice %204 {offsets = [0, 0, 0], sizes = [8, 16, 128], strides = [1, 1, 1]} : vector<14x16x128xf32> to vector<8x16x128xf32>
    %206 = vector.extract_strided_slice %122 {offsets = [0, 1, 0], sizes = [1, 1, 128], strides = [1, 1, 1]} : vector<7x7x128xf32> to vector<1x1x128xf32>
    %207 = vector.shape_cast %206 : vector<1x1x128xf32> to vector<128xf32>
    %208 = vector.shape_cast %207 : vector<128xf32> to vector<1x1x128xf32>
    %209 = vector.broadcast %208 : vector<1x1x128xf32> to vector<8x16x128xf32>
    %210 = arith.mulf %205, %209 : vector<8x16x128xf32>
    %211 = arith.addf %190, %210 : vector<8x16x128xf32>
    %212 = vector.extract_strided_slice %204 {offsets = [1, 0, 0], sizes = [8, 16, 128], strides = [1, 1, 1]} : vector<14x16x128xf32> to vector<8x16x128xf32>
    %213 = vector.extract_strided_slice %122 {offsets = [1, 1, 0], sizes = [1, 1, 128], strides = [1, 1, 1]} : vector<7x7x128xf32> to vector<1x1x128xf32>
    %214 = vector.shape_cast %213 : vector<1x1x128xf32> to vector<128xf32>
    %215 = vector.shape_cast %214 : vector<128xf32> to vector<1x1x128xf32>
    %216 = vector.broadcast %215 : vector<1x1x128xf32> to vector<8x16x128xf32>
    %217 = arith.mulf %212, %216 : vector<8x16x128xf32>
    %218 = arith.addf %211, %217 : vector<8x16x128xf32>
    %219 = vector.extract_strided_slice %204 {offsets = [2, 0, 0], sizes = [8, 16, 128], strides = [1, 1, 1]} : vector<14x16x128xf32> to vector<8x16x128xf32>
    %220 = vector.extract_strided_slice %122 {offsets = [2, 1, 0], sizes = [1, 1, 128], strides = [1, 1, 1]} : vector<7x7x128xf32> to vector<1x1x128xf32>
    %221 = vector.shape_cast %220 : vector<1x1x128xf32> to vector<128xf32>
    %222 = vector.shape_cast %221 : vector<128xf32> to vector<1x1x128xf32>
    %223 = vector.broadcast %222 : vector<1x1x128xf32> to vector<8x16x128xf32>
    %224 = arith.mulf %219, %223 : vector<8x16x128xf32>
    %225 = arith.addf %218, %224 : vector<8x16x128xf32>
    %226 = vector.extract_strided_slice %204 {offsets = [3, 0, 0], sizes = [8, 16, 128], strides = [1, 1, 1]} : vector<14x16x128xf32> to vector<8x16x128xf32>
    %227 = vector.extract_strided_slice %122 {offsets = [3, 1, 0], sizes = [1, 1, 128], strides = [1, 1, 1]} : vector<7x7x128xf32> to vector<1x1x128xf32>
    %228 = vector.shape_cast %227 : vector<1x1x128xf32> to vector<128xf32>
    %229 = vector.shape_cast %228 : vector<128xf32> to vector<1x1x128xf32>
    %230 = vector.broadcast %229 : vector<1x1x128xf32> to vector<8x16x128xf32>
    %231 = arith.mulf %226, %230 : vector<8x16x128xf32>
    %232 = arith.addf %225, %231 : vector<8x16x128xf32>
    %233 = vector.extract_strided_slice %204 {offsets = [4, 0, 0], sizes = [8, 16, 128], strides = [1, 1, 1]} : vector<14x16x128xf32> to vector<8x16x128xf32>
    %234 = vector.extract_strided_slice %122 {offsets = [4, 1, 0], sizes = [1, 1, 128], strides = [1, 1, 1]} : vector<7x7x128xf32> to vector<1x1x128xf32>
    %235 = vector.shape_cast %234 : vector<1x1x128xf32> to vector<128xf32>
    %236 = vector.shape_cast %235 : vector<128xf32> to vector<1x1x128xf32>
    %237 = vector.broadcast %236 : vector<1x1x128xf32> to vector<8x16x128xf32>
    %238 = arith.mulf %233, %237 : vector<8x16x128xf32>
    %239 = arith.addf %232, %238 : vector<8x16x128xf32>
    %240 = vector.extract_strided_slice %204 {offsets = [5, 0, 0], sizes = [8, 16, 128], strides = [1, 1, 1]} : vector<14x16x128xf32> to vector<8x16x128xf32>
    %241 = vector.extract_strided_slice %122 {offsets = [5, 1, 0], sizes = [1, 1, 128], strides = [1, 1, 1]} : vector<7x7x128xf32> to vector<1x1x128xf32>
    %242 = vector.shape_cast %241 : vector<1x1x128xf32> to vector<128xf32>
    %243 = vector.shape_cast %242 : vector<128xf32> to vector<1x1x128xf32>
    %244 = vector.broadcast %243 : vector<1x1x128xf32> to vector<8x16x128xf32>
    %245 = arith.mulf %240, %244 : vector<8x16x128xf32>
    %246 = arith.addf %239, %245 : vector<8x16x128xf32>
    %247 = vector.extract_strided_slice %204 {offsets = [6, 0, 0], sizes = [8, 16, 128], strides = [1, 1, 1]} : vector<14x16x128xf32> to vector<8x16x128xf32>
    %248 = vector.extract_strided_slice %122 {offsets = [6, 1, 0], sizes = [1, 1, 128], strides = [1, 1, 1]} : vector<7x7x128xf32> to vector<1x1x128xf32>
    %249 = vector.shape_cast %248 : vector<1x1x128xf32> to vector<128xf32>
    %250 = vector.shape_cast %249 : vector<128xf32> to vector<1x1x128xf32>
    %251 = vector.broadcast %250 : vector<1x1x128xf32> to vector<8x16x128xf32>
    %252 = arith.mulf %247, %251 : vector<8x16x128xf32>
    %253 = arith.addf %246, %252 : vector<8x16x128xf32>
    %c1_i32_55 = arith.constant 1 : i32
    %254 = tpu.dynamic_rotate %112 by %c1_i32_55 dim 1 : vector<14x16x128xf32>, i32 -> vector<14x16x128xf32>
    %c-1_i32 = arith.constant -1 : i32
    %255 = vector.broadcast %c-1_i32 : i32 to vector<1x16x1xi32>
    %256 = arith.addi %127, %255 : vector<1x16x1xi32>
    %c0_i32_56 = arith.constant 0 : i32
    %257 = vector.broadcast %c0_i32_56 : i32 to vector<1x16x1xi32>
    %258 = arith.cmpi sge, %256, %257 : vector<1x16x1xi32>
    %c-1_i32_57 = arith.constant -1 : i32
    %259 = vector.broadcast %c-1_i32_57 : i32 to vector<1x16x1xi32>
    %260 = arith.addi %127, %259 : vector<1x16x1xi32>
    %c16_i32_58 = arith.constant 16 : i32
    %261 = vector.broadcast %c16_i32_58 : i32 to vector<1x16x1xi32>
    %262 = arith.cmpi slt, %260, %261 : vector<1x16x1xi32>
    %263 = arith.andi %258, %262 : vector<1x16x1xi1>
    %cst_59 = arith.constant 0.000000e+00 : f32
    %264 = vector.shape_cast %263 : vector<1x16x1xi1> to vector<1x16x1xi1>
    %265 = vector.broadcast %264 : vector<1x16x1xi1> to vector<14x16x128xi1>
    %266 = vector.broadcast %cst_59 : f32 to vector<14x16x128xf32>
    %267 = arith.select %265, %254, %266 : vector<14x16x128xi1>, vector<14x16x128xf32>
    %268 = vector.extract_strided_slice %267 {offsets = [0, 0, 0], sizes = [8, 16, 128], strides = [1, 1, 1]} : vector<14x16x128xf32> to vector<8x16x128xf32>
    %269 = vector.extract_strided_slice %122 {offsets = [0, 2, 0], sizes = [1, 1, 128], strides = [1, 1, 1]} : vector<7x7x128xf32> to vector<1x1x128xf32>
    %270 = vector.shape_cast %269 : vector<1x1x128xf32> to vector<128xf32>
    %271 = vector.shape_cast %270 : vector<128xf32> to vector<1x1x128xf32>
    %272 = vector.broadcast %271 : vector<1x1x128xf32> to vector<8x16x128xf32>
    %273 = arith.mulf %268, %272 : vector<8x16x128xf32>
    %274 = arith.addf %253, %273 : vector<8x16x128xf32>
    %275 = vector.extract_strided_slice %267 {offsets = [1, 0, 0], sizes = [8, 16, 128], strides = [1, 1, 1]} : vector<14x16x128xf32> to vector<8x16x128xf32>
    %276 = vector.extract_strided_slice %122 {offsets = [1, 2, 0], sizes = [1, 1, 128], strides = [1, 1, 1]} : vector<7x7x128xf32> to vector<1x1x128xf32>
    %277 = vector.shape_cast %276 : vector<1x1x128xf32> to vector<128xf32>
    %278 = vector.shape_cast %277 : vector<128xf32> to vector<1x1x128xf32>
    %279 = vector.broadcast %278 : vector<1x1x128xf32> to vector<8x16x128xf32>
    %280 = arith.mulf %275, %279 : vector<8x16x128xf32>
    %281 = arith.addf %274, %280 : vector<8x16x128xf32>
    %282 = vector.extract_strided_slice %267 {offsets = [2, 0, 0], sizes = [8, 16, 128], strides = [1, 1, 1]} : vector<14x16x128xf32> to vector<8x16x128xf32>
    %283 = vector.extract_strided_slice %122 {offsets = [2, 2, 0], sizes = [1, 1, 128], strides = [1, 1, 1]} : vector<7x7x128xf32> to vector<1x1x128xf32>
    %284 = vector.shape_cast %283 : vector<1x1x128xf32> to vector<128xf32>
    %285 = vector.shape_cast %284 : vector<128xf32> to vector<1x1x128xf32>
    %286 = vector.broadcast %285 : vector<1x1x128xf32> to vector<8x16x128xf32>
    %287 = arith.mulf %282, %286 : vector<8x16x128xf32>
    %288 = arith.addf %281, %287 : vector<8x16x128xf32>
    %289 = vector.extract_strided_slice %267 {offsets = [3, 0, 0], sizes = [8, 16, 128], strides = [1, 1, 1]} : vector<14x16x128xf32> to vector<8x16x128xf32>
    %290 = vector.extract_strided_slice %122 {offsets = [3, 2, 0], sizes = [1, 1, 128], strides = [1, 1, 1]} : vector<7x7x128xf32> to vector<1x1x128xf32>
    %291 = vector.shape_cast %290 : vector<1x1x128xf32> to vector<128xf32>
    %292 = vector.shape_cast %291 : vector<128xf32> to vector<1x1x128xf32>
    %293 = vector.broadcast %292 : vector<1x1x128xf32> to vector<8x16x128xf32>
    %294 = arith.mulf %289, %293 : vector<8x16x128xf32>
    %295 = arith.addf %288, %294 : vector<8x16x128xf32>
    %296 = vector.extract_strided_slice %267 {offsets = [4, 0, 0], sizes = [8, 16, 128], strides = [1, 1, 1]} : vector<14x16x128xf32> to vector<8x16x128xf32>
    %297 = vector.extract_strided_slice %122 {offsets = [4, 2, 0], sizes = [1, 1, 128], strides = [1, 1, 1]} : vector<7x7x128xf32> to vector<1x1x128xf32>
    %298 = vector.shape_cast %297 : vector<1x1x128xf32> to vector<128xf32>
    %299 = vector.shape_cast %298 : vector<128xf32> to vector<1x1x128xf32>
    %300 = vector.broadcast %299 : vector<1x1x128xf32> to vector<8x16x128xf32>
    %301 = arith.mulf %296, %300 : vector<8x16x128xf32>
    %302 = arith.addf %295, %301 : vector<8x16x128xf32>
    %303 = vector.extract_strided_slice %267 {offsets = [5, 0, 0], sizes = [8, 16, 128], strides = [1, 1, 1]} : vector<14x16x128xf32> to vector<8x16x128xf32>
    %304 = vector.extract_strided_slice %122 {offsets = [5, 2, 0], sizes = [1, 1, 128], strides = [1, 1, 1]} : vector<7x7x128xf32> to vector<1x1x128xf32>
    %305 = vector.shape_cast %304 : vector<1x1x128xf32> to vector<128xf32>
    %306 = vector.shape_cast %305 : vector<128xf32> to vector<1x1x128xf32>
    %307 = vector.broadcast %306 : vector<1x1x128xf32> to vector<8x16x128xf32>
    %308 = arith.mulf %303, %307 : vector<8x16x128xf32>
    %309 = arith.addf %302, %308 : vector<8x16x128xf32>
    %310 = vector.extract_strided_slice %267 {offsets = [6, 0, 0], sizes = [8, 16, 128], strides = [1, 1, 1]} : vector<14x16x128xf32> to vector<8x16x128xf32>
    %311 = vector.extract_strided_slice %122 {offsets = [6, 2, 0], sizes = [1, 1, 128], strides = [1, 1, 1]} : vector<7x7x128xf32> to vector<1x1x128xf32>
    %312 = vector.shape_cast %311 : vector<1x1x128xf32> to vector<128xf32>
    %313 = vector.shape_cast %312 : vector<128xf32> to vector<1x1x128xf32>
    %314 = vector.broadcast %313 : vector<1x1x128xf32> to vector<8x16x128xf32>
    %315 = arith.mulf %310, %314 : vector<8x16x128xf32>
    %316 = arith.addf %309, %315 : vector<8x16x128xf32>
    %c0_i32_60 = arith.constant 0 : i32
    %317 = tpu.dynamic_rotate %112 by %c0_i32_60 dim 1 : vector<14x16x128xf32>, i32 -> vector<14x16x128xf32>
    %c0_i32_61 = arith.constant 0 : i32
    %318 = vector.broadcast %c0_i32_61 : i32 to vector<1x16x1xi32>
    %319 = arith.addi %127, %318 : vector<1x16x1xi32>
    %c0_i32_62 = arith.constant 0 : i32
    %320 = vector.broadcast %c0_i32_62 : i32 to vector<1x16x1xi32>
    %321 = arith.cmpi sge, %319, %320 : vector<1x16x1xi32>
    %c0_i32_63 = arith.constant 0 : i32
    %322 = vector.broadcast %c0_i32_63 : i32 to vector<1x16x1xi32>
    %323 = arith.addi %127, %322 : vector<1x16x1xi32>
    %c16_i32_64 = arith.constant 16 : i32
    %324 = vector.broadcast %c16_i32_64 : i32 to vector<1x16x1xi32>
    %325 = arith.cmpi slt, %323, %324 : vector<1x16x1xi32>
    %326 = arith.andi %321, %325 : vector<1x16x1xi1>
    %cst_65 = arith.constant 0.000000e+00 : f32
    %327 = vector.shape_cast %326 : vector<1x16x1xi1> to vector<1x16x1xi1>
    %328 = vector.broadcast %327 : vector<1x16x1xi1> to vector<14x16x128xi1>
    %329 = vector.broadcast %cst_65 : f32 to vector<14x16x128xf32>
    %330 = arith.select %328, %317, %329 : vector<14x16x128xi1>, vector<14x16x128xf32>
    %331 = vector.extract_strided_slice %330 {offsets = [0, 0, 0], sizes = [8, 16, 128], strides = [1, 1, 1]} : vector<14x16x128xf32> to vector<8x16x128xf32>
    %332 = vector.extract_strided_slice %122 {offsets = [0, 3, 0], sizes = [1, 1, 128], strides = [1, 1, 1]} : vector<7x7x128xf32> to vector<1x1x128xf32>
    %333 = vector.shape_cast %332 : vector<1x1x128xf32> to vector<128xf32>
    %334 = vector.shape_cast %333 : vector<128xf32> to vector<1x1x128xf32>
    %335 = vector.broadcast %334 : vector<1x1x128xf32> to vector<8x16x128xf32>
    %336 = arith.mulf %331, %335 : vector<8x16x128xf32>
    %337 = arith.addf %316, %336 : vector<8x16x128xf32>
    %338 = vector.extract_strided_slice %330 {offsets = [1, 0, 0], sizes = [8, 16, 128], strides = [1, 1, 1]} : vector<14x16x128xf32> to vector<8x16x128xf32>
    %339 = vector.extract_strided_slice %122 {offsets = [1, 3, 0], sizes = [1, 1, 128], strides = [1, 1, 1]} : vector<7x7x128xf32> to vector<1x1x128xf32>
    %340 = vector.shape_cast %339 : vector<1x1x128xf32> to vector<128xf32>
    %341 = vector.shape_cast %340 : vector<128xf32> to vector<1x1x128xf32>
    %342 = vector.broadcast %341 : vector<1x1x128xf32> to vector<8x16x128xf32>
    %343 = arith.mulf %338, %342 : vector<8x16x128xf32>
    %344 = arith.addf %337, %343 : vector<8x16x128xf32>
    %345 = vector.extract_strided_slice %330 {offsets = [2, 0, 0], sizes = [8, 16, 128], strides = [1, 1, 1]} : vector<14x16x128xf32> to vector<8x16x128xf32>
    %346 = vector.extract_strided_slice %122 {offsets = [2, 3, 0], sizes = [1, 1, 128], strides = [1, 1, 1]} : vector<7x7x128xf32> to vector<1x1x128xf32>
    %347 = vector.shape_cast %346 : vector<1x1x128xf32> to vector<128xf32>
    %348 = vector.shape_cast %347 : vector<128xf32> to vector<1x1x128xf32>
    %349 = vector.broadcast %348 : vector<1x1x128xf32> to vector<8x16x128xf32>
    %350 = arith.mulf %345, %349 : vector<8x16x128xf32>
    %351 = arith.addf %344, %350 : vector<8x16x128xf32>
    %352 = vector.extract_strided_slice %330 {offsets = [3, 0, 0], sizes = [8, 16, 128], strides = [1, 1, 1]} : vector<14x16x128xf32> to vector<8x16x128xf32>
    %353 = vector.extract_strided_slice %122 {offsets = [3, 3, 0], sizes = [1, 1, 128], strides = [1, 1, 1]} : vector<7x7x128xf32> to vector<1x1x128xf32>
    %354 = vector.shape_cast %353 : vector<1x1x128xf32> to vector<128xf32>
    %355 = vector.shape_cast %354 : vector<128xf32> to vector<1x1x128xf32>
    %356 = vector.broadcast %355 : vector<1x1x128xf32> to vector<8x16x128xf32>
    %357 = arith.mulf %352, %356 : vector<8x16x128xf32>
    %358 = arith.addf %351, %357 : vector<8x16x128xf32>
    %359 = vector.extract_strided_slice %330 {offsets = [4, 0, 0], sizes = [8, 16, 128], strides = [1, 1, 1]} : vector<14x16x128xf32> to vector<8x16x128xf32>
    %360 = vector.extract_strided_slice %122 {offsets = [4, 3, 0], sizes = [1, 1, 128], strides = [1, 1, 1]} : vector<7x7x128xf32> to vector<1x1x128xf32>
    %361 = vector.shape_cast %360 : vector<1x1x128xf32> to vector<128xf32>
    %362 = vector.shape_cast %361 : vector<128xf32> to vector<1x1x128xf32>
    %363 = vector.broadcast %362 : vector<1x1x128xf32> to vector<8x16x128xf32>
    %364 = arith.mulf %359, %363 : vector<8x16x128xf32>
    %365 = arith.addf %358, %364 : vector<8x16x128xf32>
    %366 = vector.extract_strided_slice %330 {offsets = [5, 0, 0], sizes = [8, 16, 128], strides = [1, 1, 1]} : vector<14x16x128xf32> to vector<8x16x128xf32>
    %367 = vector.extract_strided_slice %122 {offsets = [5, 3, 0], sizes = [1, 1, 128], strides = [1, 1, 1]} : vector<7x7x128xf32> to vector<1x1x128xf32>
    %368 = vector.shape_cast %367 : vector<1x1x128xf32> to vector<128xf32>
    %369 = vector.shape_cast %368 : vector<128xf32> to vector<1x1x128xf32>
    %370 = vector.broadcast %369 : vector<1x1x128xf32> to vector<8x16x128xf32>
    %371 = arith.mulf %366, %370 : vector<8x16x128xf32>
    %372 = arith.addf %365, %371 : vector<8x16x128xf32>
    %373 = vector.extract_strided_slice %330 {offsets = [6, 0, 0], sizes = [8, 16, 128], strides = [1, 1, 1]} : vector<14x16x128xf32> to vector<8x16x128xf32>
    %374 = vector.extract_strided_slice %122 {offsets = [6, 3, 0], sizes = [1, 1, 128], strides = [1, 1, 1]} : vector<7x7x128xf32> to vector<1x1x128xf32>
    %375 = vector.shape_cast %374 : vector<1x1x128xf32> to vector<128xf32>
    %376 = vector.shape_cast %375 : vector<128xf32> to vector<1x1x128xf32>
    %377 = vector.broadcast %376 : vector<1x1x128xf32> to vector<8x16x128xf32>
    %378 = arith.mulf %373, %377 : vector<8x16x128xf32>
    %379 = arith.addf %372, %378 : vector<8x16x128xf32>
    %c15_i32 = arith.constant 15 : i32
    %380 = tpu.dynamic_rotate %112 by %c15_i32 dim 1 : vector<14x16x128xf32>, i32 -> vector<14x16x128xf32>
    %c1_i32_66 = arith.constant 1 : i32
    %381 = vector.broadcast %c1_i32_66 : i32 to vector<1x16x1xi32>
    %382 = arith.addi %127, %381 : vector<1x16x1xi32>
    %c0_i32_67 = arith.constant 0 : i32
    %383 = vector.broadcast %c0_i32_67 : i32 to vector<1x16x1xi32>
    %384 = arith.cmpi sge, %382, %383 : vector<1x16x1xi32>
    %c1_i32_68 = arith.constant 1 : i32
    %385 = vector.broadcast %c1_i32_68 : i32 to vector<1x16x1xi32>
    %386 = arith.addi %127, %385 : vector<1x16x1xi32>
    %c16_i32_69 = arith.constant 16 : i32
    %387 = vector.broadcast %c16_i32_69 : i32 to vector<1x16x1xi32>
    %388 = arith.cmpi slt, %386, %387 : vector<1x16x1xi32>
    %389 = arith.andi %384, %388 : vector<1x16x1xi1>
    %cst_70 = arith.constant 0.000000e+00 : f32
    %390 = vector.shape_cast %389 : vector<1x16x1xi1> to vector<1x16x1xi1>
    %391 = vector.broadcast %390 : vector<1x16x1xi1> to vector<14x16x128xi1>
    %392 = vector.broadcast %cst_70 : f32 to vector<14x16x128xf32>
    %393 = arith.select %391, %380, %392 : vector<14x16x128xi1>, vector<14x16x128xf32>
    %394 = vector.extract_strided_slice %393 {offsets = [0, 0, 0], sizes = [8, 16, 128], strides = [1, 1, 1]} : vector<14x16x128xf32> to vector<8x16x128xf32>
    %395 = vector.extract_strided_slice %122 {offsets = [0, 4, 0], sizes = [1, 1, 128], strides = [1, 1, 1]} : vector<7x7x128xf32> to vector<1x1x128xf32>
    %396 = vector.shape_cast %395 : vector<1x1x128xf32> to vector<128xf32>
    %397 = vector.shape_cast %396 : vector<128xf32> to vector<1x1x128xf32>
    %398 = vector.broadcast %397 : vector<1x1x128xf32> to vector<8x16x128xf32>
    %399 = arith.mulf %394, %398 : vector<8x16x128xf32>
    %400 = arith.addf %379, %399 : vector<8x16x128xf32>
    %401 = vector.extract_strided_slice %393 {offsets = [1, 0, 0], sizes = [8, 16, 128], strides = [1, 1, 1]} : vector<14x16x128xf32> to vector<8x16x128xf32>
    %402 = vector.extract_strided_slice %122 {offsets = [1, 4, 0], sizes = [1, 1, 128], strides = [1, 1, 1]} : vector<7x7x128xf32> to vector<1x1x128xf32>
    %403 = vector.shape_cast %402 : vector<1x1x128xf32> to vector<128xf32>
    %404 = vector.shape_cast %403 : vector<128xf32> to vector<1x1x128xf32>
    %405 = vector.broadcast %404 : vector<1x1x128xf32> to vector<8x16x128xf32>
    %406 = arith.mulf %401, %405 : vector<8x16x128xf32>
    %407 = arith.addf %400, %406 : vector<8x16x128xf32>
    %408 = vector.extract_strided_slice %393 {offsets = [2, 0, 0], sizes = [8, 16, 128], strides = [1, 1, 1]} : vector<14x16x128xf32> to vector<8x16x128xf32>
    %409 = vector.extract_strided_slice %122 {offsets = [2, 4, 0], sizes = [1, 1, 128], strides = [1, 1, 1]} : vector<7x7x128xf32> to vector<1x1x128xf32>
    %410 = vector.shape_cast %409 : vector<1x1x128xf32> to vector<128xf32>
    %411 = vector.shape_cast %410 : vector<128xf32> to vector<1x1x128xf32>
    %412 = vector.broadcast %411 : vector<1x1x128xf32> to vector<8x16x128xf32>
    %413 = arith.mulf %408, %412 : vector<8x16x128xf32>
    %414 = arith.addf %407, %413 : vector<8x16x128xf32>
    %415 = vector.extract_strided_slice %393 {offsets = [3, 0, 0], sizes = [8, 16, 128], strides = [1, 1, 1]} : vector<14x16x128xf32> to vector<8x16x128xf32>
    %416 = vector.extract_strided_slice %122 {offsets = [3, 4, 0], sizes = [1, 1, 128], strides = [1, 1, 1]} : vector<7x7x128xf32> to vector<1x1x128xf32>
    %417 = vector.shape_cast %416 : vector<1x1x128xf32> to vector<128xf32>
    %418 = vector.shape_cast %417 : vector<128xf32> to vector<1x1x128xf32>
    %419 = vector.broadcast %418 : vector<1x1x128xf32> to vector<8x16x128xf32>
    %420 = arith.mulf %415, %419 : vector<8x16x128xf32>
    %421 = arith.addf %414, %420 : vector<8x16x128xf32>
    %422 = vector.extract_strided_slice %393 {offsets = [4, 0, 0], sizes = [8, 16, 128], strides = [1, 1, 1]} : vector<14x16x128xf32> to vector<8x16x128xf32>
    %423 = vector.extract_strided_slice %122 {offsets = [4, 4, 0], sizes = [1, 1, 128], strides = [1, 1, 1]} : vector<7x7x128xf32> to vector<1x1x128xf32>
    %424 = vector.shape_cast %423 : vector<1x1x128xf32> to vector<128xf32>
    %425 = vector.shape_cast %424 : vector<128xf32> to vector<1x1x128xf32>
    %426 = vector.broadcast %425 : vector<1x1x128xf32> to vector<8x16x128xf32>
    %427 = arith.mulf %422, %426 : vector<8x16x128xf32>
    %428 = arith.addf %421, %427 : vector<8x16x128xf32>
    %429 = vector.extract_strided_slice %393 {offsets = [5, 0, 0], sizes = [8, 16, 128], strides = [1, 1, 1]} : vector<14x16x128xf32> to vector<8x16x128xf32>
    %430 = vector.extract_strided_slice %122 {offsets = [5, 4, 0], sizes = [1, 1, 128], strides = [1, 1, 1]} : vector<7x7x128xf32> to vector<1x1x128xf32>
    %431 = vector.shape_cast %430 : vector<1x1x128xf32> to vector<128xf32>
    %432 = vector.shape_cast %431 : vector<128xf32> to vector<1x1x128xf32>
    %433 = vector.broadcast %432 : vector<1x1x128xf32> to vector<8x16x128xf32>
    %434 = arith.mulf %429, %433 : vector<8x16x128xf32>
    %435 = arith.addf %428, %434 : vector<8x16x128xf32>
    %436 = vector.extract_strided_slice %393 {offsets = [6, 0, 0], sizes = [8, 16, 128], strides = [1, 1, 1]} : vector<14x16x128xf32> to vector<8x16x128xf32>
    %437 = vector.extract_strided_slice %122 {offsets = [6, 4, 0], sizes = [1, 1, 128], strides = [1, 1, 1]} : vector<7x7x128xf32> to vector<1x1x128xf32>
    %438 = vector.shape_cast %437 : vector<1x1x128xf32> to vector<128xf32>
    %439 = vector.shape_cast %438 : vector<128xf32> to vector<1x1x128xf32>
    %440 = vector.broadcast %439 : vector<1x1x128xf32> to vector<8x16x128xf32>
    %441 = arith.mulf %436, %440 : vector<8x16x128xf32>
    %442 = arith.addf %435, %441 : vector<8x16x128xf32>
    %c14_i32 = arith.constant 14 : i32
    %443 = tpu.dynamic_rotate %112 by %c14_i32 dim 1 : vector<14x16x128xf32>, i32 -> vector<14x16x128xf32>
    %c2_i32_71 = arith.constant 2 : i32
    %444 = vector.broadcast %c2_i32_71 : i32 to vector<1x16x1xi32>
    %445 = arith.addi %127, %444 : vector<1x16x1xi32>
    %c0_i32_72 = arith.constant 0 : i32
    %446 = vector.broadcast %c0_i32_72 : i32 to vector<1x16x1xi32>
    %447 = arith.cmpi sge, %445, %446 : vector<1x16x1xi32>
    %c2_i32_73 = arith.constant 2 : i32
    %448 = vector.broadcast %c2_i32_73 : i32 to vector<1x16x1xi32>
    %449 = arith.addi %127, %448 : vector<1x16x1xi32>
    %c16_i32_74 = arith.constant 16 : i32
    %450 = vector.broadcast %c16_i32_74 : i32 to vector<1x16x1xi32>
    %451 = arith.cmpi slt, %449, %450 : vector<1x16x1xi32>
    %452 = arith.andi %447, %451 : vector<1x16x1xi1>
    %cst_75 = arith.constant 0.000000e+00 : f32
    %453 = vector.shape_cast %452 : vector<1x16x1xi1> to vector<1x16x1xi1>
    %454 = vector.broadcast %453 : vector<1x16x1xi1> to vector<14x16x128xi1>
    %455 = vector.broadcast %cst_75 : f32 to vector<14x16x128xf32>
    %456 = arith.select %454, %443, %455 : vector<14x16x128xi1>, vector<14x16x128xf32>
    %457 = vector.extract_strided_slice %456 {offsets = [0, 0, 0], sizes = [8, 16, 128], strides = [1, 1, 1]} : vector<14x16x128xf32> to vector<8x16x128xf32>
    %458 = vector.extract_strided_slice %122 {offsets = [0, 5, 0], sizes = [1, 1, 128], strides = [1, 1, 1]} : vector<7x7x128xf32> to vector<1x1x128xf32>
    %459 = vector.shape_cast %458 : vector<1x1x128xf32> to vector<128xf32>
    %460 = vector.shape_cast %459 : vector<128xf32> to vector<1x1x128xf32>
    %461 = vector.broadcast %460 : vector<1x1x128xf32> to vector<8x16x128xf32>
    %462 = arith.mulf %457, %461 : vector<8x16x128xf32>
    %463 = arith.addf %442, %462 : vector<8x16x128xf32>
    %464 = vector.extract_strided_slice %456 {offsets = [1, 0, 0], sizes = [8, 16, 128], strides = [1, 1, 1]} : vector<14x16x128xf32> to vector<8x16x128xf32>
    %465 = vector.extract_strided_slice %122 {offsets = [1, 5, 0], sizes = [1, 1, 128], strides = [1, 1, 1]} : vector<7x7x128xf32> to vector<1x1x128xf32>
    %466 = vector.shape_cast %465 : vector<1x1x128xf32> to vector<128xf32>
    %467 = vector.shape_cast %466 : vector<128xf32> to vector<1x1x128xf32>
    %468 = vector.broadcast %467 : vector<1x1x128xf32> to vector<8x16x128xf32>
    %469 = arith.mulf %464, %468 : vector<8x16x128xf32>
    %470 = arith.addf %463, %469 : vector<8x16x128xf32>
    %471 = vector.extract_strided_slice %456 {offsets = [2, 0, 0], sizes = [8, 16, 128], strides = [1, 1, 1]} : vector<14x16x128xf32> to vector<8x16x128xf32>
    %472 = vector.extract_strided_slice %122 {offsets = [2, 5, 0], sizes = [1, 1, 128], strides = [1, 1, 1]} : vector<7x7x128xf32> to vector<1x1x128xf32>
    %473 = vector.shape_cast %472 : vector<1x1x128xf32> to vector<128xf32>
    %474 = vector.shape_cast %473 : vector<128xf32> to vector<1x1x128xf32>
    %475 = vector.broadcast %474 : vector<1x1x128xf32> to vector<8x16x128xf32>
    %476 = arith.mulf %471, %475 : vector<8x16x128xf32>
    %477 = arith.addf %470, %476 : vector<8x16x128xf32>
    %478 = vector.extract_strided_slice %456 {offsets = [3, 0, 0], sizes = [8, 16, 128], strides = [1, 1, 1]} : vector<14x16x128xf32> to vector<8x16x128xf32>
    %479 = vector.extract_strided_slice %122 {offsets = [3, 5, 0], sizes = [1, 1, 128], strides = [1, 1, 1]} : vector<7x7x128xf32> to vector<1x1x128xf32>
    %480 = vector.shape_cast %479 : vector<1x1x128xf32> to vector<128xf32>
    %481 = vector.shape_cast %480 : vector<128xf32> to vector<1x1x128xf32>
    %482 = vector.broadcast %481 : vector<1x1x128xf32> to vector<8x16x128xf32>
    %483 = arith.mulf %478, %482 : vector<8x16x128xf32>
    %484 = arith.addf %477, %483 : vector<8x16x128xf32>
    %485 = vector.extract_strided_slice %456 {offsets = [4, 0, 0], sizes = [8, 16, 128], strides = [1, 1, 1]} : vector<14x16x128xf32> to vector<8x16x128xf32>
    %486 = vector.extract_strided_slice %122 {offsets = [4, 5, 0], sizes = [1, 1, 128], strides = [1, 1, 1]} : vector<7x7x128xf32> to vector<1x1x128xf32>
    %487 = vector.shape_cast %486 : vector<1x1x128xf32> to vector<128xf32>
    %488 = vector.shape_cast %487 : vector<128xf32> to vector<1x1x128xf32>
    %489 = vector.broadcast %488 : vector<1x1x128xf32> to vector<8x16x128xf32>
    %490 = arith.mulf %485, %489 : vector<8x16x128xf32>
    %491 = arith.addf %484, %490 : vector<8x16x128xf32>
    %492 = vector.extract_strided_slice %456 {offsets = [5, 0, 0], sizes = [8, 16, 128], strides = [1, 1, 1]} : vector<14x16x128xf32> to vector<8x16x128xf32>
    %493 = vector.extract_strided_slice %122 {offsets = [5, 5, 0], sizes = [1, 1, 128], strides = [1, 1, 1]} : vector<7x7x128xf32> to vector<1x1x128xf32>
    %494 = vector.shape_cast %493 : vector<1x1x128xf32> to vector<128xf32>
    %495 = vector.shape_cast %494 : vector<128xf32> to vector<1x1x128xf32>
    %496 = vector.broadcast %495 : vector<1x1x128xf32> to vector<8x16x128xf32>
    %497 = arith.mulf %492, %496 : vector<8x16x128xf32>
    %498 = arith.addf %491, %497 : vector<8x16x128xf32>
    %499 = vector.extract_strided_slice %456 {offsets = [6, 0, 0], sizes = [8, 16, 128], strides = [1, 1, 1]} : vector<14x16x128xf32> to vector<8x16x128xf32>
    %500 = vector.extract_strided_slice %122 {offsets = [6, 5, 0], sizes = [1, 1, 128], strides = [1, 1, 1]} : vector<7x7x128xf32> to vector<1x1x128xf32>
    %501 = vector.shape_cast %500 : vector<1x1x128xf32> to vector<128xf32>
    %502 = vector.shape_cast %501 : vector<128xf32> to vector<1x1x128xf32>
    %503 = vector.broadcast %502 : vector<1x1x128xf32> to vector<8x16x128xf32>
    %504 = arith.mulf %499, %503 : vector<8x16x128xf32>
    %505 = arith.addf %498, %504 : vector<8x16x128xf32>
    %c13_i32 = arith.constant 13 : i32
    %506 = tpu.dynamic_rotate %112 by %c13_i32 dim 1 : vector<14x16x128xf32>, i32 -> vector<14x16x128xf32>
    %c3_i32_76 = arith.constant 3 : i32
    %507 = vector.broadcast %c3_i32_76 : i32 to vector<1x16x1xi32>
    %508 = arith.addi %127, %507 : vector<1x16x1xi32>
    %c0_i32_77 = arith.constant 0 : i32
    %509 = vector.broadcast %c0_i32_77 : i32 to vector<1x16x1xi32>
    %510 = arith.cmpi sge, %508, %509 : vector<1x16x1xi32>
    %c3_i32_78 = arith.constant 3 : i32
    %511 = vector.broadcast %c3_i32_78 : i32 to vector<1x16x1xi32>
    %512 = arith.addi %127, %511 : vector<1x16x1xi32>
    %c16_i32_79 = arith.constant 16 : i32
    %513 = vector.broadcast %c16_i32_79 : i32 to vector<1x16x1xi32>
    %514 = arith.cmpi slt, %512, %513 : vector<1x16x1xi32>
    %515 = arith.andi %510, %514 : vector<1x16x1xi1>
    %cst_80 = arith.constant 0.000000e+00 : f32
    %516 = vector.shape_cast %515 : vector<1x16x1xi1> to vector<1x16x1xi1>
    %517 = vector.broadcast %516 : vector<1x16x1xi1> to vector<14x16x128xi1>
    %518 = vector.broadcast %cst_80 : f32 to vector<14x16x128xf32>
    %519 = arith.select %517, %506, %518 : vector<14x16x128xi1>, vector<14x16x128xf32>
    %520 = vector.extract_strided_slice %519 {offsets = [0, 0, 0], sizes = [8, 16, 128], strides = [1, 1, 1]} : vector<14x16x128xf32> to vector<8x16x128xf32>
    %521 = vector.extract_strided_slice %122 {offsets = [0, 6, 0], sizes = [1, 1, 128], strides = [1, 1, 1]} : vector<7x7x128xf32> to vector<1x1x128xf32>
    %522 = vector.shape_cast %521 : vector<1x1x128xf32> to vector<128xf32>
    %523 = vector.shape_cast %522 : vector<128xf32> to vector<1x1x128xf32>
    %524 = vector.broadcast %523 : vector<1x1x128xf32> to vector<8x16x128xf32>
    %525 = arith.mulf %520, %524 : vector<8x16x128xf32>
    %526 = arith.addf %505, %525 : vector<8x16x128xf32>
    %527 = vector.extract_strided_slice %519 {offsets = [1, 0, 0], sizes = [8, 16, 128], strides = [1, 1, 1]} : vector<14x16x128xf32> to vector<8x16x128xf32>
    %528 = vector.extract_strided_slice %122 {offsets = [1, 6, 0], sizes = [1, 1, 128], strides = [1, 1, 1]} : vector<7x7x128xf32> to vector<1x1x128xf32>
    %529 = vector.shape_cast %528 : vector<1x1x128xf32> to vector<128xf32>
    %530 = vector.shape_cast %529 : vector<128xf32> to vector<1x1x128xf32>
    %531 = vector.broadcast %530 : vector<1x1x128xf32> to vector<8x16x128xf32>
    %532 = arith.mulf %527, %531 : vector<8x16x128xf32>
    %533 = arith.addf %526, %532 : vector<8x16x128xf32>
    %534 = vector.extract_strided_slice %519 {offsets = [2, 0, 0], sizes = [8, 16, 128], strides = [1, 1, 1]} : vector<14x16x128xf32> to vector<8x16x128xf32>
    %535 = vector.extract_strided_slice %122 {offsets = [2, 6, 0], sizes = [1, 1, 128], strides = [1, 1, 1]} : vector<7x7x128xf32> to vector<1x1x128xf32>
    %536 = vector.shape_cast %535 : vector<1x1x128xf32> to vector<128xf32>
    %537 = vector.shape_cast %536 : vector<128xf32> to vector<1x1x128xf32>
    %538 = vector.broadcast %537 : vector<1x1x128xf32> to vector<8x16x128xf32>
    %539 = arith.mulf %534, %538 : vector<8x16x128xf32>
    %540 = arith.addf %533, %539 : vector<8x16x128xf32>
    %541 = vector.extract_strided_slice %519 {offsets = [3, 0, 0], sizes = [8, 16, 128], strides = [1, 1, 1]} : vector<14x16x128xf32> to vector<8x16x128xf32>
    %542 = vector.extract_strided_slice %122 {offsets = [3, 6, 0], sizes = [1, 1, 128], strides = [1, 1, 1]} : vector<7x7x128xf32> to vector<1x1x128xf32>
    %543 = vector.shape_cast %542 : vector<1x1x128xf32> to vector<128xf32>
    %544 = vector.shape_cast %543 : vector<128xf32> to vector<1x1x128xf32>
    %545 = vector.broadcast %544 : vector<1x1x128xf32> to vector<8x16x128xf32>
    %546 = arith.mulf %541, %545 : vector<8x16x128xf32>
    %547 = arith.addf %540, %546 : vector<8x16x128xf32>
    %548 = vector.extract_strided_slice %519 {offsets = [4, 0, 0], sizes = [8, 16, 128], strides = [1, 1, 1]} : vector<14x16x128xf32> to vector<8x16x128xf32>
    %549 = vector.extract_strided_slice %122 {offsets = [4, 6, 0], sizes = [1, 1, 128], strides = [1, 1, 1]} : vector<7x7x128xf32> to vector<1x1x128xf32>
    %550 = vector.shape_cast %549 : vector<1x1x128xf32> to vector<128xf32>
    %551 = vector.shape_cast %550 : vector<128xf32> to vector<1x1x128xf32>
    %552 = vector.broadcast %551 : vector<1x1x128xf32> to vector<8x16x128xf32>
    %553 = arith.mulf %548, %552 : vector<8x16x128xf32>
    %554 = arith.addf %547, %553 : vector<8x16x128xf32>
    %555 = vector.extract_strided_slice %519 {offsets = [5, 0, 0], sizes = [8, 16, 128], strides = [1, 1, 1]} : vector<14x16x128xf32> to vector<8x16x128xf32>
    %556 = vector.extract_strided_slice %122 {offsets = [5, 6, 0], sizes = [1, 1, 128], strides = [1, 1, 1]} : vector<7x7x128xf32> to vector<1x1x128xf32>
    %557 = vector.shape_cast %556 : vector<1x1x128xf32> to vector<128xf32>
    %558 = vector.shape_cast %557 : vector<128xf32> to vector<1x1x128xf32>
    %559 = vector.broadcast %558 : vector<1x1x128xf32> to vector<8x16x128xf32>
    %560 = arith.mulf %555, %559 : vector<8x16x128xf32>
    %561 = arith.addf %554, %560 : vector<8x16x128xf32>
    %562 = vector.extract_strided_slice %519 {offsets = [6, 0, 0], sizes = [8, 16, 128], strides = [1, 1, 1]} : vector<14x16x128xf32> to vector<8x16x128xf32>
    %563 = vector.extract_strided_slice %122 {offsets = [6, 6, 0], sizes = [1, 1, 128], strides = [1, 1, 1]} : vector<7x7x128xf32> to vector<1x1x128xf32>
    %564 = vector.shape_cast %563 : vector<1x1x128xf32> to vector<128xf32>
    %565 = vector.shape_cast %564 : vector<128xf32> to vector<1x1x128xf32>
    %566 = vector.broadcast %565 : vector<1x1x128xf32> to vector<8x16x128xf32>
    %567 = arith.mulf %562, %566 : vector<8x16x128xf32>
    %568 = arith.addf %561, %567 : vector<8x16x128xf32>
    %569 = vector.shape_cast %568 : vector<8x16x128xf32> to vector<128x128xf32>
    %570 = arith.mulf %119, %119 : vector<128x128xf32>
    %571 = arith.mulf %119, %570 : vector<128x128xf32>
    %cst_81 = arith.constant 4.471500e-02 : f32
    %572 = vector.broadcast %cst_81 : f32 to vector<128x128xf32>
    %573 = arith.mulf %572, %571 : vector<128x128xf32>
    %574 = arith.addf %119, %573 : vector<128x128xf32>
    %cst_82 = arith.constant 0.797884583 : f32
    %575 = vector.broadcast %cst_82 : f32 to vector<128x128xf32>
    %576 = arith.mulf %575, %574 : vector<128x128xf32>
    %577 = math.tanh %576 : vector<128x128xf32>
    %cst_83 = arith.constant 1.000000e+00 : f32
    %578 = vector.broadcast %cst_83 : f32 to vector<128x128xf32>
    %579 = arith.addf %578, %577 : vector<128x128xf32>
    %cst_84 = arith.constant 5.000000e-01 : f32
    %580 = vector.broadcast %cst_84 : f32 to vector<128x128xf32>
    %581 = arith.mulf %580, %579 : vector<128x128xf32>
    %582 = arith.mulf %119, %581 : vector<128x128xf32>
    %583 = arith.mulf %582, %121 : vector<128x128xf32>
    %584 = arith.truncf %583 : vector<128x128xf32> to vector<128x128xbf16>
    %585 = arith.mulf %120, %120 : vector<128x128xf32>
    %586 = arith.mulf %120, %585 : vector<128x128xf32>
    %cst_85 = arith.constant 4.471500e-02 : f32
    %587 = vector.broadcast %cst_85 : f32 to vector<128x128xf32>
    %588 = arith.mulf %587, %586 : vector<128x128xf32>
    %589 = arith.addf %120, %588 : vector<128x128xf32>
    %cst_86 = arith.constant 0.797884583 : f32
    %590 = vector.broadcast %cst_86 : f32 to vector<128x128xf32>
    %591 = arith.mulf %590, %589 : vector<128x128xf32>
    %592 = math.tanh %591 : vector<128x128xf32>
    %cst_87 = arith.constant 1.000000e+00 : f32
    %593 = vector.broadcast %cst_87 : f32 to vector<128x128xf32>
    %594 = arith.addf %593, %592 : vector<128x128xf32>
    %cst_88 = arith.constant 5.000000e-01 : f32
    %595 = vector.broadcast %cst_88 : f32 to vector<128x128xf32>
    %596 = arith.mulf %595, %594 : vector<128x128xf32>
    %597 = arith.mulf %120, %596 : vector<128x128xf32>
    %598 = arith.mulf %597, %569 : vector<128x128xf32>
    %599 = arith.truncf %598 : vector<128x128xf32> to vector<128x128xbf16>
    %c0_89 = arith.constant 0 : index
    %c0_90 = arith.constant 0 : index
    %600 = vector.load %arg13[%c0_89, %c0_90] : memref<128x128xbf16, #tpu.memory_space<vmem>>, vector<128x128xbf16>
    %cst_91 = arith.constant dense<0.000000e+00> : vector<128x128xf32>
    %601 = tpu.matmul %584, %600, %cst_91 {dimension_numbers = #tpu.dot_dimension_numbers<[1], [0], [0], [1], [0, 0, 1, 1], [], []>} : vector<128x128xbf16>, vector<128x128xbf16>, vector<128x128xf32> -> vector<128x128xf32>
    %c0_92 = arith.constant 0 : index
    %c0_93 = arith.constant 0 : index
    %602 = vector.load %arg14[%c0_92, %c0_93] : memref<128x128xbf16, #tpu.memory_space<vmem>>, vector<128x128xbf16>
    %cst_94 = arith.constant dense<0.000000e+00> : vector<128x128xf32>
    %603 = tpu.matmul %599, %602, %cst_94 {dimension_numbers = #tpu.dot_dimension_numbers<[1], [0], [0], [1], [0, 0, 1, 1], [], []>} : vector<128x128xbf16>, vector<128x128xbf16>, vector<128x128xf32> -> vector<128x128xf32>
    %604 = arith.addf %601, %603 : vector<128x128xf32>
    %c0_95 = arith.constant 0 : index
    %c0_96 = arith.constant 0 : index
    %605 = vector.load %arg15[%c0_95, %c0_96] : memref<1x128xf32, #tpu.memory_space<vmem>>, vector<1x128xf32>
    %606 = vector.broadcast %605 : vector<1x128xf32> to vector<128x128xf32>
    %607 = arith.addf %604, %606 : vector<128x128xf32>
    %c0_97 = arith.constant 0 : index
    %c0_98 = arith.constant 0 : index
    %c0_99 = arith.constant 0 : index
    %c0_100 = arith.constant 0 : index
    %608 = vector.load %arg3[%c0_97, %c0_98, %c0_99, %c0_100] : memref<1x8x16x128xf32, #tpu.memory_space<vmem>>, vector<1x8x16x128xf32>
    %609 = vector.shape_cast %608 : vector<1x8x16x128xf32> to vector<8x16x128xf32>
    %610 = vector.shape_cast %609 : vector<8x16x128xf32> to vector<128x128xf32>
    %611 = arith.addf %607, %610 : vector<128x128xf32>
    %612 = vector.shape_cast %611 : vector<128x128xf32> to vector<1x8x16x128xf32>
    %c0_101 = arith.constant 0 : index
    %c0_102 = arith.constant 0 : index
    %c0_103 = arith.constant 0 : index
    %c0_104 = arith.constant 0 : index
    %613 = vector.load %arg16[%c0_101, %c0_102, %c0_103, %c0_104] : memref<1x8x16x128xf32, #tpu.memory_space<vmem>>, vector<1x8x16x128xf32>
    tpu.vector_store %arg16[%c0_101, %c0_102, %c0_103, %c0_104], %612 {strides = array<i32>} : memref<1x8x16x128xf32, #tpu.memory_space<vmem>>, vector<1x8x16x128xf32>,
    return
  }
  func.func @transform_0(%arg0: i32, %arg1: i32) -> (i32, i32, i32, i32) {
    %c2_i32 = arith.constant 2 : i32
    %0 = arith.muli %arg1, %c2_i32 : i32
    %c1_i32 = arith.constant 1 : i32
    %1 = arith.subi %0, %c1_i32 : i32
    %c0_i32 = arith.constant 0 : i32
    %2 = arith.maxsi %1, %c0_i32 : i32
    %c0_i32_0 = arith.constant 0 : i32
    %c0_i32_1 = arith.constant 0 : i32
    %c0_i32_2 = arith.constant 0 : i32
    return %arg0, %2, %c0_i32_0, %c0_i32_1 : i32, i32, i32, i32
  }
  func.func @transform_1(%arg0: i32, %arg1: i32) -> (i32, i32, i32, i32) {
    %c0_i32 = arith.constant 0 : i32
    %c0_i32_0 = arith.constant 0 : i32
    %c0_i32_1 = arith.constant 0 : i32
    return %arg0, %arg1, %c0_i32, %c0_i32_0 : i32, i32, i32, i32
  }
  func.func @transform_2(%arg0: i32, %arg1: i32) -> (i32, i32, i32, i32) {
    %c1_i32 = arith.constant 1 : i32
    %0 = arith.addi %arg1, %c1_i32 : i32
    %c2_i32 = arith.constant 2 : i32
    %1 = arith.muli %0, %c2_i32 : i32
    %c3_i32 = arith.constant 3 : i32
    %2 = arith.minsi %1, %c3_i32 : i32
    %c0_i32 = arith.constant 0 : i32
    %c0_i32_0 = arith.constant 0 : i32
    %c0_i32_1 = arith.constant 0 : i32
    return %arg0, %2, %c0_i32, %c0_i32_0 : i32, i32, i32, i32
  }
  func.func @transform_3(%arg0: i32, %arg1: i32) -> (i32, i32) {
    %c0_i32 = arith.constant 0 : i32
    %c0_i32_0 = arith.constant 0 : i32
    %c0_i32_1 = arith.constant 0 : i32
    return %c0_i32, %c0_i32_0 : i32, i32
  }
  func.func @transform_4(%arg0: i32, %arg1: i32) -> (i32, i32) {
    %c0_i32 = arith.constant 0 : i32
    %c0_i32_0 = arith.constant 0 : i32
    %c0_i32_1 = arith.constant 0 : i32
    return %c0_i32, %c0_i32_0 : i32, i32
  }
  func.func @transform_5(%arg0: i32, %arg1: i32) -> (i32, i32) {
    %c0_i32 = arith.constant 0 : i32
    %c0_i32_0 = arith.constant 0 : i32
    %c0_i32_1 = arith.constant 0 : i32
    return %c0_i32, %c0_i32_0 : i32, i32
  }
  func.func @transform_6(%arg0: i32, %arg1: i32) -> (i32, i32) {
    %c0_i32 = arith.constant 0 : i32
    %c0_i32_0 = arith.constant 0 : i32
    %c0_i32_1 = arith.constant 0 : i32
    return %c0_i32, %c0_i32_0 : i32, i32
  }
  func.func @transform_7(%arg0: i32, %arg1: i32) -> (i32, i32) {
    %c0_i32 = arith.constant 0 : i32
    %c0_i32_0 = arith.constant 0 : i32
    %c0_i32_1 = arith.constant 0 : i32
    return %c0_i32, %c0_i32_0 : i32, i32
  }
  func.func @transform_8(%arg0: i32, %arg1: i32) -> (i32, i32) {
    %c0_i32 = arith.constant 0 : i32
    %c0_i32_0 = arith.constant 0 : i32
    %c0_i32_1 = arith.constant 0 : i32
    return %c0_i32, %c0_i32_0 : i32, i32
  }
  func.func @transform_9(%arg0: i32, %arg1: i32) -> (i32, i32, i32) {
    %c0_i32 = arith.constant 0 : i32
    %c0_i32_0 = arith.constant 0 : i32
    %c0_i32_1 = arith.constant 0 : i32
    %c0_i32_2 = arith.constant 0 : i32
    return %c0_i32, %c0_i32_0, %c0_i32_1 : i32, i32, i32
  }
  func.func @transform_10(%arg0: i32, %arg1: i32) -> (i32, i32) {
    %c0_i32 = arith.constant 0 : i32
    %c0_i32_0 = arith.constant 0 : i32
    %c0_i32_1 = arith.constant 0 : i32
    return %c0_i32, %c0_i32_0 : i32, i32
  }
  func.func @transform_11(%arg0: i32, %arg1: i32) -> (i32, i32) {
    %c0_i32 = arith.constant 0 : i32
    %c0_i32_0 = arith.constant 0 : i32
    %c0_i32_1 = arith.constant 0 : i32
    return %c0_i32, %c0_i32_0 : i32, i32
  }
  func.func @transform_12(%arg0: i32, %arg1: i32) -> (i32, i32) {
    %c0_i32 = arith.constant 0 : i32
    %c0_i32_0 = arith.constant 0 : i32
    %c0_i32_1 = arith.constant 0 : i32
    return %c0_i32, %c0_i32_0 : i32, i32
  }
  func.func @transform_13(%arg0: i32, %arg1: i32) -> (i32, i32) {
    %c0_i32 = arith.constant 0 : i32
    %c0_i32_0 = arith.constant 0 : i32
    %c0_i32_1 = arith.constant 0 : i32
    return %c0_i32, %c0_i32_0 : i32, i32
  }
  func.func @transform_14(%arg0: i32, %arg1: i32) -> (i32, i32, i32, i32) {
    %c0_i32 = arith.constant 0 : i32
    %c0_i32_0 = arith.constant 0 : i32
    %c0_i32_1 = arith.constant 0 : i32
    return %arg0, %arg1, %c0_i32, %c0_i32_0 : i32, i32, i32, i32
  }
}

</mosaic_0001>

<bundles_post_ra>
// kernel: tpu_custom_call.1
= control target key start
LH: loop header
LB: loop body
LE: loop exit
PB: predicated region body
PF: predicated region fallthrough
CT: control target
= control target key end

     0   :  { %s11573_s0 = inlined_call_operand.hbm [shape: f32[2,16,16,128], index: 0, kind: input, shape index: {}]   ;;  %s11574_s1 = inlined_call_operand.hbm [shape: f32[2,16,16,128], index: 1, kind: input, shape index: {}]   ;;  %s11575_s2 = inlined_call_operand.hbm [shape: f32[2,16,16,128], index: 2, kind: input, shape index: {}]   ;;  %s11576_s3 = inlined_call_operand.vmem [shape: f32[1,128], index: 3, kind: input, shape index: {}]   ;;  %s11577_s4 = inlined_call_operand.vmem [shape: f32[1,128], index: 4, kind: input, shape index: {}]   ;;  %s11578_s5 = inlined_call_operand.hbm [shape: bf16[128,384], index: 5, kind: input, shape index: {}]   ;;  %s11579_s6 = inlined_call_operand.vmem [shape: f32[1,384], index: 6, kind: input, shape index: {}]   ;;  %s11580_s7 = inlined_call_operand.hbm [shape: bf16[128,128], index: 7, kind: input, shape index: {}]   ;;  %s11581_s8 = inlined_call_operand.vmem [shape: f32[1,128], index: 8, kind: input, shape index: {}]   ;;  %s11582_s9 = inlined_call_operand.hbm [shape: f32[7,7,128], index: 9, kind: input, shape index: {}]   ;;  %s11583_s10 = inlined_call_operand.vmem [shape: f32[1,128], index: 10, kind: input, shape index: {}]   ;;  %s11584_s11 = inlined_call_operand.hbm [shape: bf16[128,128], index: 11, kind: input, shape index: {}]   ;;  %s11585_s12 = inlined_call_operand.hbm [shape: bf16[128,128], index: 12, kind: input, shape index: {}]   ;;  %s11586_s13 = inlined_call_operand.vmem [shape: f32[1,128], index: 13, kind: input, shape index: {}]   ;;  %s11587_s14 = inlined_call_operand.hbm [shape: f32[2,16,16,128], index: 14, kind: output, shape index: {}]  }
   0x1   :  { %12019 = sst [smem:[#allocation295_spill]] %s11573_s0 }
   0x2   :  { %12020 = sst [smem:[#allocation296_spill]] %s11574_s1 }
   0x3   :  { %12021 = sst [smem:[#allocation297_spill]] %s11575_s2 }
   0x4   :  { %12022 = sst [smem:[#allocation298_spill]] %s11576_s3 }
   0x5   :  { %12023 = sst [smem:[#allocation299_spill]] %s11577_s4 }
   0x6   :  { %12024 = sst [smem:[#allocation300_spill]] %s11578_s5 }
   0x7   :  { %12025 = sst [smem:[#allocation301_spill]] %s11579_s6 }
   0x8   :  { %12026 = sst [smem:[#allocation302_spill]] %s11580_s7 }
   0x9   :  { %12027 = sst [smem:[#allocation303_spill]] %s11581_s8 }
   0xa   :  { %12028 = sst [smem:[#allocation304_spill]] %s11582_s9 }
   0xb   :  { %12029 = sst [smem:[#allocation305_spill]] %s11583_s10 }
   0xc   :  { %12030 = sst [smem:[#allocation306_spill]] %s11584_s11 }
   0xd   :  { %12031 = sst [smem:[#allocation307_spill]] %s11585_s12 }
   0xe   :  { %12032 = sst [smem:[#allocation308_spill]] %s11586_s13 }
   0xf   :  { %12033 = sst [smem:[#allocation309_spill]] %s11587_s14 }
  0x10   :  { %19 = vsyncpa [#allocation3], 0 }
  0x11   :  { %21 = vsyncpa [#allocation3 + $0x1], 0 }
  0x12   :  { %22 = vsyncpa [#allocation6], 0 }
  0x13   :  { %24 = vsyncpa [#allocation6 + $0x1], 0 }
  0x14   :  { %25 = vsyncpa [#allocation9], 0 }
  0x15   :  { %26 = vsyncpa [#allocation12], 0 }
  0x16   :  { %27 = vsyncpa [#allocation15], 0 }
  0x17   :  { %28 = vsyncpa [#allocation4], 0 }
  0x18   :  { %30 = vsyncpa [#allocation4 + $0x1], 0  ;;  %s6392_s29 = smov 0   ;;  %s6394_s30 = smov 0  }
  0x19   :  { %s6396_s15 = smov 0   ;;  %s6398_s16 = smov 0  }
  0x1a   :  { %s6400_s17 = smov 0   ;;  %s6402_s18 = smov 0  }
  0x1b   :  { %s6404_s19 = smov 0   ;;  %s6406_s20 = smov 0  }
  0x1c   :  { %s6408_s21 = smov 0   ;;  %s6410_s22 = smov 0  }
  0x1d   :  { %s6412_s23 = smov 0   ;;  %s6414_s24 = smov 0  }
  0x1e   :  { %s6416_s25 = smov 0   ;;  %s6418_s26 = smov 0  }
  0x1f LB: > { %12034 = sst [smem:[#allocation24_spill]] %s6245_s29  ;;  %s6463_s27 = sadd.s32 4294967295, %s6297_s26   ;;  %s6297_s26 = sphi %s6418_s26, %s36_s26   ;;  %s6293_s25 = sphi %s6416_s25, %s13148_s25   ;;  %s6289_s24 = sphi %s6414_s24, %s13147_s24   ;;  %s6285_s23 = sphi %s6412_s23, %s13146_s23   ;;  %s6281_s22 = sphi %s6410_s22, %s13145_s22   ;;  %s6277_s21 = sphi %s6408_s21, %s13144_s21   ;;  %s6273_s20 = sphi %s6406_s20, %s13143_s20   ;;  %s6269_s19 = sphi %s6404_s19, %s13142_s19   ;;  %s6265_s18 = sphi %s6402_s18, %s13141_s18   ;;  %s6261_s17 = sphi %s6400_s17, %s13135_s17   ;;  %s6257_s16 = sphi %s6398_s16, %s13134_s16   ;;  %s6253_s15 = sphi %s6396_s15, %s13140_s15   ;;  %s6249_s30 = sphi %s6394_s30, %s13133_s30   ;;  %s6245_s29 = sphi %s6392_s29, %s13139_s29  }
  0x20   : > { %12035 = sst [smem:[#allocation25_spill]] %s6249_s30  ;;  %p5176_p0 = scmp.ge.s32.totalorder %s6297_s26, 1 }
  0x21   : > { %12036 = sst [smem:[#allocation26_spill]] %s6253_s15  ;;  %p11594_p1 = scmp.eq.s32.totalorder %s6463_s27, 0 }
  0x22   : > { %12037 = sst [smem:[#allocation27_spill]] %s6257_s16  ;;  %p412_p2 = scmp.lt.s32.totalorder %s6297_s26, 5 }
  0x23   : > { %12038 = sst [smem:[#allocation28_spill]] %s6261_s17  ;;  %s6299_s14 = smov [#allocation8]  }
  0x24   : > { %12039 = sst [smem:[#allocation29_spill]] %s6265_s18  ;;  %p6468_p3 = pnand %p5176_p0, %p412_p2 }
  0x25   : > { %12040 = sst [smem:[#allocation30_spill]] %s6281_s22  ;;  %s6300_s10 = smov [#allocation11]  }
  0x26   : > { %12041 = sst [smem:[#allocation31_spill]] %s6285_s23  ;;  %s430_s23 = sshll.u32 %s6299_s14, 4  ;;  %s431_s23 = int_to_ptr.vmem [resolvable:$true] %s430_s23 }
  0x27   : > { %s12042_s28 = scalar_select %p6468_p3, 1, 0 }
  0x28   : > { %p5541_p4 = pneg %p6468_p3  ;;  %s462_s8 = sshll.u32 %s6300_s10, 4  ;;  %s463_s8 = int_to_ptr.vmem [resolvable:$true] %s462_s8 }
  0x29   : > { %12043 = sst [smem:[#allocation32_spill]] %s12042_s28  ;;  %s5930_s22 = scalar_lea.vmem %s431_s23, 3072 }
  0x2a   : > { %p6476_p5 = pnand %p5541_p4, %p11594_p1  ;;  %p5931_p7 = scmp.ne.s32.totalorder %s431_s23, %s5930_s22 }
  0x2b   : > { %p5938_p10 = scmp.lt.s32.totalorder %s431_s23, %s431_s23  ;;  %p5939_p11 = scmp.lt.s32.totalorder %s5930_s22, %s5930_s22 }
  0x2c   : > { %p6482_p6 = pneg %p6476_p5 }
  0x2d   : > { %p5940_p12 = por %p5939_p11, %p5938_p10 }
  0x2e   : > { %p5933_p8 = pnand %p5931_p7, %p6482_p6 }
  0x30   : > { %p5934_p9 = pneg %p5933_p8 }
  0x32   : > { %p5941_p13 = pnand %p5940_p12, %p5934_p9 }
  0x34   : > { %5944 = shalt.err (!%p5941_p13)
}
  0x35   : > { %s6301_s14 = smov 192   ;;  %s6302_s10 = smov 12  }
  0x36   : > { %s12046_s5 = sld [smem:[#allocation300_spill]]  ;;  %s5956_s28 = scalar_lea.vmem %s463_s8, 896 }
  0x37   : > { %p5957_p0 = scmp.ne.s32.totalorder %s463_s8, %s5956_s28  ;;  %p5964_p7 = scmp.lt.s32.totalorder %s463_s8, %s463_s8 }
  0x38   : > { %p5965_p8 = scmp.lt.s32.totalorder %s5956_s28, %s5956_s28 }
  0x39   : > { %p5959_p2 = pnand %p5957_p0, %p6482_p6 }
  0x3a   : > { %p5966_p1 = por %p5965_p8, %p5964_p7 }
  0x3b   : > { %p5960_p4 = pneg %p5959_p2 }
  0x3c   : > { %5544 = dma.hbm_to_vmem [thread:$0]  (!%p6476_p5), %s12046_s5, 3072, %s431_s23, [#allocation9], %s6301_s14, %s6301_s14, %s6302_s10  }
  0x3d   : > { %p5967_p10 = pnand %p5966_p1, %p5960_p4 }
  0x3f   : > { %5970 = shalt.err (!%p5967_p10)
}
  0x40   : > { %s11595_s22 = smov 128   ;;  %s11597_s3 = smov 8  }
  0x41   : > { %s12047_s9 = sld [smem:[#allocation304_spill]]  ;;  %s5169_s28 = sadd.s32 4294967294, %s6297_s26  }
  0x42   : > { %s45_s14 = sadd.s32 1, %s6289_s24  ;;  %s48_s10 = sadd.s32 1, %s6293_s25 }
  0x43   : > { %p46_p1 = scmp.ge.s32.totalorder %s45_s14, 2  ;;  %p11612_p9 = scmp.eq.s32.totalorder %s6297_s26, 0 }
  0x44   : > { %p100_p11 = scmp.ne.s32.totalorder %s6265_s18, %s6261_s17  ;;  %p106_p12 = scmp.ne.s32.totalorder %s6261_s17, %s6257_s16 }
  0x45   : > { %s13150_s14 = smov (%p46_p1, %s45_s14), 0  ;;  %s13152_s10 = smov (!%p46_p1, %s48_s10), %s6293_s25 }
  0x46   : > { %12048 = sst [smem:[#allocation33_spill]] %s13150_s14  ;;  %p399_p13 = scmp.eq.s32.totalorder %s6463_s27, 3 }
  0x47   : > { %5550 = dma.hbm_to_vmem [thread:$0]  (!%p6476_p5), %s12047_s9, 896, %s463_s8, [#allocation12], %s11595_s22, %s11595_s22, %s11597_s3  }
  0x48   : > { %p6522_p0 = por %p100_p11, %p11612_p9  ;;  %p405_p2 = scmp.eq.s32.totalorder %s5169_s28, 3 }
  0x49   : > { %p12050_p4 = scmp.eq.s32.totalorder %s6463_s27, 0  ;;  %p6532_p8 = por %p399_p13, %p100_p11 }
  0x4a   : > { %p6536_p10 = por %p405_p2, %p106_p12  ;;  %p11611_p1 = scmp.lt.s32.totalorder %s6297_s26, 4 }
  0x4b   : > { %p6528_p7 = por %p106_p12, %p12050_p4  ;;  %s6542_s2 = sshll.u32 %s6293_s25, 5 }
  0x4c   : > { %s12053_s23 = scalar_select %p6532_p8, 1, 0 }
  0x4d   : > { %s12051_s4 = scalar_select %p6528_p7, 1, 0 }
  0x4e   : > { %12054 = sst [smem:[#allocation35_spill]] %s12053_s23  ;;  %s536_s28 = sand.u32 1, %s6297_s26  }
  0x4f   : > { %12052 = sst [smem:[#allocation34_spill]] %s12051_s4  ;;  %s538_s22 = sand.u32 1, %s6265_s18  }
  0x50   : > { %s12055_s5 = scalar_select %p6536_p10, 1, 0 }
  0x51   : > { %s5190_s3 = sshll.u32 %s538_s22, 7  ;;  %s5282_s9 = sshll.u32 %s6289_s24, 4 }
  0x52   : > { %12056 = sst [smem:[#allocation36_spill]] %s12055_s5  ;;  %s547_s16 = sadd.s32 %s5282_s9, %s6542_s2 }
  0x53   : > { %s5194_s17 = sshll.u32 %s547_s16, 7  ;;  %s540_s29 = scalar_lea.vmem [#allocation5], %s5190_s3 }
  0x54   : > { %s550_s4 = sshll.u32 %s540_s29, 4  ;;  %s12057_s1 = sld [smem:[#allocation296_spill]]  ;;  %s551_s4 = int_to_ptr.vmem [resolvable:$true] %s550_s4 }
  0x55   : > { %p6555_p11 = pnand %p11611_p1, %p6522_p0  ;;  %s6305_s0 = smov [#allocation10]  }
  0x56   : > { %s446_s18 = sshll.u32 %s6305_s0, 4  ;;  %s6561_s9 = scalar_lea.sflag [#allocation6], %s536_s28  ;;  %s6559_s18 = int_to_ptr.vmem [resolvable:$true] %s446_s18 }
  0x57   : > { %p5973_p12 = pneg %p6555_p11  ;;  %s5984_s29 = scalar_lea.vmem %s551_s4, 2048 }
  0x58   : > { %p5985_p13 = scmp.ne.s32.totalorder %s551_s4, %s5984_s29  ;;  %s6306_s30 = smov [#allocation5]  }
  0x59   : > { %s5989_s15 = sshll.u32 %s6306_s30, 4  ;;  %s5990_s15 = int_to_ptr.vmem [resolvable:$false] %s5989_s15 }
  0x5a   : > { %s549_s23 = scalar_lea.hbm %s12057_s1, %s5194_s17  ;;  %p5987_p2 = pnand %p5985_p13, %p5973_p12 }
  0x5b   : > { %s5991_s16 = scalar_lea.vmem %s5990_s15, 4096  ;;  %p5992_p0 = scmp.lt.s32.totalorder %s551_s4, %s5990_s15 }
  0x5c   : > { %p5988_p4 = pneg %p5987_p2  ;;  %p5993_p1 = scmp.lt.s32.totalorder %s5991_s16, %s5984_s29 }
  0x5e   : > { %p5994_p9 = por %p5993_p1, %p5992_p0 }
  0x60   : > { %p5995_p10 = pnand %p5994_p9, %p5988_p4 }
  0x62   : > { %5998 = shalt.err (!%p5995_p10)
}
  0x63   : > { %s12059_s0 = smov 8   ;;  %s12060_s17 = smov 128  }
  0x64   : > { %5563 = dma.hbm_to_vmem [thread:$0]  (!%p6555_p11), %s549_s23, 2048, %s551_s4, %s6561_s9, %s12060_s17, %s12060_s17, %s12059_s0  }
  0x65   : > { %s6010_s22 = scalar_lea.vmem %s6559_s18, 1024  ;;  %p6018_p1 = scmp.lt.s32.totalorder %s6559_s18, %s6559_s18 }
  0x66   : > { %p6011_p12 = scmp.ne.s32.totalorder %s6559_s18, %s6010_s22  ;;  %p6019_p9 = scmp.lt.s32.totalorder %s6010_s22, %s6010_s22 }
  0x68   : > { %p6013_p13 = pnand %p6011_p12, %p6482_p6  ;;  %p6020_p10 = por %p6019_p9, %p6018_p1 }
  0x6a   : > { %p6014_p2 = pneg %p6013_p13 }
  0x6c   : > { %p6021_p4 = pnand %p6020_p10, %p6014_p2 }
  0x6e   : > { %6024 = shalt.err (!%p6021_p4)
}
  0x6f   : > { %s6307_s5 = smov 64   ;;  %s6308_s3 = smov 4  }
  0x70   : > { %s12061_s7 = sld [smem:[#allocation302_spill]]  ;;  %s6309_s23 = smov [#allocation13]  }
  0x71   : > { %s478_s28 = sshll.u32 %s6309_s23, 4  ;;  %s6310_s29 = smov [#allocation14]   ;;  %s479_s28 = int_to_ptr.vmem [resolvable:$true] %s478_s28 }
  0x72   : > { %s491_s30 = sshll.u32 %s6310_s29, 4  ;;  %s6036_s15 = scalar_lea.vmem %s479_s28, 1024  ;;  %s492_s30 = int_to_ptr.vmem [resolvable:$true] %s491_s30 }
  0x73   : > { %p6037_p11 = scmp.ne.s32.totalorder %s479_s28, %s6036_s15  ;;  %p6044_p13 = scmp.lt.s32.totalorder %s479_s28, %s479_s28 }
  0x74   : > { %p6045_p2 = scmp.lt.s32.totalorder %s6036_s15, %s6036_s15 }
  0x75   : > { %p6039_p0 = pnand %p6037_p11, %p6482_p6 }
  0x76   : > { %5547 = dma.hbm_to_vmem [thread:$0]  (!%p6476_p5), %s12061_s7, 1024, %s6559_s18, [#allocation9], %s6307_s5, %s6307_s5, %s6308_s3  }
  0x77   : > { %p6040_p12 = pneg %p6039_p0  ;;  %p6046_p1 = por %p6045_p2, %p6044_p13 }
  0x79   : > { %p6047_p9 = pnand %p6046_p1, %p6040_p12 }
  0x7b   : > { %6050 = shalt.err (!%p6047_p9)
}
  0x7c   : > { %s12062_s11 = sld [smem:[#allocation306_spill]]  ;;  %s6062_s22 = scalar_lea.vmem %s492_s30, 1024 }
  0x7d   : > { %p6063_p10 = scmp.ne.s32.totalorder %s492_s30, %s6062_s22  ;;  %p6070_p0 = scmp.lt.s32.totalorder %s492_s30, %s492_s30 }
  0x7e   : > { %p6071_p13 = scmp.lt.s32.totalorder %s6062_s22, %s6062_s22 }
  0x7f   : > { %p6065_p4 = pnand %p6063_p10, %p6482_p6 }
  0x80   : > { %p6072_p12 = por %p6071_p13, %p6070_p0 }
  0x81   : > { %p6066_p11 = pneg %p6065_p4 }
  0x82   : > { %5553 = dma.hbm_to_vmem [thread:$0]  (!%p6476_p5), %s12062_s11, 1024, %s479_s28, [#allocation12], %s6307_s5, %s6307_s5, %s6308_s3  }
  0x83   : > { %p6073_p2 = pnand %p6072_p12, %p6066_p11 }
  0x85   : > { %6076 = shalt.err (!%p6073_p2)
}
  0x86   : > { %s12063_s12 = sld [smem:[#allocation307_spill]]  ;;  %p50_p6 = scmp.ge.s32.totalorder %s13152_s10, 2 }
  0x87   : > { %s5170_s6 = sshll.u32 %s6289_s24, 1  ;;  %s5172_s13 = sshll.u32 %s13150_s14, 1 }
  0x88   : > { %s13154_s10 = smov (%p50_p6, %s13152_s10), 0  ;;  %s5171_s23 = sadd.s32 4294967295, %s5170_s6 }
  0x89   : > { %12064 = sst [smem:[#allocation37_spill]] %s13154_s10  ;;  %s5173_s28 = sadd.s32 4294967295, %s5172_s13 }
  0x8a   : > { %p54_p1 = scmp.gt.s32.totalorder %s5171_s23, 0  ;;  %p58_p9 = scmp.gt.s32.totalorder %s5173_s28, 0 }
  0x8b   : > { %s12065_s29 = sld [smem:[#allocation29_spill]]  ;;  %s6614_s15 = ssub.s32 %s6293_s25, %s13154_s10 }
  0x8c   : > { %5556 = dma.hbm_to_vmem [thread:$0]  (!%p6476_p5), %s12063_s12, 1024, %s492_s30, [#allocation15], %s6307_s5, %s6307_s5, %s6308_s3  }
  0x8d   : > { %s65_s5 = sadd.s32 1, %s6277_s21  ;;  %s13156_s23 = smov (!%p54_p1, %s5171_s23), 0 }
  0x8e   : > { %s13158_s28 = smov (!%p58_p9, %s5173_s28), 0  ;;  %p72_p5 = scmp.ne.s32.totalorder %s6277_s21, %s6273_s20 }
  0x8f   : > { %p78_p10 = scmp.ne.s32.totalorder %s6273_s20, %s6269_s19  ;;  %s61_s3 = ssub.s32 %s13156_s23, %s13158_s28 }
  0x90   : > { %s12066_s30 = ssub.s32 %s6289_s24, %s13150_s14  ;;  %s62_s16 = sor.u32 %s61_s3, %s6614_s15 }
  0x91   : > { %s90_s18 = sor.u32 %s12066_s30, %s6614_s15  ;;  %p12067_p4 = scmp.eq.s32.totalorder %s6297_s26, 0 }
  0x92   : > { %p63_p0 = scmp.eq.s32.totalorder %s62_s16, 0  ;;  %p12069_p13 = scmp.eq.s32.totalorder %s6463_s27, 0 }
  0x93   : > { %p6628_p11 = por %p12067_p4, %p72_p5  ;;  %p91_p2 = scmp.eq.s32.totalorder %s90_s18, 0 }
  0x94   : > { %p6634_p12 = por %p12069_p13, %p78_p10  ;;  %s6638_s19 = sadd.s32 2, %s5170_s6 }
  0x95   : > { %s6641_s4 = scalar_select %p63_p0, %s6277_s21, %s65_s5  }
  0x96   : > { %s12071_s28 = sadd.s32 1, %s12065_s29  ;;  %s6649_s3 = sadd.s32 2, %s5172_s13 }
  0x97   : > { %s13160_s29 = smov (!%p91_p2, %s12065_s29), %s12071_s28  ;;  %s508_s30 = sand.u32 1, %s6277_s21  }
  0x98   : > { %s5183_s16 = sshll.u32 %s508_s30, 6  ;;  %s5281_s1 = sshll.u32 %s13156_s23, 3 }
  0x99   : > { %s523_s7 = sadd.s32 %s5281_s1, %s6542_s2  ;;  %s512_s18 = scalar_lea.vmem [#allocation2], %s5183_s16 }
  0x9a   : > { %s526_s11 = sshll.u32 %s512_s18, 4  ;;  %s5189_s12 = sshll.u32 %s523_s7, 7  ;;  %s527_s11 = int_to_ptr.vmem [resolvable:$true] %s526_s11 }
  0x9b   : > { %s12072_s5 = sld [smem:[#allocation295_spill]]  ;;  %p12073_p9 = scmp.lt.s32.totalorder %s6297_s26, 4 }
  0x9c   : > { %s509_s13 = scalar_lea.sflag [#allocation3], %s508_s30  ;;  %s6090_s23 = scalar_lea.vmem %s527_s11, 1024 }
  0x9d   : > { %p6661_p5 = pnand %p12073_p9, %p6628_p11  ;;  %p6091_p4 = scmp.ne.s32.totalorder %s527_s11, %s6090_s23 }
  0x9e   : > { %s6311_s1 = smov [#allocation2]  }
  0x9f   : > { %p6079_p10 = pneg %p6661_p5  ;;  %s6095_s7 = sshll.u32 %s6311_s1, 4  ;;  %s6096_s7 = int_to_ptr.vmem [resolvable:$false] %s6095_s7 }
  0xa0   : > { %s6097_s16 = scalar_lea.vmem %s6096_s7, 2048  ;;  %p6098_p2 = scmp.lt.s32.totalorder %s527_s11, %s6096_s7 }
  0xa1   : > { %s525_s14 = scalar_lea.hbm %s12072_s5, %s5189_s12  ;;  %p6093_p0 = pnand %p6091_p4, %p6079_p10 }
  0xa2   : > { %p6099_p1 = scmp.lt.s32.totalorder %s6097_s16, %s6090_s23 }
  0xa3   : > { %p6094_p13 = pneg %p6093_p0 }
  0xa4   : > { %p6100_p6 = por %p6099_p1, %p6098_p2 }
  0xa6   : > { %p6101_p8 = pnand %p6100_p6, %p6094_p13 }
  0xa8   : > { %6104 = shalt.err (!%p6101_p8)
}
  0xa9   : > { %s12075_s12 = sld [smem:[#allocation26_spill]]  ;;  %p12078_p8 = scmp.lt.s32.totalorder %s6638_s19, 3 }
  0xaa   : > { %s12076_s10 = sld [smem:[#allocation25_spill]]  ;;  %p12079_p11 = scmp.lt.s32.totalorder %s6649_s3, 3 }
  0xab   : > { %s12077_s22 = sld [smem:[#allocation24_spill]]  ;;  %s13162_s19 = smov (!%p12078_p8, %s6638_s19), 3 }
  0xac   : > { %5560 = dma.hbm_to_vmem [thread:$0]  (!%p6661_p5), %s525_s14, 1024, %s527_s11, %s509_s13, %s12060_s17, %s12060_s17, %s12059_s0  }
  0xad   : > { %s13164_s3 = smov (!%p12079_p11, %s6649_s3), 3  ;;  %p12080_p9 = scmp.eq.s32.totalorder %s6297_s26, 0 }
  0xae   : > { %s125_s18 = ssub.s32 %s13162_s19, %s13164_s3  ;;  %p12081_p0 = scmp.eq.s32.totalorder %s6463_s27, 0 }
  0xaf   : > { %s129_s30 = sadd.s32 1, %s12075_s12  ;;  %s562_s6 = sand.u32 1, %s12075_s12  }
  0xb0   : > { %p136_p6 = scmp.ne.s32.totalorder %s12075_s12, %s12076_s10  ;;  %s126_s5 = sor.u32 %s125_s18, %s6614_s15 }
  0xb1   : > { %p142_p1 = scmp.ne.s32.totalorder %s12076_s10, %s12077_s22  ;;  %p127_p4 = scmp.eq.s32.totalorder %s126_s5, 0 }
  0xb2   : > { %p138_p10 = por %p136_p6, %p12080_p9  ;;  %s5195_s11 = sshll.u32 %s562_s6, 6 }
  0xb3   : > { %p6689_p13 = por %p142_p1, %p12081_p0  ;;  %s5285_s14 = sshll.u32 %s13162_s19, 3 }
  0xb4   : > { %s13166_s12 = smov (!%p127_p4, %s12075_s12), %s129_s30  ;;  %s575_s13 = sadd.s32 %s5285_s14, %s6542_s2 }
  0xb5   : > { %s12082_s28 = scalar_select %p6689_p13, 1, 0 }
  0xb6   : > { %s5200_s23 = sshll.u32 %s575_s13, 7  ;;  %s564_s1 = scalar_lea.vmem [#allocation7], %s5195_s11 }
  0xb7   : > { %s578_s7 = sshll.u32 %s564_s1, 4  ;;  %s12083_s10 = sld [smem:[#allocation297_spill]]  ;;  %s579_s7 = int_to_ptr.vmem [resolvable:$true] %s578_s7 }
  0xb8   : > { %p12084_p5 = scmp.lt.s32.totalorder %s6297_s26, 4  ;;  %s6118_s19 = scalar_lea.vmem %s579_s7, 1024 }
  0xb9   : > { %p6119_p11 = scmp.ne.s32.totalorder %s579_s7, %s6118_s19  ;;  %s6312_s2 = smov [#allocation7]  }
  0xba   : > { %p6702_p2 = pnand %p12084_p5, %p138_p10  ;;  %s6123_s30 = sshll.u32 %s6312_s2, 4  ;;  %s6124_s30 = int_to_ptr.vmem [resolvable:$false] %s6123_s30 }
  0xbb   : > { %s6125_s18 = scalar_lea.vmem %s6124_s30, 2048  ;;  %p6126_p9 = scmp.lt.s32.totalorder %s579_s7, %s6124_s30 }
  0xbc   : > { %p6107_p8 = pneg %p6702_p2  ;;  %p6127_p4 = scmp.lt.s32.totalorder %s6125_s18, %s6118_s19 }
  0xbd   : > { %s577_s15 = scalar_lea.hbm %s12083_s10, %s5200_s23 }
  0xbe   : > { %p6121_p6 = pnand %p6119_p11, %p6107_p8  ;;  %p6128_p0 = por %p6127_p4, %p6126_p9 }
  0xc0   : > { %p6122_p1 = pneg %p6121_p6 }
  0xc2   : > { %p6129_p13 = pnand %p6128_p0, %p6122_p1 }
  0xc4   : > { %6132 = shalt.err (!%p6129_p13)
}
  0xc5   : > { %5566 = dma.hbm_to_vmem [thread:$0]  (!%p6702_p2), %s577_s15, 1024, %s579_s7, %s6561_s9, %s12060_s17, %s12060_s17, %s12059_s0  }
  0xc6   : > { %590 = sbr.rel (%p6468_p3) target bundleno = 1608 (0x648), region = 76 }
  0xcb   : > { %s592_s5 = sand.u32 1, %s6273_s20  }
  0xcc   : > { %s5202_s11 = sshll.u32 %s592_s5, 6  ;;  %s593_s14 = scalar_lea.sflag [#allocation3], %s592_s5 }
  0xcd   : > { %s596_s13 = scalar_lea.vmem [#allocation2], %s5202_s11 }
  0xce   : > { %6216 = dma.done.wait (%p6634_p12), %s593_s14, 1024  }
  0xcf   : > { %6218 = vsyncadd (%p6634_p12), %s593_s14, 4294966272  ;;  %s12087_s23 = sld [smem:[#allocation28_spill]]  ;;  %s601_s16 = sand.u32 1, %s6463_s27  }
  0xd0   : > { %s602_s17 = scalar_lea.sflag [#allocation6], %s601_s16 }
  0xd5   : > { %s603_s9 = sand.u32 1, %s12087_s23  }
  0xd6   : > { %s6725_s0 = sshll.u32 %s603_s9, 7 }
  0xd7   : > { %s6728_s7 = scalar_lea.vmem [#allocation5], %s6725_s0 }
  0xd8   : > { %6220 = dma.done.wait (%p6528_p7), %s602_s17, 2048  }
  0xd9   : > { %6222 = vsyncadd (%p6528_p7), %s602_s17, 4294965248  ;;  %s12089_s8 = sld [smem:[#allocation25_spill]]  ;;  %p12090_p3 = scmp.ne.s32.totalorder %s12082_s28, 0 }
  0xdf   : > { %s612_s3 = sand.u32 1, %s12089_s8  }
  0xe0   : > { %s5204_s10 = sshll.u32 %s612_s3, 6 }
  0xe1   : > { %s6735_s15 = scalar_lea.vmem [#allocation7], %s5204_s10 }
  0xe2   : > { %6224 = dma.done.wait (%p12090_p3), %s602_s17, 1024  }
  0xe3   : > { %6226 = vsyncadd (%p12090_p3), %s602_s17, 4294966272  ;;  %p12091_p12 = scmp.eq.s32.totalorder %s6463_s27, 0 }
  0xe5   : > { %6228 = dma.done.wait (%p12091_p12), [#allocation9], 4096   ;;  %p12092_p10 = pmov %p12091_p12 }
  0xe7   : > { %6230 = vsyncadd (%p12092_p10), [#allocation9], 4294963200  ;;  %p12093_p13 = pmov %p12092_p10 }
  0xe8   : > { %p12094_p7 = pmov %p12092_p10 }
  0xe9   : > { %6232 = dma.done.wait (%p12093_p13), [#allocation12], 1920  }
  0xea   : > { %6234 = vsyncadd (%p12094_p7), [#allocation12], 4294965376  ;;  %p12095_p5 = pmov %p12094_p7 }
  0xec   : > { %6236 = dma.done.wait (%p12095_p5), [#allocation15], 1024   ;;  %p12096_p2 = pmov %p12095_p5 }
  0xed   : > { %v5213_v0 = vld [vmem:[%s596_s13 + $0x10] sm:$0xff]  ;;  %v5215_v1 = vld [vmem:[%s596_s13 + $0x20] sm:$0xff]  ;;  %v6753_v2 = vld [vmem:[%s596_s13 + $0x18] sm:$0xff]  ;;  %s12109_s22 = sld [smem:[#allocation298_spill]]  ;;  %s11439_s1 = scalar_lea.vmem [#allocation16], %s6725_s0 }
  0xee   : > { %6238 = vsyncadd (%p12096_p2), [#allocation15], 4294966272  ;;  %1003 = vadd.xlane.f32.xlu0 %v5213_v0  ;;  %1007 = vadd.xlane.f32.xlu1 %v5215_v1  ;;  %v6755_v3 = vld [vmem:[%s596_s13 + $0x28] sm:$0xff]  ;;  %v6759_v4 = vld [vmem:[%s596_s13 + $0x30] sm:$0xff]  ;;  %s12110_s30 = sld [smem:[#allocation299_spill]]  ;;  %s4981_s10 = sshll.u32 %s11439_s1, 4  ;;  %s11486_s10 = int_to_ptr.vmem [resolvable:$true] %s4981_s10 }
  0xef   : > { %v6761_v5 = vld [vmem:[%s596_s13 + $0x38] sm:$0xff]  ;;  %v6764_v6 = vld [vmem:[%s6728_s7] sm:$0xff]  ;;  %v6769_v7 = vld [vmem:[%s6728_s7 + $0x8] sm:$0xff]  ;;  %s12124_s18 = sld [smem:[#allocation30_spill]]  ;;  %s6133_s5 = scalar_lea.vmem %s11486_s10, 2048 }
  0xf0   : > { %v6772_v8 = vld [vmem:[%s6728_s7 + $0x10] sm:$0xff]  ;;  %v6775_v9 = vld [vmem:[%s6728_s7 + $0x18] sm:$0xff]  ;;  %v6780_v10 = vld [vmem:[%s6728_s7 + $0x20] sm:$0xff]  ;;  %s12140_s14 = sld [smem:[#allocation301_spill]]  ;;  %p6134_p6 = scmp.ne.s32.totalorder %s11486_s10, %s6133_s5 }
  0xf1   : > { %v6783_v11 = vld [vmem:[%s6728_s7 + $0x28] sm:$0xff]  ;;  %v6788_v12 = vld [vmem:[%s6728_s7 + $0x30] sm:$0xff]  ;;  %v6791_v13 = vld [vmem:[%s6728_s7 + $0x38] sm:$0xff]  ;;  %s12145_s16 = sld [smem:[#allocation303_spill]]  ;;  %s6314_s11 = smov [#allocation16]  }
  0xf2   : > { %1005 = vadd.xlane.f32.xlu0 %v6753_v2  ;;  %1009 = vadd.xlane.f32.xlu1 %v6755_v3  ;;  %v6796_v14 = vld [vmem:[%s6728_s7 + $0x40] sm:$0xff]  ;;  %v6799_v15 = vld [vmem:[%s6728_s7 + $0x48] sm:$0xff]  ;;  %v6804_v16 = vld [vmem:[%s6728_s7 + $0x50] sm:$0xff]  ;;  %s13122_s13 = sld [smem:[#allocation308_spill]] }
  0xf3   : > { %v6807_v17 = vld [vmem:[%s6728_s7 + $0x58] sm:$0xff]  ;;  %v6812_v18 = vld [vmem:[%s6728_s7 + $0x60] sm:$0xff]  ;;  %v6815_v19 = vld [vmem:[%s6728_s7 + $0x68] sm:$0xff]  ;;  %s13123_s0 = sld [smem:[#allocation31_spill]] }
  0xf4   : > { %v6822_v20 = vld [vmem:[%s6728_s7 + $0x70] sm:$0xff]  ;;  %v6825_v21 = vld [vmem:[%s6728_s7 + $0x78] sm:$0xff]  ;;  %v6830_v22 = vld [vmem:[%s6735_s15] sm:$0xff]  ;;  %s13125_s19 = sld [smem:[#allocation309_spill]] }
  0xf5   : > { %v6833_v23 = vld [vmem:[%s6735_s15 + $0x8] sm:$0xff]  ;;  %v6838_v24 = vld [vmem:[%s6735_s15 + $0x10] sm:$0xff]  ;;  %v6841_v25 = vld [vmem:[%s6735_s15 + $0x18] sm:$0xff]  ;;  %p1423_p8 = scmp.gt.s32.totalorder %s12124_s18, 0  ;;  %p1427_p11 = scmp.lt.s32.totalorder %s12124_s18, 1 }
  0xf6   : > { %1011 = vadd.xlane.f32.xlu0 %v6759_v4  ;;  %1013 = vadd.xlane.f32.xlu1 %v6761_v5  ;;  %v6846_v26 = vld [vmem:[%s6735_s15 + $0x20] sm:$0xff]  ;;  %v6849_v27 = vld [vmem:[%s6735_s15 + $0x28] sm:$0xff]  ;;  %s12186_s15 = sld [smem:[#allocation305_spill]] }
  0xf7   : > { %s1424_s6 = scalar_select %p1423_p8, 1, 0 }
  0xf8   : > { %s12146_s8 = smov %s12145_s16 }
  0xf9   : > { %s7434_s17 = scalar_select %p1427_p11, 1, 0 }
  0xfa   : > { %720 = vadd.xlane.f32.xlu0 %v6764_v6  ;;  %722 = vadd.xlane.f32.xlu1 %v6769_v7  ;;  %s13126_s2 = smov %s13125_s19 }
  0xfc   : > { %s12187_s27 = smov %s12186_s15 }
  0xfe   : > { %724 = vadd.xlane.f32.xlu0 %v6772_v8  ;;  %726 = vadd.xlane.f32.xlu1 %v6775_v9 }
 0x102   : > { %728 = vadd.xlane.f32.xlu0 %v6780_v10  ;;  %730 = vadd.xlane.f32.xlu1 %v6783_v11 }
 0x106   : > { %732 = vadd.xlane.f32.xlu0 %v6788_v12  ;;  %734 = vadd.xlane.f32.xlu1 %v6791_v13 }
 0x10a   : > { %736 = vadd.xlane.f32.xlu0 %v6796_v14  ;;  %738 = vadd.xlane.f32.xlu1 %v6799_v15 }
 0x10e   : > { %740 = vadd.xlane.f32.xlu0 %v6804_v16  ;;  %742 = vadd.xlane.f32.xlu1 %v6807_v17 }
 0x112   : > { %744 = vadd.xlane.f32.xlu0 %v6812_v18  ;;  %746 = vadd.xlane.f32.xlu1 %v6815_v19 }
 0x116   : > { %748 = vadd.xlane.f32.xlu0 %v6822_v20  ;;  %750 = vadd.xlane.f32.xlu1 %v6825_v21 }
 0x11a   : > { %1108 = vadd.xlane.f32.xlu0 %v6830_v22  ;;  %1110 = vadd.xlane.f32.xlu1 %v6833_v23 }
 0x11e   : > { %1112 = vadd.xlane.f32.xlu0 %v6838_v24  ;;  %1114 = vadd.xlane.f32.xlu1 %v6841_v25 }
 0x122   : > { %1116 = vadd.xlane.f32.xlu0 %v6846_v26  ;;  %1118 = vadd.xlane.f32.xlu1 %v6849_v27 }
 0x177   : > { %v1004_v28 = vpop.xlane.xlu0 %1003  ;;  %v1008_v29 = vpop.xlane.xlu1 %1007 }
 0x178   : > { %v6853_v30 = vmul.f32 0.020833334, %v1004_v28  ;;  %v6855_v31 = vmul.f32 0.020833334, %v1008_v29 }
 0x17a   : > { %v6858_v32 = vsub.f32 %v5213_v0, %v6853_v30  ;;  %v6861_v33 = vsub.f32 %v5215_v1, %v6855_v31 }
 0x17b   : > { %v1006_v34 = vpop.xlane.xlu0 %1005  ;;  %v1010_v35 = vpop.xlane.xlu1 %1009 }
 0x17c   : > { %v6863_v36 = vmul.f32 0.020833334, %v1006_v34  ;;  %v6865_v37 = vmul.f32 0.020833334, %v1010_v35  ;;  %v1027_v38 = vmul.f32 %v6858_v32, %v6858_v32  ;;  %v1029_v40 = vmul.f32 %v6861_v33, %v6861_v33  ;;  %v5710_v35 = vld [vmem:[#allocation10 + $0x30] sm:$0xff]  }
 0x17e   : > { %1033 = vadd.xlane.f32.xlu0 %v1027_v38  ;;  %v6871_v39 = vsub.f32 %v6753_v2, %v6863_v36  ;;  %v6877_v41 = vsub.f32 %v6755_v3, %v6865_v37 }
 0x17f   : > { %v1012_v42 = vpop.xlane.xlu0 %1011  ;;  %v1014_v43 = vpop.xlane.xlu1 %1013 }
 0x180   : > { %v6879_v44 = vmul.f32 0.020833334, %v1012_v42  ;;  %v6881_v45 = vmul.f32 0.020833334, %v1014_v43  ;;  %v1028_v46 = vmul.f32 %v6871_v39, %v6871_v39  ;;  %v1030_v47 = vmul.f32 %v6877_v41, %v6877_v41 }
 0x182   : > { %1035 = vadd.xlane.f32.xlu1 %v1028_v46  ;;  %1037 = vadd.xlane.f32.xlu0 %v1029_v40  ;;  %v6889_v48 = vsub.f32 %v6759_v4, %v6879_v44  ;;  %v6893_v49 = vsub.f32 %v6761_v5, %v6881_v45  ;;  %v5709_v4 = vld [vmem:[#allocation10 + $0x38] sm:$0xff]  }
 0x183   : > { %v721_v50 = vpop.xlane.xlu0 %720  ;;  %v723_v51 = vpop.xlane.xlu1 %722  ;;  %5357 = vmatprep.subr.bf16.mxu0 %v5709_v4 }
 0x184   : > { %v6895_v52 = vmul.f32 0.020833334, %v721_v50  ;;  %v6897_v53 = vmul.f32 0.020833334, %v723_v51  ;;  %v1031_v54 = vmul.f32 %v6889_v48, %v6889_v48  ;;  %v1032_v55 = vmul.f32 %v6893_v49, %v6893_v49  ;;  %5358 = vmatpush3.bf16.msra.mxu0 %v5709_v4  ;;  %v5711_v50 = vld [vmem:[#allocation10 + $0x28] sm:$0xff]  }
 0x185   : > { %5359 = vmatprep.subr.bf16.mxu0 %v5710_v35  ;;  %v5712_v51 = vld [vmem:[#allocation8 + $0xac] ss:$12 sps:$4 sm:$0xff]   ;;  %v5716_v4 = vld [vmem:[#allocation8 + $0x94] ss:$12 sps:$4 sm:$0xff]  }
 0x186   : > { %1039 = vadd.xlane.f32.xlu1 %v1030_v47  ;;  %1041 = vadd.xlane.f32.xlu0 %v1031_v54  ;;  %v6905_v56 = vsub.f32 %v6764_v6, %v6895_v52  ;;  %v6909_v57 = vsub.f32 %v6769_v7, %v6897_v53 }
 0x187   : > { %v725_v58 = vpop.xlane.xlu0 %724  ;;  %v727_v59 = vpop.xlane.xlu1 %726  ;;  %1640 = vmatprep.subr.bf16.mxu1 %v5712_v51 }
 0x188   : > { %v6911_v60 = vmul.f32 0.020833334, %v725_v58  ;;  %v6913_v61 = vmul.f32 0.020833334, %v727_v59  ;;  %v784_v62 = vmul.f32 %v6905_v56, %v6905_v56  ;;  %v785_v63 = vmul.f32 %v6909_v57, %v6909_v57  ;;  %5360 = vmatpush3.bf16.msra.mxu0 %v5710_v35  ;;  %v5714_v59 = vld [vmem:[#allocation8 + $0xa8] ss:$12 sps:$4 sm:$0xff]  }
 0x189   : > { %5361 = vmatprep.subr.bf16.mxu0 %v5711_v50  ;;  %1641 = vmatpush1.bf16.msra.mxu1 %v5714_v59  ;;  %v5722_v59 = vld [vmem:[#allocation8 + $0x78] ss:$12 sps:$4 sm:$0xff]  }
 0x18a   : > { %1043 = vadd.xlane.f32.xlu1 %v1032_v55  ;;  %800 = vadd.xlane.f32.xlu0 %v784_v62  ;;  %v6921_v0 = vsub.f32 %v6772_v8, %v6911_v60  ;;  %v6925_v1 = vsub.f32 %v6775_v9, %v6913_v61 }
 0x18b   : > { %v729_v2 = vpop.xlane.xlu0 %728  ;;  %v731_v3 = vpop.xlane.xlu1 %730  ;;  %1642 = vmatprep.subr.bf16.mxu1 %v5716_v4  ;;  %v5724_v4 = vld [vmem:[#allocation8 + $0x64] ss:$12 sps:$4 sm:$0xff]  }
 0x18c   : > { %v6927_v5 = vmul.f32 0.020833334, %v729_v2  ;;  %v6929_v6 = vmul.f32 0.020833334, %v731_v3  ;;  %v786_v7 = vmul.f32 %v6921_v0, %v6921_v0  ;;  %v787_v8 = vmul.f32 %v6925_v1, %v6925_v1  ;;  %5362 = vmatpush3.bf16.msra.mxu0 %v5711_v50  ;;  %v5715_v3 = vld [vmem:[#allocation10 + $0x20] sm:$0xff]  }
 0x18d   : > { %5363 = vmatprep.subr.bf16.mxu0 %v5715_v3 }
 0x18e   : > { %802 = vadd.xlane.f32.xlu1 %v785_v63  ;;  %804 = vadd.xlane.f32.xlu0 %v786_v7  ;;  %v6937_v9 = vsub.f32 %v6780_v10, %v6927_v5  ;;  %v6941_v28 = vsub.f32 %v6783_v11, %v6929_v6 }
 0x18f   : > { %v733_v29 = vpop.xlane.xlu0 %732  ;;  %v735_v34 = vpop.xlane.xlu1 %734 }
 0x190   : > { %v6943_v38 = vmul.f32 0.020833334, %v733_v29  ;;  %v6945_v40 = vmul.f32 0.020833334, %v735_v34  ;;  %v788_v42 = vmul.f32 %v6937_v9, %v6937_v9  ;;  %v789_v10 = vmul.f32 %v6941_v28, %v6941_v28  ;;  %v5718_v34 = vld [vmem:[#allocation8 + $0x90] ss:$12 sps:$4 sm:$0xff]   ;;  %5364 = vmatpush3.bf16.msra.mxu0 %v5715_v3 }
 0x191   : > { %1643 = vmatpush1.bf16.msra.mxu1 %v5718_v34  ;;  %v5723_v3 = vld [vmem:[#allocation10 + $0x10] sm:$0xff]  }
 0x192   : > { %806 = vadd.xlane.f32.xlu1 %v787_v8  ;;  %808 = vadd.xlane.f32.xlu0 %v788_v42  ;;  %v6953_v11 = vsub.f32 %v6788_v12, %v6943_v38  ;;  %v6957_v43 = vsub.f32 %v6791_v13, %v6945_v40 }
 0x193   : > { %v737_v46 = vpop.xlane.xlu0 %736  ;;  %v739_v47 = vpop.xlane.xlu1 %738 }
 0x194   : > { %v6959_v54 = vmul.f32 0.020833334, %v737_v46  ;;  %v6961_v55 = vmul.f32 0.020833334, %v739_v47  ;;  %v790_v58 = vmul.f32 %v6953_v11, %v6953_v11  ;;  %v791_v12 = vmul.f32 %v6957_v43, %v6957_v43  ;;  %v5719_v46 = vld [vmem:[#allocation10 + $0x18] sm:$0xff]  }
 0x195   : > { %v5720_v47 = vld [vmem:[#allocation8 + $0x7c] ss:$12 sps:$4 sm:$0xff]   ;;  %5365 = vmatprep.subr.bf16.mxu0 %v5719_v46 }
 0x196   : > { %810 = vadd.xlane.f32.xlu1 %v789_v10  ;;  %812 = vadd.xlane.f32.xlu0 %v790_v58  ;;  %v6969_v13 = vsub.f32 %v6796_v14, %v6959_v54  ;;  %v6973_v62 = vsub.f32 %v6799_v15, %v6961_v55 }
 0x197   : > { %v741_v63 = vpop.xlane.xlu0 %740  ;;  %v743_v2 = vpop.xlane.xlu1 %742  ;;  %1644 = vmatprep.subr.bf16.mxu1 %v5720_v47  ;;  %5366 = vmatpush3.bf16.msra.mxu0 %v5719_v46 }
 0x198   : > { %v6975_v7 = vmul.f32 0.020833334, %v741_v63  ;;  %v6977_v8 = vmul.f32 0.020833334, %v743_v2  ;;  %v792_v29 = vmul.f32 %v6969_v13, %v6969_v13  ;;  %v793_v14 = vmul.f32 %v6973_v62, %v6973_v62  ;;  %1645 = vmatpush1.bf16.msra.mxu1 %v5722_v59  ;;  %5367 = vmatprep.subr.bf16.mxu0 %v5723_v3  ;;  %v5728_v59 = vld [vmem:[#allocation8 + $0x4c] ss:$12 sps:$4 sm:$0xff]  }
 0x199   : > { %1646 = vmatprep.subr.bf16.mxu1 %v5724_v4  ;;  %v5730_v4 = vld [vmem:[#allocation8 + $0x48] ss:$12 sps:$4 sm:$0xff]  }
 0x19a   : > { %814 = vadd.xlane.f32.xlu1 %v791_v12  ;;  %816 = vadd.xlane.f32.xlu0 %v792_v29  ;;  %v6985_v15 = vsub.f32 %v6804_v16, %v6975_v7  ;;  %v6989_v35 = vsub.f32 %v6807_v17, %v6977_v8 }
 0x19b   : > { %v745_v42 = vpop.xlane.xlu0 %744  ;;  %v747_v10 = vpop.xlane.xlu1 %746  ;;  %5368 = vmatpush3.bf16.msra.mxu0 %v5723_v3 }
 0x19c   : > { %12097 = vst [vmem:[#allocation38_spill] sm:$0xff] %v6985_v15  ;;  %12098 = vst [vmem:[#allocation39_spill] sm:$0xff] %v6989_v35  ;;  %v6991_v50 = vmul.f32 0.020833334, %v745_v42  ;;  %v6993_v51 = vmul.f32 0.020833334, %v747_v10  ;;  %v794_v58 = vmul.f32 %v6985_v15, %v6985_v15  ;;  %v795_v16 = vmul.f32 %v6989_v35, %v6989_v35 }
 0x19d   : > { %v5726_v42 = vld [vmem:[#allocation8 + $0x60] ss:$12 sps:$4 sm:$0xff]  }
 0x19e   : > { %818 = vadd.xlane.f32.xlu1 %v793_v14  ;;  %820 = vadd.xlane.f32.xlu0 %v794_v58  ;;  %v7001_v17 = vsub.f32 %v6812_v18, %v6991_v50  ;;  %v7005_v12 = vsub.f32 %v6815_v19, %v6993_v51  ;;  %v5727_v58 = vld [vmem:[#allocation10 + $0x8] sm:$0xff]  }
 0x19f   : > { %v749_v63 = vpop.xlane.xlu0 %748  ;;  %v751_v2 = vpop.xlane.xlu1 %750  ;;  %1647 = vmatpush1.bf16.msra.mxu1 %v5726_v42  ;;  %5369 = vmatprep.subr.bf16.mxu0 %v5727_v58 }
 0x1a0   : > { %12099 = vst [vmem:[#allocation40_spill] sm:$0xff] %v7001_v17  ;;  %12100 = vst [vmem:[#allocation41_spill] sm:$0xff] %v7005_v12  ;;  %v7007_v29 = vmul.f32 0.020833334, %v749_v63  ;;  %v7009_v34 = vmul.f32 0.020833334, %v751_v2  ;;  %v796_v14 = vmul.f32 %v7001_v17, %v7001_v17  ;;  %v797_v18 = vmul.f32 %v7005_v12, %v7005_v12  ;;  %1648 = vmatprep.subr.bf16.mxu1 %v5728_v59 }
 0x1a1   : > { %5370 = vmatpush3.bf16.msra.mxu0 %v5727_v58 }
 0x1a2   : > { %822 = vadd.xlane.f32.xlu1 %v795_v16  ;;  %824 = vadd.xlane.f32.xlu0 %v796_v14  ;;  %v7017_v19 = vsub.f32 %v6822_v20, %v7007_v29  ;;  %v7021_v10 = vsub.f32 %v6825_v21, %v7009_v34 }
 0x1a3   : > { %v1109_v46 = vpop.xlane.xlu0 %1108  ;;  %v1111_v47 = vpop.xlane.xlu1 %1110  ;;  %1649 = vmatpush1.bf16.msra.mxu1 %v5730_v4 }
 0x1a4   : > { %12101 = vst [vmem:[#allocation42_spill] sm:$0xff] %v7017_v19  ;;  %12102 = vst [vmem:[#allocation43_spill] sm:$0xff] %v7021_v10  ;;  %v7023_v63 = vmul.f32 0.020833334, %v1109_v46  ;;  %v7025_v16 = vmul.f32 0.020833334, %v1111_v47  ;;  %v798_v2 = vmul.f32 %v7017_v19, %v7017_v19  ;;  %v799_v20 = vmul.f32 %v7021_v10, %v7021_v10 }
 0x1a5   : > { %v5731_v46 = vld [vmem:[#allocation10] sm:$0xff]   ;;  %v5734_v10 = vld [vmem:[#allocation8 + $0x30] ss:$12 sps:$4 sm:$0xff]  }
 0x1a6   : > { %826 = vadd.xlane.f32.xlu1 %v797_v18  ;;  %828 = vadd.xlane.f32.xlu0 %v798_v2  ;;  %v7033_v21 = vsub.f32 %v6830_v22, %v7023_v63  ;;  %v7037_v3 = vsub.f32 %v6833_v23, %v7025_v16  ;;  %v5732_v47 = vld [vmem:[#allocation8 + $0x34] ss:$12 sps:$4 sm:$0xff]  }
 0x1a7   : > { %v1113_v14 = vpop.xlane.xlu0 %1112  ;;  %v1115_v42 = vpop.xlane.xlu1 %1114  ;;  %5371 = vmatprep.subr.bf16.mxu0 %v5731_v46  ;;  %1650 = vmatprep.subr.bf16.mxu1 %v5732_v47 }
 0x1a8   : > { %12103 = vst [vmem:[#allocation44_spill] sm:$0xff] %v7033_v21  ;;  %12104 = vst [vmem:[#allocation45_spill] sm:$0xff] %v7037_v3  ;;  %v7039_v59 = vmul.f32 0.020833334, %v1113_v14  ;;  %v7041_v18 = vmul.f32 0.020833334, %v1115_v42  ;;  %v1132_v2 = vmul.f32 %v7033_v21, %v7033_v21  ;;  %v1133_v22 = vmul.f32 %v7037_v3, %v7037_v3  ;;  %5372 = vmatpush3.bf16.msra.mxu0 %v5731_v46 }
 0x1a9   : > { %1651 = vmatpush1.bf16.msra.mxu1 %v5734_v10  ;;  %v5735_v42 = vld [vmem:[#allocation8 + $0x1c] ss:$12 sps:$4 sm:$0xff]   ;;  %v5738_v46 = vld [vmem:[#allocation8 + $0x4] ss:$12 sps:$4 sm:$0xff]   ;;  %v1050_v3 = vmul.f32 80.0, %v6881_v45 }
 0x1aa   : > { %830 = vadd.xlane.f32.xlu1 %v799_v20  ;;  %1138 = vadd.xlane.f32.xlu0 %v1132_v2  ;;  %v7049_v23 = vsub.f32 %v6838_v24, %v7039_v59  ;;  %v7053_v58 = vsub.f32 %v6841_v25, %v7041_v18  ;;  %v5737_v2 = vld [vmem:[#allocation8 + $0x18] ss:$12 sps:$4 sm:$0xff]  }
 0x1ab   : > { %v1117_v4 = vpop.xlane.xlu0 %1116  ;;  %v1119_v14 = vpop.xlane.xlu1 %1118  ;;  %1652 = vmatprep.subr.bf16.mxu1 %v5735_v42  ;;  %v11620_v42 = vmov 0   ;;  %v1056_v35 = vmul.f32 %v1050_v3, %v6881_v45  ;;  %v838_v3 = vmul.f32 80.0, %v6943_v38 }
 0x1ac   : > { %12105 = vst [vmem:[#allocation46_spill] sm:$0xff] %v7049_v23  ;;  %12106 = vst [vmem:[#allocation47_spill] sm:$0xff] %v7053_v58  ;;  %v7055_v21 = vmul.f32 0.020833334, %v1117_v4  ;;  %v7057_v20 = vmul.f32 0.020833334, %v1119_v14  ;;  %v1134_v47 = vmul.f32 %v7049_v23, %v7049_v23  ;;  %v1135_v24 = vmul.f32 %v7053_v58, %v7053_v58  ;;  %1672 = vmatprep.mubr.bf16.mxu1 %v11620_v42 }
 0x1ad   : > { %1653 = vmatpush1.bf16.msra.mxu1 %v5737_v2  ;;  %v5740_v14 = vld [vmem:[#allocation8] ss:$12 sps:$4 sm:$0xff]   ;;  %v1046_v2 = vmul.f32 80.0, %v6863_v36 }
 0x1ae   : > { %1140 = vadd.xlane.f32.xlu1 %v1133_v22  ;;  %1142 = vadd.xlane.f32.xlu0 %v1134_v47  ;;  %v7065_v25 = vsub.f32 %v6846_v26, %v7055_v21  ;;  %v7069_v10 = vsub.f32 %v6849_v27, %v7057_v20  ;;  %v7076_v26 = vld [vmem:[#allocation8 + $0xb0] ss:$12 sps:$4 sm:$0xff]   ;;  %v1045_v27 = vmul.f32 80.0, %v6853_v30 }
 0x1af   : > { %1654 = vmatprep.subr.bf16.mxu1 %v5738_v46  ;;  %5401 = vmatprep.subr.bf16.mxu0 %v7076_v26  ;;  %v1052_v42 = vmul.f32 %v1046_v2, %v6863_v36 }
 0x1b0   : > { %12107 = vst [vmem:[#allocation48_spill] sm:$0xff] %v7065_v25  ;;  %12108 = vst [vmem:[#allocation49_spill] sm:$0xff] %v7069_v10  ;;  %v1136_v4 = vmul.f32 %v7065_v25, %v7065_v25  ;;  %v1137_v22 = vmul.f32 %v7069_v10, %v7069_v10  ;;  %v1051_v47 = vmul.f32 %v1045_v27, %v6853_v30  ;;  %v1049_v25 = vmul.f32 80.0, %v6879_v44 }
 0x1b1   : > { %1655 = vmatpush1.bf16.msra.mxu1 %v5740_v14  ;;  %v1048_v14 = vmul.f32 80.0, %v6865_v37  ;;  %v832_v30 = vmul.f32 80.0, %v6895_v52 }
 0x1b2   : > { %1144 = vadd.xlane.f32.xlu1 %v1135_v24  ;;  %1146 = vadd.xlane.f32.xlu0 %v1136_v4  ;;  %v1047_v24 = vmul.f32 80.0, %v6855_v31  ;;  %v1055_v2 = vmul.f32 %v1049_v25, %v6879_v44  ;;  %v837_v25 = vmul.f32 80.0, %v6929_v6 }
 0x1b3   : > { %v848_v15 = vmul.f32 %v832_v30, %v6895_v52 }
 0x1b6   : > { %1148 = vadd.xlane.f32.xlu1 %v1137_v22  ;;  %v1053_v22 = vmul.f32 %v1047_v24, %v6855_v31 }
 0x207   : > { %v1034_v46 = vpop.xlane.xlu0 %1033 }
 0x208   : > { %v1057_v4 = vsub.f32 %v1034_v46, %v1051_v47  ;;  %v1054_v47 = vmul.f32 %v1048_v14, %v6865_v37  ;;  %v833_v46 = vmul.f32 80.0, %v6897_v53 }
 0x20a   : > { %v1063_v10 = vmul.f32 0.020833334, %v1057_v4  ;;  %v834_v4 = vmul.f32 80.0, %v6911_v60  ;;  %v849_v37 = vmul.f32 %v833_v46, %v6897_v53  ;;  %v840_v53 = vmul.f32 80.0, %v6959_v54 }
 0x20b   : > { %v1036_v58 = vpop.xlane.xlu1 %1035  ;;  %v1038_v23 = vpop.xlane.xlu0 %1037 }
 0x20c   : > { %v1069_v27 = vadd.f32 1e-06, %v1063_v10  ;;  %v1058_v19 = vsub.f32 %v1036_v58, %v1052_v42  ;;  %v1059_v12 = vsub.f32 %v1038_v23, %v1053_v22  ;;  %v850_v14 = vmul.f32 %v834_v4, %v6911_v60 }
 0x20d   : > { %v835_v22 = vmul.f32 80.0, %v6913_v61 }
 0x20e   : > { %5765 = vrsqrt.f32 %v1069_v27  ;;  %v1064_v36 = vmul.f32 0.020833334, %v1058_v19  ;;  %v1065_v31 = vmul.f32 0.020833334, %v1059_v12  ;;  %v836_v12 = vmul.f32 80.0, %v6927_v5 }
 0x20f   : > { %v1040_v24 = vpop.xlane.xlu1 %1039  ;;  %v1042_v17 = vpop.xlane.xlu0 %1041  ;;  %v851_v46 = vmul.f32 %v835_v22, %v6913_v61  ;;  %v7113_v61 = vmul.f32 %v840_v53, %v6959_v54  ;;  %v845_v54 = vmul.f32 80.0, %v6993_v51 }
 0x210   : > { %v1070_v10 = vadd.f32 1e-06, %v1064_v36  ;;  %v1071_v58 = vadd.f32 1e-06, %v1065_v31  ;;  %v1060_v23 = vsub.f32 %v1040_v24, %v1054_v47  ;;  %v1061_v42 = vsub.f32 %v1042_v17, %v1055_v2 }
 0x211   : > { %v839_v17 = vmul.f32 80.0, %v6945_v40  ;;  %v852_v4 = vmul.f32 %v836_v12, %v6927_v5  ;;  %v841_v36 = vmul.f32 80.0, %v6961_v55  ;;  %v842_v31 = vmul.f32 80.0, %v6975_v7 }
 0x212   : > { %5767 = vrsqrt.f32 %v1070_v10  ;;  %v1066_v44 = vmul.f32 0.020833334, %v1060_v23  ;;  %v1067_v19 = vmul.f32 0.020833334, %v1061_v42  ;;  %v853_v10 = vmul.f32 %v837_v25, %v6929_v6 }
 0x213   : > { %5769 = vrsqrt.f32 %v1071_v58  ;;  %v1044_v45 = vpop.xlane.xlu1 %1043  ;;  %v801_v52 = vpop.xlane.xlu0 %800  ;;  %v854_v42 = vmul.f32 %v838_v3, %v6943_v38  ;;  %v7119_v6 = vmul.f32 %v842_v31, %v6975_v7  ;;  %v844_v38 = vmul.f32 80.0, %v6991_v50 }
 0x214   : > { %v1072_v30 = vadd.f32 1e-06, %v1066_v44  ;;  %v1073_v60 = vadd.f32 1e-06, %v1067_v19  ;;  %v1062_v27 = vsub.f32 %v1044_v45, %v1056_v35  ;;  %v864_v47 = vsub.f32 %v801_v52, %v848_v15 }
 0x215   : > { %v7110_v15 = vmul.f32 %v839_v17, %v6945_v40  ;;  %v7116_v44 = vmul.f32 %v841_v36, %v6961_v55  ;;  %v843_v19 = vmul.f32 80.0, %v6977_v8  ;;  %v847_v55 = vmul.f32 80.0, %v7009_v34 }
 0x216   : > { %5771 = vrsqrt.f32 %v1072_v30  ;;  %v1068_v2 = vmul.f32 0.020833334, %v1062_v27  ;;  %v880_v24 = vmul.f32 0.020833334, %v864_v47  ;;  %v1150_v7 = vmul.f32 80.0, %v7023_v63 }
 0x217   : > { %5773 = vrsqrt.f32 %v1073_v60  ;;  %v803_v58 = vpop.xlane.xlu1 %802  ;;  %v805_v23 = vpop.xlane.xlu0 %804  ;;  %v7129_v27 = vmul.f32 %v843_v19, %v6977_v8  ;;  %v7132_v47 = vmul.f32 %v844_v38, %v6991_v50  ;;  %v1151_v36 = vmul.f32 80.0, %v7025_v16 }
 0x218   : > { %v1074_v5 = vadd.f32 1e-06, %v1068_v2  ;;  %v896_v35 = vadd.f32 1e-06, %v880_v24  ;;  %v865_v22 = vsub.f32 %v803_v58, %v849_v37  ;;  %v866_v12 = vsub.f32 %v805_v23, %v850_v14  ;;  %v7138_v24 = vld [vmem:[%s12109_s22] ss:$0 sm:$0xff] }
 0x219   : > { %v846_v14 = vmul.f32 80.0, %v7007_v29  ;;  %v7147_v58 = vmul.f32 %v847_v55, %v7009_v34  ;;  %v7150_v23 = vmul.f32 %v1150_v7, %v7023_v63 }
 0x21a   : > { %5775 = vrsqrt.f32 %v1074_v5  ;;  %v881_v40 = vmul.f32 0.020833334, %v865_v22  ;;  %v882_v25 = vmul.f32 0.020833334, %v866_v12 }
 0x21b   : > { %v5766_v45 = vpop.eup %5765  ;;  %5777 = vrsqrt.f32 %v896_v35  ;;  %v807_v52 = vpop.xlane.xlu1 %806  ;;  %v7144_v50 = vmul.f32 %v846_v14, %v7007_v29 }
 0x21c   : > { %v809_v37 = vpop.xlane.xlu0 %808  ;;  %v897_v3 = vadd.f32 1e-06, %v881_v40  ;;  %v898_v17 = vadd.f32 1e-06, %v882_v25  ;;  %v867_v53 = vsub.f32 %v807_v52, %v851_v46  ;;  %v1081_v60 = vmul.f32 %v5766_v45, %v6858_v32 }
 0x21d   : > { %v868_v30 = vsub.f32 %v809_v37, %v852_v4  ;;  %v7141_v46 = vmul.f32 %v845_v54, %v6993_v51  ;;  %v7155_v51 = vld [vmem:[%s12110_s30] ss:$0 sm:$0xff]  ;;  %v7161_v40 = vmul.f32 %v1151_v36, %v7025_v16  ;;  %v1153_v37 = vmul.f32 80.0, %v7041_v18 }
 0x21e   : > { %5779 = vrsqrt.f32 %v897_v3  ;;  %v883_v31 = vmul.f32 0.020833334, %v867_v53  ;;  %v1087_v29 = vmul.f32 %v7138_v24, %v1081_v60 }
 0x21f   : > { %v884_v2 = vmul.f32 0.020833334, %v868_v30  ;;  %v5768_v32 = vpop.eup %5767  ;;  %5781 = vrsqrt.f32 %v898_v17  ;;  %v811_v8 = vpop.xlane.xlu1 %810 }
 0x220   : > { %v813_v4 = vpop.xlane.xlu0 %812  ;;  %v5770_v5 = vpop.eup %5769  ;;  %v899_v35 = vadd.f32 1e-06, %v883_v31  ;;  %v869_v12 = vsub.f32 %v811_v8, %v853_v10  ;;  %v1082_v38 = vmul.f32 %v5768_v32, %v6871_v39  ;;  %v1152_v10 = vmul.f32 80.0, %v7039_v59 }
 0x221   : > { %v900_v22 = vadd.f32 1e-06, %v884_v2  ;;  %v870_v19 = vsub.f32 %v813_v4, %v854_v42  ;;  %v1083_v34 = vmul.f32 %v5770_v5, %v6861_v33  ;;  %v1093_v3 = vadd.f32 %v7155_v51, %v1087_v29 }
 0x222   : > { %5783 = vrsqrt.f32 %v899_v35  ;;  %v885_v63 = vmul.f32 0.020833334, %v869_v12  ;;  %v1088_v52 = vmul.f32 %v7138_v24, %v1082_v38  ;;  %v7174_v31 = vmul.f32 %v1152_v10, %v7039_v59 }
 0x223   : > { %v886_v25 = vmul.f32 0.020833334, %v870_v19  ;;  %v5772_v42 = vpop.eup %5771  ;;  %5785 = vrsqrt.f32 %v900_v22  ;;  %v815_v54 = vpop.xlane.xlu1 %814  ;;  %v1089_v39 = vmul.f32 %v7138_v24, %v1083_v34 }
 0x224   : > { %v817_v45 = vpop.xlane.xlu0 %816  ;;  %v5774_v14 = vpop.eup %5773  ;;  %v901_v33 = vadd.f32 1e-06, %v885_v63  ;;  %v871_v16 = vsub.f32 %v815_v54, %v7110_v15  ;;  %v1094_v17 = vadd.f32 %v7155_v51, %v1088_v52  ;;  %v1084_v53 = vmul.f32 %v5772_v42, %v6877_v41 }
 0x225   : > { %v902_v55 = vadd.f32 1e-06, %v886_v25  ;;  %v872_v7 = vsub.f32 %v817_v45, %v7113_v61  ;;  %v1085_v30 = vmul.f32 %v5774_v14, %v6889_v48  ;;  %v1095_v4 = vadd.f32 %v7155_v51, %v1089_v39 }
 0x226   : > { %5787 = vrsqrt.f32 %v901_v33  ;;  %v887_v60 = vmul.f32 0.020833334, %v871_v16  ;;  %v1099_v8 = vpack.c.bf16 %v1094_v17, %v1093_v3  ;;  %v1090_v61 = vmul.f32 %v7138_v24, %v1084_v53 }
 0x227   : > { %v888_v36 = vmul.f32 0.020833334, %v872_v7  ;;  %v5776_v2 = vpop.eup %5775  ;;  %5789 = vrsqrt.f32 %v902_v55  ;;  %v819_v32 = vpop.xlane.xlu1 %818  ;;  %v1091_v19 = vmul.f32 %v7138_v24, %v1085_v30  ;;  %v7185_v63 = vmul.f32 %v1153_v37, %v7041_v18 }
 0x228   : > { %v821_v15 = vpop.xlane.xlu0 %820  ;;  %v5778_v5 = vpop.eup %5777  ;;  %v903_v35 = vadd.f32 1e-06, %v887_v60  ;;  %v873_v48 = vsub.f32 %v819_v32, %v7116_v44  ;;  %5373 = vmatprep.mubr.bf16.mxu0 %v1099_v8  ;;  %v1096_v59 = vadd.f32 %v7155_v51, %v1090_v61  ;;  %v1086_v12 = vmul.f32 %v5776_v2, %v6893_v49  ;;  %v5742_v49 = vld [vmem:[#allocation8 + $0x98] ss:$12 sps:$4 sm:$0xff]  }
 0x229   : > { %v904_v41 = vadd.f32 1e-06, %v888_v36  ;;  %v874_v22 = vsub.f32 %v821_v15, %v7119_v6  ;;  %v928_v38 = vmul.f32 %v5778_v5, %v6905_v56  ;;  %v1097_v18 = vadd.f32 %v7155_v51, %v1091_v19 }
 0x22a   : > { %5791 = vrsqrt.f32 %v903_v35  ;;  %v889_v29 = vmul.f32 0.020833334, %v873_v48  ;;  %v1100_v6 = vpack.c.bf16 %v1096_v59, %v1095_v4  ;;  %v1092_v42 = vmul.f32 %v7138_v24, %v1086_v12  ;;  %v5744_v12 = vld [vmem:[#allocation8 + $0x68] ss:$12 sps:$4 sm:$0xff]  }
 0x22b   : > { %v890_v34 = vmul.f32 0.020833334, %v874_v22  ;;  %v5780_v25 = vpop.eup %5779  ;;  %5793 = vrsqrt.f32 %v904_v41  ;;  %v823_v44 = vpop.xlane.xlu1 %822  ;;  %v950_v54 = vmul.f32 %v7138_v24, %v928_v38  ;;  %v1154_v3 = vmul.f32 80.0, %v7055_v21 }
 0x22c   : > { %v825_v10 = vpop.xlane.xlu0 %824  ;;  %v5782_v45 = vpop.eup %5781  ;;  %v905_v52 = vadd.f32 1e-06, %v889_v29  ;;  %v875_v56 = vsub.f32 %v823_v44, %v7129_v27  ;;  %5374 = vmatmul.mubr.bf16.vlgmr.msra.gmra.mxu0 %v1100_v6  ;;  %v1098_v37 = vadd.f32 %v7155_v51, %v1092_v42  ;;  %v929_v33 = vmul.f32 %v5780_v25, %v6909_v57  ;;  %v5743_v57 = vld [vmem:[#allocation8 + $0x80] ss:$12 sps:$4 sm:$0xff]  }
 0x22d   : > { %v906_v39 = vadd.f32 1e-06, %v890_v34  ;;  %v876_v14 = vsub.f32 %v825_v10, %v7132_v47  ;;  %v930_v55 = vmul.f32 %v5782_v45, %v6921_v0  ;;  %5402 = vmatpush3.bf16.msra.mxu0 %v7076_v26  ;;  %v972_v60 = vadd.f32 %v7155_v51, %v950_v54 }
 0x22e   : > { %5795 = vrsqrt.f32 %v905_v52  ;;  %v891_v16 = vmul.f32 0.020833334, %v875_v56  ;;  %v1101_v53 = vpack.c.bf16 %v1098_v37, %v1097_v18  ;;  %v951_v30 = vmul.f32 %v7138_v24, %v929_v33  ;;  %5403 = vmatprep.subr.bf16.mxu0 %v5742_v49  ;;  %v5745_v56 = vld [vmem:[#allocation8 + $0x50] ss:$12 sps:$4 sm:$0xff]  }
 0x22f   : > { %v892_v7 = vmul.f32 0.020833334, %v876_v14  ;;  %v5784_v17 = vpop.eup %5783  ;;  %5797 = vrsqrt.f32 %v906_v39  ;;  %v827_v27 = vpop.xlane.xlu1 %826  ;;  %v952_v61 = vmul.f32 %v7138_v24, %v930_v55  ;;  %v7206_v41 = vmul.f32 %v1154_v3, %v7055_v21 }
 0x230   : > { %v829_v47 = vpop.xlane.xlu0 %828  ;;  %v5786_v36 = vpop.eup %5785  ;;  %v907_v0 = vadd.f32 1e-06, %v891_v16  ;;  %v877_v32 = vsub.f32 %v827_v27, %v7141_v46  ;;  %5377 = vmatprep.mubr.bf16.mxu0 %v1101_v53  ;;  %v973_v26 = vadd.f32 %v7155_v51, %v951_v30  ;;  %v931_v8 = vmul.f32 %v5784_v17, %v6925_v1 }
 0x231   : > { %v908_v2 = vadd.f32 1e-06, %v892_v7  ;;  %v878_v15 = vsub.f32 %v829_v47, %v7144_v50  ;;  %v932_v4 = vmul.f32 %v5786_v36, %v6937_v9  ;;  %5404 = vmatpush3.bf16.msra.mxu0 %v5742_v49  ;;  %v974_v34 = vadd.f32 %v7155_v51, %v952_v61 }
 0x232   : > { %5799 = vrsqrt.f32 %v907_v0  ;;  %v893_v5 = vmul.f32 0.020833334, %v877_v32  ;;  %v7208_v22 = vpack.c.bf16 %v973_v26, %v972_v60  ;;  %v953_v59 = vmul.f32 %v7138_v24, %v931_v8  ;;  %5405 = vmatprep.subr.bf16.mxu0 %v5743_v57 }
 0x233   : > { %v894_v35 = vmul.f32 0.020833334, %v878_v15  ;;  %v5788_v48 = vpop.eup %5787  ;;  %5801 = vrsqrt.f32 %v908_v2  ;;  %v831_v46 = vpop.xlane.xlu1 %830  ;;  %v954_v1 = vmul.f32 %v7138_v24, %v932_v4  ;;  %v1155_v10 = vmul.f32 80.0, %v7057_v20  ;;  %v12112_v4 = vld [vmem:[#allocation38_spill] sm:$0xff] }
 0x234   : > { %v1139_v50 = vpop.xlane.xlu0 %1138  ;;  %v5790_v9 = vpop.eup %5789  ;;  %v909_v19 = vadd.f32 1e-06, %v893_v5  ;;  %v879_v29 = vsub.f32 %v831_v46, %v7147_v58  ;;  %5378 = vmatmul.mubr.bf16.gmra.mxu0 %v7208_v22  ;;  %1673 = vmatmul.mubr.bf16.vlgmr.msra.gmra.mxu1 %v7208_v22  ;;  %v975_v25 = vadd.f32 %v7155_v51, %v953_v59  ;;  %v933_v44 = vmul.f32 %v5788_v48, %v6941_v28  ;;  %v5747_v46 = vld [vmem:[#allocation8 + $0x20] ss:$12 sps:$4 sm:$0xff]  }
 0x235   : > { %v910_v38 = vadd.f32 1e-06, %v894_v35  ;;  %v1162_v21 = vsub.f32 %v1139_v50, %v7150_v23  ;;  %v12111_v54 = vmov 0   ;;  %v934_v58 = vmul.f32 %v5790_v9, %v6953_v11  ;;  %5406 = vmatpush3.bf16.msra.mxu0 %v5743_v57  ;;  %v5746_v57 = vld [vmem:[#allocation8 + $0x38] ss:$12 sps:$4 sm:$0xff]  }
 0x236   : > { %5803 = vrsqrt.f32 %v909_v19  ;;  %v895_v6 = vmul.f32 0.020833334, %v879_v29  ;;  %1682 = vmatprep.mubr.bf16.mxu1 %v12111_v54  ;;  %v7222_v52 = vpack.c.bf16 %v975_v25, %v974_v34  ;;  %v955_v39 = vmul.f32 %v7138_v24, %v933_v44  ;;  %5407 = vmatprep.subr.bf16.mxu0 %v5744_v12 }
 0x237   : > { %v1168_v42 = vmul.f32 0.020833334, %v1162_v21  ;;  %v5792_v23 = vpop.eup %5791  ;;  %5805 = vrsqrt.f32 %v910_v38  ;;  %v1141_v49 = vpop.xlane.xlu1 %1140  ;;  %v976_v28 = vadd.f32 %v7155_v51, %v954_v1  ;;  %v956_v7 = vmul.f32 %v7138_v24, %v934_v58  ;;  %v12114_v21 = vld [vmem:[#allocation40_spill] sm:$0xff] }
 0x238   : > { %v1143_v45 = vpop.xlane.xlu0 %1142  ;;  %v5794_v14 = vpop.eup %5793  ;;  %v911_v18 = vadd.f32 1e-06, %v895_v6  ;;  %v1163_v33 = vsub.f32 %v1141_v49, %v7161_v40  ;;  %5381 = vmatprep.mubr.bf16.mxu0 %v7222_v52  ;;  %v977_v55 = vadd.f32 %v7155_v51, %v955_v39  ;;  %v935_v16 = vmul.f32 %v5792_v23, %v6957_v43  ;;  %v5748_v58 = vld [vmem:[#allocation8 + $0x8] ss:$12 sps:$4 sm:$0xff]  }
 0x239   : > { %v1174_v37 = vadd.f32 1e-06, %v1168_v42  ;;  %v1164_v11 = vsub.f32 %v1143_v45, %v7174_v31  ;;  %v936_v3 = vmul.f32 %v5794_v14, %v6969_v13  ;;  %v1161_v47 = vmul.f32 %v1155_v10, %v7057_v20  ;;  %5408 = vmatpush3.bf16.msra.mxu0 %v5744_v12  ;;  %v12113_v12 = vld [vmem:[#allocation39_spill] sm:$0xff]  ;;  %v12115_v39 = vld [vmem:[#allocation41_spill] sm:$0xff]  ;;  %v12116_v14 = vld [vmem:[#allocation42_spill] sm:$0xff] }
 0x23a   : > { %5807 = vrsqrt.f32 %v911_v18  ;;  %v1169_v17 = vmul.f32 0.020833334, %v1163_v33  ;;  %v7234_v30 = vpack.c.bf16 %v977_v55, %v976_v28  ;;  %v957_v60 = vmul.f32 %v7138_v24, %v935_v16  ;;  %5409 = vmatprep.subr.bf16.mxu0 %v5745_v56 }
 0x23b   : > { %v1170_v27 = vmul.f32 0.020833334, %v1164_v11  ;;  %v5796_v53 = vpop.eup %5795  ;;  %5809 = vrsqrt.f32 %v1174_v37  ;;  %v1145_v40 = vpop.xlane.xlu1 %1144  ;;  %v978_v43 = vadd.f32 %v7155_v51, %v956_v7  ;;  %v958_v26 = vmul.f32 %v7138_v24, %v936_v3  ;;  %v12117_v3 = vld [vmem:[#allocation43_spill] sm:$0xff] }
 0x23c   : > { %v1147_v31 = vpop.xlane.xlu0 %1146  ;;  %v5798_v36 = vpop.eup %5797  ;;  %v1175_v13 = vadd.f32 1e-06, %v1169_v17  ;;  %v1165_v2 = vsub.f32 %v1145_v40, %v7185_v63  ;;  %5382 = vmatmul.mubr.bf16.gmra.mxu0 %v7234_v30  ;;  %1683 = vmatmul.mubr.bf16.gmra.mxu1 %v7222_v52  ;;  %v979_v32 = vadd.f32 %v7155_v51, %v957_v60  ;;  %v937_v15 = vmul.f32 %v5796_v53, %v6973_v62 }
 0x23d   : > { %v1176_v0 = vadd.f32 1e-06, %v1170_v27  ;;  %v1166_v20 = vsub.f32 %v1147_v31, %v7206_v41  ;;  %1692 = vmatprep.mubr.bf16.mxu1 %v12111_v54  ;;  %v938_v5 = vmul.f32 %v5798_v36, %v12112_v4  ;;  %5410 = vmatpush3.bf16.msra.mxu0 %v5745_v56  ;;  %v980_v19 = vadd.f32 %v7155_v51, %v958_v26 }
 0x23e   : > { %5811 = vrsqrt.f32 %v1175_v13  ;;  %v1171_v8 = vmul.f32 0.020833334, %v1165_v2  ;;  %v7247_v41 = vpack.c.bf16 %v979_v32, %v978_v43  ;;  %v959_v48 = vmul.f32 %v7138_v24, %v937_v15  ;;  %5411 = vmatprep.subr.bf16.mxu0 %v5746_v57  ;;  %v12119_v13 = vld [vmem:[#allocation45_spill] sm:$0xff] }
 0x23f   : > { %v1172_v61 = vmul.f32 0.020833334, %v1166_v20  ;;  %v5800_v63 = vpop.eup %5799  ;;  %5813 = vrsqrt.f32 %v1176_v0  ;;  %v1149_v35 = vpop.xlane.xlu1 %1148  ;;  %v960_v29 = vmul.f32 %v7138_v24, %v938_v5  ;;  %v12120_v20 = vld [vmem:[#allocation46_spill] sm:$0xff] }
 0x240   : > { %v5802_v62 = vpop.eup %5801  ;;  %v1177_v50 = vadd.f32 1e-06, %v1171_v8  ;;  %v1167_v1 = vsub.f32 %v1149_v35, %v1161_v47  ;;  %v939_v9 = vmul.f32 %v5800_v63, %v12113_v12  ;;  %5385 = vmatprep.mubr.bf16.mxu0 %v7247_v41  ;;  %v981_v38 = vadd.f32 %v7155_v51, %v959_v48  ;;  %v12118_v47 = vld [vmem:[#allocation44_spill] sm:$0xff]  ;;  %v12121_v63 = vld [vmem:[#allocation47_spill] sm:$0xff] }
 0x241   : > { %v1178_v59 = vadd.f32 1e-06, %v1172_v61  ;;  %v940_v34 = vmul.f32 %v5802_v62, %v12114_v21  ;;  %5412 = vmatpush3.bf16.msra.mxu0 %v5746_v57  ;;  %v982_v42 = vadd.f32 %v7155_v51, %v960_v29 }
 0x242   : > { %5815 = vrsqrt.f32 %v1177_v50  ;;  %v1173_v25 = vmul.f32 0.020833334, %v1167_v1  ;;  %v961_v44 = vmul.f32 %v7138_v24, %v939_v9  ;;  %v7257_v6 = vpack.c.bf16 %v981_v38, %v980_v19  ;;  %5413 = vmatprep.subr.bf16.mxu0 %v5747_v46  ;;  %v12123_v19 = vld [vmem:[#allocation49_spill] sm:$0xff] }
 0x243   : > { %v5804_v10 = vpop.eup %5803  ;;  %5817 = vrsqrt.f32 %v1178_v59  ;;  %v962_v56 = vmul.f32 %v7138_v24, %v940_v34 }
 0x244   : > { %v5806_v23 = vpop.eup %5805  ;;  %v1179_v49 = vadd.f32 1e-06, %v1173_v25  ;;  %v983_v45 = vadd.f32 %v7155_v51, %v961_v44  ;;  %v941_v28 = vmul.f32 %v5804_v10, %v12115_v39  ;;  %5386 = vmatmul.mubr.bf16.gmra.mxu0 %v7257_v6  ;;  %1693 = vmatmul.mubr.bf16.gmra.mxu1 %v7234_v30  ;;  %v1851_v39 = vld [vmem:[#allocation11 + $0x8] sm:$0x7f] }
 0x245   : > { %v942_v18 = vmul.f32 %v5806_v23, %v12116_v14  ;;  %1702 = vmatprep.mubr.bf16.mxu1 %v12111_v54  ;;  %5414 = vmatpush3.bf16.msra.mxu0 %v5747_v46  ;;  %v984_v16 = vadd.f32 %v7155_v51, %v962_v56  ;;  %v12122_v46 = vld [vmem:[#allocation48_spill] sm:$0xff]  ;;  %v5752_v23 = vld [vmem:[#allocation13 + $0x20] sm:$0xff]  }
 0x246   : > { %5819 = vrsqrt.f32 %v1179_v49  ;;  %v993_v37 = vpack.c.bf16 %v983_v45, %v982_v42  ;;  %v963_v33 = vmul.f32 %v7138_v24, %v941_v28  ;;  %5415 = vmatprep.subr.bf16.mxu0 %v5748_v58  ;;  %v5750_v42 = vld [vmem:[#allocation13 + $0x30] sm:$0xff]   ;;  %v1425_v45 = vstv %s1424_s6  ;;  %s11498_s6 = scalar_lea.sflag [#allocation4], %s603_s9 }
 0x247   : > { %v5808_v11 = vpop.eup %5807  ;;  %v964_v27 = vmul.f32 %v7138_v24, %v942_v18  ;;  %vm7333_vm0 = vcmp.eq.s32.totalorder %v1425_v45, 1 }
 0x248   : > { %v5810_v55 = vpop.eup %5809  ;;  %5389 = vmatprep.mubr.bf16.mxu0 %v993_v37  ;;  %v985_v7 = vadd.f32 %v7155_v51, %v963_v33  ;;  %v943_v17 = vmul.f32 %v5808_v11, %v12117_v3 }
 0x249   : > { %v1186_v53 = vmul.f32 %v5810_v55, %v12118_v47  ;;  %5416 = vmatpush3.bf16.msra.mxu0 %v5748_v58  ;;  %v986_v57 = vadd.f32 %v7155_v51, %v964_v27  ;;  %v5751_v58 = vld [vmem:[#allocation13 + $0x28] sm:$0xff]  }
 0x24a   : > { %v994_v40 = vpack.c.bf16 %v985_v7, %v984_v16  ;;  %v965_v31 = vmul.f32 %v7138_v24, %v943_v17  ;;  %v1495_v27 = vld [vmem:[%s12140_s14] sm:$0x7] }
 0x24b   : > { %v5812_v60 = vpop.eup %5811  ;;  %v1192_v2 = vmul.f32 %v7138_v24, %v1186_v53 }
 0x24c   : > { %v5814_v43 = vpop.eup %5813  ;;  %v987_v36 = vadd.f32 %v7155_v51, %v965_v31  ;;  %v1187_v0 = vmul.f32 %v5812_v60, %v12119_v13  ;;  %5390 = vmatmul.mubr.bf16.gmra.mxu0 %v994_v40  ;;  %1703 = vmatmul.mubr.bf16.gmra.mxu1 %v7247_v41 }
 0x24d   : > { %v1188_v32 = vmul.f32 %v5814_v43, %v12120_v20  ;;  %1712 = vmatprep.mubr.bf16.mxu1 %v12111_v54  ;;  %v1198_v4 = vadd.f32 %v7155_v51, %v1192_v2  ;;  %v1852_v43 = vld [vmem:[#allocation11 + $0x10] sm:$0x7f] }
 0x24e   : > { %v995_v15 = vpack.c.bf16 %v987_v36, %v986_v57  ;;  %v1193_v26 = vmul.f32 %v7138_v24, %v1187_v0  ;;  %v1853_v57 = vld [vmem:[#allocation11 + $0x18] sm:$0x7f]  ;;  %v7371_v36 = vld [vmem:[%s12145_s16] ss:$0 sm:$0xff]  ;;  %s5286_s16 = sshll.u32 %s12124_s18, 4  ;;  %s13124_s18 = sld [smem:[#allocation35_spill]] }
 0x24f   : > { %v5816_v8 = vpop.eup %5815  ;;  %v1194_v48 = vmul.f32 %v7138_v24, %v1188_v32 }
 0x250   : > { %v5818_v61 = vpop.eup %5817  ;;  %5393 = vmatprep.mubr.bf16.mxu0 %v995_v15  ;;  %v1199_v5 = vadd.f32 %v7155_v51, %v1193_v26  ;;  %v1189_v35 = vmul.f32 %v5816_v8, %v12121_v63 }
 0x251   : > { %v1190_v62 = vmul.f32 %v5818_v61, %v12122_v46  ;;  %v1200_v12 = vadd.f32 %v7155_v51, %v1194_v48  ;;  %v1854_v48 = vld [vmem:[#allocation11 + $0x20] sm:$0x7f]  ;;  %v1855_v46 = vld [vmem:[#allocation11 + $0x28] sm:$0x7f] }
 0x252   : > { %v1204_v50 = vpack.c.bf16 %v1199_v5, %v1198_v4  ;;  %v1195_v59 = vmul.f32 %v7138_v24, %v1189_v35 }
 0x253   : > { %v5820_v1 = vpop.eup %5819  ;;  %v1196_v29 = vmul.f32 %v7138_v24, %v1190_v62  ;;  %v1856_v62 = vld [vmem:[#allocation11 + $0x30] sm:$0x7f] }
 0x254   : > { %v1201_v9 = vadd.f32 %v7155_v51, %v1195_v59  ;;  %v1191_v38 = vmul.f32 %v5820_v1, %v12123_v19  ;;  %5394 = vmatmul.mubr.bf16.gmra.mxu0 %v1204_v50  ;;  %1713 = vmatmul.mubr.bf16.gmra.mxu1 %v7257_v6  ;;  %p13127_p1 = scmp.ne.s32.totalorder %s13124_s18, 0 }
 0x255   : > { %1722 = vmatprep.mubr.bf16.mxu1 %v12111_v54  ;;  %v1202_v25 = vadd.f32 %v7155_v51, %v1196_v29 }
 0x256   : > { %v1205_v21 = vpack.c.bf16 %v1201_v9, %v1200_v12  ;;  %v1197_v34 = vmul.f32 %v7138_v24, %v1191_v38  ;;  %v1497_v24 = vlaneseq  ;;  %p6135_p9 = pnand %p6134_p6, %p13127_p1 }
 0x258   : > { %5397 = vmatprep.mubr.bf16.mxu0 %v1205_v21  ;;  %v1203_v44 = vadd.f32 %v7155_v51, %v1197_v34  ;;  %v7304_v51 = vshrl.u32 %v1497_v24, 7  ;;  %p6136_p4 = pneg %p6135_p9 }
 0x25a   : > { %v1206_v10 = vpack.c.bf16 %v1203_v44, %v1202_v25  ;;  %12125 = vst [vmem:[#allocation38_spill] sm:$0xff] %v7304_v51  ;;  %v2954_v49 = vsub.s32 3, %v7304_v51  ;;  %v7321_v28 = vsub.s32 1, %v7304_v51  ;;  %v7324_v56 = vsub.s32 2, %v7304_v51 }
 0x25b   : > { %v7327_v14 = vsub.s32 0, %v7304_v51  ;;  %v1866_v18 = vadd.s32 8, %v7304_v51  ;;  %v7342_v16 = vadd.s32 4294967293, %v7304_v51  ;;  %v7351_v17 = vadd.s32 4294967294, %v7304_v51 }
 0x25c   : > { %5398 = vmatmul.mubr.bf16.gmra.mxu0 %v1206_v10  ;;  %1723 = vmatmul.mubr.bf16.gmra.mxu1 %v993_v37  ;;  %12130 = vst [vmem:[#allocation43_spill] sm:$0xff] %v7324_v56  ;;  %v7339_v55 = vrot.slane %v1851_v39, %v2954_v49  ;;  %v7363_v31 = vadd.s32 4294967295, %v7304_v51  ;;  %v7374_v13 = vrot.slane %v1851_v39, %v7324_v56  ;;  %vm1895_vm1 = vcmp.lt.s32.totalorder %v7304_v51, 3 }
 0x25d   : > { %5417 = vmatprep.mubr.bf16.mxu0 %v7208_v22  ;;  %1732 = vmatprep.mubr.bf16.mxu1 %v12111_v54  ;;  %v7307_v22 = vsub.s32 5, %v7304_v51  ;;  %12136 = vst [vmem:[#allocation47_spill] sm:$0xff] %v7342_v16  ;;  %v7348_v3 = vrot.slane %v1851_v39, %v7327_v14  ;;  %12139 = vst [vmem:[#allocation50_spill] sm:$0xff] %v7351_v17  ;;  %v7376_v0 = vadd.s32 1, %v1866_v18  ;;  %v7390_v8 = vadd.s32 3, %v1866_v18 }
 0x25e   : > { %12135 = vst [vmem:[#allocation46_spill] sm:$0xff] %v7339_v55  ;;  %12143 = vst [vmem:[#allocation53_spill] sm:$0xff] %v7363_v31  ;;  %v7393_v61 = vrot.slane %v1495_v27, %v7327_v14  ;;  %v7396_v4 = vrot.slane %v1852_v43, %v2954_v49  ;;  %v7398_v5 = vrot.slane %v1853_v57, %v2954_v49  ;;  %vm2244_vm2 = vcmp.lt.s32.totalorder %v7304_v51, 2 }
 0x25f   : > { %12126 = vst [vmem:[#allocation39_spill] sm:$0xff] %v7307_v22  ;;  %12138 = vst [vmem:[#allocation49_spill] sm:$0xff] %v7348_v3  ;;  %v7388_v26 = vrot.slane %v1851_v39, %v7307_v22  ;;  %v7401_v63 = vrot.slane %v1495_v27, %v7321_v28  ;;  %v7404_v35 = vrot.slane %v1852_v43, %v7321_v28  ;;  %vm1926_vm3 = vcmp.ge.s32.totalorder %v7342_v16, 0 }
 0x260   : > { %12147 = vst [vmem:[#allocation55_spill] sm:$0xff] %v7374_v13  ;;  %12148 = vst [vmem:[#allocation56_spill] sm:$0xff] %v7376_v0  ;;  %v7409_v1 = vrot.slane %v1853_v57, %v7321_v28  ;;  %v7412_v12 = vrot.slane %v1852_v43, %v7324_v56  ;;  %v7415_v9 = vrot.slane %v1853_v57, %v7324_v56  ;;  %vm3581_vm4 = vcmp.lt.s32.totalorder %v7304_v51, 6 }
 0x261   : > { %12152 = vst [vmem:[#allocation60_spill] sm:$0xff] %v7388_v26  ;;  %12153 = vst [vmem:[#allocation61_spill] sm:$0xff] %v7390_v8  ;;  %v7420_v19 = vrot.slane %v1852_v43, %v7327_v14  ;;  %v7423_v38 = vrot.slane %v1853_v57, %v7327_v14  ;;  %v7429_v21 = vrot.slane %v1852_v43, %v7307_v22  ;;  %vm2275_vm5 = vcmp.ge.s32.totalorder %v7351_v17, 0 }
 0x262   : > { %12154 = vst [vmem:[#allocation62_spill] sm:$0xff] %v7393_v61  ;;  %12155 = vst [vmem:[#allocation63_spill] sm:$0xff] %v7396_v4  ;;  %v7436_v25 = vrot.slane %v1854_v48, %v2954_v49  ;;  %v7438_v44 = vrot.slane %v1855_v46, %v2954_v49  ;;  %v7440_v10 = vrot.slane %v1856_v62, %v2954_v49  ;;  %vm2593_vm6 = vcmp.lt.s32.totalorder %v7304_v51, 1 }
 0x263   : > { %12156 = vst [vmem:[#allocation64_spill] sm:$0xff] %v7398_v5  ;;  %12157 = vst [vmem:[#allocation65_spill] sm:$0xff] %v7401_v63  ;;  %v7466_v45 = vrot.slane %v1854_v48, %v7324_v56  ;;  %vm3232_vm7 = vcmp.lt.s32.totalorder %v7304_v51, 7  ;;  %v7474_v27 = vrot.slane %v1855_v46, %v7324_v56  ;;  %vm2624_vm8 = vcmp.ge.s32.totalorder %v7363_v31, 0 }
 0x264   : > { %1733 = vmatmul.mubr.bf16.gmra.mxu1 %v994_v40  ;;  %5418 = vmatmul.mubr.bf16.vlgmr.msra.gmra.mxu0 %v7222_v52  ;;  %v1850_v52 = vld [vmem:[#allocation11] sm:$0x7f]  ;;  %12158 = vst [vmem:[#allocation66_spill] sm:$0xff] %v7404_v35  ;;  %12159 = vst [vmem:[#allocation67_spill] sm:$0xff] %v7409_v1  ;;  %v7482_v57 = vrot.slane %v1856_v62, %v7321_v28  ;;  %vm3266_vm9 = vcmp.lt.s32.totalorder %v7376_v0, 16  ;;  %vm3930_vm11 = vcmp.lt.s32.totalorder %v7304_v51, 5 }
 0x265   : > { %5421 = vmatprep.mubr.bf16.mxu0 %v7234_v30  ;;  %1742 = vmatprep.mubr.bf16.mxu1 %v12111_v54  ;;  %v7310_v30 = vrot.slane %v1850_v52, %v7307_v22  ;;  %v7313_v54 = vsub.s32 6, %v7304_v51  ;;  %v7337_v11 = vrot.slane %v1850_v52, %v2954_v49  ;;  %v7345_v7 = vrot.slane %v1850_v52, %v7327_v14 }
 0x266   : > { %v7357_v53 = vrot.slane %v1850_v52, %v7321_v28  ;;  %v7366_v60 = vrot.slane %v1850_v52, %v7324_v56  ;;  %12160 = vst [vmem:[#allocation68_spill] sm:$0xff] %v7412_v12  ;;  %12161 = vst [vmem:[#allocation69_spill] sm:$0xff] %v7415_v9  ;;  %v7463_v49 = vrot.slane %v1855_v46, %v7321_v28  ;;  %vm3964_vm12 = vcmp.lt.s32.totalorder %v7390_v8, 16 }
 0x267   : > { %12127 = vst [vmem:[#allocation40_spill] sm:$0xff] %v7310_v30  ;;  %12128 = vst [vmem:[#allocation41_spill] sm:$0xff] %v7313_v54 }
 0x268   : > { %12134 = vst [vmem:[#allocation45_spill] sm:$0xff] %v7337_v11  ;;  %12137 = vst [vmem:[#allocation48_spill] sm:$0xff] %v7345_v7 }
 0x269   : > { %12141 = vst [vmem:[#allocation51_spill] sm:$0xff] %v7357_v53  ;;  %12144 = vst [vmem:[#allocation54_spill] sm:$0xff] %v7366_v60 }
 0x26a   : > { %12163 = vst [vmem:[#allocation71_spill] sm:$0xff] %v7429_v21  ;;  %12164 = vst [vmem:[#allocation72_spill] sm:$0xff] %v7436_v25 }
 0x26b   : > { %12165 = vst [vmem:[#allocation73_spill] sm:$0xff] %v7438_v44  ;;  %12166 = vst [vmem:[#allocation74_spill] sm:$0xff] %v7440_v10 }
 0x26c   : > { %1743 = vmatmul.mubr.bf16.gmra.mxu1 %v995_v15  ;;  %5422 = vmatmul.mubr.bf16.gmra.mxu0 %v7247_v41  ;;  %v7316_v41 = vrot.slane %v1850_v52, %v7313_v54  ;;  %12172 = vst [vmem:[#allocation80_spill] sm:$0xff] %v7463_v49  ;;  %12173 = vst [vmem:[#allocation81_spill] sm:$0xff] %v7466_v45  ;;  %v7504_v54 = vrot.slane %v1856_v62, %v7307_v22 }
 0x26d   : > { %5425 = vmatprep.mubr.bf16.mxu0 %v7257_v6  ;;  %v5749_v6 = vld [vmem:[#allocation13 + $0x38] sm:$0xff]   ;;  %12175 = vst [vmem:[#allocation83_spill] sm:$0xff] %v7474_v27  ;;  %12177 = vst [vmem:[#allocation85_spill] sm:$0xff] %v7482_v57 }
 0x26e   : > { %12129 = vst [vmem:[#allocation42_spill] sm:$0xff] %v7316_v41  ;;  %5465 = vmatprep.subr.bf16.mxu0 %v5749_v6  ;;  %12181 = vst [vmem:[#allocation89_spill] sm:$0xff] %v7504_v54 }
 0x26f   : > { %5466 = vmatpush3.bf16.msra.mxu0 %v5749_v6  ;;  %v7449_v6 = vrot.slane %v1855_v46, %v7327_v14 }
 0x270   : > { %5467 = vmatprep.subr.bf16.mxu0 %v5750_v42 }
 0x271   : > { %12168 = vst [vmem:[#allocation76_spill] sm:$0xff] %v7449_v6 }
 0x273   : > { %5468 = vmatpush3.bf16.msra.mxu0 %v5750_v42  ;;  %v7452_v42 = vrot.slane %v1854_v48, %v7321_v28 }
 0x274   : > { %5426 = vmatmul.mubr.bf16.gmra.mxu0 %v993_v37  ;;  %5469 = vmatprep.subr.bf16.mxu0 %v5751_v58  ;;  %v7331_v37 = vsub.s32 4, %v7304_v51 }
 0x275   : > { %5429 = vmatprep.mubr.bf16.mxu0 %v994_v40  ;;  %v7360_v40 = vrot.slane %v1851_v39, %v7321_v28  ;;  %12169 = vst [vmem:[#allocation77_spill] sm:$0xff] %v7452_v42 }
 0x276   : > { %12131 = vst [vmem:[#allocation44_spill] sm:$0xff] %v7331_v37  ;;  %v7379_v2 = vrot.slane %v1850_v52, %v7331_v37  ;;  %v7382_v20 = vrot.slane %v1851_v39, %v7331_v37  ;;  %v7426_v29 = vrot.slane %v1852_v43, %v7331_v37  ;;  %v7446_v52 = vrot.slane %v1854_v48, %v7327_v14 }
 0x277   : > { %5470 = vmatpush3.bf16.msra.mxu0 %v5751_v58  ;;  %12142 = vst [vmem:[#allocation52_spill] sm:$0xff] %v7360_v40 }
 0x278   : > { %5471 = vmatprep.subr.bf16.mxu0 %v5752_v23  ;;  %12149 = vst [vmem:[#allocation57_spill] sm:$0xff] %v7379_v2  ;;  %12150 = vst [vmem:[#allocation58_spill] sm:$0xff] %v7382_v20 }
 0x279   : > { %12162 = vst [vmem:[#allocation70_spill] sm:$0xff] %v7426_v29  ;;  %12167 = vst [vmem:[#allocation75_spill] sm:$0xff] %v7446_v52 }
 0x27b   : > { %5472 = vmatpush3.bf16.msra.mxu0 %v5752_v23 }
 0x27c   : > { %5430 = vmatmul.mubr.bf16.gmra.mxu0 %v995_v15  ;;  %v7385_v15 = vadd.s32 2, %v1866_v18  ;;  %v7471_v18 = vrot.slane %v1856_v62, %v7327_v14 }
 0x27e   : > { %12151 = vst [vmem:[#allocation59_spill] sm:$0xff] %v7385_v15  ;;  %12174 = vst [vmem:[#allocation82_spill] sm:$0xff] %v7471_v18  ;;  %vm3615_vm10 = vcmp.lt.s32.totalorder %v7385_v15, 16 }
 0x2ec   : > { %v5375_v47 = vpop.f32.mrf.mxu0 }
 0x2ed   : > { %v1321_v50 = vadd.f32 %v5375_v47, %v7371_v36  ;;  %v7477_v47 = vrot.slane %v1854_v48, %v7331_v37 }
 0x2ee   : > { %v1312_v32 = vpop.f32.mrf.mxu0 }
 0x2ef   : > { %v1313_v24 = vadd.f32 %v7371_v36, %v1312_v32  ;;  %v7456_v58 = vsel %vm7333_vm0, %v1321_v50, 0.0  ;;  %12176 = vst [vmem:[#allocation84_spill] sm:$0xff] %v7477_v47  ;;  %v7485_v32 = vrot.slane %v1856_v62, %v7324_v56  ;;  %v7488_v50 = vrot.slane %v1855_v46, %v7331_v37 }
 0x2f0   : > { %v5376_v59 = vpop.f32.mrf.mxu0  ;;  %12170 = vst [vmem:[#allocation78_spill] sm:$0xff] %v7456_v58  ;;  %v1868_v14 = vrot.slane %v7456_v58, 5  ;;  %v2217_v28 = vrot.slane %v7456_v58, 6  ;;  %v2566_v43 = vrot.slane %v7456_v58, 7  ;;  %v7512_v56 = vmul.f32 %v7339_v55, %v7456_v58 }
 0x2f1   : > { %v1324_v34 = vadd.f32 %v5376_v59, %v7371_v36  ;;  %12178 = vst [vmem:[#allocation86_spill] sm:$0xff] %v7485_v32  ;;  %12179 = vst [vmem:[#allocation87_spill] sm:$0xff] %v7488_v50  ;;  %v7493_v59 = vsel %vm7333_vm0, %v1313_v24, 0.0  ;;  %v7508_v24 = vmul.f32 %v7337_v11, %v7456_v58  ;;  %v3554_v50 = vrot.slane %v7456_v58, 2 }
 0x2f2   : > { %12183 = vst [vmem:[#allocation91_spill] sm:$0xff] %v7512_v56  ;;  %v7530_v27 = vmul.f32 %v7337_v11, %v7493_v59  ;;  %v1315_v45 = vpop.f32.mrf.mxu0 }
 0x2f3   : > { %v7460_v23 = vsel %vm7333_vm0, %v1324_v34, 0.0  ;;  %v7497_v34 = vrot.slane %v1856_v62, %v7331_v37  ;;  %12182 = vst [vmem:[#allocation90_spill] sm:$0xff] %v7508_v24  ;;  %v3205_v37 = vrot.slane %v7456_v58, 1  ;;  %v1867_v62 = vrot.slane %v7493_v59, 5  ;;  %v7554_v24 = vld [vmem:[%s12186_s15] ss:$0 sm:$0xff] }
 0x2f4   : > { %12171 = vst [vmem:[#allocation79_spill] sm:$0xff] %v7460_v23  ;;  %v1882_v39 = vrot.slane %v7460_v23, 5  ;;  %v2231_v48 = vrot.slane %v7460_v23, 6  ;;  %v3568_v46 = vrot.slane %v7460_v23, 2  ;;  %v2580_v54 = vrot.slane %v7460_v23, 7  ;;  %12184 = vst [vmem:[#allocation92_spill] sm:$0xff] %v7530_v27 }
 0x2f5   : > { %12180 = vst [vmem:[#allocation88_spill] sm:$0xff] %v7497_v34  ;;  %v3219_v58 = vrot.slane %v7460_v23, 1  ;;  %v7542_v57 = vmul.f32 %v7337_v11, %v7460_v23  ;;  %v7561_v18 = vmul.f32 %v7339_v55, %v7460_v23 }
 0x2f6   : > { %v1911_v34 = vsel %vm1895_vm1, %v1882_v39, %v1868_v14  ;;  %v1897_v56 = vsel %vm1895_vm1, %v1868_v14, %v1882_v39  ;;  %v2260_v32 = vsel %vm2244_vm2, %v2231_v48, %v2217_v28  ;;  %v3583_v22 = vsel %vm3581_vm4, %v3554_v50, %v3568_v46 }
 0x2f7   : > { %v1938_v47 = vsel %vm1926_vm3, %v1911_v34, 0.0  ;;  %v3553_v39 = vrot.slane %v7493_v59, 2  ;;  %12185 = vst [vmem:[#allocation93_spill] sm:$0xff] %v7542_v57  ;;  %v1971_v27 = vmul.f32 %v7345_v7, %v1897_v56  ;;  %v2287_v34 = vsel %vm2275_vm5, %v2260_v32, 0.0  ;;  %12188 = vst [vmem:[#allocation94_spill] sm:$0xff] %v7561_v18 }
 0x2f8   : > { %v2609_v49 = vsel %vm2593_vm6, %v2580_v54, %v2566_v43  ;;  %v3597_v42 = vsel %vm3581_vm4, %v3568_v46, %v3554_v50  ;;  %v1970_v14 = vmul.f32 %v7345_v7, %v1938_v47  ;;  %v2246_v57 = vsel %vm2244_vm2, %v2217_v28, %v2231_v48  ;;  %v5379_v28 = vpop.f32.mrf.mxu0 }
 0x2f9   : > { %v1316_v32 = vadd.f32 %v7371_v36, %v1315_v45  ;;  %v7565_v6 = vmul.f32 %v7348_v3, %v1938_v47  ;;  %v7568_v50 = vmul.f32 %v7348_v3, %v1897_v56  ;;  %v3248_v46 = vsel %vm3232_vm7, %v3219_v58, %v3205_v37 }
 0x2fa   : > { %v7574_v10 = vmul.f32 %v7357_v53, %v2287_v34  ;;  %v2595_v48 = vsel %vm2593_vm6, %v2566_v43, %v2580_v54  ;;  %v2636_v45 = vsel %vm2624_vm8, %v2609_v49, 0.0  ;;  %v7583_v56 = vadd.f32 %v7554_v24, %v1971_v27 }
 0x2fb   : > { %v1436_v47 = vsel %vm7333_vm0, %v1316_v32, 0.0  ;;  %v7586_v18 = vmul.f32 %v7357_v53, %v2246_v57  ;;  %v3234_v52 = vsel %vm3232_vm7, %v3205_v37, %v3219_v58  ;;  %v7592_v54 = vadd.f32 %v7554_v24, %v1970_v14  ;;  %v1674_v32 = vpop.f32.mrf.mxu1 }
 0x2fc   : > { %12189 = vst [vmem:[#allocation95_spill] sm:$0xff] %v7574_v10  ;;  %v1881_v23 = vrot.slane %v1436_v47, 5  ;;  %v7595_v49 = vmul.f32 %v7360_v40, %v2287_v34  ;;  %v7598_v43 = vmul.f32 %v7360_v40, %v2246_v57  ;;  %v3276_v27 = vsel %vm3266_vm9, %v3248_v46, 0.0 }
 0x2fd   : > { %12190 = vst [vmem:[#allocation96_spill] sm:$0xff] %v7586_v18  ;;  %v7603_v18 = vmul.f32 %v7366_v60, %v2636_v45  ;;  %v7606_v37 = vmul.f32 %v7366_v60, %v2595_v48  ;;  %v7609_v58 = vmul.f32 %v7374_v13, %v2595_v48  ;;  %v7614_v34 = vmul.f32 %v7374_v13, %v2636_v45 }
 0x2fe   : > { %12191 = vst [vmem:[#allocation97_spill] sm:$0xff] %v7595_v49  ;;  %12192 = vst [vmem:[#allocation98_spill] sm:$0xff] %v7598_v43  ;;  %v1910_v14 = vsel %vm1895_vm1, %v1881_v23, %v1867_v62  ;;  %v7617_v57 = vmul.f32 %v7379_v2, %v3234_v52  ;;  %v3625_v46 = vsel %vm3615_vm10, %v3597_v42, 0.0  ;;  %v3567_v43 = vrot.slane %v1436_v47, 2 }
 0x2ff   : > { %12193 = vst [vmem:[#allocation99_spill] sm:$0xff] %v7603_v18  ;;  %12194 = vst [vmem:[#allocation100_spill] sm:$0xff] %v7606_v37  ;;  %v1328_v18 = vpop.f32.mrf.mxu0  ;;  %v7622_v49 = vmul.f32 %v7379_v2, %v3276_v27  ;;  %v1896_v48 = vsel %vm1895_vm1, %v1867_v62, %v1881_v23  ;;  %v2579_v37 = vrot.slane %v1436_v47, 7  ;;  %v7627_v10 = vmul.f32 %v7382_v20, %v3234_v52 }
 0x300   : > { %12195 = vst [vmem:[#allocation101_spill] sm:$0xff] %v7609_v58  ;;  %12196 = vst [vmem:[#allocation102_spill] sm:$0xff] %v7614_v34  ;;  %v2230_v58 = vrot.slane %v1436_v47, 6  ;;  %v7630_v45 = vmul.f32 %v7382_v20, %v3276_v27  ;;  %v3916_v42 = vrot.slane %v1436_v47, 3  ;;  %v1676_v34 = vpop.f32.mrf.mxu1  ;;  %v7635_v44 = vmul.f32 %v7310_v30, %v3583_v22 }
 0x301   : > { %12197 = vst [vmem:[#allocation103_spill] sm:$0xff] %v7617_v57  ;;  %12198 = vst [vmem:[#allocation104_spill] sm:$0xff] %v7622_v49  ;;  %v1936_v57 = vsel %vm1926_vm3, %v1910_v14, 0.0  ;;  %v7638_v49 = vmul.f32 %v7310_v30, %v3625_v46  ;;  %v7641_v23 = vmul.f32 %v7388_v26, %v3583_v22  ;;  %v3218_v62 = vrot.slane %v1436_v47, 1 }
 0x302   : > { %12199 = vst [vmem:[#allocation105_spill] sm:$0xff] %v7627_v10  ;;  %12200 = vst [vmem:[#allocation106_spill] sm:$0xff] %v7630_v45  ;;  %v1969_v52 = vmul.f32 %v7345_v7, %v1896_v48  ;;  %v3582_v27 = vsel %vm3581_vm4, %v3553_v39, %v3567_v43  ;;  %v3596_v14 = vsel %vm3581_vm4, %v3567_v43, %v3553_v39  ;;  %v12205_v22 = vrot.slane %v7493_v59, 6  ;;  %v1678_v29 = vpop.f32.mrf.mxu1 }
 0x303   : > { %12201 = vst [vmem:[#allocation107_spill] sm:$0xff] %v7635_v44  ;;  %12202 = vst [vmem:[#allocation108_spill] sm:$0xff] %v7638_v49  ;;  %v7650_v45 = vadd.f32 %v1674_v32, %v7393_v61  ;;  %v5380_v44 = vpop.f32.mrf.mxu0  ;;  %v1968_v49 = vmul.f32 %v7345_v7, %v1936_v57  ;;  %v12206_v10 = vrot.slane %v7493_v59, 7  ;;  %v7662_v25 = vadd.f32 %v1676_v34, %v7401_v63 }
 0x304   : > { %12203 = vst [vmem:[#allocation109_spill] sm:$0xff] %v7641_v23  ;;  %v2259_v23 = vsel %vm2244_vm2, %v2230_v58, %v12205_v22  ;;  %v7665_v39 = vmul.f32 %v7388_v26, %v3625_v46  ;;  %v12209_v43 = vrot.slane %v7493_v59, 3  ;;  %v7676_v21 = vadd.f32 %v5379_v28, %v7371_v36 }
 0x305   : > { %12204 = vst [vmem:[#allocation110_spill] sm:$0xff] %v7650_v45  ;;  %v2608_v48 = vsel %vm2593_vm6, %v2579_v37, %v12206_v10  ;;  %12207 = vst [vmem:[#allocation111_spill] sm:$0xff] %v7662_v25  ;;  %v12212_v10 = vrot.slane %v7493_v59, 6  ;;  %v12213_v46 = vrot.slane %v7493_v59, 1  ;;  %v7688_v26 = vadd.f32 %v5380_v44, %v7371_v36 }
 0x306   : > { %12208 = vst [vmem:[#allocation112_spill] sm:$0xff] %v7665_v39  ;;  %v3931_v32 = vsel %vm3930_vm11, %v12209_v43, %v3916_v42  ;;  %v12210_v57 = vmov %v12209_v43  ;;  %12211 = vst [vmem:[#allocation113_spill] sm:$0xff] %v7676_v21  ;;  %v1329_v43 = vadd.f32 %v7371_v36, %v1328_v18  ;;  %v2285_v28 = vsel %vm2275_vm5, %v2259_v23, 0.0 }
 0x307   : > { %v3945_v22 = vsel %vm3930_vm11, %v3916_v42, %v12210_v57  ;;  %v2245_v34 = vsel %vm2244_vm2, %v12212_v10, %v2230_v58  ;;  %v3247_v39 = vsel %vm3232_vm7, %v3218_v62, %v12213_v46  ;;  %12214 = vst [vmem:[#allocation114_spill] sm:$0xff] %v7688_v26  ;;  %v1985_v42 = vadd.f32 %v7554_v24, %v1969_v52 }
 0x308   : > { %v12215_v57 = vrot.slane %v7493_v59, 7  ;;  %v2634_v10 = vsel %vm2624_vm8, %v2608_v48, 0.0  ;;  %v1984_v46 = vadd.f32 %v7554_v24, %v1968_v49  ;;  %v12216_v18 = vrot.slane %v7493_v59, 1 }
 0x309   : > { %v4251_v52 = vmul.f32 %v7650_v45, %v7650_v45  ;;  %v4419_v23 = vmul.f32 %v7662_v25, %v7662_v25  ;;  %v7709_v20 = vmul.f32 %v7357_v53, %v2245_v34  ;;  %v3274_v49 = vsel %vm3266_vm9, %v3247_v39, 0.0 }
 0x30a   : > { %v2594_v58 = vsel %vm2593_vm6, %v12215_v57, %v2579_v37  ;;  %v3233_v44 = vsel %vm3232_vm7, %v12216_v18, %v3218_v62  ;;  %v7712_v37 = vmul.f32 %v7337_v11, %v1436_v47  ;;  %v2219_v59 = vrot.slane %v7676_v21, 6 }
 0x30b   : > { %12217 = vst [vmem:[#allocation115_spill] sm:$0xff] %v7709_v20  ;;  %v7718_v48 = vmul.f32 %v7357_v53, %v2285_v28  ;;  %v7721_v62 = vmul.f32 %v7366_v60, %v2634_v10  ;;  %v7724_v57 = vmul.f32 %v7366_v60, %v2594_v58  ;;  %v3623_v34 = vsel %vm3615_vm10, %v3596_v14, 0.0  ;;  %v7735_v20 = vpop.f32.mrf.mxu1 }
 0x30c   : > { %12218 = vst [vmem:[#allocation116_spill] sm:$0xff] %v7712_v37  ;;  %v7729_v47 = vmul.f32 %v7379_v2, %v3233_v44  ;;  %v3972_v39 = vsel %vm3964_vm12, %v3945_v22, 0.0  ;;  %v4267_v18 = vmul.f32 %v4251_v52, %v7650_v45  ;;  %v2233_v28 = vrot.slane %v7688_v26, 6  ;;  %v1331_v37 = vpop.f32.mrf.mxu0 }
 0x30d   : > { %12219 = vst [vmem:[#allocation117_spill] sm:$0xff] %v7718_v48  ;;  %12220 = vst [vmem:[#allocation118_spill] sm:$0xff] %v7721_v62  ;;  %v7738_v10 = vadd.f32 %v7565_v6, %v1984_v46  ;;  %v7741_v58 = vadd.f32 %v7568_v50, %v1985_v42  ;;  %v7744_v14 = vmul.f32 %v7379_v2, %v3274_v49  ;;  %v2568_v8 = vrot.slane %v7676_v21, 7 }
 0x30e   : > { %12221 = vst [vmem:[#allocation119_spill] sm:$0xff] %v7724_v57  ;;  %12222 = vst [vmem:[#allocation120_spill] sm:$0xff] %v7729_v47  ;;  %v4435_v44 = vmul.f32 %v4419_v23, %v7662_v25  ;;  %v7748_v22 = vmul.f32 %v7310_v30, %v3582_v27  ;;  %v7751_v52 = vmul.f32 %v7310_v30, %v3623_v34  ;;  %v7756_v6 = vsel %vm7333_vm0, %v1329_v43, 0.0  ;;  %v7779_v34 = vpop.f32.mrf.mxu0 }
 0x30f   : > { %12223 = vst [vmem:[#allocation121_spill] sm:$0xff] %v7744_v14  ;;  %12226 = vst [vmem:[#allocation124_spill] sm:$0xff] %v7756_v6  ;;  %v7759_v50 = vmul.f32 %v7316_v41, %v3931_v32  ;;  %v7762_v42 = vmul.f32 %v7316_v41, %v3972_v39  ;;  %v7766_v46 = vmul.f32 %v7337_v11, %v7676_v21  ;;  %v4283_v43 = vmul.f32 0.044715, %v4267_v18  ;;  %v7781_v39 = vpop.f32.mrf.mxu1 }
 0x310   : > { %12224 = vst [vmem:[#allocation122_spill] sm:$0xff] %v7748_v22  ;;  %12225 = vst [vmem:[#allocation123_spill] sm:$0xff] %v7751_v52  ;;  %v7770_v27 = vmul.f32 %v7339_v55, %v7676_v21  ;;  %v7774_v23 = vmul.f32 %v7396_v4, %v7676_v21  ;;  %v2262_v32 = vsel %vm2244_vm2, %v2233_v28, %v2219_v59  ;;  %v2582_v49 = vrot.slane %v7688_v26, 7 }
 0x311   : > { %12227 = vst [vmem:[#allocation125_spill] sm:$0xff] %v7759_v50  ;;  %12228 = vst [vmem:[#allocation126_spill] sm:$0xff] %v7762_v42  ;;  %v7785_v42 = vmul.f32 %v7398_v5, %v7676_v21  ;;  %v1869_v41 = vrot.slane %v7756_v6, 5  ;;  %v4451_v52 = vmul.f32 0.044715, %v4435_v44  ;;  %v7793_v14 = vmul.f32 %v7337_v11, %v7756_v6 }
 0x312   : > { %12229 = vst [vmem:[#allocation127_spill] sm:$0xff] %v7766_v46  ;;  %12230 = vst [vmem:[#allocation128_spill] sm:$0xff] %v7770_v27  ;;  %v7797_v47 = vsel %vm2244_vm2, %v2219_v59, %v2233_v28  ;;  %v7805_v50 = vmul.f32 %v7396_v4, %v7756_v6  ;;  %v7810_v22 = vsel %vm2275_vm5, %v2262_v32, 0.0  ;;  %v4299_v18 = vadd.f32 %v4283_v43, %v7650_v45  ;;  %v1344_v27 = vpop.f32.mrf.mxu0 }
 0x313   : > { %12231 = vst [vmem:[#allocation129_spill] sm:$0xff] %v7774_v23  ;;  %12232 = vst [vmem:[#allocation130_spill] sm:$0xff] %v7785_v42  ;;  %v7801_v42 = vmul.f32 %v7339_v55, %v7756_v6  ;;  %v2611_v59 = vsel %vm2593_vm6, %v2582_v49, %v2568_v8  ;;  %v7817_v28 = vadd.f32 %v1678_v29, %v7393_v61  ;;  %v1884_v46 = vrot.slane %v7688_v26, 5 }
 0x314   : > { %12233 = vst [vmem:[#allocation131_spill] sm:$0xff] %v7793_v14  ;;  %12234 = vst [vmem:[#allocation132_spill] sm:$0xff] %v7797_v47  ;;  %v4467_v44 = vadd.f32 %v4451_v52, %v7662_v25  ;;  %v7825_v32 = vmul.f32 %v7360_v40, %v7797_v47  ;;  %v1332_v43 = vadd.f32 %v7371_v36, %v1331_v37  ;;  %v7848_v37 = vsel %vm2624_vm8, %v2611_v59, 0.0 }
 0x315   : > { %12235 = vst [vmem:[#allocation133_spill] sm:$0xff] %v7801_v42  ;;  %12236 = vst [vmem:[#allocation134_spill] sm:$0xff] %v7805_v50  ;;  %v7819_v42 = vpop.f32.mrf.mxu1  ;;  %v7830_v23 = vmul.f32 %v7360_v40, %v7810_v22  ;;  %v7834_v29 = vmul.f32 %v7404_v35, %v7797_v47  ;;  %v7838_v45 = vmul.f32 %v7409_v1, %v7797_v47  ;;  %v4315_v14 = vmul.f32 0.7978846, %v4299_v18 }
 0x316   : > { %12237 = vst [vmem:[#allocation135_spill] sm:$0xff] %v7810_v22  ;;  %12238 = vst [vmem:[#allocation136_spill] sm:$0xff] %v7817_v28  ;;  %v4252_v52 = vmul.f32 %v7817_v28, %v7817_v28  ;;  %v7844_v50 = vsel %vm2593_vm6, %v2568_v8, %v2582_v49  ;;  %v7852_v25 = vsel %vm7333_vm0, %v1332_v43, 0.0  ;;  %v7857_v57 = vmul.f32 %v7404_v35, %v7810_v22  ;;  %v7861_v49 = vpop.f32.mrf.mxu0 }
 0x317   : > { %12239 = vst [vmem:[#allocation137_spill] sm:$0xff] %v7825_v32  ;;  %12240 = vst [vmem:[#allocation138_spill] sm:$0xff] %v7830_v23  ;;  %v1883_v8 = vrot.slane %v7852_v25, 5  ;;  %v4483_v59 = vmul.f32 0.7978846, %v4467_v44  ;;  %v7867_v33 = vmul.f32 %v7409_v1, %v7810_v22  ;;  %v7871_v18 = vmul.f32 %v7337_v11, %v7688_v26 }
 0x318   : > { %12241 = vst [vmem:[#allocation139_spill] sm:$0xff] %v7834_v29  ;;  %12242 = vst [vmem:[#allocation140_spill] sm:$0xff] %v7838_v45  ;;  %v4268_v62 = vmul.f32 %v4252_v52, %v7817_v28  ;;  %v7863_v45 = vpop.f32.mrf.mxu1  ;;  %v1870_v43 = vrot.slane %v7676_v21, 5  ;;  %v7876_v52 = vmul.f32 %v7374_v13, %v7848_v37  ;;  %v7880_v29 = vmul.f32 %v7374_v13, %v7844_v50 }
 0x319   : > { %12243 = vst [vmem:[#allocation141_spill] sm:$0xff] %v7844_v50  ;;  %12244 = vst [vmem:[#allocation142_spill] sm:$0xff] %v7848_v37  ;;  %v7884_v44 = vmul.f32 %v7412_v12, %v7844_v50  ;;  %5821 = vtanh.f32 %v4315_v14  ;;  %v7916_v14 = vmul.f32 %v7396_v4, %v7688_v26  ;;  %v2581_v22 = vrot.slane %v7852_v25, 7 }
 0x31a   : > { %12245 = vst [vmem:[#allocation143_spill] sm:$0xff] %v7852_v25  ;;  %12246 = vst [vmem:[#allocation144_spill] sm:$0xff] %v7857_v57  ;;  %v4284_v21 = vmul.f32 0.044715, %v4268_v62  ;;  %v1898_v57 = vsel %vm1895_vm1, %v1869_v41, %v1883_v8  ;;  %v7908_v62 = vpop.f32.mrf.mxu1  ;;  %5823 = vtanh.f32 %v4483_v59 }
 0x31b   : > { %12247 = vst [vmem:[#allocation145_spill] sm:$0xff] %v7867_v33  ;;  %12248 = vst [vmem:[#allocation146_spill] sm:$0xff] %v7871_v18  ;;  %v1912_v33 = vsel %vm1895_vm1, %v1883_v8, %v1869_v41  ;;  %v7890_v18 = vmul.f32 %v7412_v12, %v7848_v37  ;;  %v7912_v41 = vmul.f32 %v7339_v55, %v7688_v26 }
 0x31c   : > { %12249 = vst [vmem:[#allocation147_spill] sm:$0xff] %v7876_v52  ;;  %12250 = vst [vmem:[#allocation148_spill] sm:$0xff] %v7880_v29  ;;  %v1913_v52 = vsel %vm1895_vm1, %v1884_v46, %v1870_v43  ;;  %v7898_v29 = vmul.f32 %v7415_v9, %v7848_v37  ;;  %v1940_v1 = vsel %vm1926_vm3, %v1912_v33, 0.0  ;;  %v7920_v8 = vadd.f32 %v7735_v20, %v7401_v63 }
 0x31d   : > { %12251 = vst [vmem:[#allocation149_spill] sm:$0xff] %v7884_v44  ;;  %12252 = vst [vmem:[#allocation150_spill] sm:$0xff] %v7890_v18  ;;  %v7902_v44 = vmul.f32 %v7415_v9, %v7844_v50  ;;  %v7906_v18 = vpop.f32.mrf.mxu0  ;;  %v1899_v33 = vsel %vm1895_vm1, %v1870_v43, %v1884_v46  ;;  %v1973_v59 = vmul.f32 %v7345_v7, %v1898_v57 }
 0x31e   : > { %12253 = vst [vmem:[#allocation151_spill] sm:$0xff] %v7898_v29  ;;  %12255 = vst [vmem:[#allocation153_spill] sm:$0xff] %v7912_v41  ;;  %v2007_v29 = vmul.f32 %v7348_v3, %v1898_v57  ;;  %v7930_v41 = vmul.f32 %v7398_v5, %v7688_v26  ;;  %v4300_v9 = vadd.f32 %v4284_v21, %v7817_v28 }
 0x31f   : > { %12254 = vst [vmem:[#allocation152_spill] sm:$0xff] %v7902_v44  ;;  %12256 = vst [vmem:[#allocation154_spill] sm:$0xff] %v7916_v14  ;;  %v1942_v44 = vsel %vm1926_vm3, %v1913_v52, 0.0  ;;  %v1972_v20 = vmul.f32 %v7345_v7, %v1940_v1  ;;  %v2006_v50 = vmul.f32 %v7348_v3, %v1940_v1  ;;  %v2040_v46 = vmul.f32 %v7420_v19, %v1940_v1  ;;  %v7945_v37 = vpop.f32.mrf.mxu0 }
 0x320   : > { %12257 = vst [vmem:[#allocation155_spill] sm:$0xff] %v7920_v8  ;;  %12258 = vst [vmem:[#allocation156_spill] sm:$0xff] %v7930_v41  ;;  %v7939_v43 = vadd.f32 %v7779_v34, %v7371_v36  ;;  %v7943_v52 = vadd.f32 %v7781_v39, %v7393_v61  ;;  %v7947_v41 = vpop.f32.mrf.mxu1  ;;  %v1974_v21 = vmul.f32 %v7345_v7, %v1942_v44  ;;  %v2232_v39 = vrot.slane %v7852_v25, 6 }
 0x321   : > { %v1975_v14 = vmul.f32 %v7345_v7, %v1899_v33  ;;  %v2041_v26 = vmul.f32 %v7420_v19, %v1898_v57  ;;  %v7953_v1 = vadd.f32 %v7371_v36, %v1344_v27  ;;  %v1989_v34 = vadd.f32 %v7554_v24, %v1973_v59 }
 0x322   : > { %12259 = vst [vmem:[#allocation157_spill] sm:$0xff] %v7939_v43  ;;  %12260 = vst [vmem:[#allocation158_spill] sm:$0xff] %v7943_v52  ;;  %v2023_v28 = vadd.f32 %v2007_v29, %v7583_v56  ;;  %v4420_v32 = vmul.f32 %v7920_v8, %v7920_v8  ;;  %v4316_v23 = vmul.f32 0.7978846, %v4300_v9  ;;  %v1988_v48 = vadd.f32 %v7554_v24, %v1972_v20  ;;  %v7967_v29 = vpop.f32.mrf.mxu0  ;;  %v7969_v7 = vpop.f32.mrf.mxu1 }
 0x323   : > { %12261 = vst [vmem:[#allocation159_spill] sm:$0xff] %v7953_v1  ;;  %v2008_v47 = vmul.f32 %v7348_v3, %v1942_v44  ;;  %v2009_v57 = vmul.f32 %v7348_v3, %v1899_v33  ;;  %v2022_v27 = vadd.f32 %v2006_v50, %v7592_v54  ;;  %v2043_v59 = vmul.f32 %v7420_v19, %v1899_v33 }
 0x324   : > { %v2056_v56 = vadd.f32 %v2040_v46, %v7738_v10  ;;  %v7972_v9 = vadd.f32 %v7554_v24, %v1974_v21  ;;  %v7975_v20 = vadd.f32 %v7554_v24, %v1975_v14  ;;  %v2042_v43 = vmul.f32 %v7420_v19, %v1942_v44 }
 0x325   : > { %v2057_v3 = vadd.f32 %v2041_v26, %v7741_v58  ;;  %v7979_v16 = vadd.f32 %v2009_v57, %v1989_v34  ;;  %v7981_v54 = vadd.f32 %v2043_v59, %v2023_v28  ;;  %v2076_v10 = vmul.f32 %v7423_v38, %v1942_v44 }
 0x326   : > { %v12264_v50 = vrot.slane %v7756_v6, 6  ;;  %5825 = vtanh.f32 %v4316_v23  ;;  %v7988_v21 = vadd.f32 %v2008_v47, %v1988_v48  ;;  %v2077_v24 = vmul.f32 %v7423_v38, %v1899_v33  ;;  %v8004_v48 = vpop.f32.mrf.mxu0  ;;  %v1698_v47 = vpop.f32.mrf.mxu1 }
 0x327   : > { %12262 = vst [vmem:[#allocation160_spill] sm:$0xff] %v7979_v16  ;;  %12263 = vst [vmem:[#allocation161_spill] sm:$0xff] %v7981_v54  ;;  %v12265_v14 = vrot.slane %v7756_v6, 7  ;;  %v7995_v58 = vadd.f32 %v2042_v43, %v2022_v27  ;;  %v7997_v28 = vadd.f32 %v2076_v10, %v2056_v56  ;;  %v3220_v23 = vrot.slane %v7852_v25, 1  ;;  %v8006_v33 = vpop.eup %5821 }
 0x328   : > { %v2261_v46 = vsel %vm2244_vm2, %v2232_v39, %v12264_v50  ;;  %v12268_v44 = vmov %v12264_v50  ;;  %12269 = vst [vmem:[#allocation164_spill] sm:$0xff] %v8006_v33  ;;  %v8008_v57 = vadd.f32 %v2077_v24, %v2057_v3  ;;  %v8014_v27 = vmul.f32 %v7337_v11, %v7852_v25  ;;  %v8017_v56 = vpop.eup %5823 }
 0x329   : > { %v2610_v26 = vsel %vm2593_vm6, %v2581_v22, %v12265_v14  ;;  %12266 = vst [vmem:[#allocation162_spill] sm:$0xff] %v7995_v58  ;;  %12267 = vst [vmem:[#allocation163_spill] sm:$0xff] %v7997_v28  ;;  %v2247_v34 = vsel %vm2244_vm2, %v12268_v44, %v2232_v39  ;;  %v2289_v43 = vsel %vm2275_vm5, %v2261_v46, 0.0  ;;  %v3569_v59 = vrot.slane %v7852_v25, 2 }
 0x32a   : > { %12270 = vst [vmem:[#allocation165_spill] sm:$0xff] %v8008_v57  ;;  %12271 = vst [vmem:[#allocation166_spill] sm:$0xff] %v8014_v27  ;;  %v12273_v39 = vmov %v12265_v14  ;;  %v2638_v3 = vsel %vm2624_vm8, %v2610_v26, 0.0  ;;  %v8027_v50 = vmul.f32 %v7339_v55, %v7852_v25  ;;  %v8031_v46 = vmul.f32 %v7396_v4, %v7852_v25  ;;  %v8061_v4 = vpop.f32.mrf.mxu0 }
 0x32b   : > { %12272 = vst [vmem:[#allocation167_spill] sm:$0xff] %v8017_v56  ;;  %v2596_v10 = vsel %vm2593_vm6, %v12273_v39, %v2581_v22  ;;  %v8034_v24 = vmul.f32 %v7357_v53, %v2247_v34  ;;  %v12277_v14 = vrot.slane %v7756_v6, 2  ;;  %v8046_v39 = vadd.f32 %v7819_v42, %v7401_v63 }
 0x32c   : > { %12274 = vst [vmem:[#allocation168_spill] sm:$0xff] %v8027_v50  ;;  %12275 = vst [vmem:[#allocation169_spill] sm:$0xff] %v8031_v46  ;;  %v8049_v56 = vmul.f32 %v7357_v53, %v2289_v43  ;;  %v8052_v46 = vmul.f32 %v7360_v40, %v2247_v34  ;;  %v8055_v33 = vmul.f32 %v7404_v35, %v2247_v34  ;;  %v12373_v53 = vld [vmem:[#allocation80_spill] sm:$0xff] }
 0x32d   : > { %12276 = vst [vmem:[#allocation170_spill] sm:$0xff] %v8034_v24  ;;  %v3584_v44 = vsel %vm3581_vm4, %v12277_v14, %v3569_v59  ;;  %v12278_v22 = vmov %v12277_v14  ;;  %v12282_v14 = vrot.slane %v7756_v6, 1  ;;  %v8064_v42 = vmul.f32 %v7360_v40, %v2289_v43 }
 0x32e   : > { %v3598_v26 = vsel %vm3581_vm4, %v3569_v59, %v12278_v22  ;;  %12279 = vst [vmem:[#allocation171_spill] sm:$0xff] %v8049_v56  ;;  %12280 = vst [vmem:[#allocation172_spill] sm:$0xff] %v8052_v46  ;;  %v1700_v59 = vpop.f32.mrf.mxu1  ;;  %v8067_v22 = vmul.f32 %v7404_v35, %v2289_v43  ;;  %v8070_v27 = vmul.f32 %v7366_v60, %v2638_v3 }
 0x32f   : > { %12281 = vst [vmem:[#allocation173_spill] sm:$0xff] %v8055_v33  ;;  %v3249_v50 = vsel %vm3232_vm7, %v3220_v23, %v12282_v14  ;;  %12283 = vst [vmem:[#allocation174_spill] sm:$0xff] %v8064_v42  ;;  %v8073_v34 = vmul.f32 %v7366_v60, %v2596_v10  ;;  %v8076_v55 = vmul.f32 %v7374_v13, %v2638_v3  ;;  %v3627_v25 = vsel %vm3615_vm10, %v3598_v26, 0.0 }
 0x330   : > { %12284 = vst [vmem:[#allocation175_spill] sm:$0xff] %v8067_v22  ;;  %12285 = vst [vmem:[#allocation176_spill] sm:$0xff] %v8070_v27  ;;  %v3235_v11 = vsel %vm3232_vm7, %v12282_v14, %v3220_v23  ;;  %v4421_v33 = vmul.f32 %v8046_v39, %v8046_v39  ;;  %v8086_v43 = vadd.f32 %v7863_v45, %v7393_v61 }
 0x331   : > { %12286 = vst [vmem:[#allocation177_spill] sm:$0xff] %v8073_v34  ;;  %12287 = vst [vmem:[#allocation178_spill] sm:$0xff] %v8076_v55  ;;  %v8089_v27 = vmul.f32 %v7374_v13, %v2596_v10  ;;  %v8092_v34 = vmul.f32 %v7412_v12, %v2638_v3  ;;  %v3278_v55 = vsel %vm3266_vm9, %v3249_v50, 0.0  ;;  %v8098_v6 = vadd.f32 %v7908_v62, %v7401_v63  ;;  %v8109_v3 = vpop.f32.mrf.mxu0  ;;  %v12294_v13 = vld [vmem:[#allocation58_spill] sm:$0xff] }
 0x332   : > { %12288 = vst [vmem:[#allocation179_spill] sm:$0xff] %v8086_v43  ;;  %v8101_v23 = vmul.f32 %v7412_v12, %v2596_v10  ;;  %v4436_v14 = vmul.f32 %v4420_v32, %v7920_v8  ;;  %v4437_v45 = vmul.f32 %v4421_v33, %v8046_v39  ;;  %v8112_v50 = vmul.f32 %v7379_v2, %v3235_v11 }
 0x333   : > { %12289 = vst [vmem:[#allocation180_spill] sm:$0xff] %v8089_v27  ;;  %12290 = vst [vmem:[#allocation181_spill] sm:$0xff] %v8092_v34  ;;  %v8107_v27 = vadd.f32 %v7947_v41, %v7393_v61  ;;  %v1704_v34 = vpop.f32.mrf.mxu1  ;;  %v8115_v62 = vmul.f32 %v12294_v13, %v3235_v11  ;;  %v4253_v10 = vmul.f32 %v7943_v52, %v7943_v52  ;;  %v12297_v41 = vld [vmem:[#allocation70_spill] sm:$0xff] }
 0x334   : > { %12291 = vst [vmem:[#allocation182_spill] sm:$0xff] %v8101_v23  ;;  %12293 = vst [vmem:[#allocation184_spill] sm:$0xff] %v8112_v50  ;;  %v4422_v32 = vmul.f32 %v8098_v6, %v8098_v6  ;;  %v8122_v33 = vmul.f32 %v7379_v2, %v3278_v55  ;;  %v8125_v23 = vmul.f32 %v12297_v41, %v3235_v11  ;;  %v4453_v12 = vmul.f32 0.044715, %v4437_v45 }
 0x335   : > { %12292 = vst [vmem:[#allocation183_spill] sm:$0xff] %v8107_v27  ;;  %12295 = vst [vmem:[#allocation185_spill] sm:$0xff] %v8115_v62  ;;  %v4254_v60 = vmul.f32 %v8086_v43, %v8086_v43  ;;  %v8130_v50 = vmul.f32 %v12294_v13, %v3278_v55  ;;  %v4255_v22 = vmul.f32 %v8107_v27, %v8107_v27 }
 0x336   : > { %12296 = vst [vmem:[#allocation186_spill] sm:$0xff] %v8122_v33  ;;  %12298 = vst [vmem:[#allocation187_spill] sm:$0xff] %v8125_v23  ;;  %v4438_v62 = vmul.f32 %v4422_v32, %v8098_v6  ;;  %v8137_v46 = vadd.f32 %v7969_v7, %v7401_v63  ;;  %v8139_v33 = vpop.eup %5825  ;;  %v8142_v11 = vmul.f32 %v12297_v41, %v3278_v55  ;;  %v4452_v23 = vmul.f32 0.044715, %v4436_v14  ;;  %v1706_v32 = vpop.f32.mrf.mxu1  ;;  %v12306_v55 = vld [vmem:[#allocation60_spill] sm:$0xff] }
 0x337   : > { %12299 = vst [vmem:[#allocation188_spill] sm:$0xff] %v8130_v50  ;;  %12301 = vst [vmem:[#allocation190_spill] sm:$0xff] %v8139_v33  ;;  %v4469_v13 = vadd.f32 %v4453_v12, %v8046_v39  ;;  %v8146_v50 = vpop.f32.mrf.mxu0  ;;  %v4269_v2 = vmul.f32 %v4253_v10, %v7943_v52  ;;  %v8152_v35 = vadd.f32 %v1698_v47, %v7393_v61 }
 0x338   : > { %12300 = vst [vmem:[#allocation189_spill] sm:$0xff] %v8137_v46  ;;  %12302 = vst [vmem:[#allocation191_spill] sm:$0xff] %v8142_v11  ;;  %v4454_v42 = vmul.f32 0.044715, %v4438_v62  ;;  %v4423_v7 = vmul.f32 %v8137_v46, %v8137_v46  ;;  %v8157_v45 = vmul.f32 %v7398_v5, %v7953_v1  ;;  %v4270_v12 = vmul.f32 %v4254_v60, %v8086_v43 }
 0x339   : > { %12303 = vst [vmem:[#allocation192_spill] sm:$0xff] %v8152_v35  ;;  %v4485_v14 = vmul.f32 0.7978846, %v4469_v13  ;;  %v4271_v10 = vmul.f32 %v4255_v22, %v8107_v27  ;;  %v4256_v47 = vmul.f32 %v8152_v35, %v8152_v35  ;;  %v8167_v11 = vmul.f32 %v7310_v30, %v3584_v44  ;;  %v8178_v26 = vpop.f32.mrf.mxu0 }
 0x33a   : > { %12304 = vst [vmem:[#allocation193_spill] sm:$0xff] %v8157_v45  ;;  %v4470_v62 = vadd.f32 %v4454_v42, %v8098_v6  ;;  %v8170_v33 = vmul.f32 %v12306_v55, %v3584_v44  ;;  %v12308_v45 = vld [vmem:[#allocation71_spill] sm:$0xff]  ;;  %v8176_v60 = vadd.f32 %v1700_v59, %v7401_v63  ;;  %v1708_v42 = vpop.f32.mrf.mxu1  ;;  %v4468_v22 = vadd.f32 %v4452_v23, %v7920_v8 }
 0x33b   : > { %12305 = vst [vmem:[#allocation194_spill] sm:$0xff] %v8167_v11  ;;  %v8173_v13 = vmul.f32 %v12308_v45, %v3584_v44  ;;  %v4285_v41 = vmul.f32 0.044715, %v4269_v2  ;;  %v4439_v24 = vmul.f32 %v4423_v7, %v8137_v46  ;;  %5827 = vtanh.f32 %v4485_v14 }
 0x33c   : > { %12307 = vst [vmem:[#allocation195_spill] sm:$0xff] %v8170_v33  ;;  %12310 = vst [vmem:[#allocation197_spill] sm:$0xff] %v8176_v60  ;;  %v4486_v15 = vmul.f32 0.7978846, %v4470_v62  ;;  %v4286_v11 = vmul.f32 0.044715, %v4270_v12  ;;  %v4424_v33 = vmul.f32 %v8176_v60, %v8176_v60  ;;  %v8185_v44 = vadd.f32 %v1704_v34, %v7393_v61  ;;  %v8206_v12 = vpop.f32.mrf.mxu0  ;;  %v1710_v62 = vpop.f32.mrf.mxu1 }
 0x33d   : > { %12309 = vst [vmem:[#allocation196_spill] sm:$0xff] %v8173_v13  ;;  %v8188_v59 = vmul.f32 %v7310_v30, %v3627_v25  ;;  %v8191_v13 = vmul.f32 %v12306_v55, %v3627_v25  ;;  %v4287_v56 = vmul.f32 0.044715, %v4271_v10  ;;  %v4272_v2 = vmul.f32 %v4256_v47, %v8152_v35 }
 0x33e   : > { %12311 = vst [vmem:[#allocation198_spill] sm:$0xff] %v8185_v44  ;;  %v8195_v23 = vmul.f32 %v12308_v45, %v3627_v25  ;;  %v8199_v7 = vadd.f32 %v7371_v36, %v7906_v18  ;;  %v4257_v34 = vmul.f32 %v8185_v44, %v8185_v44  ;;  %v8204_v14 = vadd.f32 %v1706_v32, %v7401_v63 }
 0x33f   : > { %12312 = vst [vmem:[#allocation199_spill] sm:$0xff] %v8188_v59  ;;  %12313 = vst [vmem:[#allocation200_spill] sm:$0xff] %v8191_v13  ;;  %v4301_v10 = vadd.f32 %v4285_v41, %v7943_v52  ;;  %5829 = vtanh.f32 %v4486_v15  ;;  %v4455_v47 = vmul.f32 0.044715, %v4439_v24  ;;  %v8210_v25 = vadd.f32 %v1708_v42, %v7393_v61 }
 0x340   : > { %12314 = vst [vmem:[#allocation201_spill] sm:$0xff] %v8195_v23  ;;  %12315 = vst [vmem:[#allocation202_spill] sm:$0xff] %v8199_v7  ;;  %v4484_v59 = vmul.f32 0.7978846, %v4468_v22  ;;  %v4302_v18 = vadd.f32 %v4286_v11, %v8086_v43  ;;  %v4440_v8 = vmul.f32 %v4424_v33, %v8176_v60  ;;  %v4425_v23 = vmul.f32 %v8204_v14, %v8204_v14  ;;  %v1714_v43 = vpop.f32.mrf.mxu1 }
 0x341   : > { %12316 = vst [vmem:[#allocation203_spill] sm:$0xff] %v8204_v14  ;;  %12317 = vst [vmem:[#allocation204_spill] sm:$0xff] %v8210_v25  ;;  %v12318_v32 = vstv %s7434_s17  ;;  %v4303_v41 = vadd.f32 %v4287_v56, %v8107_v27  ;;  %v4288_v15 = vmul.f32 0.044715, %v4272_v2  ;;  %v4258_v24 = vmul.f32 %v8210_v25, %v8210_v25  ;;  %v5395_v56 = vpop.f32.mrf.mxu0  ;;  %s5273_s17 = sshll.u32 %s13123_s0, 5 }
 0x342   : > { %vm8218_vm13 = vcmp.eq.s32.totalorder %v12318_v32, 1  ;;  %v8226_v42 = vadd.f32 %v1710_v62, %v7401_v63  ;;  %v8230_v33 = vadd.f32 %v7861_v49, %v7371_v36  ;;  %v8234_v11 = vadd.f32 %v7945_v37, %v7371_v36  ;;  %s4978_s3 = sadd.s32 %s5286_s16, %s5273_s17 }
 0x343   : > { %v4273_v22 = vmul.f32 %v4257_v34, %v8185_v44  ;;  %v4441_v32 = vmul.f32 %v4425_v23, %v8204_v14  ;;  %v4317_v2 = vmul.f32 0.7978846, %v4301_v10  ;;  %v4471_v27 = vadd.f32 %v4455_v47, %v8137_v46  ;;  %v1392_v30 = vpop.f32.mrf.mxu0  ;;  %s5274_s15 = sshll.u32 %s4978_s3, 7 }
 0x344   : > { %12321 = vst [vmem:[#allocation205_spill] sm:$0xff] %v8226_v42  ;;  %12322 = vst [vmem:[#allocation206_spill] sm:$0xff] %v8230_v33  ;;  %v4426_v62 = vmul.f32 %v8226_v42, %v8226_v42  ;;  %v4318_v49 = vmul.f32 0.7978846, %v4302_v18  ;;  %v8244_v52 = vmul.f32 %v7398_v5, %v8199_v7  ;;  %v4456_v37 = vmul.f32 0.044715, %v4440_v8  ;;  %s11493_s30 = scalar_lea.hbm %s13125_s19, %s5274_s15 }
 0x345   : > { %12323 = vst [vmem:[#allocation207_spill] sm:$0xff] %v8234_v11  ;;  %v4274_v34 = vmul.f32 %v4258_v24, %v8210_v25  ;;  %5831 = vtanh.f32 %v4484_v59  ;;  %v4319_v23 = vmul.f32 0.7978846, %v4303_v41  ;;  %v8249_v10 = vadd.f32 %v7371_v36, %v7967_v29 }
 0x346   : > { %12324 = vst [vmem:[#allocation208_spill] sm:$0xff] %v8244_v52  ;;  %v4304_v47 = vadd.f32 %v4288_v15, %v8152_v35  ;;  %v4289_v45 = vmul.f32 0.044715, %v4273_v22  ;;  %v4457_v46 = vmul.f32 0.044715, %v4441_v32  ;;  %v4442_v55 = vmul.f32 %v4426_v62, %v8226_v42  ;;  %v1716_v22 = vpop.f32.mrf.mxu1  ;;  %v12342_v35 = vld [vmem:[#allocation74_spill] sm:$0xff] }
 0x347   : > { %12325 = vst [vmem:[#allocation209_spill] sm:$0xff] %v8249_v10  ;;  %v8254_v18 = vadd.f32 %v1714_v43, %v7393_v61  ;;  %5833 = vtanh.f32 %v4317_v2  ;;  %v4487_v8 = vmul.f32 0.7978846, %v4471_v27  ;;  %v8258_v59 = vadd.f32 %v8004_v48, %v7371_v36 }
 0x348   : > { %v1401_v41 = vadd.f32 %v5395_v56, %v7371_v36  ;;  %5835 = vtanh.f32 %v4318_v49  ;;  %v8263_v29 = vadd.f32 %v7371_v36, %v8061_v4  ;;  %v4472_v15 = vadd.f32 %v4456_v37, %v8176_v60  ;;  %v5828_v43 = vpop.eup %5827  ;;  %v5396_v49 = vpop.f32.mrf.mxu0 }
 0x349   : > { %12326 = vst [vmem:[#allocation210_spill] sm:$0xff] %v8254_v18  ;;  %12327 = vst [vmem:[#allocation211_spill] sm:$0xff] %v8258_v59  ;;  %v4290_v24 = vmul.f32 0.044715, %v4274_v34  ;;  %5837 = vtanh.f32 %v4319_v23  ;;  %v4320_v32 = vmul.f32 0.7978846, %v4304_v47  ;;  %v8268_v27 = vadd.f32 %v8109_v3, %v7371_v36 }
 0x34a   : > { %12328 = vst [vmem:[#allocation212_spill] sm:$0xff] %v8263_v29  ;;  %v8272_v48 = vadd.f32 %v7371_v36, %v8146_v50  ;;  %v4305_v56 = vadd.f32 %v4289_v45, %v8185_v44  ;;  %v4473_v4 = vadd.f32 %v4457_v46, %v8204_v14  ;;  %v4458_v2 = vmul.f32 0.044715, %v4442_v55 }
 0x34b   : > { %12329 = vst [vmem:[#allocation213_spill] sm:$0xff] %v8268_v27  ;;  %v4259_v62 = vmul.f32 %v8254_v18, %v8254_v18  ;;  %5839 = vtanh.f32 %v4487_v8  ;;  %v8280_v37 = vadd.f32 %v8178_v26, %v7371_v36  ;;  %v8284_v3 = vsel %vm8218_vm13, %v1401_v41, 0.0 }
 0x34c   : > { %12330 = vst [vmem:[#allocation214_spill] sm:$0xff] %v8272_v48  ;;  %12332 = vst [vmem:[#allocation216_spill] sm:$0xff] %v8284_v3  ;;  %v8287_v50 = vadd.f32 %v1716_v22, %v7401_v63  ;;  %v5830_v45 = vpop.eup %5829  ;;  %v4517_v34 = vadd.f32 1.0, %v5828_v43  ;;  %v4488_v46 = vmul.f32 0.7978846, %v4472_v15  ;;  %v4306_v55 = vadd.f32 %v4290_v24, %v8210_v25 }
 0x34d   : > { %12331 = vst [vmem:[#allocation215_spill] sm:$0xff] %v8280_v37  ;;  %v4275_v23 = vmul.f32 %v4259_v62, %v8254_v18  ;;  %5841 = vtanh.f32 %v4320_v32  ;;  %v8293_v47 = vadd.f32 %v7371_v36, %v8206_v12  ;;  %v1404_v8 = vadd.f32 %v5396_v49, %v7371_v36  ;;  %v1718_v49 = vpop.f32.mrf.mxu1 }
 0x34e   : > { %12333 = vst [vmem:[#allocation217_spill] sm:$0xff] %v8287_v50  ;;  %v4427_v26 = vmul.f32 %v8287_v50, %v8287_v50  ;;  %v4321_v41 = vmul.f32 0.7978846, %v4305_v56  ;;  %v4489_v22 = vmul.f32 0.7978846, %v4473_v4  ;;  %v4474_v14 = vadd.f32 %v4458_v2, %v8226_v42  ;;  %v12336_v4 = vld [vmem:[#allocation72_spill] sm:$0xff] }
 0x34f   : > { %12334 = vst [vmem:[#allocation218_spill] sm:$0xff] %v8293_v47  ;;  %v1878_v15 = vrot.slane %v8284_v3, 5  ;;  %v4518_v43 = vadd.f32 1.0, %v5830_v45  ;;  %v4291_v24 = vmul.f32 0.044715, %v4275_v23  ;;  %v8303_v32 = vsel %vm8218_vm13, %v1404_v8, 0.0 }
 0x350   : > { %v4443_v62 = vmul.f32 %v4427_v26, %v8287_v50  ;;  %12335 = vst [vmem:[#allocation219_spill] sm:$0xff] %v8303_v32  ;;  %v4533_v12 = vmul.f32 0.5, %v4517_v34  ;;  %5843 = vtanh.f32 %v4488_v46  ;;  %v4322_v60 = vmul.f32 0.7978846, %v4306_v55  ;;  %v1395_v26 = vpop.f32.mrf.mxu0  ;;  %v12340_v46 = vld [vmem:[#allocation73_spill] sm:$0xff] }
 0x351   : > { %v2227_v52 = vrot.slane %v8284_v3, 6  ;;  %v8309_v2 = vmul.f32 %v12336_v4, %v8284_v3  ;;  %v8312_v45 = vadd.f32 %v7371_v36, %v1392_v30  ;;  %v1892_v23 = vrot.slane %v8303_v32, 5 }
 0x352   : > { %v8315_v8 = vpop.eup %5831  ;;  %5845 = vtanh.f32 %v4321_v41  ;;  %v4490_v34 = vmul.f32 0.7978846, %v4474_v14  ;;  %v8319_v55 = vmul.f32 %v12340_v46, %v8284_v3  ;;  %v4459_v42 = vmul.f32 0.044715, %v4443_v62 }
 0x353   : > { %12337 = vst [vmem:[#allocation220_spill] sm:$0xff] %v8309_v2  ;;  %12338 = vst [vmem:[#allocation221_spill] sm:$0xff] %v8312_v45  ;;  %v4534_v56 = vmul.f32 0.5, %v4518_v43  ;;  %5847 = vtanh.f32 %v4489_v22  ;;  %v8323_v25 = vmul.f32 %v12342_v35, %v8284_v3  ;;  %v4307_v30 = vadd.f32 %v4291_v24, %v8254_v18 }
 0x354   : > { %12339 = vst [vmem:[#allocation222_spill] sm:$0xff] %v8315_v8  ;;  %12341 = vst [vmem:[#allocation223_spill] sm:$0xff] %v8319_v55  ;;  %v8326_v44 = vpop.eup %5833  ;;  %v8329_v2 = vmul.f32 %v4533_v12, %v8046_v39  ;;  %5849 = vtanh.f32 %v4322_v60  ;;  %v1720_v8 = vpop.f32.mrf.mxu1  ;;  %v8337_v22 = vmul.f32 %v12340_v46, %v8312_v45  ;;  %v1921_v43 = vsel %vm1895_vm1, %v1892_v23, %v1878_v15 }
 0x355   : > { %12343 = vst [vmem:[#allocation224_spill] sm:$0xff] %v8323_v25  ;;  %12344 = vst [vmem:[#allocation225_spill] sm:$0xff] %v8326_v44  ;;  %v8333_v62 = vpop.eup %5835  ;;  %v2241_v24 = vrot.slane %v8303_v32, 6  ;;  %v8343_v39 = vadd.f32 %v1718_v49, %v7393_v61  ;;  %v5399_v60 = vpop.f32.mrf.mxu0  ;;  %5851 = vtanh.f32 %v4490_v34  ;;  %v8349_v41 = vmul.f32 %v12342_v35, %v8312_v45 }
 0x356   : > { %12345 = vst [vmem:[#allocation226_spill] sm:$0xff] %v8329_v2  ;;  %12346 = vst [vmem:[#allocation227_spill] sm:$0xff] %v8333_v62  ;;  %v8345_v12 = vpop.eup %5837  ;;  %v4475_v14 = vadd.f32 %v4459_v42, %v8287_v50  ;;  %v8353_v25 = vadd.f32 %v7371_v36, %v1395_v26  ;;  %v4323_v2 = vmul.f32 0.7978846, %v4307_v30  ;;  %v1907_v49 = vsel %vm1895_vm1, %v1878_v15, %v1892_v23  ;;  %v12360_v50 = vld [vmem:[#allocation75_spill] sm:$0xff] }
 0x357   : > { %12347 = vst [vmem:[#allocation228_spill] sm:$0xff] %v8337_v22  ;;  %12348 = vst [vmem:[#allocation229_spill] sm:$0xff] %v8343_v39  ;;  %v8356_v22 = vmul.f32 %v4534_v56, %v8098_v6  ;;  %v8361_v18 = vadd.f32 %v1720_v8, %v7401_v63  ;;  %v2590_v42 = vrot.slane %v8303_v32, 7  ;;  %v8370_v36 = vmul.f32 %v12336_v4, %v8303_v32  ;;  %v8375_v6 = vld [vmem:[%s12146_s8] ss:$0 sm:$0xff] }
 0x358   : > { %12349 = vst [vmem:[#allocation230_spill] sm:$0xff] %v8345_v12  ;;  %12350 = vst [vmem:[#allocation231_spill] sm:$0xff] %v8349_v41  ;;  %v8363_v34 = vpop.eup %5839  ;;  %v1958_v41 = vsel %vm1926_vm3, %v1921_v43, 0.0  ;;  %v1417_v15 = vadd.f32 %v8375_v6, %v5399_v60  ;;  %v2270_v56 = vsel %vm2244_vm2, %v2241_v24, %v2227_v52  ;;  %v8382_v23 = vmul.f32 %v12340_v46, %v8303_v32  ;;  %v12362_v60 = vld [vmem:[#allocation76_spill] sm:$0xff] }
 0x359   : > { %12351 = vst [vmem:[#allocation232_spill] sm:$0xff] %v8353_v25  ;;  %12352 = vst [vmem:[#allocation233_spill] sm:$0xff] %v8356_v22  ;;  %v8386_v26 = vmul.f32 %v12342_v35, %v8303_v32  ;;  %v4260_v8 = vmul.f32 %v8343_v39, %v8343_v39  ;;  %v4491_v43 = vmul.f32 0.7978846, %v4475_v14  ;;  %v8396_v22 = vmul.f32 %v12362_v60, %v1907_v49  ;;  %v1724_v14 = vpop.f32.mrf.mxu1 }
 0x35a   : > { %12353 = vst [vmem:[#allocation234_spill] sm:$0xff] %v8361_v18  ;;  %12354 = vst [vmem:[#allocation235_spill] sm:$0xff] %v8363_v34  ;;  %v8390_v30 = vpop.eup %5841  ;;  %v8393_v34 = vmul.f32 %v12360_v50, %v1907_v49  ;;  %v2256_v62 = vsel %vm2244_vm2, %v2227_v52, %v2241_v24  ;;  %5853 = vtanh.f32 %v4323_v2  ;;  %v8401_v44 = vmul.f32 %v12360_v50, %v1958_v41 }
 0x35b   : > { %12356 = vst [vmem:[#allocation47_spill] sm:$0xff] %v8370_v36  ;;  %12357 = vst [vmem:[#allocation236_spill] sm:$0xff] %v8382_v23  ;;  %v12366_v23 = vld [vmem:[#allocation82_spill] sm:$0xff]  ;;  %v12368_v36 = vrot.slane %v8284_v3, 7  ;;  %v3229_v52 = vrot.slane %v8303_v32, 1  ;;  %v4276_v2 = vmul.f32 %v4260_v8, %v8343_v39  ;;  %5855 = vtanh.f32 %v4491_v43 }
 0x35c   : > { %12358 = vst [vmem:[#allocation237_spill] sm:$0xff] %v8386_v26  ;;  %12359 = vst [vmem:[#allocation238_spill] sm:$0xff] %v8390_v30  ;;  %v8404_v26 = vmul.f32 %v12362_v60, %v1958_v41  ;;  %v8407_v55 = vmul.f32 %v12366_v23, %v1958_v41  ;;  %v2307_v30 = vsel %vm2275_vm5, %v2270_v56, 0.0  ;;  %v8420_v5 = vmul.f32 %v12366_v23, %v1907_v49  ;;  %v12371_v41 = vld [vmem:[#allocation77_spill] sm:$0xff]  ;;  %v1726_v60 = vpop.f32.mrf.mxu1 }
 0x35d   : > { %12361 = vst [vmem:[#allocation239_spill] sm:$0xff] %v8393_v34  ;;  %12363 = vst [vmem:[#allocation240_spill] sm:$0xff] %v8396_v22  ;;  %v2619_v4 = vsel %vm2593_vm6, %v2590_v42, %v12368_v36  ;;  %v8417_v24 = vpop.eup %5843  ;;  %v8423_v40 = vmul.f32 %v12371_v41, %v2256_v62  ;;  %v12375_v56 = vmov %v12368_v36  ;;  %v12376_v22 = vld [vmem:[#allocation85_spill] sm:$0xff]  ;;  %v4428_v8 = vmul.f32 %v8361_v18, %v8361_v18 }
 0x35e   : > { %12364 = vst [vmem:[#allocation241_spill] sm:$0xff] %v8401_v44  ;;  %12365 = vst [vmem:[#allocation242_spill] sm:$0xff] %v8404_v26  ;;  %v2605_v36 = vsel %vm2593_vm6, %v12375_v56, %v2590_v42  ;;  %v8433_v26 = vmul.f32 %v12376_v22, %v2256_v62  ;;  %v8438_v49 = vadd.f32 %v1724_v14, %v7393_v61  ;;  %v12384_v56 = vld [vmem:[#allocation81_spill] sm:$0xff]  ;;  %v1891_v16 = vrot.slane %v8353_v25, 5 }
 0x35f   : > { %12367 = vst [vmem:[#allocation243_spill] sm:$0xff] %v8407_v55  ;;  %12369 = vst [vmem:[#allocation244_spill] sm:$0xff] %v8417_v24  ;;  %v8426_v55 = vmul.f32 %v12373_v53, %v2256_v62  ;;  %v1408_v24 = vpop.f32.mrf.mxu0  ;;  %v8449_v42 = vmul.f32 %v12376_v22, %v2307_v30  ;;  %v2656_v62 = vsel %vm2624_vm8, %v2619_v4, 0.0  ;;  %v8456_v14 = vmul.f32 %v12384_v56, %v2605_v36 }
 0x360   : > { %12370 = vst [vmem:[#allocation245_spill] sm:$0xff] %v8420_v5  ;;  %12372 = vst [vmem:[#allocation246_spill] sm:$0xff] %v8423_v40  ;;  %v8440_v40 = vpop.eup %5845  ;;  %v8446_v5 = vmul.f32 %v12373_v53, %v2307_v30  ;;  %v4444_v53 = vmul.f32 %v4428_v8, %v8361_v18  ;;  %v8475_v34 = vmul.f32 %v12384_v56, %v2656_v62  ;;  %v12395_v8 = vrot.slane %v8284_v3, 1 }
 0x361   : > { %12374 = vst [vmem:[#allocation247_spill] sm:$0xff] %v8426_v55  ;;  %12377 = vst [vmem:[#allocation248_spill] sm:$0xff] %v8433_v26  ;;  %v8443_v55 = vmul.f32 %v12371_v41, %v2307_v30  ;;  %v8453_v43 = vpop.eup %5847  ;;  %v12386_v26 = vrot.slane %v8284_v3, 1  ;;  %v12388_v30 = vld [vmem:[#allocation83_spill] sm:$0xff]  ;;  %v12390_v41 = vld [vmem:[#allocation86_spill] sm:$0xff]  ;;  %v8500_v3 = vmul.f32 %v12342_v35, %v8353_v25 }
 0x362   : > { %12378 = vst [vmem:[#allocation249_spill] sm:$0xff] %v8438_v49  ;;  %12379 = vst [vmem:[#allocation250_spill] sm:$0xff] %v8440_v40  ;;  %v8469_v4 = vmul.f32 %v12390_v41, %v2605_v36 }
 0x363   : > { %12380 = vst [vmem:[#allocation251_spill] sm:$0xff] %v8443_v55  ;;  %12381 = vst [vmem:[#allocation252_spill] sm:$0xff] %v8446_v5  ;;  %v3258_v40 = vsel %vm3232_vm7, %v3229_v52, %v12386_v26  ;;  %v4292_v55 = vmul.f32 0.044715, %v4276_v2  ;;  %v8463_v5 = vpop.eup %5849  ;;  %v8478_v26 = vmul.f32 %v12388_v30, %v2656_v62  ;;  %v8481_v2 = vmul.f32 %v12390_v41, %v2656_v62 }
 0x364   : > { %12382 = vst [vmem:[#allocation253_spill] sm:$0xff] %v8449_v42  ;;  %12383 = vst [vmem:[#allocation254_spill] sm:$0xff] %v8453_v43  ;;  %v8466_v42 = vmul.f32 %v12388_v30, %v2605_v36  ;;  %v3244_v36 = vsel %vm3232_vm7, %v12395_v8, %v3229_v52  ;;  %v8487_v43 = vpop.eup %5851  ;;  %v3296_v32 = vsel %vm3266_vm9, %v3258_v40, 0.0  ;;  %v1409_v62 = vadd.f32 %v8375_v6, %v1408_v24 }
 0x365   : > { %12385 = vst [vmem:[#allocation255_spill] sm:$0xff] %v8456_v14  ;;  %12387 = vst [vmem:[#allocation256_spill] sm:$0xff] %v8463_v5  ;;  %v4261_v14 = vmul.f32 %v8438_v49, %v8438_v49  ;;  %v5400_v5 = vpop.f32.mrf.mxu0  ;;  %v4460_v52 = vmul.f32 0.044715, %v4444_v53  ;;  %v8503_v8 = vadd.f32 %v1726_v60, %v7401_v63  ;;  %v12407_v60 = vld [vmem:[#allocation88_spill] sm:$0xff] }
 0x366   : > { %12389 = vst [vmem:[#allocation257_spill] sm:$0xff] %v8466_v42  ;;  %12391 = vst [vmem:[#allocation258_spill] sm:$0xff] %v8469_v4  ;;  %v8493_v4 = vmul.f32 %v12340_v46, %v8353_v25 }
 0x367   : > { %12392 = vst [vmem:[#allocation259_spill] sm:$0xff] %v8475_v34  ;;  %12393 = vst [vmem:[#allocation260_spill] sm:$0xff] %v8478_v26  ;;  %v4277_v42 = vmul.f32 %v4261_v14, %v8438_v49  ;;  %v12402_v26 = vld [vmem:[#allocation87_spill] sm:$0xff]  ;;  %v8513_v14 = vsel %vm8218_vm13, %v1417_v15, 0.0  ;;  %v8532_v15 = vsel %vm8218_vm13, %v1409_v62, 0.0 }
 0x368   : > { %12394 = vst [vmem:[#allocation261_spill] sm:$0xff] %v8481_v2  ;;  %12396 = vst [vmem:[#allocation262_spill] sm:$0xff] %v8487_v43  ;;  %v4308_v2 = vadd.f32 %v4292_v55, %v8343_v39  ;;  %v12400_v43 = vld [vmem:[#allocation84_spill] sm:$0xff]  ;;  %v8509_v30 = vmul.f32 %v12402_v26, %v3244_v36  ;;  %v1420_v55 = vadd.f32 %v8375_v6, %v5400_v5 }
 0x369   : > { %12397 = vst [vmem:[#allocation263_spill] sm:$0xff] %v8493_v4  ;;  %12398 = vst [vmem:[#allocation264_spill] sm:$0xff] %v8500_v3  ;;  %v8506_v40 = vmul.f32 %v12400_v43, %v3244_v36  ;;  %v8517_v24 = vmul.f32 %v12400_v43, %v3296_v32  ;;  %v8520_v53 = vmul.f32 %v12402_v26, %v3296_v32  ;;  %v4293_v63 = vmul.f32 0.044715, %v4277_v42 }
 0x36a   : > { %12399 = vst [vmem:[#allocation265_spill] sm:$0xff] %v8503_v8  ;;  %12403 = vst [vmem:[#allocation267_spill] sm:$0xff] %v8509_v30  ;;  %v8523_v4 = vmul.f32 %v12407_v60, %v3244_v36  ;;  %v4429_v3 = vmul.f32 %v8503_v8, %v8503_v8  ;;  %v8528_v39 = vmul.f32 %v12407_v60, %v3296_v32  ;;  %v8536_v5 = vsel %vm8218_vm13, %v1420_v55, 0.0  ;;  %v8538_v30 = vpop.eup %5853 }
 0x36b   : > { %12401 = vst [vmem:[#allocation266_spill] sm:$0xff] %v8506_v40  ;;  %12404 = vst [vmem:[#allocation268_spill] sm:$0xff] %v8513_v14  ;;  %v4476_v36 = vadd.f32 %v4460_v52, %v8361_v18  ;;  %v2229_v43 = vrot.slane %v8513_v14, 6  ;;  %v2578_v32 = vrot.slane %v8513_v14, 7  ;;  %v8546_v42 = vmul.f32 %v12342_v35, %v8513_v14  ;;  %v8554_v40 = vpop.eup %5855 }
 0x36c   : > { %12405 = vst [vmem:[#allocation269_spill] sm:$0xff] %v8517_v24  ;;  %12406 = vst [vmem:[#allocation270_spill] sm:$0xff] %v8520_v53  ;;  %v4324_v53 = vmul.f32 0.7978846, %v4308_v2  ;;  %v3566_v55 = vrot.slane %v8513_v14, 2  ;;  %v1411_v24 = vpop.f32.mrf.mxu0  ;;  %v4445_v18 = vmul.f32 %v4429_v3, %v8503_v8  ;;  %v4309_v26 = vadd.f32 %v4293_v63, %v8438_v49 }
 0x36d   : > { %12408 = vst [vmem:[#allocation271_spill] sm:$0xff] %v8523_v4  ;;  %12409 = vst [vmem:[#allocation272_spill] sm:$0xff] %v8528_v39  ;;  %v1880_v4 = vrot.slane %v8513_v14, 5  ;;  %v1728_v39 = vpop.f32.mrf.mxu1  ;;  %v2243_v34 = vrot.slane %v8536_v5, 6  ;;  %v4492_v56 = vmul.f32 0.7978846, %v4476_v36  ;;  %v1412_v52 = vadd.f32 %v8375_v6, %v1411_v24 }
 0x36e   : > { %12410 = vst [vmem:[#allocation273_spill] sm:$0xff] %v8532_v15  ;;  %12411 = vst [vmem:[#allocation274_spill] sm:$0xff] %v8536_v5  ;;  %5857 = vtanh.f32 %v4324_v53  ;;  %v8561_v2 = vadd.f32 %v1728_v39, %v7393_v61  ;;  %v8566_v3 = vmul.f32 %v12340_v46, %v8532_v15  ;;  %v8570_v63 = vmul.f32 %v12342_v35, %v8532_v15  ;;  %v12418_v39 = vld [vmem:[#allocation157_spill] sm:$0xff] }
 0x36f   : > { %12412 = vst [vmem:[#allocation275_spill] sm:$0xff] %v8538_v30  ;;  %12413 = vst [vmem:[#allocation276_spill] sm:$0xff] %v8546_v42  ;;  %v1894_v30 = vrot.slane %v8536_v5, 5  ;;  %v1872_v36 = vrot.slane %v12418_v39, 5  ;;  %v1873_v6 = vrot.slane %v8249_v10, 5  ;;  %v2272_v49 = vsel %vm2244_vm2, %v2243_v34, %v2229_v43 }
 0x370   : > { %12414 = vst [vmem:[#allocation277_spill] sm:$0xff] %v8554_v40  ;;  %12415 = vst [vmem:[#allocation278_spill] sm:$0xff] %v8561_v2  ;;  %v4461_v40 = vmul.f32 0.044715, %v4445_v18  ;;  %v4325_v24 = vmul.f32 0.7978846, %v4309_v26  ;;  %5859 = vtanh.f32 %v4492_v56  ;;  %v8586_v18 = vmul.f32 %v8561_v2, %v8561_v2 }
 0x371   : > { %12416 = vst [vmem:[#allocation279_spill] sm:$0xff] %v8566_v3  ;;  %12417 = vst [vmem:[#allocation280_spill] sm:$0xff] %v8570_v63  ;;  %v1923_v53 = vsel %vm1895_vm1, %v1894_v30, %v1880_v4  ;;  %v2592_v61 = vrot.slane %v8536_v5, 7  ;;  %v3580_v63 = vrot.slane %v8536_v5, 2  ;;  %v1909_v62 = vsel %vm1895_vm1, %v1880_v4, %v1894_v30 }
 0x372   : > { %v8590_v42 = vsel %vm8218_vm13, %v1412_v52, 0.0  ;;  %v1962_v26 = vsel %vm1926_vm3, %v1923_v53, 0.0  ;;  %v3231_v3 = vrot.slane %v8536_v5, 1  ;;  %v4477_v30 = vadd.f32 %v4461_v40, %v8503_v8 }
 0x373   : > { %12419 = vst [vmem:[#allocation281_spill] sm:$0xff] %v8590_v42  ;;  %v8597_v46 = vsel %vm3581_vm4, %v3566_v55, %v3580_v63  ;;  %v8601_v56 = vsel %vm3581_vm4, %v3580_v63, %v3566_v55  ;;  %v2258_v13 = vsel %vm2244_vm2, %v2229_v43, %v2243_v34  ;;  %v2311_v4 = vsel %vm2275_vm5, %v2272_v49, 0.0 }
 0x374   : > { %12420 = vst [vmem:[#allocation282_spill] sm:$0xff] %v8597_v46  ;;  %12421 = vst [vmem:[#allocation283_spill] sm:$0xff] %v8601_v56  ;;  %v8610_v52 = vmul.f32 %v12342_v35, %v8536_v5  ;;  %5861 = vtanh.f32 %v4325_v24  ;;  %v8613_v53 = vmul.f32 %v12366_v23, %v1909_v62  ;;  %v2607_v55 = vsel %vm2593_vm6, %v2578_v32, %v2592_v61 }
 0x375   : > { %v2621_v40 = vsel %vm2593_vm6, %v2592_v61, %v2578_v32  ;;  %v8620_v63 = vmul.f32 %v12366_v23, %v1962_v26  ;;  %v1886_v34 = vrot.slane %v8230_v33, 5  ;;  %v1887_v49 = vrot.slane %v8263_v29, 5  ;;  %v12438_v33 = vld [vmem:[#allocation49_spill] sm:$0xff] }
 0x376   : > { %12422 = vst [vmem:[#allocation284_spill] sm:$0xff] %v8610_v52  ;;  %12423 = vst [vmem:[#allocation285_spill] sm:$0xff] %v8613_v53  ;;  %v1888_v43 = vrot.slane %v8258_v59, 5  ;;  %v8626_v24 = vmul.f32 %v12376_v22, %v2311_v4  ;;  %v8629_v62 = vmul.f32 %v12376_v22, %v2258_v13  ;;  %v12427_v46 = vrot.slane %v8513_v14, 1 }
 0x377   : > { %12424 = vst [vmem:[#allocation286_spill] sm:$0xff] %v8620_v63  ;;  %v1889_v32 = vrot.slane %v8293_v47, 5  ;;  %v8638_v26 = vmul.f32 0.7978846, %v4477_v30  ;;  %v8642_v8 = vsel %vm2624_vm8, %v2621_v40, 0.0  ;;  %v8645_v4 = vmul.f32 %v12390_v41, %v2607_v55 }
 0x378   : > { %12425 = vst [vmem:[#allocation287_spill] sm:$0xff] %v8626_v24  ;;  %12426 = vst [vmem:[#allocation288_spill] sm:$0xff] %v8629_v62  ;;  %v8635_v61 = vsel %vm3232_vm7, %v12427_v46, %v3231_v3  ;;  %v1874_v13 = vrot.slane %v8234_v11, 5  ;;  %v1875_v52 = vrot.slane %v8272_v48, 5  ;;  %v1876_v35 = vrot.slane %v8268_v27, 5 }
 0x379   : > { %12428 = vst [vmem:[#allocation289_spill] sm:$0xff] %v8645_v4  ;;  %v1890_v46 = vrot.slane %v8280_v37, 5  ;;  %v12429_v56 = vrot.slane %v7953_v1, 5  ;;  %v12430_v30 = vrot.slane %v8199_v7, 5  ;;  %v1915_v62 = vsel %vm1895_vm1, %v1886_v34, %v1872_v36  ;;  %v5886_v27 = vld [vmem:[%s12187_s27] ss:$0 sm:$0xff] }
 0x37a   : > { %v1916_v24 = vsel %vm1895_vm1, %v1887_v49, %v1873_v6  ;;  %v1917_v22 = vsel %vm1895_vm1, %v1888_v43, %v1874_v13  ;;  %v4278_v58 = vmul.f32 %v8586_v18, %v8561_v2  ;;  %5863 = vtanh.f32 %v8638_v26 }
 0x37b   : > { %v1914_v31 = vsel %vm1895_vm1, %v12430_v30, %v12429_v56  ;;  %v12431_v40 = vmov %v12430_v30  ;;  %v12432_v55 = vmov %v12429_v56  ;;  %v8671_v5 = vpop.eup %5857  ;;  %v8675_v56 = vsel %vm1895_vm1, %v1872_v36, %v1886_v34 }
 0x37c   : > { %v8663_v4 = vsel %vm1895_vm1, %v12432_v55, %v12431_v40  ;;  %12433 = vst [vmem:[#allocation290_spill] sm:$0xff] %v8671_v5  ;;  %v8679_v30 = vsel %vm1895_vm1, %v1873_v6, %v1887_v49  ;;  %v8683_v40 = vsel %vm1895_vm1, %v1874_v13, %v1888_v43  ;;  %v1918_v55 = vsel %vm1895_vm1, %v1889_v32, %v1875_v52 }
 0x37d   : > { %v8689_v17 = vsel %vm1926_vm3, %v1914_v31, 0.0  ;;  %v8693_v5 = vsel %vm1926_vm3, %v1915_v62, 0.0  ;;  %v8697_v36 = vsel %vm1926_vm3, %v1916_v24, 0.0  ;;  %v8701_v6 = vsel %vm1926_vm3, %v1917_v22, 0.0  ;;  %v12435_v22 = vld [vmem:[#allocation48_spill] sm:$0xff] }
 0x37e   : > { %v12434_v34 = vrot.slane %v8513_v14, 1  ;;  %v8711_v31 = vsel %vm1895_vm1, %v1875_v52, %v1889_v32  ;;  %v1919_v43 = vsel %vm1895_vm1, %v1890_v46, %v1876_v35  ;;  %v8717_v24 = vsel %vm1926_vm3, %v1918_v55, 0.0  ;;  %v8727_v32 = vpop.eup %5859 }
 0x37f   : > { %v1976_v62 = vmul.f32 %v12435_v22, %v8689_v17  ;;  %v1977_v13 = vmul.f32 %v12435_v22, %v8663_v4  ;;  %v1979_v52 = vmul.f32 %v12435_v22, %v8675_v56  ;;  %12436 = vst [vmem:[#allocation48_spill] sm:$0xff] %v8727_v32  ;;  %v1981_v55 = vmul.f32 %v12435_v22, %v8679_v30 }
 0x380   : > { %v8707_v49 = vsel %vm3232_vm7, %v3231_v3, %v12434_v34  ;;  %v1978_v3 = vmul.f32 %v12435_v22, %v8693_v5  ;;  %v1980_v34 = vmul.f32 %v12435_v22, %v8697_v36  ;;  %v1982_v14 = vmul.f32 %v12435_v22, %v8701_v6 }
 0x381   : > { %v1983_v37 = vmul.f32 %v12435_v22, %v8683_v40  ;;  %v1992_v48 = vadd.f32 %v5886_v27, %v1976_v62  ;;  %v1993_v47 = vadd.f32 %v5886_v27, %v1977_v13  ;;  %v1995_v32 = vadd.f32 %v5886_v27, %v1979_v52  ;;  %v8740_v29 = vpop.eup %5861 }
 0x382   : > { %v1994_v11 = vadd.f32 %v5886_v27, %v1978_v3  ;;  %v1996_v10 = vadd.f32 %v5886_v27, %v1980_v34  ;;  %v1997_v39 = vadd.f32 %v5886_v27, %v1981_v55  ;;  %v1998_v1 = vadd.f32 %v5886_v27, %v1982_v14  ;;  %12437 = vst [vmem:[#allocation291_spill] sm:$0xff] %v8740_v29 }
 0x383   : > { %v1999_v59 = vadd.f32 %v5886_v27, %v1983_v37  ;;  %v2010_v7 = vmul.f32 %v12438_v33, %v8689_v17  ;;  %v2011_v22 = vmul.f32 %v12438_v33, %v8663_v4  ;;  %v2012_v53 = vmul.f32 %v12438_v33, %v8693_v5 }
 0x384   : > { %v2013_v62 = vmul.f32 %v12438_v33, %v8675_v56  ;;  %v2014_v13 = vmul.f32 %v12438_v33, %v8697_v36  ;;  %v2015_v27 = vmul.f32 %v12438_v33, %v8679_v30  ;;  %v2016_v37 = vmul.f32 %v12438_v33, %v8701_v6 }
 0x385   : > { %v2017_v14 = vmul.f32 %v12438_v33, %v8683_v40  ;;  %v2018_v3 = vmul.f32 %v12438_v33, %v8717_v24  ;;  %v2019_v52 = vmul.f32 %v12438_v33, %v8711_v31  ;;  %v2026_v34 = vadd.f32 %v2010_v7, %v7972_v9 }
 0x386   : > { %v2027_v55 = vadd.f32 %v2011_v22, %v7975_v20  ;;  %v2028_v29 = vadd.f32 %v2012_v53, %v1992_v48  ;;  %v2029_v63 = vadd.f32 %v2013_v62, %v1993_v47  ;;  %v2030_v23 = vadd.f32 %v2014_v13, %v1994_v11 }
 0x387   : > { %v2031_v44 = vadd.f32 %v2015_v27, %v1995_v32  ;;  %v2032_v57 = vadd.f32 %v2016_v37, %v1996_v10  ;;  %v2033_v28 = vadd.f32 %v2017_v14, %v1997_v39  ;;  %v2034_v50 = vadd.f32 %v2018_v3, %v1998_v1 }
 0x388   : > { %v2035_v54 = vadd.f32 %v2019_v52, %v1999_v59  ;;  %v8769_v33 = vsel %vm1895_vm1, %v1876_v35, %v1890_v46  ;;  %v8773_v9 = vsel %vm1926_vm3, %v1919_v43, 0.0  ;;  %v2046_v20 = vmul.f32 %v7420_v19, %v8693_v5 }
 0x389   : > { %v2047_v1 = vmul.f32 %v7420_v19, %v8675_v56  ;;  %v2048_v7 = vmul.f32 %v7420_v19, %v8697_v36  ;;  %v2049_v11 = vmul.f32 %v7420_v19, %v8679_v30  ;;  %v2050_v35 = vmul.f32 %v7420_v19, %v8701_v6 }
 0x38a   : > { %v2051_v10 = vmul.f32 %v7420_v19, %v8683_v40  ;;  %v2052_v59 = vmul.f32 %v7420_v19, %v8717_v24  ;;  %v2053_v48 = vmul.f32 %v7420_v19, %v8711_v31  ;;  %v2054_v47 = vmul.f32 %v7420_v19, %v8773_v9 }
 0x38b   : > { %v2055_v39 = vmul.f32 %v7420_v19, %v8769_v33  ;;  %v2062_v18 = vadd.f32 %v2046_v20, %v2026_v34  ;;  %v2063_v53 = vadd.f32 %v2047_v1, %v2027_v55  ;;  %v2064_v46 = vadd.f32 %v2048_v7, %v2028_v29 }
 0x38c   : > { %v2065_v43 = vadd.f32 %v2049_v11, %v2029_v63  ;;  %v2066_v32 = vadd.f32 %v2050_v35, %v2030_v23  ;;  %v2067_v22 = vadd.f32 %v2051_v10, %v2031_v44  ;;  %v2068_v62 = vadd.f32 %v2052_v59, %v2032_v57 }
 0x38d   : > { %v2069_v13 = vadd.f32 %v2053_v48, %v2033_v28  ;;  %v2070_v27 = vadd.f32 %v2054_v47, %v2034_v50  ;;  %v2071_v37 = vadd.f32 %v2055_v39, %v2035_v54  ;;  %v8797_v14 = vmul.f32 %v12390_v41, %v8642_v8  ;;  %v12453_v41 = vld [vmem:[#allocation239_spill] sm:$0xff] }
 0x38e   : > { %v3300_v3 = vsel %vm3266_vm9, %v8707_v49, 0.0  ;;  %v8804_v52 = vmul.f32 %v12407_v60, %v8635_v61  ;;  %v1893_v29 = vrot.slane %v8590_v42, 5  ;;  %v1877_v28 = vrot.slane %v8312_v45, 5 }
 0x38f   : > { %12439 = vst [vmem:[#allocation49_spill] sm:$0xff] %v8797_v14  ;;  %v2082_v54 = vmul.f32 %v7423_v38, %v8697_v36  ;;  %v2083_v57 = vmul.f32 %v7423_v38, %v8679_v30  ;;  %v4294_v44 = vmul.f32 0.044715, %v4278_v58  ;;  %v2044_v50 = vmul.f32 %v7420_v19, %v8689_v17 }
 0x390   : > { %12440 = vst [vmem:[#allocation292_spill] sm:$0xff] %v8804_v52  ;;  %v2086_v23 = vmul.f32 %v7423_v38, %v8717_v24  ;;  %v2087_v8 = vmul.f32 %v7423_v38, %v8711_v31  ;;  %v1920_v63 = vsel %vm1895_vm1, %v1891_v16, %v1877_v28  ;;  %v2045_v61 = vmul.f32 %v7420_v19, %v8663_v4 }
 0x391   : > { %v2084_v26 = vmul.f32 %v7423_v38, %v8701_v6  ;;  %v2085_v58 = vmul.f32 %v7423_v38, %v8683_v40  ;;  %v12441_v49 = vrot.slane %v8532_v15, 5  ;;  %v2078_v55 = vmul.f32 %v7423_v38, %v8689_v17 }
 0x392   : > { %v2098_v20 = vadd.f32 %v2082_v54, %v2062_v18  ;;  %v2099_v1 = vadd.f32 %v2083_v57, %v2063_v53  ;;  %v2102_v35 = vadd.f32 %v2086_v23, %v2066_v32  ;;  %v2103_v19 = vadd.f32 %v2087_v8, %v2067_v22  ;;  %v12446_v54 = vld [vmem:[#allocation162_spill] sm:$0xff]  ;;  %v12448_v8 = vld [vmem:[#allocation75_spill] sm:$0xff] }
 0x393   : > { %v1922_v34 = vsel %vm1895_vm1, %v1893_v29, %v12441_v49  ;;  %v2100_v7 = vadd.f32 %v2084_v26, %v2064_v46  ;;  %v2101_v11 = vadd.f32 %v2085_v58, %v2065_v43  ;;  %v8835_v10 = vsel %vm1895_vm1, %v1877_v28, %v1891_v16  ;;  %v12445_v46 = vld [vmem:[#allocation160_spill] sm:$0xff] }
 0x394   : > { %v8839_v59 = vsel %vm1926_vm3, %v1920_v63, 0.0  ;;  %v2060_v48 = vadd.f32 %v2044_v50, %v7988_v21  ;;  %v2079_v47 = vmul.f32 %v7423_v38, %v8663_v4  ;;  %v8845_v39 = vmul.f32 %v12407_v60, %v3300_v3 }
 0x395   : > { %v8848_v18 = vadd.f32 %v4294_v44, %v8561_v2  ;;  %v12444_v53 = vmov %v12441_v49  ;;  %v2061_v43 = vadd.f32 %v2045_v61, %v12445_v46  ;;  %v8859_v21 = vsel %vm1926_vm3, %v1922_v34, 0.0  ;;  %v12447_v44 = vld [vmem:[#allocation161_spill] sm:$0xff] }
 0x396   : > { %12442 = vst [vmem:[#allocation293_spill] sm:$0xff] %v8845_v39  ;;  %v8854_v16 = vsel %vm1895_vm1, %v12444_v53, %v1893_v29  ;;  %v2080_v32 = vmul.f32 %v7423_v38, %v8693_v5  ;;  %v2081_v22 = vmul.f32 %v7423_v38, %v8675_v56  ;;  %v2088_v3 = vmul.f32 %v7423_v38, %v8773_v9 }
 0x397   : > { %12443 = vst [vmem:[#allocation294_spill] sm:$0xff] %v8848_v18  ;;  %v2089_v28 = vmul.f32 %v7423_v38, %v8769_v33  ;;  %v2090_v29 = vmul.f32 %v7423_v38, %v8839_v59  ;;  %v2091_v12 = vmul.f32 %v7423_v38, %v8835_v10  ;;  %v2094_v57 = vadd.f32 %v2078_v55, %v12446_v54 }
 0x398   : > { %v2095_v50 = vadd.f32 %v2079_v47, %v12447_v44  ;;  %v2096_v23 = vadd.f32 %v2080_v32, %v2060_v48  ;;  %v2118_v63 = vmul.f32 %v12448_v8, %v8701_v6  ;;  %v2119_v61 = vmul.f32 %v12448_v8, %v8683_v40 }
 0x399   : > { %v2097_v26 = vadd.f32 %v2081_v22, %v2061_v43  ;;  %v2104_v58 = vadd.f32 %v2088_v3, %v2068_v62  ;;  %v2105_v49 = vadd.f32 %v2089_v28, %v2069_v13  ;;  %v2112_v34 = vmul.f32 %v12448_v8, %v8689_v17  ;;  %v8891_v13 = vpop.eup %5863  ;;  %v12450_v3 = vld [vmem:[#allocation163_spill] sm:$0xff] }
 0x39a   : > { %v2113_v38 = vmul.f32 %v12448_v8, %v8663_v4  ;;  %v2116_v55 = vmul.f32 %v12448_v8, %v8697_v36  ;;  %v2134_v47 = vadd.f32 %v2118_v63, %v2098_v20  ;;  %v2135_v48 = vadd.f32 %v2119_v61, %v2099_v1  ;;  %12449 = vst [vmem:[#allocation160_spill] sm:$0xff] %v8891_v13 }
 0x39b   : > { %v2106_v53 = vadd.f32 %v2090_v29, %v2070_v27  ;;  %v2117_v46 = vmul.f32 %v12448_v8, %v8679_v30  ;;  %v2120_v43 = vmul.f32 %v12448_v8, %v8717_v24  ;;  %v2121_v62 = vmul.f32 %v12448_v8, %v8711_v31  ;;  %v12451_v29 = vld [vmem:[#allocation165_spill] sm:$0xff] }
 0x39c   : > { %v2114_v17 = vmul.f32 %v12448_v8, %v8693_v5  ;;  %v2115_v4 = vmul.f32 %v12448_v8, %v8675_v56  ;;  %v2124_v27 = vmul.f32 %v12448_v8, %v8839_v59  ;;  %v2125_v20 = vmul.f32 %v12448_v8, %v8835_v10 }
 0x39d   : > { %v2107_v1 = vadd.f32 %v2091_v12, %v2071_v37  ;;  %v2122_v32 = vmul.f32 %v12448_v8, %v8773_v9  ;;  %v2123_v22 = vmul.f32 %v12448_v8, %v8769_v33  ;;  %v2128_v28 = vadd.f32 %v2112_v34, %v12450_v3  ;;  %v12452_v12 = vld [vmem:[#allocation241_spill] sm:$0xff]  ;;  %v12454_v8 = vld [vmem:[#allocation76_spill] sm:$0xff]  ;;  %v12455_v3 = vld [vmem:[#allocation242_spill] sm:$0xff] }
 0x39e   : > { %v2129_v54 = vadd.f32 %v2113_v38, %v12451_v29  ;;  %v2130_v44 = vadd.f32 %v2114_v17, %v2094_v57  ;;  %v2131_v63 = vadd.f32 %v2115_v4, %v2095_v50  ;;  %v2132_v61 = vadd.f32 %v2116_v55, %v2096_v23 }
 0x39f   : > { %v2133_v13 = vadd.f32 %v2117_v46, %v2097_v26  ;;  %v2136_v2 = vadd.f32 %v2120_v43, %v2100_v7  ;;  %v2137_v60 = vadd.f32 %v2121_v62, %v2101_v11  ;;  %v2138_v39 = vadd.f32 %v2122_v32, %v2102_v35 }
 0x3a0   : > { %v2139_v52 = vadd.f32 %v2123_v22, %v2103_v19  ;;  %v2140_v0 = vadd.f32 %v2124_v27, %v2104_v58  ;;  %v2141_v37 = vadd.f32 %v2125_v20, %v2105_v49  ;;  %v2142_v14 = vadd.f32 %v12452_v12, %v2106_v53  ;;  %v12456_v12 = vld [vmem:[#allocation82_spill] sm:$0xff] }
 0x3a1   : > { %v2143_v15 = vadd.f32 %v12453_v41, %v2107_v1  ;;  %v2148_v18 = vmul.f32 %v12454_v8, %v8693_v5  ;;  %v2150_v34 = vmul.f32 %v12454_v8, %v8697_v36  ;;  %v2151_v57 = vmul.f32 %v12454_v8, %v8679_v30 }
 0x3a2   : > { %v2149_v7 = vmul.f32 %v12454_v8, %v8675_v56  ;;  %v2154_v11 = vmul.f32 %v12454_v8, %v8717_v24  ;;  %v2162_v35 = vmul.f32 %v12454_v8, %v8859_v21  ;;  %v2163_v41 = vmul.f32 %v12454_v8, %v8854_v16 }
 0x3a3   : > { %v2152_v5 = vmul.f32 %v12454_v8, %v8701_v6  ;;  %v2153_v19 = vmul.f32 %v12454_v8, %v8683_v40  ;;  %v2155_v50 = vmul.f32 %v12454_v8, %v8711_v31  ;;  %v2158_v56 = vmul.f32 %v12454_v8, %v8839_v59 }
 0x3a4   : > { %v2156_v23 = vmul.f32 %v12454_v8, %v8773_v9  ;;  %v2157_v26 = vmul.f32 %v12454_v8, %v8769_v33  ;;  %v2159_v58 = vmul.f32 %v12454_v8, %v8835_v10  ;;  %v2164_v49 = vadd.f32 %v2148_v18, %v2128_v28  ;;  %v12457_v28 = vld [vmem:[#allocation240_spill] sm:$0xff] }
 0x3a5   : > { %v2165_v38 = vadd.f32 %v2149_v7, %v2129_v54  ;;  %v2166_v55 = vadd.f32 %v2150_v34, %v2130_v44  ;;  %v2167_v53 = vadd.f32 %v2151_v57, %v2131_v63  ;;  %v2168_v46 = vadd.f32 %v2152_v5, %v2132_v61  ;;  %v12461_v61 = vld [vmem:[#allocation206_spill] sm:$0xff]  ;;  %v12462_v8 = vld [vmem:[#allocation212_spill] sm:$0xff] }
 0x3a6   : > { %v2169_v43 = vadd.f32 %v2153_v19, %v2133_v13  ;;  %v2170_v62 = vadd.f32 %v2154_v11, %v2134_v47  ;;  %v2178_v17 = vadd.f32 %v2162_v35, %v2142_v14  ;;  %v2179_v4 = vadd.f32 %v2163_v41, %v2143_v15  ;;  %v12464_v11 = vld [vmem:[#allocation159_spill] sm:$0xff]  ;;  %v12465_v41 = vld [vmem:[#allocation157_spill] sm:$0xff] }
 0x3a7   : > { %v2171_v27 = vadd.f32 %v2155_v50, %v2135_v48  ;;  %v2172_v20 = vadd.f32 %v2156_v23, %v2136_v2  ;;  %v2173_v1 = vadd.f32 %v2157_v26, %v2137_v60  ;;  %v2174_v32 = vadd.f32 %v2158_v56, %v2138_v39  ;;  %v12466_v50 = vld [vmem:[#allocation243_spill] sm:$0xff]  ;;  %v12467_v23 = vld [vmem:[#allocation209_spill] sm:$0xff] }
 0x3a8   : > { %v2175_v22 = vadd.f32 %v2159_v58, %v2139_v52  ;;  %v2176_v29 = vadd.f32 %v12455_v3, %v2140_v0  ;;  %v2184_v42 = vmul.f32 %v12456_v12, %v8697_v36  ;;  %v2185_v18 = vmul.f32 %v12456_v12, %v8679_v30  ;;  %v12458_v36 = vld [vmem:[#allocation286_spill] sm:$0xff]  ;;  %v12459_v30 = vld [vmem:[#allocation285_spill] sm:$0xff]  ;;  %v12468_v58 = vld [vmem:[#allocation207_spill] sm:$0xff] }
 0x3a9   : > { %v2177_v54 = vadd.f32 %v12457_v28, %v2141_v37  ;;  %v2186_v47 = vmul.f32 %v12456_v12, %v8701_v6  ;;  %v2187_v15 = vmul.f32 %v12456_v12, %v8683_v40  ;;  %v2188_v60 = vmul.f32 %v12456_v12, %v8717_v24  ;;  %v12472_v3 = vld [vmem:[#allocation213_spill] sm:$0xff] }
 0x3aa   : > { %v2189_v0 = vmul.f32 %v12456_v12, %v8711_v31  ;;  %v2190_v2 = vmul.f32 %v12456_v12, %v8773_v9  ;;  %v8954_v14 = vadd.f32 %v12458_v36, %v2178_v17  ;;  %v8957_v52 = vadd.f32 %v12459_v30, %v2179_v4  ;;  %v12470_v17 = vld [vmem:[#allocation218_spill] sm:$0xff] }
 0x3ab   : > { %v2191_v6 = vmul.f32 %v12456_v12, %v8769_v33  ;;  %v2192_v40 = vmul.f32 %v12456_v12, %v8839_v59  ;;  %v2193_v24 = vmul.f32 %v12456_v12, %v8835_v10  ;;  %v2196_v31 = vmul.f32 %v12456_v12, %v8859_v21  ;;  %v12460_v59 = vld [vmem:[#allocation202_spill] sm:$0xff] }
 0x3ac   : > { %v2197_v9 = vmul.f32 %v12456_v12, %v8854_v16  ;;  %v8969_v39 = vadd.f32 %v2184_v42, %v2164_v49  ;;  %v8971_v48 = vadd.f32 %v2185_v18, %v2165_v38  ;;  %v8973_v13 = vadd.f32 %v2186_v47, %v2166_v55  ;;  %v12463_v16 = vld [vmem:[#allocation211_spill] sm:$0xff]  ;;  %v12469_v38 = vld [vmem:[#allocation245_spill] sm:$0xff] }
 0x3ad   : > { %v8975_v44 = vadd.f32 %v2187_v15, %v2167_v53  ;;  %v8977_v33 = vadd.f32 %v2188_v60, %v2168_v46  ;;  %v2234_v63 = vrot.slane %v12460_v59, 6  ;;  %v2235_v10 = vrot.slane %v12461_v61, 6  ;;  %v12473_v12 = vld [vmem:[#allocation215_spill] sm:$0xff] }
 0x3ae   : > { %v8981_v37 = vadd.f32 %v2189_v0, %v2169_v43  ;;  %v2206_v21 = vadd.f32 %v2190_v2, %v2170_v62  ;;  %v2236_v34 = vrot.slane %v12462_v8, 6  ;;  %v2237_v42 = vrot.slane %v12463_v16, 6 }
 0x3af   : > { %v2207_v57 = vadd.f32 %v2191_v6, %v2171_v27  ;;  %v2208_v7 = vadd.f32 %v2192_v40, %v2172_v20  ;;  %v2220_v35 = vrot.slane %v12464_v11, 6  ;;  %v2221_v5 = vrot.slane %v12465_v41, 6  ;;  %v12475_v6 = vld [vmem:[#allocation281_spill] sm:$0xff] }
 0x3b0   : > { %v2209_v19 = vadd.f32 %v2193_v24, %v2173_v1  ;;  %v2210_v56 = vadd.f32 %v12466_v50, %v2174_v32  ;;  %v2222_v26 = vrot.slane %v12467_v23, 6  ;;  %v2223_v49 = vrot.slane %v12468_v58, 6  ;;  %v12471_v1 = vld [vmem:[#allocation214_spill] sm:$0xff] }
 0x3b1   : > { %v2211_v55 = vadd.f32 %v12469_v38, %v2175_v22  ;;  %v2212_v53 = vadd.f32 %v2196_v31, %v2176_v29  ;;  %v2263_v46 = vsel %vm2244_vm2, %v2234_v63, %v2220_v35  ;;  %v2264_v43 = vsel %vm2244_vm2, %v2235_v10, %v2221_v5  ;;  %v12490_v23 = vld [vmem:[#allocation294_spill] sm:$0xff] }
 0x3b2   : > { %v2213_v62 = vadd.f32 %v2197_v9, %v2177_v54  ;;  %v2238_v4 = vrot.slane %v12470_v17, 6  ;;  %v2265_v27 = vsel %vm2244_vm2, %v2236_v34, %v2222_v26  ;;  %v2266_v20 = vsel %vm2244_vm2, %v2237_v42, %v2223_v49  ;;  %v12476_v9 = vld [vmem:[#allocation135_spill] sm:$0xff] }
 0x3b3   : > { %v2224_v32 = vrot.slane %v12471_v1, 6  ;;  %v2225_v22 = vrot.slane %v12472_v3, 6  ;;  %v2239_v18 = vrot.slane %v12473_v12, 6  ;;  %v9007_v54 = vsel %vm2244_vm2, %v2220_v35, %v2234_v63  ;;  %v12477_v63 = vld [vmem:[#allocation51_spill] sm:$0xff] }
 0x3b4   : > { %v9011_v15 = vsel %vm2275_vm5, %v2263_v46, 0.0  ;;  %v9015_v60 = vsel %vm2275_vm5, %v2264_v43, 0.0  ;;  %v9019_v0 = vsel %vm2244_vm2, %v2221_v5, %v2235_v10  ;;  %v9023_v2 = vsel %vm2244_vm2, %v2222_v26, %v2236_v34  ;;  %v12478_v34 = vld [vmem:[#allocation132_spill] sm:$0xff] }
 0x3b5   : > { %v9027_v36 = vsel %vm2275_vm5, %v2265_v27, 0.0  ;;  %v9031_v30 = vsel %vm2275_vm5, %v2266_v20, 0.0  ;;  %v9036_v24 = vsel %vm2244_vm2, %v2223_v49, %v2237_v42  ;;  %v2267_v31 = vsel %vm2244_vm2, %v2238_v4, %v2224_v32 }
 0x3b6   : > { %v2323_v10 = vmul.f32 %v12477_v63, %v12476_v9  ;;  %v2324_v35 = vmul.f32 %v12477_v63, %v12478_v34  ;;  %v2325_v5 = vmul.f32 %v12477_v63, %v9011_v15  ;;  %v2326_v50 = vmul.f32 %v12477_v63, %v9007_v54 }
 0x3b7   : > { %v2327_v26 = vmul.f32 %v12477_v63, %v9015_v60  ;;  %v2328_v42 = vmul.f32 %v12477_v63, %v9019_v0  ;;  %v2329_v49 = vmul.f32 %v12477_v63, %v9027_v36  ;;  %v2330_v38 = vmul.f32 %v12477_v63, %v9023_v2 }
 0x3b8   : > { %v2331_v46 = vmul.f32 %v12477_v63, %v9031_v30  ;;  %v2332_v43 = vmul.f32 %v12477_v63, %v9036_v24  ;;  %v2341_v27 = vadd.f32 %v2325_v5, %v2208_v7  ;;  %v2342_v20 = vadd.f32 %v2326_v50, %v2209_v19 }
 0x3b9   : > { %v2343_v9 = vadd.f32 %v2327_v26, %v2210_v56  ;;  %v2344_v34 = vadd.f32 %v2328_v42, %v2211_v55  ;;  %v2345_v40 = vadd.f32 %v2329_v49, %v2212_v53  ;;  %v2346_v28 = vadd.f32 %v2330_v38, %v2213_v62 }
 0x3ba   : > { %v2347_v29 = vadd.f32 %v2331_v46, %v8954_v14  ;;  %v9063_v12 = vsel %vm2275_vm5, %v2267_v31, 0.0  ;;  %v2339_v3 = vadd.f32 %v2323_v10, %v2206_v21  ;;  %v2340_v1 = vadd.f32 %v2324_v35, %v2207_v57  ;;  %v12479_v14 = vld [vmem:[#allocation52_spill] sm:$0xff] }
 0x3bb   : > { %v2348_v17 = vadd.f32 %v2332_v43, %v8957_v52  ;;  %v9068_v58 = vsel %vm2244_vm2, %v2224_v32, %v2238_v4  ;;  %v9072_v7 = vsel %vm2244_vm2, %v2225_v22, %v2239_v18  ;;  %v2268_v19 = vsel %vm2244_vm2, %v2239_v18, %v2225_v22 }
 0x3bc   : > { %v2359_v56 = vmul.f32 %v12479_v14, %v9011_v15  ;;  %v2360_v21 = vmul.f32 %v12479_v14, %v9007_v54  ;;  %v2361_v52 = vmul.f32 %v12479_v14, %v9015_v60  ;;  %v2362_v57 = vmul.f32 %v12479_v14, %v9019_v0 }
 0x3bd   : > { %v2363_v55 = vmul.f32 %v12479_v14, %v9027_v36  ;;  %v2364_v53 = vmul.f32 %v12479_v14, %v9023_v2  ;;  %v2365_v62 = vmul.f32 %v12479_v14, %v9031_v30  ;;  %v2366_v4 = vmul.f32 %v12479_v14, %v9036_v24 }
 0x3be   : > { %v2367_v32 = vmul.f32 %v12479_v14, %v9063_v12  ;;  %v2368_v22 = vmul.f32 %v12479_v14, %v9068_v58  ;;  %v2375_v18 = vadd.f32 %v2359_v56, %v2339_v3  ;;  %v2376_v31 = vadd.f32 %v2360_v21, %v2340_v1  ;;  %v12482_v1 = vld [vmem:[#allocation117_spill] sm:$0xff] }
 0x3bf   : > { %v2377_v63 = vadd.f32 %v2361_v52, %v2341_v27  ;;  %v2378_v10 = vadd.f32 %v2362_v57, %v2342_v20  ;;  %v2379_v35 = vadd.f32 %v2363_v55, %v2343_v9  ;;  %v2380_v5 = vadd.f32 %v2364_v53, %v2344_v34  ;;  %v12483_v27 = vld [vmem:[#allocation115_spill] sm:$0xff]  ;;  %v12485_v34 = vld [vmem:[#allocation96_spill] sm:$0xff] }
 0x3c0   : > { %v2381_v50 = vadd.f32 %v2365_v62, %v2345_v40  ;;  %v12480_v26 = vrot.slane %v8312_v45, 6  ;;  %v12481_v42 = vrot.slane %v8353_v25, 6  ;;  %v2382_v38 = vadd.f32 %v2366_v4, %v2346_v28  ;;  %v12484_v20 = vld [vmem:[#allocation95_spill] sm:$0xff] }
 0x3c1   : > { %v2383_v46 = vadd.f32 %v2367_v32, %v2347_v29  ;;  %v2384_v43 = vadd.f32 %v2368_v22, %v2348_v17  ;;  %v9104_v14 = vsel %vm2275_vm5, %v2268_v19, 0.0  ;;  %v2333_v3 = vadd.f32 %v12482_v1, %v8969_v39  ;;  %v12486_v28 = vld [vmem:[#allocation171_spill] sm:$0xff]  ;;  %v12487_v17 = vld [vmem:[#allocation170_spill] sm:$0xff] }
 0x3c2   : > { %v2269_v49 = vsel %vm2244_vm2, %v12481_v42, %v12480_v26  ;;  %v2334_v40 = vadd.f32 %v12483_v27, %v8971_v48  ;;  %v2335_v9 = vadd.f32 %v12484_v20, %v8973_v13  ;;  %v2336_v56 = vadd.f32 %v12485_v34, %v8975_v44  ;;  %v12488_v19 = vld [vmem:[#allocation66_spill] sm:$0xff]  ;;  %v12508_v27 = vld [vmem:[#allocation144_spill] sm:$0xff] }
 0x3c3   : > { %v2337_v29 = vadd.f32 %v12486_v28, %v8977_v33  ;;  %v2338_v21 = vadd.f32 %v12487_v17, %v8981_v37  ;;  %v2395_v52 = vmul.f32 %v12488_v19, %v9015_v60  ;;  %v2396_v39 = vmul.f32 %v12488_v19, %v9019_v0 }
 0x3c4   : > { %v2397_v48 = vmul.f32 %v12488_v19, %v9027_v36  ;;  %v2398_v13 = vmul.f32 %v12488_v19, %v9023_v2  ;;  %v2399_v44 = vmul.f32 %v12488_v19, %v9031_v30  ;;  %v2400_v33 = vmul.f32 %v12488_v19, %v9036_v24 }
 0x3c5   : > { %v2401_v37 = vmul.f32 %v12488_v19, %v9063_v12  ;;  %v2402_v57 = vmul.f32 %v12488_v19, %v9068_v58  ;;  %v2403_v55 = vmul.f32 %v12488_v19, %v9104_v14  ;;  %v2404_v53 = vmul.f32 %v12488_v19, %v9072_v7 }
 0x3c6   : > { %v2411_v62 = vadd.f32 %v2395_v52, %v2375_v18  ;;  %v2412_v4 = vadd.f32 %v2396_v39, %v2376_v31  ;;  %v2413_v32 = vadd.f32 %v2397_v48, %v2377_v63  ;;  %v2414_v22 = vadd.f32 %v2398_v13, %v2378_v10  ;;  %v12495_v63 = vld [vmem:[#allocation273_spill] sm:$0xff]  ;;  %v12501_v52 = vld [vmem:[#allocation174_spill] sm:$0xff]  ;;  %v12502_v48 = vld [vmem:[#allocation172_spill] sm:$0xff] }
 0x3c7   : > { %v2415_v26 = vadd.f32 %v2399_v44, %v2379_v35  ;;  %v2416_v42 = vadd.f32 %v2400_v33, %v2380_v5  ;;  %v2417_v1 = vadd.f32 %v2401_v37, %v2381_v50  ;;  %v2418_v34 = vadd.f32 %v2402_v57, %v2382_v38  ;;  %v12503_v44 = vld [vmem:[#allocation138_spill] sm:$0xff]  ;;  %v12504_v37 = vld [vmem:[#allocation137_spill] sm:$0xff] }
 0x3c8   : > { %v2419_v28 = vadd.f32 %v2403_v55, %v2383_v46  ;;  %v2420_v17 = vadd.f32 %v2404_v53, %v2384_v43  ;;  %v9140_v41 = vmul.f32 0.7978846, %v12490_v23  ;;  %v12492_v16 = vrot.slane %v8353_v25, 6  ;;  %v12500_v46 = vld [vmem:[#allocation98_spill] sm:$0xff]  ;;  %v12505_v55 = vld [vmem:[#allocation67_spill] sm:$0xff] }
 0x3c9   : > { %v12493_v11 = vrot.slane %v8312_v45, 6  ;;  %v12494_v31 = vrot.slane %v12475_v6, 6  ;;  %v12496_v10 = vrot.slane %v12495_v63, 6  ;;  %v9166_v38 = vsel %vm2275_vm5, %v2269_v49, 0.0  ;;  %v12515_v45 = vld [vmem:[#allocation80_spill] sm:$0xff] }
 0x3ca   : > { %12491 = vst [vmem:[#allocation162_spill] sm:$0xff] %v9140_v41  ;;  %v2370_v43 = vadd.f32 %v12500_v46, %v2334_v40  ;;  %v2371_v39 = vadd.f32 %v12501_v52, %v2335_v9  ;;  %v2372_v13 = vadd.f32 %v12502_v48, %v2336_v56  ;;  %v2373_v33 = vadd.f32 %v12503_v44, %v2337_v29  ;;  %v12506_v52 = vld [vmem:[#allocation175_spill] sm:$0xff]  ;;  %v12507_v44 = vld [vmem:[#allocation173_spill] sm:$0xff] }
 0x3cb   : > { %v9148_v18 = vsel %vm2244_vm2, %v12493_v11, %v12492_v16  ;;  %v9156_v35 = vsel %vm2244_vm2, %v12496_v10, %v12494_v31  ;;  %v12497_v5 = vmov %v12496_v10  ;;  %v12498_v23 = vmov %v12494_v31  ;;  %v12499_v16 = vld [vmem:[#allocation97_spill] sm:$0xff] }
 0x3cc   : > { %v2271_v50 = vsel %vm2244_vm2, %v12498_v23, %v12497_v5  ;;  %v2369_v11 = vadd.f32 %v12499_v16, %v2333_v3  ;;  %v2374_v57 = vadd.f32 %v12504_v37, %v2338_v21  ;;  %v2431_v53 = vmul.f32 %v12505_v55, %v9027_v36 }
 0x3cd   : > { %v2432_v31 = vmul.f32 %v12505_v55, %v9023_v2  ;;  %v2433_v49 = vmul.f32 %v12505_v55, %v9031_v30  ;;  %v2434_v3 = vmul.f32 %v12505_v55, %v9036_v24  ;;  %v2435_v40 = vmul.f32 %v12505_v55, %v9063_v12 }
 0x3ce   : > { %v2393_v9 = vmul.f32 %v12488_v19, %v9011_v15  ;;  %v2394_v56 = vmul.f32 %v12488_v19, %v9007_v54  ;;  %v2436_v29 = vmul.f32 %v12505_v55, %v9068_v58  ;;  %v2447_v21 = vadd.f32 %v2431_v53, %v2411_v62  ;;  %v12509_v19 = vld [vmem:[#allocation139_spill] sm:$0xff] }
 0x3cf   : > { %v2448_v10 = vadd.f32 %v2432_v31, %v2412_v4  ;;  %v2449_v5 = vadd.f32 %v2433_v49, %v2413_v32  ;;  %v2450_v23 = vadd.f32 %v2434_v3, %v2414_v22  ;;  %v2451_v16 = vadd.f32 %v2435_v40, %v2415_v26 }
 0x3d0   : > { %v9192_v46 = vsel %vm2275_vm5, %v2271_v50, 0.0  ;;  %v2405_v48 = vadd.f32 %v12506_v52, %v2369_v11  ;;  %v2406_v37 = vadd.f32 %v12507_v44, %v2370_v43  ;;  %v2452_v20 = vadd.f32 %v2436_v29, %v2416_v42  ;;  %v12510_v50 = vld [vmem:[#allocation145_spill] sm:$0xff]  ;;  %v12511_v43 = vld [vmem:[#allocation140_spill] sm:$0xff] }
 0x3d1   : > { %v2407_v63 = vadd.f32 %v12508_v27, %v2371_v39  ;;  %v2408_v41 = vadd.f32 %v12509_v19, %v2372_v13  ;;  %v2409_v6 = vadd.f32 %v2393_v9, %v2373_v33  ;;  %v2410_v25 = vadd.f32 %v2394_v56, %v2374_v57  ;;  %v12512_v13 = vld [vmem:[#allocation77_spill] sm:$0xff] }
 0x3d2   : > { %v2427_v62 = vmul.f32 %v12505_v55, %v9011_v15  ;;  %v2428_v4 = vmul.f32 %v12505_v55, %v9007_v54  ;;  %v2429_v47 = vmul.f32 %v12505_v55, %v9015_v60  ;;  %v2430_v32 = vmul.f32 %v12505_v55, %v9019_v0 }
 0x3d3   : > { %v2437_v22 = vmul.f32 %v12505_v55, %v9104_v14  ;;  %v2438_v26 = vmul.f32 %v12505_v55, %v9072_v7  ;;  %v2439_v42 = vmul.f32 %v12505_v55, %v9166_v38  ;;  %v2440_v27 = vmul.f32 %v12505_v55, %v9148_v18 }
 0x3d4   : > { %v2441_v11 = vadd.f32 %v12510_v50, %v2405_v48  ;;  %v2442_v39 = vadd.f32 %v12511_v43, %v2406_v37  ;;  %v2467_v33 = vmul.f32 %v12512_v13, %v9031_v30  ;;  %v2468_v57 = vmul.f32 %v12512_v13, %v9036_v24  ;;  %v12513_v50 = vld [vmem:[#allocation251_spill] sm:$0xff] }
 0x3d5   : > { %v2443_v53 = vadd.f32 %v2427_v62, %v2407_v63  ;;  %v2444_v31 = vadd.f32 %v2428_v4, %v2408_v41  ;;  %v2445_v49 = vadd.f32 %v2429_v47, %v2409_v6  ;;  %v2446_v3 = vadd.f32 %v2430_v32, %v2410_v25 }
 0x3d6   : > { %v2453_v40 = vadd.f32 %v2437_v22, %v2417_v1  ;;  %v2454_v9 = vadd.f32 %v2438_v26, %v2418_v34  ;;  %v2483_v56 = vadd.f32 %v2467_v33, %v2447_v21  ;;  %v2484_v29 = vadd.f32 %v2468_v57, %v2448_v10  ;;  %v12514_v33 = vld [vmem:[#allocation246_spill] sm:$0xff] }
 0x3d7   : > { %v2455_v52 = vadd.f32 %v2439_v42, %v2419_v28  ;;  %v2456_v55 = vadd.f32 %v2440_v27, %v2420_v17  ;;  %v2461_v48 = vmul.f32 %v12512_v13, %v9011_v15  ;;  %v2462_v44 = vmul.f32 %v12512_v13, %v9007_v54 }
 0x3d8   : > { %v2463_v37 = vmul.f32 %v12512_v13, %v9015_v60  ;;  %v2464_v41 = vmul.f32 %v12512_v13, %v9019_v0  ;;  %v2465_v25 = vmul.f32 %v12512_v13, %v9027_v36  ;;  %v2466_v6 = vmul.f32 %v12512_v13, %v9023_v2 }
 0x3d9   : > { %v2469_v1 = vmul.f32 %v12512_v13, %v9063_v12  ;;  %v2470_v15 = vmul.f32 %v12512_v13, %v9068_v58  ;;  %v2471_v54 = vmul.f32 %v12512_v13, %v9104_v14  ;;  %v2472_v34 = vmul.f32 %v12512_v13, %v9072_v7 }
 0x3da   : > { %v2473_v28 = vmul.f32 %v12512_v13, %v9166_v38  ;;  %v2474_v17 = vmul.f32 %v12512_v13, %v9148_v18  ;;  %v2477_v63 = vadd.f32 %v2461_v48, %v2441_v11  ;;  %v2478_v21 = vadd.f32 %v2462_v44, %v2442_v39 }
 0x3db   : > { %v2479_v10 = vadd.f32 %v2463_v37, %v2443_v53  ;;  %v2480_v19 = vadd.f32 %v2464_v41, %v2444_v31  ;;  %v2481_v62 = vadd.f32 %v2465_v25, %v2445_v49  ;;  %v2482_v4 = vadd.f32 %v2466_v6, %v2446_v3 }
 0x3dc   : > { %v2485_v47 = vadd.f32 %v2469_v1, %v2449_v5  ;;  %v2486_v32 = vadd.f32 %v2470_v15, %v2450_v23  ;;  %v2487_v22 = vadd.f32 %v2471_v54, %v2451_v16  ;;  %v2488_v26 = vadd.f32 %v2472_v34, %v2452_v20  ;;  %v5753_v1 = vld [vmem:[#allocation13 + $0x18] sm:$0xff]  }
 0x3dd   : > { %v2489_v42 = vadd.f32 %v2473_v28, %v2453_v40  ;;  %v2490_v27 = vadd.f32 %v2474_v17, %v2454_v9  ;;  %v2491_v43 = vadd.f32 %v12513_v50, %v2455_v52  ;;  %v2492_v57 = vadd.f32 %v12514_v33, %v2456_v55  ;;  %v12516_v17 = vld [vmem:[#allocation252_spill] sm:$0xff]  ;;  %v12517_v33 = vld [vmem:[#allocation247_spill] sm:$0xff]  ;;  %5473 = vmatprep.subr.bf16.mxu0 %v5753_v1 }
 0x3de   : > { %v2497_v51 = vmul.f32 %v12515_v45, %v9015_v60  ;;  %v2498_v11 = vmul.f32 %v12515_v45, %v9019_v0  ;;  %v2499_v39 = vmul.f32 %v12515_v45, %v9027_v36  ;;  %v2500_v5 = vmul.f32 %v12515_v45, %v9023_v2  ;;  %5474 = vmatpush3.bf16.msra.mxu0 %v5753_v1 }
 0x3df   : > { %v2501_v20 = vmul.f32 %v12515_v45, %v9031_v30  ;;  %v2502_v23 = vmul.f32 %v12515_v45, %v9036_v24  ;;  %v2503_v16 = vmul.f32 %v12515_v45, %v9063_v12  ;;  %v2504_v60 = vmul.f32 %v12515_v45, %v9068_v58 }
 0x3e0   : > { %v2505_v0 = vmul.f32 %v12515_v45, %v9104_v14  ;;  %v2506_v13 = vmul.f32 %v12515_v45, %v9072_v7  ;;  %v2507_v53 = vmul.f32 %v12515_v45, %v9166_v38  ;;  %v2511_v31 = vmul.f32 %v12515_v45, %v9192_v46 }
 0x3e1   : > { %v2508_v49 = vmul.f32 %v12515_v45, %v9148_v18  ;;  %v2512_v3 = vmul.f32 %v12515_v45, %v9156_v35  ;;  %v2513_v40 = vadd.f32 %v2497_v51, %v2477_v63  ;;  %v2514_v9 = vadd.f32 %v2498_v11, %v2478_v21  ;;  %v12518_v51 = vld [vmem:[#allocation85_spill] sm:$0xff]  ;;  %v5754_v21 = vld [vmem:[#allocation13 + $0x10] sm:$0xff]   ;;  %v12522_v11 = vld [vmem:[#allocation159_spill] sm:$0xff] }
 0x3e2   : > { %v2515_v52 = vadd.f32 %v2499_v39, %v2479_v10  ;;  %v2516_v55 = vadd.f32 %v2500_v5, %v2480_v19  ;;  %v2517_v48 = vadd.f32 %v2501_v20, %v2481_v62  ;;  %v2527_v44 = vadd.f32 %v2511_v31, %v2491_v43  ;;  %v12519_v19 = vld [vmem:[#allocation287_spill] sm:$0xff]  ;;  %5475 = vmatprep.subr.bf16.mxu0 %v5754_v21  ;;  %v12521_v43 = vld [vmem:[#allocation212_spill] sm:$0xff] }
 0x3e3   : > { %v2518_v37 = vadd.f32 %v2502_v23, %v2482_v4  ;;  %v2519_v41 = vadd.f32 %v2503_v16, %v2483_v56  ;;  %v2520_v25 = vadd.f32 %v2504_v60, %v2484_v29  ;;  %v2528_v6 = vadd.f32 %v2512_v3, %v2492_v57  ;;  %5476 = vmatpush3.bf16.msra.mxu0 %v5754_v21  ;;  %v12523_v5 = vld [vmem:[#allocation211_spill] sm:$0xff]  ;;  %v12524_v60 = vld [vmem:[#allocation157_spill] sm:$0xff] }
 0x3e4   : > { %v2521_v15 = vadd.f32 %v2505_v0, %v2485_v47  ;;  %v2522_v54 = vadd.f32 %v2506_v13, %v2486_v32  ;;  %v2523_v34 = vadd.f32 %v2507_v53, %v2487_v22  ;;  %v2524_v28 = vadd.f32 %v2508_v49, %v2488_v26  ;;  %v12525_v13 = vld [vmem:[#allocation209_spill] sm:$0xff] }
 0x3e5   : > { %v2525_v50 = vadd.f32 %v12516_v17, %v2489_v42  ;;  %v2526_v8 = vadd.f32 %v12517_v33, %v2490_v27  ;;  %v2533_v45 = vmul.f32 %v12518_v51, %v9027_v36  ;;  %v2534_v63 = vmul.f32 %v12518_v51, %v9023_v2  ;;  %v5755_v42 = vld [vmem:[#allocation13 + $0x8] sm:$0xff]   ;;  %v12526_v49 = vld [vmem:[#allocation253_spill] sm:$0xff] }
 0x3e6   : > { %v2535_v56 = vmul.f32 %v12518_v51, %v9031_v30  ;;  %v2536_v29 = vmul.f32 %v12518_v51, %v9036_v24  ;;  %v2537_v10 = vmul.f32 %v12518_v51, %v9063_v12  ;;  %v9287_v62 = vadd.f32 %v12519_v19, %v2527_v44  ;;  %v12520_v30 = vld [vmem:[#allocation288_spill] sm:$0xff]  ;;  %5477 = vmatprep.subr.bf16.mxu0 %v5755_v42  ;;  %v12532_v33 = vld [vmem:[#allocation213_spill] sm:$0xff]  ;;  %v5756_v19 = vld [vmem:[#allocation13] sm:$0xff]  }
 0x3e7   : > { %v2538_v36 = vmul.f32 %v12518_v51, %v9068_v58  ;;  %v2539_v2 = vmul.f32 %v12518_v51, %v9104_v14  ;;  %v2540_v4 = vmul.f32 %v12518_v51, %v9072_v7  ;;  %v9296_v47 = vadd.f32 %v12520_v30, %v2528_v6  ;;  %5478 = vmatpush3.bf16.msra.mxu0 %v5755_v42  ;;  %v12538_v42 = vld [vmem:[#allocation141_spill] sm:$0xff] }
 0x3e8   : > { %v2541_v12 = vmul.f32 %v12518_v51, %v9166_v38  ;;  %v2542_v24 = vmul.f32 %v12518_v51, %v9148_v18  ;;  %v2545_v32 = vmul.f32 %v12518_v51, %v9192_v46  ;;  %v2546_v58 = vmul.f32 %v12518_v51, %v9156_v35  ;;  %5479 = vmatprep.subr.bf16.mxu0 %v5756_v19 }
 0x3e9   : > { %v9306_v14 = vadd.f32 %v2533_v45, %v2513_v40  ;;  %v9308_v22 = vadd.f32 %v2534_v63, %v2514_v9  ;;  %v9310_v7 = vadd.f32 %v2535_v56, %v2515_v52  ;;  %v2583_v26 = vrot.slane %v12460_v59, 7  ;;  %v12527_v40 = vld [vmem:[#allocation207_spill] sm:$0xff]  ;;  %v12533_v45 = vld [vmem:[#allocation221_spill] sm:$0xff] }
 0x3ea   : > { %v9313_v27 = vadd.f32 %v2536_v29, %v2516_v55  ;;  %v9315_v38 = vadd.f32 %v2537_v10, %v2517_v48  ;;  %v2584_v18 = vrot.slane %v12461_v61, 7  ;;  %v2585_v46 = vrot.slane %v12521_v43, 7  ;;  %v12529_v48 = vld [vmem:[#allocation248_spill] sm:$0xff] }
 0x3eb   : > { %v9319_v57 = vadd.f32 %v2538_v36, %v2518_v37  ;;  %v2555_v35 = vadd.f32 %v2539_v2, %v2519_v41  ;;  %v2569_v39 = vrot.slane %v12522_v11, 7  ;;  %v2586_v20 = vrot.slane %v12523_v5, 7  ;;  %v12530_v37 = vld [vmem:[#allocation218_spill] sm:$0xff]  ;;  %v5757_v36 = vld [vmem:[#allocation14 + $0x38] sm:$0xff]   ;;  %v12535_v2 = vld [vmem:[#allocation215_spill] sm:$0xff]  ;;  %5480 = vmatpush3.bf16.msra.mxu0 %v5756_v19 }
 0x3ec   : > { %v2556_v23 = vadd.f32 %v2540_v4, %v2520_v25  ;;  %v2557_v16 = vadd.f32 %v2541_v12, %v2521_v15  ;;  %v2570_v0 = vrot.slane %v12524_v60, 7  ;;  %v2571_v53 = vrot.slane %v12525_v13, 7  ;;  %5433 = vmatprep.subr.bf16.mxu1 %v5757_v36  ;;  %v12539_v61 = vld [vmem:[#allocation232_spill] sm:$0xff]  ;;  %v12576_v60 = vld [vmem:[#allocation255_spill] sm:$0xff] }
 0x3ed   : > { %v2558_v31 = vadd.f32 %v2542_v24, %v2522_v54  ;;  %v2559_v3 = vadd.f32 %v12526_v49, %v2523_v34  ;;  %v2572_v9 = vrot.slane %v12527_v40, 7  ;;  %v2612_v55 = vsel %vm2593_vm6, %v2583_v26, %v2569_v39  ;;  %v12531_v54 = vld [vmem:[#allocation214_spill] sm:$0xff]  ;;  %5434 = vmatpush3.bf16.msra.mxu1 %v5757_v36 }
 0x3ee   : > { %v2560_v44 = vadd.f32 %v12529_v48, %v2524_v28  ;;  %v2587_v41 = vrot.slane %v12530_v37, 7  ;;  %v2613_v25 = vsel %vm2593_vm6, %v2584_v18, %v2570_v0  ;;  %v2614_v6 = vsel %vm2593_vm6, %v2585_v46, %v2571_v53 }
 0x3ef   : > { %v2561_v1 = vadd.f32 %v2545_v32, %v2525_v50  ;;  %v2562_v15 = vadd.f32 %v2546_v58, %v2526_v8  ;;  %v2573_v34 = vrot.slane %v12531_v54, 7  ;;  %v2615_v17 = vsel %vm2593_vm6, %v2586_v20, %v2572_v9  ;;  %v12536_v32 = vld [vmem:[#allocation142_spill] sm:$0xff]  ;;  %v5758_v54 = vld [vmem:[#allocation14 + $0x30] sm:$0xff]  }
 0x3f0   : > { %v9342_v63 = vsel %vm2593_vm6, %v2569_v39, %v2583_v26  ;;  %v9346_v56 = vsel %vm2624_vm8, %v2612_v55, 0.0  ;;  %v9350_v8 = vsel %vm2593_vm6, %v2570_v0, %v2584_v18  ;;  %v9354_v50 = vsel %vm2593_vm6, %v2571_v53, %v2585_v46  ;;  %v12537_v58 = vld [vmem:[#allocation54_spill] sm:$0xff]  ;;  %5435 = vmatprep.subr.bf16.mxu1 %v5758_v54 }
 0x3f1   : > { %v9358_v29 = vsel %vm2624_vm8, %v2613_v25, 0.0  ;;  %v9362_v10 = vsel %vm2624_vm8, %v2614_v6, 0.0  ;;  %v2588_v4 = vrot.slane %v12535_v2, 7  ;;  %v9367_v30 = vsel %vm2593_vm6, %v2572_v9, %v2586_v20  ;;  %5436 = vmatpush3.bf16.msra.mxu1 %v5758_v54 }
 0x3f2   : > { %v2616_v12 = vsel %vm2593_vm6, %v2587_v41, %v2573_v34  ;;  %v9373_v24 = vsel %vm2624_vm8, %v2615_v17, 0.0  ;;  %v2672_v26 = vmul.f32 %v12537_v58, %v12536_v32  ;;  %v2673_v18 = vmul.f32 %v12537_v58, %v12538_v42 }
 0x3f3   : > { %v2674_v46 = vmul.f32 %v12537_v58, %v9346_v56  ;;  %v2675_v39 = vmul.f32 %v12537_v58, %v9342_v63  ;;  %v2676_v20 = vmul.f32 %v12537_v58, %v9358_v29  ;;  %v2677_v0 = vmul.f32 %v12537_v58, %v9350_v8 }
 0x3f4   : > { %v2678_v53 = vmul.f32 %v12537_v58, %v9362_v10  ;;  %v2679_v49 = vmul.f32 %v12537_v58, %v9354_v50  ;;  %v2680_v9 = vmul.f32 %v12537_v58, %v9373_v24  ;;  %v2681_v55 = vmul.f32 %v12537_v58, %v9367_v30 }
 0x3f5   : > { %v2690_v48 = vadd.f32 %v2674_v46, %v2557_v16  ;;  %v2691_v25 = vadd.f32 %v2675_v39, %v2558_v31  ;;  %v2692_v6 = vadd.f32 %v2676_v20, %v2559_v3  ;;  %v2693_v17 = vadd.f32 %v2677_v0, %v2560_v44 }
 0x3f6   : > { %v2694_v32 = vadd.f32 %v2678_v53, %v2561_v1  ;;  %v2695_v42 = vadd.f32 %v2679_v49, %v2562_v15  ;;  %v2688_v28 = vadd.f32 %v2672_v26, %v2555_v35  ;;  %v2689_v51 = vadd.f32 %v2673_v18, %v2556_v23 }
 0x3f7   : > { %v2696_v2 = vadd.f32 %v2680_v9, %v9287_v62  ;;  %v2697_v37 = vadd.f32 %v2681_v55, %v9296_v47  ;;  %v2589_v5 = vrot.slane %v12539_v61, 7  ;;  %v9400_v58 = vsel %vm2593_vm6, %v2573_v34, %v2587_v41  ;;  %v12541_v62 = vld [vmem:[#allocation55_spill] sm:$0xff]  ;;  %v12542_v55 = vld [vmem:[#allocation281_spill] sm:$0xff] }
 0x3f8   : > { %v12540_v16 = vrot.slane %v12532_v33, 7  ;;  %v9408_v35 = vsel %vm2624_vm8, %v2616_v12, 0.0  ;;  %v2708_v23 = vmul.f32 %v12541_v62, %v9346_v56  ;;  %v2709_v47 = vmul.f32 %v12541_v62, %v9342_v63 }
 0x3f9   : > { %v2710_v3 = vmul.f32 %v12541_v62, %v9358_v29  ;;  %v2711_v44 = vmul.f32 %v12541_v62, %v9350_v8  ;;  %v2712_v41 = vmul.f32 %v12541_v62, %v9362_v10  ;;  %v2713_v1 = vmul.f32 %v12541_v62, %v9354_v50 }
 0x3fa   : > { %v2617_v31 = vsel %vm2593_vm6, %v2588_v4, %v12540_v16  ;;  %v2714_v15 = vmul.f32 %v12541_v62, %v9373_v24  ;;  %v2715_v34 = vmul.f32 %v12541_v62, %v9367_v30  ;;  %v2716_v19 = vmul.f32 %v12541_v62, %v9408_v35 }
 0x3fb   : > { %v2717_v36 = vmul.f32 %v12541_v62, %v9400_v58  ;;  %v2724_v12 = vadd.f32 %v2708_v23, %v2688_v28  ;;  %v2725_v26 = vadd.f32 %v2709_v47, %v2689_v51  ;;  %v2726_v18 = vadd.f32 %v2710_v3, %v2690_v48  ;;  %v12546_v48 = vld [vmem:[#allocation119_spill] sm:$0xff] }
 0x3fc   : > { %v2727_v46 = vadd.f32 %v2711_v44, %v2691_v25  ;;  %v2728_v39 = vadd.f32 %v2712_v41, %v2692_v6  ;;  %v2729_v20 = vadd.f32 %v2713_v1, %v2693_v17  ;;  %v2730_v0 = vadd.f32 %v2714_v15, %v2694_v32  ;;  %v12547_v6 = vld [vmem:[#allocation99_spill] sm:$0xff] }
 0x3fd   : > { %v2731_v53 = vadd.f32 %v2715_v34, %v2695_v42  ;;  %v2732_v49 = vadd.f32 %v2716_v19, %v2696_v2  ;;  %v2733_v9 = vadd.f32 %v2717_v36, %v2697_v37  ;;  %v2591_v16 = vrot.slane %v12542_v55, 7  ;;  %v12545_v2 = vld [vmem:[#allocation118_spill] sm:$0xff]  ;;  %v12549_v42 = vld [vmem:[#allocation68_spill] sm:$0xff]  ;;  %v5759_v34 = vld [vmem:[#allocation14 + $0x28] sm:$0xff]  }
 0x3fe   : > { %v12543_v54 = vrot.slane %v12532_v33, 7  ;;  %v12544_v62 = vrot.slane %v12533_v45, 7  ;;  %v9443_v28 = vsel %vm2624_vm8, %v2617_v31, 0.0  ;;  %v2682_v37 = vadd.f32 %v12545_v2, %v9306_v14  ;;  %5437 = vmatprep.subr.bf16.mxu1 %v5759_v34  ;;  %v12550_v55 = vld [vmem:[#allocation283_spill] sm:$0xff] }
 0x3ff   : > { %v2683_v25 = vadd.f32 %v12546_v48, %v9308_v22  ;;  %v2684_v17 = vadd.f32 %v12547_v6, %v9310_v7  ;;  %v2744_v23 = vmul.f32 %v12549_v42, %v9358_v29  ;;  %v2745_v47 = vmul.f32 %v12549_v42, %v9350_v8  ;;  %5438 = vmatpush3.bf16.msra.mxu1 %v5759_v34  ;;  %v12565_v34 = vld [vmem:[#allocation147_spill] sm:$0xff] }
 0x400   : > { %v9435_v61 = vsel %vm2593_vm6, %v12543_v54, %v2588_v4  ;;  %v2618_v51 = vsel %vm2593_vm6, %v2589_v5, %v12544_v62  ;;  %v12548_v4 = vld [vmem:[#allocation100_spill] sm:$0xff]  ;;  %v2746_v31 = vmul.f32 %v12549_v42, %v9362_v10  ;;  %v2747_v14 = vmul.f32 %v12549_v42, %v9354_v50 }
 0x401   : > { %v2685_v32 = vadd.f32 %v12548_v4, %v9313_v27  ;;  %v2748_v22 = vmul.f32 %v12549_v42, %v9373_v24  ;;  %v2749_v7 = vmul.f32 %v12549_v42, %v9367_v30  ;;  %v2750_v27 = vmul.f32 %v12549_v42, %v9408_v35 }
 0x402   : > { %v2751_v3 = vmul.f32 %v12549_v42, %v9400_v58  ;;  %v2752_v44 = vmul.f32 %v12549_v42, %v9443_v28  ;;  %v2753_v41 = vmul.f32 %v12549_v42, %v9435_v61  ;;  %v2760_v1 = vadd.f32 %v2744_v23, %v2724_v12  ;;  %v12553_v12 = vld [vmem:[#allocation162_spill] sm:$0xff] }
 0x403   : > { %v2761_v15 = vadd.f32 %v2745_v47, %v2725_v26  ;;  %v2762_v19 = vadd.f32 %v2746_v31, %v2726_v18  ;;  %v2763_v36 = vadd.f32 %v2747_v14, %v2727_v46  ;;  %v2764_v54 = vadd.f32 %v2748_v22, %v2728_v39  ;;  %v12554_v26 = vld [vmem:[#allocation176_spill] sm:$0xff]  ;;  %v12555_v46 = vld [vmem:[#allocation177_spill] sm:$0xff]  ;;  %v12560_v23 = vld [vmem:[#allocation102_spill] sm:$0xff] }
 0x404   : > { %v2765_v62 = vadd.f32 %v2749_v7, %v2729_v20  ;;  %v9473_v2 = vadd.f32 %v2750_v27, %v2730_v0  ;;  %v9475_v48 = vadd.f32 %v2751_v3, %v2731_v53  ;;  %v9477_v6 = vadd.f32 %v2752_v44, %v2732_v49  ;;  %v12557_v53 = vld [vmem:[#allocation273_spill] sm:$0xff]  ;;  %v12562_v14 = vld [vmem:[#allocation178_spill] sm:$0xff]  ;;  %v12563_v7 = vld [vmem:[#allocation180_spill] sm:$0xff] }
 0x405   : > { %v9479_v4 = vadd.f32 %v2753_v41, %v2733_v9  ;;  %v9484_v40 = vsel %vm3615_vm10, %v12550_v55, 0.0  ;;  %5865 = vtanh.f32 %v12553_v12  ;;  %v2686_v18 = vadd.f32 %v12554_v26, %v9315_v38  ;;  %v12561_v31 = vld [vmem:[#allocation101_spill] sm:$0xff]  ;;  %v12566_v12 = vld [vmem:[#allocation148_spill] sm:$0xff] }
 0x406   : > { %12552 = vst [vmem:[#allocation161_spill] sm:$0xff] %v9484_v40  ;;  %v2687_v39 = vadd.f32 %v12555_v46, %v9319_v57  ;;  %v12556_v20 = vrot.slane %v12533_v45, 7  ;;  %v12558_v49 = vrot.slane %v12557_v53, 7  ;;  %v9509_v57 = vsel %vm2624_vm8, %v2618_v51, 0.0  ;;  %v12564_v3 = vld [vmem:[#allocation69_spill] sm:$0xff] }
 0x407   : > { %v2718_v47 = vadd.f32 %v12560_v23, %v2682_v37  ;;  %v2720_v22 = vadd.f32 %v12562_v14, %v2684_v17  ;;  %v2721_v27 = vadd.f32 %v12563_v7, %v2685_v32  ;;  %v2780_v44 = vmul.f32 %v12564_v3, %v9362_v10  ;;  %v5761_v23 = vld [vmem:[#allocation14 + $0x18] sm:$0xff]  }
 0x408   : > { %v9495_v0 = vsel %vm2593_vm6, %v12556_v20, %v2589_v5  ;;  %v9501_v9 = vsel %vm2593_vm6, %v12558_v49, %v2591_v16  ;;  %v12559_v55 = vmov %v12558_v49  ;;  %v2719_v5 = vadd.f32 %v12561_v31, %v2683_v25 }
 0x409   : > { %v2620_v38 = vsel %vm2593_vm6, %v2591_v16, %v12559_v55  ;;  %v2781_v41 = vmul.f32 %v12564_v3, %v9354_v50  ;;  %v2782_v16 = vmul.f32 %v12564_v3, %v9373_v24  ;;  %v2783_v51 = vmul.f32 %v12564_v3, %v9367_v30  ;;  %v5760_v55 = vld [vmem:[#allocation14 + $0x20] sm:$0xff]  }
 0x40a   : > { %v2722_v37 = vadd.f32 %v12565_v34, %v2686_v18  ;;  %v2723_v25 = vadd.f32 %v12566_v12, %v2687_v39  ;;  %v2784_v17 = vmul.f32 %v12564_v3, %v9408_v35  ;;  %v2785_v32 = vmul.f32 %v12564_v3, %v9400_v58  ;;  %5439 = vmatprep.subr.bf16.mxu1 %v5760_v55 }
 0x40b   : > { %v2796_v26 = vadd.f32 %v2780_v44, %v2760_v1  ;;  %v2797_v46 = vadd.f32 %v2781_v41, %v2761_v15  ;;  %v9529_v20 = vadd.f32 %v2782_v16, %v2762_v19  ;;  %v9531_v49 = vadd.f32 %v2783_v51, %v2763_v36  ;;  %v12567_v1 = vld [vmem:[#allocation181_spill] sm:$0xff]  ;;  %v12568_v19 = vld [vmem:[#allocation182_spill] sm:$0xff]  ;;  %5440 = vmatpush3.bf16.msra.mxu1 %v5760_v55 }
 0x40c   : > { %v2742_v31 = vmul.f32 %v12549_v42, %v9346_v56  ;;  %v2743_v18 = vmul.f32 %v12549_v42, %v9342_v63  ;;  %v2800_v39 = vadd.f32 %v2784_v17, %v2764_v54  ;;  %v2801_v14 = vadd.f32 %v2785_v32, %v2765_v62  ;;  %v12569_v36 = vld [vmem:[#allocation150_spill] sm:$0xff]  ;;  %v12570_v16 = vld [vmem:[#allocation149_spill] sm:$0xff]  ;;  %5441 = vmatprep.subr.bf16.mxu1 %v5761_v23  ;;  %v12572_v32 = vld [vmem:[#allocation151_spill] sm:$0xff] }
 0x40d   : > { %v9539_v7 = vsel %vm2624_vm8, %v2620_v38, 0.0  ;;  %v2754_v15 = vadd.f32 %v12567_v1, %v2718_v47  ;;  %v2755_v44 = vadd.f32 %v12568_v19, %v2719_v5  ;;  %v2756_v41 = vadd.f32 %v12569_v36, %v2720_v22  ;;  %v5762_v47 = vld [vmem:[#allocation14 + $0x10] sm:$0xff]  }
 0x40e   : > { %v2757_v51 = vadd.f32 %v12570_v16, %v2721_v27  ;;  %v2758_v34 = vadd.f32 %v2742_v31, %v2722_v37  ;;  %v2759_v12 = vadd.f32 %v2743_v18, %v2723_v25  ;;  %v2776_v42 = vmul.f32 %v12564_v3, %v9346_v56  ;;  %v12571_v27 = vld [vmem:[#allocation81_spill] sm:$0xff]  ;;  %v12573_v31 = vld [vmem:[#allocation152_spill] sm:$0xff] }
 0x40f   : > { %v2777_v21 = vmul.f32 %v12564_v3, %v9342_v63  ;;  %v2778_v54 = vmul.f32 %v12564_v3, %v9358_v29  ;;  %v2779_v62 = vmul.f32 %v12564_v3, %v9350_v8  ;;  %v2786_v38 = vmul.f32 %v12564_v3, %v9443_v28  ;;  %5442 = vmatpush3.bf16.msra.mxu1 %v5761_v23 }
 0x410   : > { %v2787_v5 = vmul.f32 %v12564_v3, %v9435_v61  ;;  %v2788_v22 = vmul.f32 %v12564_v3, %v9509_v57  ;;  %v2816_v37 = vmul.f32 %v12571_v27, %v9373_v24  ;;  %v2817_v25 = vmul.f32 %v12571_v27, %v9367_v30  ;;  %5443 = vmatprep.subr.bf16.mxu1 %v5762_v47 }
 0x411   : > { %v2789_v17 = vmul.f32 %v12564_v3, %v9495_v0  ;;  %v2790_v55 = vadd.f32 %v12572_v32, %v2754_v15  ;;  %v2791_v18 = vadd.f32 %v12573_v31, %v2755_v44  ;;  %v2792_v1 = vadd.f32 %v2776_v42, %v2756_v41  ;;  %v5763_v15 = vld [vmem:[#allocation14 + $0x8] sm:$0xff]  }
 0x412   : > { %v2793_v19 = vadd.f32 %v2777_v21, %v2757_v51  ;;  %v2794_v36 = vadd.f32 %v2778_v54, %v2758_v34  ;;  %v9567_v16 = vadd.f32 %v2816_v37, %v2796_v26  ;;  %v9569_v40 = vadd.f32 %v2817_v25, %v2797_v46  ;;  %v9571_v33 = vpop.eup %5865  ;;  %v5764_v54 = vld [vmem:[#allocation14] sm:$0xff]  }
 0x413   : > { %12574 = vst [vmem:[#allocation75_spill] sm:$0xff] %v9571_v33  ;;  %v2795_v53 = vadd.f32 %v2779_v62, %v2759_v12  ;;  %v2802_v52 = vadd.f32 %v2786_v38, %v9473_v2  ;;  %v2803_v45 = vadd.f32 %v2787_v5, %v9475_v48  ;;  %v2804_v3 = vadd.f32 %v2788_v22, %v9477_v6 }
 0x414   : > { %v2805_v44 = vadd.f32 %v2789_v17, %v9479_v4  ;;  %v2810_v26 = vmul.f32 %v12571_v27, %v9346_v56  ;;  %v2811_v46 = vmul.f32 %v12571_v27, %v9342_v63  ;;  %v2812_v23 = vmul.f32 %v12571_v27, %v9358_v29  ;;  %5444 = vmatpush3.bf16.msra.mxu1 %v5762_v47  ;;  %v12575_v47 = vld [vmem:[#allocation259_spill] sm:$0xff] }
 0x415   : > { %v2813_v2 = vmul.f32 %v12571_v27, %v9350_v8  ;;  %v2814_v48 = vmul.f32 %v12571_v27, %v9362_v10  ;;  %v2815_v6 = vmul.f32 %v12571_v27, %v9354_v50  ;;  %v2818_v4 = vmul.f32 %v12571_v27, %v9408_v35  ;;  %5445 = vmatprep.subr.bf16.mxu1 %v5763_v15 }
 0x416   : > { %v2819_v56 = vmul.f32 %v12571_v27, %v9400_v58  ;;  %v2820_v63 = vmul.f32 %v12571_v27, %v9443_v28  ;;  %v2821_v41 = vmul.f32 %v12571_v27, %v9435_v61  ;;  %v2822_v51 = vmul.f32 %v12571_v27, %v9509_v57 }
 0x417   : > { %v2823_v34 = vmul.f32 %v12571_v27, %v9495_v0  ;;  %v2826_v12 = vadd.f32 %v2810_v26, %v2790_v55  ;;  %v2827_v42 = vadd.f32 %v2811_v46, %v2791_v18  ;;  %v2828_v21 = vadd.f32 %v2812_v23, %v2792_v1  ;;  %v12577_v55 = vld [vmem:[#allocation83_spill] sm:$0xff] }
 0x418   : > { %v2829_v62 = vadd.f32 %v2813_v2, %v2793_v19  ;;  %v2830_v38 = vadd.f32 %v2814_v48, %v2794_v36  ;;  %v2831_v5 = vadd.f32 %v2815_v6, %v2795_v53  ;;  %v2834_v22 = vadd.f32 %v2818_v4, %v9529_v20  ;;  %5446 = vmatpush3.bf16.msra.mxu1 %v5763_v15  ;;  %v5887_v48 = vld [vmem:[#allocation13 + $0x38] sm:$0xff]  }
 0x419   : > { %v2835_v37 = vadd.f32 %v2819_v56, %v9531_v49  ;;  %v2836_v25 = vadd.f32 %v2820_v63, %v2800_v39  ;;  %v2837_v17 = vadd.f32 %v2821_v41, %v2801_v14  ;;  %v2838_v32 = vadd.f32 %v2822_v51, %v2802_v52  ;;  %5447 = vmatprep.subr.bf16.mxu1 %v5764_v54 }
 0x41a   : > { %v2839_v31 = vadd.f32 %v2823_v34, %v2803_v45  ;;  %v2840_v33 = vadd.f32 %v12575_v47, %v2804_v3  ;;  %v2841_v27 = vadd.f32 %v12576_v60, %v2805_v44  ;;  %v2846_v18 = vmul.f32 %v12577_v55, %v9358_v29  ;;  %v12578_v47 = vld [vmem:[#allocation260_spill] sm:$0xff] }
 0x41b   : > { %v2847_v1 = vmul.f32 %v12577_v55, %v9350_v8  ;;  %v2848_v53 = vmul.f32 %v12577_v55, %v9362_v10  ;;  %v2849_v20 = vmul.f32 %v12577_v55, %v9354_v50  ;;  %v2850_v52 = vmul.f32 %v12577_v55, %v9373_v24 }
 0x41c   : > { %v2851_v60 = vmul.f32 %v12577_v55, %v9367_v30  ;;  %v2852_v45 = vmul.f32 %v12577_v55, %v9408_v35  ;;  %v2853_v29 = vmul.f32 %v12577_v55, %v9400_v58  ;;  %v2854_v8 = vmul.f32 %v12577_v55, %v9443_v28  ;;  %5448 = vmatpush3.bf16.msra.mxu1 %v5764_v54  ;;  %v12580_v54 = vld [vmem:[#allocation86_spill] sm:$0xff] }
 0x41d   : > { %v2855_v49 = vmul.f32 %v12577_v55, %v9435_v61  ;;  %v2856_v39 = vmul.f32 %v12577_v55, %v9509_v57  ;;  %v2860_v14 = vmul.f32 %v12577_v55, %v9539_v7  ;;  %v2861_v19 = vmul.f32 %v12577_v55, %v9501_v9  ;;  %5497 = vmatprep.subr.bf16.mxu1 %v5887_v48 }
 0x41e   : > { %v2857_v36 = vmul.f32 %v12577_v55, %v9495_v0  ;;  %v2862_v3 = vadd.f32 %v2846_v18, %v2826_v12  ;;  %v2863_v15 = vadd.f32 %v2847_v1, %v2827_v42  ;;  %v2864_v44 = vadd.f32 %v2848_v53, %v2828_v21  ;;  %v12579_v42 = vld [vmem:[#allocation257_spill] sm:$0xff] }
 0x41f   : > { %v2865_v26 = vadd.f32 %v2849_v20, %v2829_v62  ;;  %v2866_v46 = vadd.f32 %v2850_v52, %v2830_v38  ;;  %v2876_v23 = vadd.f32 %v2860_v14, %v2840_v33  ;;  %v2877_v2 = vadd.f32 %v2861_v19, %v2841_v27  ;;  %v12586_v14 = vld [vmem:[#allocation157_spill] sm:$0xff] }
 0x420   : > { %v2867_v6 = vadd.f32 %v2851_v60, %v2831_v5  ;;  %v2868_v4 = vadd.f32 %v2852_v45, %v9567_v16  ;;  %v2869_v56 = vadd.f32 %v2853_v29, %v9569_v40  ;;  %v2870_v63 = vadd.f32 %v2854_v8, %v2834_v22  ;;  %v12581_v5 = vld [vmem:[#allocation49_spill] sm:$0xff]  ;;  %v12584_v45 = vld [vmem:[#allocation258_spill] sm:$0xff] }
 0x421   : > { %v2871_v41 = vadd.f32 %v2855_v49, %v2835_v37  ;;  %v2872_v51 = vadd.f32 %v2856_v39, %v2836_v25  ;;  %v2873_v34 = vadd.f32 %v2857_v36, %v2837_v17  ;;  %v2874_v12 = vadd.f32 %v12578_v47, %v2838_v32  ;;  %v12582_v37 = vld [vmem:[#allocation289_spill] sm:$0xff]  ;;  %v12587_v36 = vld [vmem:[#allocation207_spill] sm:$0xff] }
 0x422   : > { %v2875_v21 = vadd.f32 %v12579_v42, %v2839_v31  ;;  %v2882_v62 = vmul.f32 %v12580_v54, %v9362_v10  ;;  %v2883_v33 = vmul.f32 %v12580_v54, %v9354_v50  ;;  %v2884_v38 = vmul.f32 %v12580_v54, %v9373_v24  ;;  %v12583_v60 = vld [vmem:[#allocation261_spill] sm:$0xff]  ;;  %v12594_v42 = vld [vmem:[#allocation131_spill] sm:$0xff] }
 0x423   : > { %v2885_v40 = vmul.f32 %v12580_v54, %v9367_v30  ;;  %v2886_v16 = vmul.f32 %v12580_v54, %v9408_v35  ;;  %v2912_v22 = vadd.f32 %v12581_v5, %v2876_v23  ;;  %v2913_v25 = vadd.f32 %v12582_v37, %v2877_v2  ;;  %v12590_v23 = vld [vmem:[#allocation92_spill] sm:$0xff]  ;;  %v12593_v47 = vld [vmem:[#allocation93_spill] sm:$0xff]  ;;  %v12598_v37 = vld [vmem:[#allocation214_spill] sm:$0xff] }
 0x424   : > { %v2887_v17 = vmul.f32 %v12580_v54, %v9400_v58  ;;  %v2888_v10 = vmul.f32 %v12580_v54, %v9443_v28  ;;  %v2889_v50 = vmul.f32 %v12580_v54, %v9435_v61  ;;  %v2890_v24 = vmul.f32 %v12580_v54, %v9509_v57 }
 0x425   : > { %v2891_v30 = vmul.f32 %v12580_v54, %v9495_v0  ;;  %v2894_v35 = vmul.f32 %v12580_v54, %v9539_v7  ;;  %v2895_v32 = vmul.f32 %v12580_v54, %v9501_v9  ;;  %v2898_v31 = vadd.f32 %v2882_v62, %v2862_v3  ;;  %v12585_v7 = vld [vmem:[#allocation45_spill] sm:$0xff]  ;;  %v12595_v54 = vld [vmem:[#allocation46_spill] sm:$0xff] }
 0x426   : > { %v2899_v58 = vadd.f32 %v2883_v33, %v2863_v15  ;;  %v2900_v27 = vadd.f32 %v2884_v38, %v2864_v44  ;;  %v2901_v55 = vadd.f32 %v2885_v40, %v2865_v26  ;;  %v2902_v28 = vadd.f32 %v2886_v16, %v2866_v46  ;;  %v12588_v15 = vld [vmem:[#allocation211_spill] sm:$0xff]  ;;  %v12589_v26 = vld [vmem:[#allocation206_spill] sm:$0xff] }
 0x427   : > { %v2903_v18 = vadd.f32 %v2887_v17, %v2867_v6  ;;  %v2904_v1 = vadd.f32 %v2888_v10, %v2868_v4  ;;  %v2910_v61 = vadd.f32 %v2894_v35, %v2874_v12  ;;  %v2911_v53 = vadd.f32 %v2895_v32, %v2875_v21  ;;  %v12591_v4 = vld [vmem:[#allocation116_spill] sm:$0xff]  ;;  %v12596_v38 = vld [vmem:[#allocation166_spill] sm:$0xff]  ;;  %v12597_v16 = vld [vmem:[#allocation127_spill] sm:$0xff] }
 0x428   : > { %v2905_v20 = vadd.f32 %v2889_v50, %v2869_v56  ;;  %v2906_v57 = vadd.f32 %v2890_v24, %v2870_v63  ;;  %v2907_v52 = vadd.f32 %v2891_v30, %v2871_v41  ;;  %v2908_v0 = vadd.f32 %v12583_v60, %v2872_v51  ;;  %v12592_v63 = vld [vmem:[#allocation90_spill] sm:$0xff]  ;;  %v12603_v60 = vld [vmem:[#allocation215_spill] sm:$0xff] }
 0x429   : > { %v2909_v29 = vadd.f32 %v12584_v45, %v2873_v34  ;;  %v2964_v8 = vmul.f32 %v12585_v7, %v12522_v11  ;;  %v2968_v9 = vmul.f32 %v12585_v7, %v12525_v13  ;;  %v2969_v49 = vmul.f32 %v12585_v7, %v12521_v43  ;;  %v12599_v10 = vld [vmem:[#allocation218_spill] sm:$0xff] }
 0x42a   : > { %v2965_v39 = vmul.f32 %v12585_v7, %v12460_v59  ;;  %v2966_v19 = vmul.f32 %v12585_v7, %v12586_v14  ;;  %v2970_v3 = vmul.f32 %v12585_v7, %v12587_v36  ;;  %v2971_v44 = vmul.f32 %v12585_v7, %v12588_v15 }
 0x42b   : > { %v2967_v46 = vmul.f32 %v12585_v7, %v12589_v26  ;;  %v9682_v2 = vadd.f32 %v12590_v23, %v2898_v31  ;;  %v2984_v48 = vadd.f32 %v2968_v9, %v2910_v61  ;;  %v2985_v6 = vadd.f32 %v2969_v49, %v2911_v53  ;;  %v12604_v49 = vld [vmem:[#allocation133_spill] sm:$0xff]  ;;  %v12606_v23 = vld [vmem:[#allocation128_spill] sm:$0xff] }
 0x42c   : > { %v9685_v56 = vadd.f32 %v12591_v4, %v2899_v58  ;;  %v2974_v41 = vadd.f32 %v12592_v63, %v2900_v27  ;;  %v2986_v51 = vadd.f32 %v2970_v3, %v2912_v22  ;;  %v2987_v34 = vadd.f32 %v2971_v44, %v2913_v25  ;;  %v12600_v25 = vld [vmem:[#allocation146_spill] sm:$0xff]  ;;  %v12605_v44 = vld [vmem:[#allocation168_spill] sm:$0xff] }
 0x42d   : > { %v2975_v12 = vadd.f32 %v12593_v47, %v2901_v55  ;;  %v2976_v21 = vadd.f32 %v12594_v42, %v2902_v28  ;;  %v3004_v62 = vmul.f32 %v12595_v54, %v12587_v36  ;;  %v3005_v33 = vmul.f32 %v12595_v54, %v12588_v15 }
 0x42e   : > { %v2977_v40 = vadd.f32 %v12596_v38, %v2903_v18  ;;  %v2978_v5 = vadd.f32 %v12597_v16, %v2904_v1  ;;  %v3006_v17 = vmul.f32 %v12595_v54, %v12598_v37  ;;  %v3007_v22 = vmul.f32 %v12595_v54, %v12599_v10  ;;  %v12601_v18 = vld [vmem:[#allocation63_spill] sm:$0xff] }
 0x42f   : > { %v2979_v50 = vadd.f32 %v12600_v25, %v2905_v20  ;;  %v2980_v24 = vadd.f32 %v2964_v8, %v2906_v57  ;;  %v3020_v30 = vadd.f32 %v3004_v62, %v2984_v48  ;;  %v3021_v35 = vadd.f32 %v3005_v33, %v2985_v6  ;;  %v12602_v57 = vld [vmem:[#allocation213_spill] sm:$0xff]  ;;  %v12608_v6 = vld [vmem:[#allocation64_spill] sm:$0xff] }
 0x430   : > { %v2981_v32 = vadd.f32 %v2965_v39, %v2907_v52  ;;  %v2982_v31 = vadd.f32 %v2966_v19, %v2908_v0  ;;  %v3022_v58 = vadd.f32 %v3006_v17, %v2986_v51  ;;  %v3023_v27 = vadd.f32 %v3007_v22, %v2987_v34  ;;  %v12609_v51 = vld [vmem:[#allocation153_spill] sm:$0xff] }
 0x431   : > { %v2983_v55 = vadd.f32 %v2967_v46, %v2909_v29  ;;  %v2998_v28 = vmul.f32 %v12595_v54, %v12522_v11  ;;  %v3040_v1 = vmul.f32 %v12601_v18, %v12598_v37  ;;  %v3041_v61 = vmul.f32 %v12601_v18, %v12599_v10 }
 0x432   : > { %v2999_v53 = vmul.f32 %v12595_v54, %v12460_v59  ;;  %v3000_v20 = vmul.f32 %v12595_v54, %v12586_v14  ;;  %v3042_v52 = vmul.f32 %v12601_v18, %v12602_v57  ;;  %v3043_v0 = vmul.f32 %v12601_v18, %v12603_v60 }
 0x433   : > { %v3001_v45 = vmul.f32 %v12595_v54, %v12589_v26  ;;  %v3002_v29 = vmul.f32 %v12595_v54, %v12525_v13  ;;  %v3056_v7 = vadd.f32 %v3040_v1, %v3020_v30  ;;  %v3057_v8 = vadd.f32 %v3041_v61, %v3021_v35  ;;  %v12613_v30 = vld [vmem:[#allocation72_spill] sm:$0xff] }
 0x434   : > { %v3003_v9 = vmul.f32 %v12595_v54, %v12521_v43  ;;  %v9722_v39 = vadd.f32 %v12604_v49, %v2974_v41  ;;  %v3058_v19 = vadd.f32 %v3042_v52, %v3022_v58  ;;  %v3059_v3 = vadd.f32 %v3043_v0, %v3023_v27  ;;  %v12611_v41 = vld [vmem:[#allocation221_spill] sm:$0xff]  ;;  %v12612_v54 = vld [vmem:[#allocation232_spill] sm:$0xff]  ;;  %v12615_v58 = vld [vmem:[#allocation47_spill] sm:$0xff] }
 0x435   : > { %v9725_v46 = vadd.f32 %v12605_v44, %v2975_v12  ;;  %v9728_v48 = vadd.f32 %v12606_v23, %v2976_v21  ;;  %v3076_v4 = vmul.f32 %v12608_v6, %v12602_v57  ;;  %v3077_v63 = vmul.f32 %v12608_v6, %v12603_v60  ;;  %v12621_v44 = vld [vmem:[#allocation74_spill] sm:$0xff] }
 0x436   : > { %v9735_v34 = vadd.f32 %v12609_v51, %v2977_v40  ;;  %v9737_v47 = vadd.f32 %v2998_v28, %v2978_v5  ;;  %v3078_v42 = vmul.f32 %v12608_v6, %v12611_v41  ;;  %v3079_v12 = vmul.f32 %v12608_v6, %v12612_v54  ;;  %v12617_v28 = vld [vmem:[#allocation73_spill] sm:$0xff] }
 0x437   : > { %12607 = vst [vmem:[#allocation163_spill] sm:$0xff] %v9728_v48  ;;  %v9743_v62 = vadd.f32 %v2999_v53, %v2979_v50  ;;  %v9745_v21 = vadd.f32 %v3000_v20, %v2980_v24  ;;  %v3092_v33 = vadd.f32 %v3076_v4, %v3056_v7  ;;  %v3093_v38 = vadd.f32 %v3077_v63, %v3057_v8  ;;  %v12622_v63 = vld [vmem:[#allocation276_spill] sm:$0xff] }
 0x438   : > { %12610 = vst [vmem:[#allocation165_spill] sm:$0xff] %v9735_v34  ;;  %v9747_v16 = vadd.f32 %v3001_v45, %v2981_v32  ;;  %v9749_v17 = vadd.f32 %v3002_v29, %v2982_v31  ;;  %v3094_v40 = vadd.f32 %v3078_v42, %v3058_v19  ;;  %v3095_v22 = vadd.f32 %v3079_v12, %v3059_v3  ;;  %v12614_v32 = vld [vmem:[#allocation220_spill] sm:$0xff]  ;;  %v12618_v29 = vld [vmem:[#allocation279_spill] sm:$0xff] }
 0x439   : > { %v9751_v5 = vadd.f32 %v3003_v9, %v2983_v55  ;;  %v9755_v25 = vmul.f32 %v12601_v18, %v12586_v14  ;;  %v3112_v50 = vmul.f32 %v12613_v30, %v12611_v41  ;;  %v3113_v24 = vmul.f32 %v12613_v30, %v12612_v54  ;;  %v12616_v55 = vld [vmem:[#allocation281_spill] sm:$0xff]  ;;  %v12619_v9 = vld [vmem:[#allocation223_spill] sm:$0xff]  ;;  %v12620_v19 = vld [vmem:[#allocation236_spill] sm:$0xff] }
 0x43a   : > { %v9763_v35 = vmul.f32 %v12601_v18, %v12589_v26  ;;  %v3130_v31 = vadd.f32 %v12614_v32, %v3094_v40  ;;  %v3131_v27 = vadd.f32 %v12615_v58, %v3095_v22  ;;  %v3151_v1 = vmul.f32 %v12617_v28, %v12616_v55 }
 0x43b   : > { %v9771_v61 = vmul.f32 %v12601_v18, %v12525_v13  ;;  %v9775_v53 = vmul.f32 %v12601_v18, %v12521_v43  ;;  %v3128_v20 = vadd.f32 %v3112_v50, %v3092_v33  ;;  %v3129_v52 = vadd.f32 %v3113_v24, %v3093_v38  ;;  %v12623_v24 = vld [vmem:[#allocation280_spill] sm:$0xff] }
 0x43c   : > { %v9779_v0 = vmul.f32 %v12601_v18, %v12587_v36  ;;  %v9783_v45 = vmul.f32 %v12601_v18, %v12588_v15  ;;  %v3166_v7 = vadd.f32 %v12618_v29, %v3130_v31  ;;  %v3167_v8 = vadd.f32 %v3151_v1, %v3131_v27  ;;  %v12624_v31 = vld [vmem:[#allocation284_spill] sm:$0xff] }
 0x43d   : > { %v3164_v49 = vadd.f32 %v12619_v9, %v3128_v20  ;;  %v3165_v3 = vadd.f32 %v12620_v19, %v3129_v52  ;;  %v3185_v23 = vmul.f32 %v12621_v44, %v12616_v55  ;;  %v3224_v4 = vrot.slane %v12521_v43, 1 }
 0x43e   : > { %v3202_v51 = vadd.f32 %v12622_v63, %v3166_v7  ;;  %v3210_v42 = vrot.slane %v12525_v13, 1  ;;  %v3225_v12 = vrot.slane %v12588_v15, 1  ;;  %v3226_v33 = vrot.slane %v12599_v10, 1  ;;  %v12747_v63 = vld [vmem:[#allocation187_spill] sm:$0xff] }
 0x43f   : > { %v3211_v38 = vrot.slane %v12587_v36, 1  ;;  %v3212_v40 = vrot.slane %v12598_v37, 1  ;;  %v3213_v22 = vrot.slane %v12602_v57, 1  ;;  %v3227_v50 = vrot.slane %v12603_v60, 1 }
 0x440   : > { %v3200_v32 = vadd.f32 %v12623_v24, %v3164_v49  ;;  %v3203_v58 = vadd.f32 %v12624_v31, %v3167_v8  ;;  %v3214_v27 = vrot.slane %v12611_v41, 1  ;;  %v3228_v1 = vrot.slane %v12612_v54, 1 }
 0x441   : > { %v3201_v20 = vadd.f32 %v3185_v23, %v3165_v3  ;;  %v9805_v29 = vsel %vm3232_vm7, %v3210_v42, %v3224_v4  ;;  %v3253_v7 = vsel %vm3232_vm7, %v3224_v4, %v3210_v42  ;;  %v3254_v9 = vsel %vm3232_vm7, %v3225_v12, %v3211_v38 }
 0x442   : > { %12626 = vst [vmem:[#allocation241_spill] sm:$0xff] %v9805_v29  ;;  %v3230_v19 = vrot.slane %v12616_v55, 1  ;;  %v9814_v8 = vsel %vm3232_vm7, %v3211_v38, %v3225_v12  ;;  %v3255_v49 = vsel %vm3232_vm7, %v3226_v33, %v3212_v40  ;;  %v3256_v3 = vsel %vm3232_vm7, %v3227_v50, %v3213_v22 }
 0x443   : > { %12627 = vst [vmem:[#allocation239_spill] sm:$0xff] %v9814_v8  ;;  %v9822_v23 = vsel %vm3232_vm7, %v3212_v40, %v3226_v33  ;;  %v9826_v4 = vsel %vm3232_vm7, %v3213_v22, %v3227_v50  ;;  %v9830_v42 = vsel %vm3266_vm9, %v3253_v7, 0.0  ;;  %v9834_v12 = vsel %vm3266_vm9, %v3254_v9, 0.0  ;;  %v12635_v22 = vld [vmem:[#allocation57_spill] sm:$0xff]  ;;  %v12637_v9 = vld [vmem:[#allocation58_spill] sm:$0xff] }
 0x444   : > { %12628 = vst [vmem:[#allocation76_spill] sm:$0xff] %v9822_v23  ;;  %12629 = vst [vmem:[#allocation242_spill] sm:$0xff] %v9826_v4  ;;  %v9838_v38 = vsel %vm3232_vm7, %v3214_v27, %v3228_v1  ;;  %v3257_v33 = vsel %vm3232_vm7, %v3228_v1, %v3214_v27  ;;  %v9844_v40 = vsel %vm3266_vm9, %v3255_v49, 0.0  ;;  %v3317_v50 = vmul.f32 %v12635_v22, %v9805_v29 }
 0x445   : > { %12631 = vst [vmem:[#allocation82_spill] sm:$0xff] %v9830_v42  ;;  %12632 = vst [vmem:[#allocation240_spill] sm:$0xff] %v9834_v12  ;;  %v9850_v24 = vsel %vm3266_vm9, %v3256_v3, 0.0  ;;  %v3318_v31 = vmul.f32 %v12635_v22, %v9830_v42  ;;  %v3319_v7 = vmul.f32 %v12635_v22, %v9814_v8  ;;  %v3320_v27 = vmul.f32 %v12635_v22, %v9834_v12 }
 0x446   : > { %12633 = vst [vmem:[#allocation286_spill] sm:$0xff] %v9838_v38  ;;  %12634 = vst [vmem:[#allocation285_spill] sm:$0xff] %v9844_v40  ;;  %v3333_v1 = vadd.f32 %v3317_v50, %v3200_v32  ;;  %v3353_v49 = vmul.f32 %v12637_v9, %v9814_v8  ;;  %v3354_v54 = vmul.f32 %v12637_v9, %v9834_v12  ;;  %v9868_v48 = vsel %vm3266_vm9, %v3257_v33, 0.0  ;;  %v12639_v50 = vld [vmem:[#allocation70_spill] sm:$0xff]  ;;  %v9874_v12 = vpop.f32.mrf.mxu0  ;;  %v12641_v33 = vld [vmem:[#allocation273_spill] sm:$0xff] }
 0x447   : > { %12636 = vst [vmem:[#allocation202_spill] sm:$0xff] %v9850_v24  ;;  %v3355_v3 = vmul.f32 %v12637_v9, %v9822_v23  ;;  %v3334_v41 = vadd.f32 %v3318_v31, %v3201_v20  ;;  %v3335_v60 = vadd.f32 %v3319_v7, %v3202_v51  ;;  %v3336_v57 = vadd.f32 %v3320_v27, %v3203_v58 }
 0x448   : > { %v3356_v34 = vmul.f32 %v12637_v9, %v9844_v40  ;;  %12638 = vst [vmem:[#allocation243_spill] sm:$0xff] %v9868_v48  ;;  %v3369_v32 = vadd.f32 %v3353_v49, %v3333_v1  ;;  %v3389_v22 = vmul.f32 %v12639_v50, %v9822_v23  ;;  %v3391_v18 = vmul.f32 %v12639_v50, %v9826_v4  ;;  %v9888_v49 = vld [vmem:[#allocation11 + $0x18] sm:$0x7f]  ;;  %v9906_v23 = vpop.f32.mrf.mxu0 }
 0x449   : > { %v3370_v8 = vadd.f32 %v3354_v54, %v3334_v41  ;;  %v3371_v20 = vadd.f32 %v3355_v3, %v3335_v60  ;;  %v3392_v58 = vmul.f32 %v12639_v50, %v9850_v24  ;;  %v9880_v31 = vadd.f32 %v9755_v25, %v9737_v47  ;;  %12643 = vst [vmem:[#allocation50_spill] sm:$0xff] %v9888_v49  ;;  %v12644_v41 = vld [vmem:[#allocation44_spill] sm:$0xff]  ;;  %v1730_v25 = vpop.f32.mrf.mxu1 }
 0x44a   : > { %v3372_v51 = vadd.f32 %v3356_v34, %v3336_v57  ;;  %v12642_v7 = vrot.slane %v12641_v33, 1  ;;  %v3390_v1 = vmul.f32 %v12639_v50, %v9844_v40  ;;  %v9892_v57 = vrot.slane %v9888_v49, %v12644_v41 }
 0x44b   : > { %12640 = vst [vmem:[#allocation245_spill] sm:$0xff] %v9880_v31  ;;  %v9896_v60 = vadd.f32 %v9763_v35, %v9743_v62  ;;  %v3405_v34 = vadd.f32 %v3389_v22, %v3369_v32  ;;  %v3407_v47 = vadd.f32 %v3391_v18, %v3371_v20  ;;  %v3052_v62 = vadd.f32 %v9771_v61, %v9745_v21 }
 0x44c   : > { %v3259_v27 = vsel %vm3232_vm7, %v3230_v19, %v12642_v7  ;;  %12645 = vst [vmem:[#allocation135_spill] sm:$0xff] %v9892_v57  ;;  %v3408_v54 = vadd.f32 %v3392_v58, %v3372_v51  ;;  %v12647_v3 = vmov %v12642_v7  ;;  %v3406_v31 = vadd.f32 %v3390_v1, %v3370_v8  ;;  %v1734_v58 = vpop.f32.mrf.mxu1  ;;  %v12649_v1 = vld [vmem:[#allocation266_spill] sm:$0xff] }
 0x44d   : > { %12646 = vst [vmem:[#allocation51_spill] sm:$0xff] %v9896_v60  ;;  %v3245_v7 = vsel %vm3232_vm7, %v12647_v3, %v3230_v19  ;;  %v3427_v40 = vmul.f32 %v9892_v57, %v9838_v38  ;;  %v3428_v41 = vmul.f32 %v9892_v57, %v9868_v48  ;;  %v3053_v18 = vadd.f32 %v9775_v53, %v9747_v16  ;;  %v12648_v53 = vld [vmem:[#allocation87_spill] sm:$0xff] }
 0x44e   : > { %v3298_v35 = vsel %vm3266_vm9, %v3259_v27, 0.0  ;;  %v3425_v19 = vmul.f32 %v9892_v57, %v9826_v4  ;;  %v3054_v8 = vadd.f32 %v9779_v0, %v9749_v17  ;;  %v3426_v22 = vmul.f32 %v9892_v57, %v9850_v24  ;;  %v12650_v4 = vld [vmem:[#allocation269_spill] sm:$0xff]  ;;  %v9928_v24 = vpop.f32.mrf.mxu0 }
 0x44f   : > { %v3443_v32 = vadd.f32 %v3427_v40, %v3407_v47  ;;  %v3444_v20 = vadd.f32 %v3428_v41, %v3408_v54  ;;  %v3072_v21 = vmul.f32 %v12608_v6, %v12587_v36  ;;  %v3073_v16 = vmul.f32 %v12608_v6, %v12588_v15 }
 0x450   : > { %v3441_v61 = vadd.f32 %v3425_v19, %v3405_v34  ;;  %v3499_v51 = vmul.f32 %v12648_v53, %v3245_v7  ;;  %v3442_v27 = vadd.f32 %v3426_v22, %v3406_v31  ;;  %v3500_v0 = vmul.f32 %v12648_v53, %v3298_v35  ;;  %v12651_v34 = vld [vmem:[#allocation84_spill] sm:$0xff] }
 0x451   : > { %v3479_v3 = vadd.f32 %v12649_v1, %v3443_v32  ;;  %v3480_v17 = vadd.f32 %v12650_v4, %v3444_v20  ;;  %v3055_v40 = vadd.f32 %v9783_v45, %v9751_v5  ;;  %v3074_v47 = vmul.f32 %v12608_v6, %v12598_v37  ;;  %v12652_v1 = vld [vmem:[#allocation292_spill] sm:$0xff] }
 0x452   : > { %v3088_v54 = vadd.f32 %v3072_v21, %v3052_v62  ;;  %v3461_v41 = vmul.f32 %v12651_v34, %v9838_v38  ;;  %v3089_v19 = vadd.f32 %v3073_v16, %v3053_v18  ;;  %v3462_v31 = vmul.f32 %v12651_v34, %v9868_v48  ;;  %v1736_v62 = vpop.f32.mrf.mxu1  ;;  %v12653_v18 = vld [vmem:[#allocation293_spill] sm:$0xff]  ;;  %v12689_v34 = vld [vmem:[#allocation190_spill] sm:$0xff] }
 0x453   : > { %v3515_v22 = vadd.f32 %v3499_v51, %v3479_v3  ;;  %v3516_v4 = vadd.f32 %v3500_v0, %v3480_v17  ;;  %v3075_v32 = vmul.f32 %v12608_v6, %v12599_v10  ;;  %v3108_v20 = vmul.f32 %v12613_v30, %v12598_v37  ;;  %v9951_v3 = vpop.f32.mrf.mxu0  ;;  %v12680_v37 = vld [vmem:[#allocation225_spill] sm:$0xff] }
 0x454   : > { %v3109_v5 = vmul.f32 %v12613_v30, %v12599_v10  ;;  %v3477_v45 = vadd.f32 %v3461_v41, %v3441_v61  ;;  %v3478_v21 = vadd.f32 %v3462_v31, %v3442_v27  ;;  %v3573_v51 = vrot.slane %v12521_v43, 2  ;;  %v12658_v27 = vld [vmem:[#allocation88_spill] sm:$0xff] }
 0x455   : > { %v9945_v38 = vadd.f32 %v12652_v1, %v3515_v22  ;;  %v9948_v16 = vadd.f32 %v12653_v18, %v3516_v4  ;;  %v9953_v17 = vadd.f32 %v3074_v47, %v3054_v8  ;;  %v9955_v0 = vadd.f32 %v3075_v32, %v3055_v40  ;;  %v12659_v1 = vld [vmem:[#allocation267_spill] sm:$0xff]  ;;  %v9968_v40 = vld [vmem:[#allocation11 + $0x28] sm:$0x7f]  ;;  %v12663_v32 = vld [vmem:[#allocation270_spill] sm:$0xff] }
 0x456   : > { %v9957_v48 = vadd.f32 %v3108_v20, %v3088_v54  ;;  %v3574_v61 = vrot.slane %v12588_v15, 2  ;;  %v9960_v41 = vadd.f32 %v3109_v5, %v3089_v19  ;;  %v3533_v31 = vmul.f32 %v12658_v27, %v3245_v7  ;;  %12660 = vst [vmem:[#allocation95_spill] sm:$0xff] %v9968_v40  ;;  %v12661_v47 = vld [vmem:[#allocation39_spill] sm:$0xff]  ;;  %v1738_v19 = vpop.f32.mrf.mxu1  ;;  %v12664_v5 = vld [vmem:[#allocation65_spill] sm:$0xff]  ;;  %v12679_v10 = vld [vmem:[#allocation40_spill] sm:$0xff] }
 0x457   : > { %12654 = vst [vmem:[#allocation132_spill] sm:$0xff] %v9953_v17  ;;  %12655 = vst [vmem:[#allocation52_spill] sm:$0xff] %v9955_v0  ;;  %v3559_v22 = vrot.slane %v12525_v13, 2  ;;  %v3579_v4 = vrot.slane %v12616_v55, 2  ;;  %v3513_v18 = vadd.f32 %v12659_v1, %v3477_v45  ;;  %v3534_v60 = vmul.f32 %v12658_v27, %v3298_v35  ;;  %v12666_v45 = vld [vmem:[#allocation62_spill] sm:$0xff]  ;;  %v9983_v35 = vpop.f32.mrf.mxu0 }
 0x458   : > { %12656 = vst [vmem:[#allocation117_spill] sm:$0xff] %v9957_v48  ;;  %12657 = vst [vmem:[#allocation115_spill] sm:$0xff] %v9960_v41  ;;  %v3560_v8 = vrot.slane %v12587_v36, 2  ;;  %v9972_v54 = vrot.slane %v9968_v40, %v12661_v47  ;;  %v3514_v20 = vadd.f32 %v12663_v32, %v3478_v21  ;;  %v9978_v55 = vadd.f32 %v1730_v25, %v12664_v5 }
 0x459   : > { %v3602_v7 = vsel %vm3581_vm4, %v3573_v51, %v3559_v22  ;;  %v9981_v1 = vadd.f32 %v1734_v58, %v12666_v45  ;;  %v9987_v0 = vsel %vm3581_vm4, %v3559_v22, %v3573_v51  ;;  %v9996_v32 = vadd.f32 %v1736_v62, %v12664_v5 }
 0x45a   : > { %12662 = vst [vmem:[#allocation96_spill] sm:$0xff] %v9972_v54  ;;  %12665 = vst [vmem:[#allocation171_spill] sm:$0xff] %v9978_v55  ;;  %v9991_v17 = vsel %vm3581_vm4, %v3560_v8, %v3574_v61  ;;  %v3603_v21 = vsel %vm3581_vm4, %v3574_v61, %v3560_v8  ;;  %v12671_v25 = vrot.slane %v12641_v33, 2  ;;  %v4430_v22 = vmul.f32 %v9978_v55, %v9978_v55  ;;  %v1740_v33 = vpop.f32.mrf.mxu1 }
 0x45b   : > { %12667 = vst [vmem:[#allocation170_spill] sm:$0xff] %v9981_v1  ;;  %12668 = vst [vmem:[#allocation66_spill] sm:$0xff] %v9987_v0  ;;  %v4263_v61 = vmul.f32 %v9981_v1, %v9981_v1  ;;  %v3549_v8 = vadd.f32 %v3533_v31, %v3513_v18  ;;  %v10014_v48 = vsel %vm3615_vm10, %v3602_v7, 0.0  ;;  %v3550_v9 = vadd.f32 %v3534_v60, %v3514_v20  ;;  %v10027_v18 = vpop.f32.mrf.mxu0 }
 0x45c   : > { %12669 = vst [vmem:[#allocation294_spill] sm:$0xff] %v9991_v17  ;;  %12670 = vst [vmem:[#allocation97_spill] sm:$0xff] %v9996_v32  ;;  %v10002_v58 = vsel %vm3581_vm4, %v12671_v25, %v3579_v4  ;;  %v12673_v41 = vmov %v12671_v25  ;;  %v4431_v25 = vmul.f32 %v9996_v32, %v9996_v32  ;;  %v4349_v6 = vadd.f32 1.0, %v12680_v37  ;;  %v1744_v62 = vpop.f32.mrf.mxu1 }
 0x45d   : > { %12672 = vst [vmem:[#allocation98_spill] sm:$0xff] %v10002_v58  ;;  %v3608_v51 = vsel %vm3581_vm4, %v3579_v4, %v12673_v41  ;;  %12675 = vst [vmem:[#allocation174_spill] sm:$0xff] %v10014_v48  ;;  %v10019_v58 = vadd.f32 %v1738_v19, %v12666_v45  ;;  %v10023_v41 = vsel %vm3615_vm10, %v3603_v21, 0.0  ;;  %v4446_v4 = vmul.f32 %v4430_v22, %v9978_v55  ;;  %v12681_v22 = vld [vmem:[#allocation227_spill] sm:$0xff]  ;;  %v10060_v27 = vpop.f32.mrf.mxu0 }
 0x45e   : > { %12677 = vst [vmem:[#allocation138_spill] sm:$0xff] %v10023_v41  ;;  %v4279_v31 = vmul.f32 %v4263_v61, %v9981_v1  ;;  %v10031_v7 = vsel %vm3615_vm10, %v3608_v51, 0.0  ;;  %v3666_v19 = vmul.f32 %v12679_v10, %v9987_v0  ;;  %v4447_v21 = vmul.f32 %v4431_v25, %v9996_v32  ;;  %v12683_v0 = vld [vmem:[#allocation164_spill] sm:$0xff] }
 0x45f   : > { %12676 = vst [vmem:[#allocation172_spill] sm:$0xff] %v10019_v58  ;;  %12678 = vst [vmem:[#allocation137_spill] sm:$0xff] %v10031_v7  ;;  %v4264_v60 = vmul.f32 %v10019_v58, %v10019_v58  ;;  %v4462_v20 = vmul.f32 0.044715, %v4446_v4  ;;  %v4350_v40 = vadd.f32 1.0, %v12681_v22  ;;  %v10041_v61 = vadd.f32 %v1740_v33, %v12664_v5  ;;  %v12684_v4 = vld [vmem:[#allocation60_spill] sm:$0xff] }
 0x460   : > { %v3667_v51 = vmul.f32 %v12679_v10, %v10014_v48  ;;  %v3668_v7 = vmul.f32 %v12679_v10, %v9991_v17  ;;  %v3669_v37 = vmul.f32 %v12679_v10, %v10023_v41  ;;  %v4347_v54 = vadd.f32 1.0, %v12683_v0  ;;  %v5890_v33 = vld [vmem:[%s12140_s14] sm:$0x7] }
 0x461   : > { %12682 = vst [vmem:[#allocation67_spill] sm:$0xff] %v10041_v61  ;;  %v3702_v49 = vmul.f32 %v12684_v4, %v9991_v17  ;;  %v3703_v25 = vmul.f32 %v12684_v4, %v10023_v41  ;;  %v4295_v22 = vmul.f32 0.044715, %v4279_v31  ;;  %v12685_v48 = vld [vmem:[#allocation43_spill] sm:$0xff]  ;;  %v3682_v10 = vadd.f32 %v3666_v19, %v3549_v8 }
 0x462   : > { %v10058_v47 = vrot.slane %v5890_v33, %v12685_v48  ;;  %v3683_v42 = vadd.f32 %v3667_v51, %v3550_v9  ;;  %v4365_v0 = vmul.f32 0.5, %v4349_v6  ;;  %v4280_v29 = vmul.f32 %v4264_v60, %v10019_v58  ;;  %v1746_v60 = vpop.f32.mrf.mxu1 }
 0x463   : > { %v4478_v17 = vadd.f32 %v4462_v20, %v9978_v55  ;;  %v4463_v53 = vmul.f32 0.044715, %v4447_v21  ;;  %v4366_v4 = vmul.f32 0.5, %v4350_v40  ;;  %v4432_v31 = vmul.f32 %v10041_v61, %v10041_v61 }
 0x464   : > { %12686 = vst [vmem:[#allocation175_spill] sm:$0xff] %v10058_v47  ;;  %v10067_v41 = vadd.f32 %v3668_v7, %v9945_v38  ;;  %v10070_v48 = vadd.f32 %v3669_v37, %v9948_v16  ;;  %v4363_v33 = vmul.f32 0.5, %v4347_v54  ;;  %v4348_v8 = vadd.f32 1.0, %v12689_v34  ;;  %v1806_v38 = vpop.f32.mrf.mxu0  ;;  %v12690_v7 = vld [vmem:[#allocation158_spill] sm:$0xff]  ;;  %v12691_v37 = vld [vmem:[#allocation179_spill] sm:$0xff] }
 0x465   : > { %v4311_v6 = vadd.f32 %v4295_v22, %v9981_v1  ;;  %v1796_v9 = vadd.f32 %v9874_v12, %v10058_v47  ;;  %v1788_v40 = vadd.f32 %v9906_v23, %v10058_v47  ;;  %v1799_v19 = vadd.f32 %v9928_v24, %v10058_v47  ;;  %v12692_v23 = vld [vmem:[#allocation110_spill] sm:$0xff] }
 0x466   : > { %12687 = vst [vmem:[#allocation173_spill] sm:$0xff] %v10067_v41  ;;  %12688 = vst [vmem:[#allocation144_spill] sm:$0xff] %v10070_v48  ;;  %v4381_v20 = vmul.f32 %v4365_v0, %v12690_v7  ;;  %v4296_v16 = vmul.f32 0.044715, %v4280_v29  ;;  %v1791_v54 = vadd.f32 %v9951_v3, %v10058_v47  ;;  %v4364_v34 = vmul.f32 0.5, %v4348_v8  ;;  %v12693_v48 = vld [vmem:[#allocation136_spill] sm:$0xff] }
 0x467   : > { %v4494_v21 = vmul.f32 0.7978846, %v4478_v17  ;;  %v4479_v51 = vadd.f32 %v4463_v53, %v9996_v32  ;;  %v4382_v12 = vmul.f32 %v4366_v4, %v12691_v37  ;;  %v4448_v22 = vmul.f32 %v4432_v31, %v10041_v61  ;;  %v10096_v53 = vpop.f32.mrf.mxu0 }
 0x468   : > { %v4379_v1 = vmul.f32 %v4363_v33, %v12692_v23  ;;  %v4380_v24 = vmul.f32 %v4364_v34, %v12693_v48  ;;  %v10089_v41 = vadd.f32 %v1744_v62, %v12666_v45  ;;  %v10092_v29 = vadd.f32 %v1746_v60, %v12664_v5  ;;  %v12697_v33 = vld [vmem:[#allocation250_spill] sm:$0xff]  ;;  %v1748_v48 = vpop.f32.mrf.mxu1 }
 0x469   : > { %v10094_v0 = vadd.f32 %v3702_v49, %v3682_v10  ;;  %v4327_v3 = vmul.f32 0.7978846, %v4311_v6  ;;  %v4397_v17 = vmul.f32 %v4381_v20, %v1796_v9  ;;  %v4398_v8 = vmul.f32 %v4382_v12, %v1799_v19  ;;  %v12698_v23 = vld [vmem:[#allocation230_spill] sm:$0xff]  ;;  %v12699_v6 = vld [vmem:[#allocation256_spill] sm:$0xff] }
 0x46a   : > { %12694 = vst [vmem:[#allocation139_spill] sm:$0xff] %v10089_v41  ;;  %12695 = vst [vmem:[#allocation145_spill] sm:$0xff] %v10092_v29  ;;  %v4395_v4 = vmul.f32 %v4379_v1, %v1788_v40  ;;  %v4312_v31 = vadd.f32 %v4296_v16, %v10019_v58  ;;  %v4396_v7 = vmul.f32 %v4380_v24, %v1791_v54  ;;  %v4353_v37 = vadd.f32 1.0, %v12697_v33  ;;  %v1819_v16 = vpop.f32.mrf.mxu0  ;;  %v12704_v33 = vld [vmem:[#allocation291_spill] sm:$0xff] }
 0x46b   : > { %12696 = vst [vmem:[#allocation140_spill] sm:$0xff] %v10094_v0  ;;  %5867 = vtanh.f32 %v4494_v21  ;;  %v4495_v62 = vmul.f32 0.7978846, %v4479_v51  ;;  %v4464_v34 = vmul.f32 0.044715, %v4448_v22  ;;  %v4351_v60 = vadd.f32 1.0, %v12698_v23  ;;  %v1750_v22 = vpop.f32.mrf.mxu1 }
 0x46c   : > { %v4265_v10 = vmul.f32 %v10089_v41, %v10089_v41  ;;  %v4433_v49 = vmul.f32 %v10092_v29, %v10092_v29  ;;  %v4354_v9 = vadd.f32 1.0, %v12699_v6  ;;  %v4411_v1 = vpack.c.bf16 %v4396_v7, %v4395_v4 }
 0x46d   : > { %v10106_v40 = vadd.f32 %v3703_v25, %v3683_v42  ;;  %5869 = vtanh.f32 %v4327_v3  ;;  %v4412_v19 = vpack.c.bf16 %v4398_v8, %v4397_v17  ;;  %v1812_v20 = vadd.f32 %v9983_v35, %v10058_v47  ;;  %v12702_v42 = vld [vmem:[#allocation238_spill] sm:$0xff] }
 0x46e   : > { %v4328_v54 = vmul.f32 0.7978846, %v4312_v31  ;;  %v4369_v21 = vmul.f32 0.5, %v4353_v37  ;;  %v10111_v51 = vadd.f32 %v1748_v48, %v12666_v45  ;;  %v4370_v12 = vmul.f32 0.5, %v4354_v9  ;;  %5481 = vmatprep.mubr.bf16.mxu0 %v4411_v1  ;;  %v5428_v48 = vpop.f32.mrf.mxu0 }
 0x46f   : > { %12700 = vst [vmem:[#allocation77_spill] sm:$0xff] %v10106_v40  ;;  %5871 = vtanh.f32 %v4495_v62  ;;  %v4480_v24 = vadd.f32 %v4464_v34, %v10041_v61  ;;  %v4367_v4 = vmul.f32 0.5, %v4351_v60  ;;  %v4352_v25 = vadd.f32 1.0, %v12702_v42  ;;  %5482 = vmatmul.mubr.bf16.vlgmr.msra.gmra.mxu0 %v4412_v19  ;;  %v12705_v62 = vld [vmem:[#allocation198_spill] sm:$0xff]  ;;  %v12706_v60 = vld [vmem:[#allocation204_spill] sm:$0xff]  ;;  %v12710_v42 = vld [vmem:[#allocation75_spill] sm:$0xff] }
 0x470   : > { %12701 = vst [vmem:[#allocation251_spill] sm:$0xff] %v10111_v51  ;;  %v4281_v3 = vmul.f32 %v4265_v10, %v10089_v41  ;;  %v4449_v35 = vmul.f32 %v4433_v49, %v10092_v29  ;;  %v1804_v17 = vadd.f32 %v10027_v18, %v10058_v47  ;;  %v1815_v45 = vadd.f32 %v10060_v27, %v10058_v47  ;;  %v12707_v18 = vld [vmem:[#allocation275_spill] sm:$0xff]  ;;  %v12779_v61 = vld [vmem:[#allocation196_spill] sm:$0xff] }
 0x471   : > { %v10122_v8 = vadd.f32 %v1750_v22, %v12664_v5  ;;  %v1807_v31 = vadd.f32 %v1806_v38, %v10058_v47  ;;  %v4368_v7 = vmul.f32 0.5, %v4352_v25  ;;  %v4357_v37 = vadd.f32 1.0, %v12704_v33  ;;  %v12708_v27 = vld [vmem:[#allocation183_spill] sm:$0xff]  ;;  %v12709_v5 = vld [vmem:[#allocation192_spill] sm:$0xff] }
 0x472   : > { %v4385_v34 = vmul.f32 %v4369_v21, %v12705_v62  ;;  %v4266_v23 = vmul.f32 %v10111_v51, %v10111_v51  ;;  %v4386_v10 = vmul.f32 %v4370_v12, %v12706_v60  ;;  %v4355_v49 = vadd.f32 1.0, %v12707_v18  ;;  %v1822_v12 = vpop.f32.mrf.mxu0 }
 0x473   : > { %12703 = vst [vmem:[#allocation246_spill] sm:$0xff] %v10122_v8  ;;  %5873 = vtanh.f32 %v4328_v54  ;;  %v4383_v6 = vmul.f32 %v4367_v4, %v12708_v27  ;;  %v4384_v9 = vmul.f32 %v4368_v7, %v12709_v5  ;;  %v4373_v1 = vmul.f32 0.5, %v4357_v37  ;;  %v12711_v4 = vld [vmem:[#allocation290_spill] sm:$0xff]  ;;  %v12712_v7 = vld [vmem:[#allocation249_spill] sm:$0xff] }
 0x474   : > { %v4297_v38 = vmul.f32 0.044715, %v4281_v3  ;;  %v4401_v19 = vmul.f32 %v4385_v34, %v1812_v20  ;;  %v4402_v22 = vmul.f32 %v4386_v10, %v1815_v45  ;;  %v4358_v25 = vadd.f32 1.0, %v12710_v42 }
 0x475   : > { %v4465_v33 = vmul.f32 0.044715, %v4449_v35  ;;  %v4399_v21 = vmul.f32 %v4383_v6, %v1804_v17  ;;  %v4434_v62 = vmul.f32 %v10122_v8, %v10122_v8  ;;  %v4400_v58 = vmul.f32 %v4384_v9, %v1807_v31  ;;  %v12714_v17 = vld [vmem:[#allocation278_spill] sm:$0xff] }
 0x476   : > { %v4282_v60 = vmul.f32 %v4266_v23, %v10111_v51  ;;  %v4371_v54 = vmul.f32 0.5, %v4355_v49  ;;  %v4374_v18 = vmul.f32 0.5, %v4358_v25  ;;  %v4356_v27 = vadd.f32 1.0, %v12711_v4  ;;  %v12717_v25 = vld [vmem:[#allocation229_spill] sm:$0xff] }
 0x477   : > { %v4389_v37 = vmul.f32 %v4373_v1, %v12712_v7  ;;  %v1820_v20 = vadd.f32 %v1819_v16, %v10058_v47  ;;  %v1831_v3 = vadd.f32 %v5428_v48, %v10058_v47  ;;  %v4413_v45 = vpack.c.bf16 %v4400_v58, %v4399_v21  ;;  %v12716_v48 = vld [vmem:[#allocation210_spill] sm:$0xff] }
 0x478   : > { %v10141_v35 = vpop.eup %5867  ;;  %v4390_v34 = vmul.f32 %v4374_v18, %v12714_v17  ;;  %v1823_v31 = vadd.f32 %v1822_v12, %v10058_v47  ;;  %v4372_v10 = vmul.f32 0.5, %v4356_v27  ;;  %v4414_v6 = vpack.c.bf16 %v4402_v22, %v4401_v19  ;;  %v12719_v22 = vld [vmem:[#allocation94_spill] sm:$0xff]  ;;  %v12724_v17 = vld [vmem:[#allocation169_spill] sm:$0xff] }
 0x479   : > { %12713 = vst [vmem:[#allocation80_spill] sm:$0xff] %v10141_v35  ;;  %v4496_v23 = vmul.f32 0.7978846, %v4480_v24  ;;  %v4313_v49 = vadd.f32 %v4297_v38, %v10089_v41  ;;  %v4481_v5 = vadd.f32 %v4465_v33, %v10092_v29  ;;  %v4450_v9 = vmul.f32 %v4434_v62, %v10122_v8  ;;  %5485 = vmatprep.mubr.bf16.mxu0 %v4413_v45  ;;  %v12718_v24 = vld [vmem:[#allocation91_spill] sm:$0xff]  ;;  %v12720_v62 = vld [vmem:[#allocation129_spill] sm:$0xff]  ;;  %v12783_v35 = vld [vmem:[#allocation66_spill] sm:$0xff] }
 0x47a   : > { %v10148_v16 = vpop.eup %5869  ;;  %v1828_v58 = vadd.f32 %v10096_v53, %v10058_v47  ;;  %v4387_v1 = vmul.f32 %v4371_v54, %v12716_v48  ;;  %v4406_v42 = vmul.f32 %v4390_v34, %v1831_v3  ;;  %v4388_v21 = vmul.f32 %v4372_v10, %v12717_v25  ;;  %5486 = vmatmul.mubr.bf16.gmra.mxu0 %v4414_v6  ;;  %v12722_v54 = vld [vmem:[#allocation154_spill] sm:$0xff]  ;;  %v12725_v6 = vld [vmem:[#allocation193_spill] sm:$0xff] }
 0x47b   : > { %12715 = vst [vmem:[#allocation252_spill] sm:$0xff] %v10148_v16  ;;  %v4298_v19 = vmul.f32 0.044715, %v4282_v60  ;;  %v3008_v38 = vadd.f32 %v12718_v24, %v9682_v2  ;;  %v3009_v33 = vadd.f32 %v12719_v22, %v9685_v56  ;;  %v3046_v12 = vadd.f32 %v12720_v62, %v9722_v39  ;;  %v12723_v60 = vld [vmem:[#allocation134_spill] sm:$0xff]  ;;  %v12727_v24 = vld [vmem:[#allocation156_spill] sm:$0xff] }
 0x47c   : > { %v10160_v18 = vpop.eup %5871  ;;  %v4405_v4 = vmul.f32 %v4389_v37, %v1828_v58  ;;  %v4403_v53 = vmul.f32 %v4387_v1, %v1820_v20  ;;  %v4404_v27 = vmul.f32 %v4388_v21, %v1823_v31  ;;  %v3047_v7 = vadd.f32 %v12722_v54, %v9725_v46  ;;  %v12726_v39 = vld [vmem:[#allocation130_spill] sm:$0xff]  ;;  %v12728_v20 = vld [vmem:[#allocation208_spill] sm:$0xff] }
 0x47d   : > { %12721 = vst [vmem:[#allocation247_spill] sm:$0xff] %v10160_v18  ;;  %5875 = vtanh.f32 %v4496_v23  ;;  %v4466_v3 = vmul.f32 0.044715, %v4450_v9  ;;  %v3044_v45 = vadd.f32 %v12723_v60, %v3008_v38  ;;  %v3045_v2 = vadd.f32 %v12724_v17, %v3009_v33 }
 0x47e   : > { %v4329_v34 = vmul.f32 0.7978846, %v4313_v49  ;;  %v4415_v10 = vpack.c.bf16 %v4404_v27, %v4403_v53  ;;  %v4416_v56 = vpack.c.bf16 %v4406_v42, %v4405_v4  ;;  %v3082_v48 = vadd.f32 %v12725_v6, %v3046_v12 }
 0x47f   : > { %v3080_v25 = vadd.f32 %v12726_v39, %v3044_v45  ;;  %v3081_v37 = vadd.f32 %v12727_v24, %v3045_v2  ;;  %v3083_v31 = vadd.f32 %v12728_v20, %v3047_v7  ;;  %v3100_v46 = vmul.f32 %v12613_v30, %v12522_v11  ;;  %v12730_v20 = vld [vmem:[#allocation113_spill] sm:$0xff] }
 0x480   : > { %v10172_v23 = vpop.eup %5873  ;;  %v4497_v9 = vmul.f32 0.7978846, %v4481_v5  ;;  %v4314_v58 = vadd.f32 %v4298_v19, %v10111_v51  ;;  %5489 = vmatprep.mubr.bf16.mxu0 %v4415_v10  ;;  %v3101_v49 = vmul.f32 %v12613_v30, %v12460_v59  ;;  %v3102_v1 = vmul.f32 %v12613_v30, %v12586_v14 }
 0x481   : > { %12729 = vst [vmem:[#allocation85_spill] sm:$0xff] %v10172_v23  ;;  %v4482_v42 = vadd.f32 %v4466_v3, %v10122_v8  ;;  %v3103_v21 = vmul.f32 %v12613_v30, %v12589_v26  ;;  %v3116_v38 = vadd.f32 %v3100_v46, %v3080_v25  ;;  %v3136_v22 = vmul.f32 %v12617_v28, %v12586_v14  ;;  %v12732_v46 = vld [vmem:[#allocation114_spill] sm:$0xff]  ;;  %v12775_v23 = vld [vmem:[#allocation39_spill] sm:$0xff] }
 0x482   : > { %5490 = vmatmul.mubr.bf16.gmra.mxu0 %v4416_v56  ;;  %v3117_v5 = vadd.f32 %v3101_v49, %v3081_v37  ;;  %v3118_v33 = vadd.f32 %v3102_v1, %v3082_v48  ;;  %v3137_v19 = vmul.f32 %v12617_v28, %v12589_v26  ;;  %v3138_v62 = vmul.f32 %v12617_v28, %v12525_v13 }
 0x483   : > { %5877 = vtanh.f32 %v4329_v34  ;;  %v3119_v12 = vadd.f32 %v3103_v21, %v3083_v31  ;;  %v3139_v4 = vmul.f32 %v12617_v28, %v12521_v43  ;;  %v3152_v53 = vadd.f32 %v3136_v22, %v3116_v38  ;;  %v12736_v22 = vld [vmem:[#allocation120_spill] sm:$0xff] }
 0x484   : > { %v4330_v27 = vmul.f32 0.7978846, %v4314_v58  ;;  %v3153_v54 = vadd.f32 %v3137_v19, %v3117_v5  ;;  %v3154_v7 = vadd.f32 %v3138_v62, %v3118_v33  ;;  %v3172_v3 = vmul.f32 %v12621_v44, %v12525_v13 }
 0x485   : > { %v3155_v60 = vadd.f32 %v3139_v4, %v3119_v12  ;;  %v3173_v45 = vmul.f32 %v12621_v44, %v12521_v43  ;;  %v3174_v17 = vmul.f32 %v12621_v44, %v12587_v36  ;;  %v3175_v2 = vmul.f32 %v12621_v44, %v12588_v15 }
 0x486   : > { %5879 = vtanh.f32 %v4497_v9  ;;  %v4498_v34 = vmul.f32 0.7978846, %v4482_v42  ;;  %v3188_v10 = vadd.f32 %v3172_v3, %v3152_v53  ;;  %v3208_v56 = vrot.slane %v12522_v11, 1  ;;  %v12739_v53 = vld [vmem:[#allocation121_spill] sm:$0xff]  ;;  %v12741_v3 = vld [vmem:[#allocation104_spill] sm:$0xff] }
 0x487   : > { %v3189_v6 = vadd.f32 %v3173_v45, %v3153_v54  ;;  %v3190_v48 = vadd.f32 %v3174_v17, %v3154_v7  ;;  %v3191_v39 = vadd.f32 %v3175_v2, %v3155_v60  ;;  %v3222_v25 = vrot.slane %v12460_v59, 1  ;;  %v12740_v54 = vld [vmem:[#allocation103_spill] sm:$0xff]  ;;  %v12743_v17 = vld [vmem:[#allocation105_spill] sm:$0xff] }
 0x488   : > { %5881 = vtanh.f32 %v4330_v27  ;;  %v3209_v24 = vrot.slane %v12586_v14, 1  ;;  %v3223_v37 = vrot.slane %v12589_v26, 1  ;;  %v12731_v31 = vrot.slane %v12730_v20, 1 }
 0x489   : > { %v12733_v58 = vrot.slane %v12732_v46, 1  ;;  %v3251_v21 = vsel %vm3232_vm7, %v3222_v25, %v3208_v56  ;;  %v3321_v5 = vadd.f32 %v12736_v22, %v3188_v10  ;;  %5883 = vtanh.f32 %v4498_v34 }
 0x48a   : > { %v12735_v1 = vmov %v12731_v31  ;;  %v10223_v33 = vpop.eup %5875  ;;  %v10227_v19 = vsel %vm3232_vm7, %v3208_v56, %v3222_v25  ;;  %v10231_v62 = vsel %vm3232_vm7, %v3209_v24, %v3223_v37  ;;  %v3252_v12 = vsel %vm3232_vm7, %v3223_v37, %v3209_v24  ;;  %v12744_v56 = vld [vmem:[#allocation106_spill] sm:$0xff]  ;;  %v12745_v24 = vld [vmem:[#allocation185_spill] sm:$0xff]  ;;  %v12746_v37 = vld [vmem:[#allocation188_spill] sm:$0xff] }
 0x48b   : > { %v3250_v9 = vsel %vm3232_vm7, %v12733_v58, %v12731_v31  ;;  %v12734_v49 = vmov %v12733_v58  ;;  %12737 = vst [vmem:[#allocation287_spill] sm:$0xff] %v10223_v33  ;;  %12738 = vst [vmem:[#allocation288_spill] sm:$0xff] %v10231_v62  ;;  %v10237_v4 = vsel %vm3266_vm9, %v3251_v21, 0.0  ;;  %v3322_v27 = vadd.f32 %v12739_v53, %v3189_v6 }
 0x48c   : > { %v10214_v42 = vsel %vm3232_vm7, %v12735_v1, %v12734_v49  ;;  %v10220_v38 = vsel %vm3266_vm9, %v3250_v9, 0.0  ;;  %v3323_v7 = vadd.f32 %v12740_v54, %v3190_v48  ;;  %v3324_v60 = vadd.f32 %v12741_v3, %v3191_v39  ;;  %v12748_v1 = vld [vmem:[#allocation191_spill] sm:$0xff] }
 0x48d   : > { %v10244_v45 = vsel %vm3266_vm9, %v3252_v12, 0.0  ;;  %v3357_v2 = vadd.f32 %v12743_v17, %v3321_v5  ;;  %v3379_v34 = vmul.f32 %v12639_v50, %v10214_v42  ;;  %v3380_v10 = vmul.f32 %v12639_v50, %v10220_v38  ;;  %v12749_v12 = vld [vmem:[#allocation84_spill] sm:$0xff] }
 0x48e   : > { %12742 = vst [vmem:[#allocation212_spill] sm:$0xff] %v10244_v45  ;;  %v3358_v25 = vadd.f32 %v12744_v56, %v3322_v27  ;;  %v3359_v6 = vadd.f32 %v12745_v24, %v3323_v7  ;;  %v3360_v48 = vadd.f32 %v12746_v37, %v3324_v60  ;;  %v3413_v39 = vmul.f32 %v9892_v57, %v10214_v42 }
 0x48f   : > { %v3393_v31 = vadd.f32 %v12747_v63, %v3357_v2  ;;  %v3414_v58 = vmul.f32 %v9892_v57, %v10220_v38  ;;  %v3415_v9 = vmul.f32 %v9892_v57, %v10227_v19  ;;  %v3416_v49 = vmul.f32 %v9892_v57, %v10237_v4 }
 0x490   : > { %v3394_v21 = vadd.f32 %v12748_v1, %v3358_v25  ;;  %v3395_v22 = vadd.f32 %v3379_v34, %v3359_v6  ;;  %v3396_v5 = vadd.f32 %v3380_v10, %v3360_v48  ;;  %v3449_v53 = vmul.f32 %v12749_v12, %v10227_v19  ;;  %v10266_v27 = vpop.eup %5877  ;;  %v12751_v34 = vld [vmem:[#allocation87_spill] sm:$0xff]  ;;  %v12752_v6 = vld [vmem:[#allocation241_spill] sm:$0xff]  ;;  %v12753_v48 = vld [vmem:[#allocation82_spill] sm:$0xff] }
 0x491   : > { %12750 = vst [vmem:[#allocation159_spill] sm:$0xff] %v10266_v27  ;;  %v3429_v54 = vadd.f32 %v3413_v39, %v3393_v31  ;;  %v3450_v7 = vmul.f32 %v12749_v12, %v10237_v4  ;;  %v3451_v3 = vmul.f32 %v12749_v12, %v10231_v62  ;;  %v3452_v60 = vmul.f32 %v12749_v12, %v10244_v45 }
 0x492   : > { %v3430_v17 = vadd.f32 %v3414_v58, %v3394_v21  ;;  %v3431_v2 = vadd.f32 %v3415_v9, %v3395_v22  ;;  %v3432_v56 = vadd.f32 %v3416_v49, %v3396_v5  ;;  %v3485_v10 = vmul.f32 %v12751_v34, %v10231_v62  ;;  %v12755_v9 = vld [vmem:[#allocation88_spill] sm:$0xff]  ;;  %v12756_v5 = vld [vmem:[#allocation239_spill] sm:$0xff] }
 0x493   : > { %v3465_v25 = vadd.f32 %v3449_v53, %v3429_v54  ;;  %v3486_v24 = vmul.f32 %v12751_v34, %v10244_v45  ;;  %v3487_v37 = vmul.f32 %v12751_v34, %v12752_v6  ;;  %v3488_v39 = vmul.f32 %v12751_v34, %v12753_v48  ;;  %v10282_v63 = vpop.eup %5879  ;;  %v12757_v54 = vld [vmem:[#allocation240_spill] sm:$0xff] }
 0x494   : > { %12754 = vst [vmem:[#allocation209_spill] sm:$0xff] %v10282_v63  ;;  %v3466_v31 = vadd.f32 %v3450_v7, %v3430_v17  ;;  %v3467_v1 = vadd.f32 %v3451_v3, %v3431_v2  ;;  %v3468_v58 = vadd.f32 %v3452_v60, %v3432_v56  ;;  %v3521_v49 = vmul.f32 %v12755_v9, %v12752_v6 }
 0x495   : > { %v3501_v21 = vadd.f32 %v3485_v10, %v3465_v25  ;;  %v3522_v22 = vmul.f32 %v12755_v9, %v12753_v48  ;;  %v3523_v53 = vmul.f32 %v12755_v9, %v12756_v5  ;;  %v3524_v41 = vmul.f32 %v12755_v9, %v12757_v54  ;;  %v10292_v51 = vpop.eup %5881 }
 0x496   : > { %12758 = vst [vmem:[#allocation253_spill] sm:$0xff] %v10292_v51  ;;  %v3502_v8 = vadd.f32 %v3486_v24, %v3466_v31  ;;  %v3503_v29 = vadd.f32 %v3487_v37, %v3467_v1  ;;  %v3504_v7 = vadd.f32 %v3488_v39, %v3468_v58  ;;  %v3556_v3 = vrot.slane %v12730_v20, 2  ;;  %v10298_v10 = vpop.eup %5883  ;;  %v12761_v31 = vld [vmem:[#allocation122_spill] sm:$0xff]  ;;  %v12773_v51 = vld [vmem:[#allocation195_spill] sm:$0xff] }
 0x497   : > { %v3537_v60 = vadd.f32 %v3521_v49, %v3501_v21  ;;  %v3557_v17 = vrot.slane %v12522_v11, 2  ;;  %v3558_v2 = vrot.slane %v12586_v14, 2  ;;  %v3570_v56 = vrot.slane %v12732_v46, 2  ;;  %12759 = vst [vmem:[#allocation248_spill] sm:$0xff] %v10298_v10  ;;  %v12765_v49 = vld [vmem:[#allocation123_spill] sm:$0xff] }
 0x498   : > { %v3538_v25 = vadd.f32 %v3522_v22, %v3502_v8  ;;  %v3539_v47 = vadd.f32 %v3523_v53, %v3503_v29  ;;  %v3540_v27 = vadd.f32 %v3524_v41, %v3504_v7  ;;  %v3571_v63 = vrot.slane %v12460_v59, 2 }
 0x499   : > { %v3572_v24 = vrot.slane %v12589_v26, 2  ;;  %v10304_v37 = vsel %vm3581_vm4, %v3556_v3, %v3570_v56  ;;  %v3599_v39 = vsel %vm3581_vm4, %v3570_v56, %v3556_v3  ;;  %v3670_v1 = vadd.f32 %v12761_v31, %v3537_v60  ;;  %v12768_v3 = vld [vmem:[#allocation107_spill] sm:$0xff]  ;;  %v12772_v31 = vld [vmem:[#allocation112_spill] sm:$0xff] }
 0x49a   : > { %12760 = vst [vmem:[#allocation53_spill] sm:$0xff] %v10304_v37  ;;  %v10311_v58 = vsel %vm3581_vm4, %v3557_v17, %v3571_v63  ;;  %v3600_v41 = vsel %vm3581_vm4, %v3571_v63, %v3557_v17  ;;  %v10317_v8 = vsel %vm3615_vm10, %v3599_v39, 0.0  ;;  %v3671_v21 = vadd.f32 %v12765_v49, %v3538_v25  ;;  %v12770_v17 = vld [vmem:[#allocation108_spill] sm:$0xff]  ;;  %v12771_v25 = vld [vmem:[#allocation109_spill] sm:$0xff] }
 0x49b   : > { %12762 = vst [vmem:[#allocation142_spill] sm:$0xff] %v10311_v58  ;;  %12764 = vst [vmem:[#allocation54_spill] sm:$0xff] %v10317_v8  ;;  %v10322_v22 = vsel %vm3581_vm4, %v3558_v2, %v3572_v24  ;;  %v3601_v53 = vsel %vm3581_vm4, %v3572_v24, %v3558_v2  ;;  %v10328_v7 = vsel %vm3615_vm10, %v3600_v41, 0.0  ;;  %v3672_v60 = vadd.f32 %v12768_v3, %v3539_v47  ;;  %v12774_v2 = vld [vmem:[#allocation71_spill] sm:$0xff]  ;;  %v12776_v47 = vld [vmem:[#allocation50_spill] sm:$0xff] }
 0x49c   : > { %12766 = vst [vmem:[#allocation141_spill] sm:$0xff] %v10322_v22  ;;  %12767 = vst [vmem:[#allocation55_spill] sm:$0xff] %v10328_v7  ;;  %v10333_v63 = vsel %vm3615_vm10, %v3601_v53, 0.0  ;;  %v3673_v56 = vadd.f32 %v12770_v17, %v3540_v27  ;;  %v3706_v39 = vadd.f32 %v12771_v25, %v3670_v1  ;;  %v3707_v49 = vadd.f32 %v12772_v31, %v3671_v21  ;;  %v12778_v53 = vld [vmem:[#allocation200_spill] sm:$0xff]  ;;  %v12780_v17 = vld [vmem:[#allocation201_spill] sm:$0xff] }
 0x49d   : > { %12769 = vst [vmem:[#allocation118_spill] sm:$0xff] %v10333_v63  ;;  %v3708_v10 = vadd.f32 %v12773_v51, %v3672_v60  ;;  %v3728_v24 = vmul.f32 %v12774_v2, %v10304_v37  ;;  %v3729_v41 = vmul.f32 %v12774_v2, %v10317_v8  ;;  %v10345_v3 = vrot.slane %v12776_v47, %v12775_v23  ;;  %v10350_v25 = vld [vmem:[#allocation11 + $0x20] sm:$0x7f] }
 0x49e   : > { %v3709_v16 = vadd.f32 %v12778_v53, %v3673_v56  ;;  %v3742_v27 = vadd.f32 %v12779_v61, %v3706_v39  ;;  %v3743_v1 = vadd.f32 %v12780_v17, %v3707_v49  ;;  %v10354_v51 = vrot.slane %v10350_v25, %v12775_v23 }
 0x49f   : > { %12777 = vst [vmem:[#allocation119_spill] sm:$0xff] %v10345_v3  ;;  %v3744_v21 = vadd.f32 %v3728_v24, %v3708_v10  ;;  %v3762_v60 = vmul.f32 %v10345_v3, %v10304_v37  ;;  %v3763_v31 = vmul.f32 %v10345_v3, %v10317_v8  ;;  %v3764_v56 = vmul.f32 %v10345_v3, %v10311_v58 }
 0x4a0   : > { %12781 = vst [vmem:[#allocation99_spill] sm:$0xff] %v10354_v51  ;;  %v3745_v53 = vadd.f32 %v3729_v41, %v3709_v16  ;;  %v3765_v61 = vmul.f32 %v10345_v3, %v10328_v7  ;;  %v3798_v39 = vmul.f32 %v10354_v51, %v10311_v58  ;;  %v3799_v23 = vmul.f32 %v10354_v51, %v10328_v7  ;;  %v12782_v16 = vld [vmem:[#allocation96_spill] sm:$0xff]  ;;  %v12809_v3 = vld [vmem:[#allocation41_spill] sm:$0xff] }
 0x4a1   : > { %v3778_v10 = vadd.f32 %v3762_v60, %v3742_v27  ;;  %v3779_v49 = vadd.f32 %v3763_v31, %v3743_v1  ;;  %v3780_v24 = vadd.f32 %v3764_v56, %v3744_v21  ;;  %v3800_v17 = vmul.f32 %v10354_v51, %v10322_v22  ;;  %v12784_v21 = vld [vmem:[#allocation174_spill] sm:$0xff]  ;;  %v12785_v31 = vld [vmem:[#allocation89_spill] sm:$0xff] }
 0x4a2   : > { %v3781_v32 = vadd.f32 %v3765_v61, %v3745_v53  ;;  %v3801_v33 = vmul.f32 %v10354_v51, %v10333_v63  ;;  %v3834_v41 = vmul.f32 %v12782_v16, %v10322_v22  ;;  %v3835_v18 = vmul.f32 %v12782_v16, %v10333_v63  ;;  %v12786_v63 = vld [vmem:[#allocation294_spill] sm:$0xff]  ;;  %v5893_v22 = vld [vmem:[#allocation11 + $0x10] sm:$0x7f] }
 0x4a3   : > { %v3814_v55 = vadd.f32 %v3798_v39, %v3778_v10  ;;  %v3815_v40 = vadd.f32 %v3799_v23, %v3779_v49  ;;  %v3816_v0 = vadd.f32 %v3800_v17, %v3780_v24  ;;  %v3836_v27 = vmul.f32 %v12782_v16, %v12783_v35  ;;  %v12787_v10 = vld [vmem:[#allocation138_spill] sm:$0xff] }
 0x4a4   : > { %v3817_v1 = vadd.f32 %v3801_v33, %v3781_v32  ;;  %v3837_v60 = vmul.f32 %v12782_v16, %v12784_v21  ;;  %v3870_v56 = vmul.f32 %v12785_v31, %v12783_v35  ;;  %v3871_v53 = vmul.f32 %v12785_v31, %v12784_v21 }
 0x4a5   : > { %v3850_v61 = vadd.f32 %v3834_v41, %v3814_v55  ;;  %v3851_v51 = vadd.f32 %v3835_v18, %v3815_v40  ;;  %v3852_v29 = vadd.f32 %v3836_v27, %v3816_v0  ;;  %v3872_v39 = vmul.f32 %v12785_v31, %v12786_v63  ;;  %v12788_v27 = vld [vmem:[#allocation79_spill] sm:$0xff] }
 0x4a6   : > { %v3853_v23 = vadd.f32 %v3837_v60, %v3817_v1  ;;  %v3873_v49 = vmul.f32 %v12785_v31, %v12787_v10  ;;  %v3905_v32 = vrot.slane %v12730_v20, 3  ;;  %v3906_v33 = vrot.slane %v12522_v11, 3  ;;  %v12790_v1 = vld [vmem:[#allocation78_spill] sm:$0xff] }
 0x4a7   : > { %v3886_v24 = vadd.f32 %v3870_v56, %v3850_v61  ;;  %v3887_v17 = vadd.f32 %v3871_v53, %v3851_v51  ;;  %v3888_v16 = vadd.f32 %v3872_v39, %v3852_v29  ;;  %v3907_v35 = vrot.slane %v12586_v14, 3  ;;  %v12792_v51 = vld [vmem:[#allocation143_spill] sm:$0xff]  ;;  %v12794_v53 = vld [vmem:[#allocation124_spill] sm:$0xff] }
 0x4a8   : > { %v3889_v21 = vadd.f32 %v3873_v49, %v3853_v23  ;;  %v3908_v55 = vrot.slane %v12525_v13, 3  ;;  %v3919_v0 = vrot.slane %v12732_v46, 3  ;;  %v3920_v40 = vrot.slane %v12460_v59, 3 }
 0x4a9   : > { %v3921_v18 = vrot.slane %v12589_v26, 3  ;;  %v3922_v41 = vrot.slane %v12521_v43, 3  ;;  %v12789_v20 = vrot.slane %v12788_v27, 3  ;;  %v12791_v60 = vrot.slane %v12790_v1, 3 }
 0x4aa   : > { %v12793_v56 = vrot.slane %v12792_v51, 3  ;;  %v12795_v61 = vrot.slane %v12794_v53, 3  ;;  %v10412_v39 = vsel %vm3930_vm11, %v3905_v32, %v3919_v0  ;;  %v10416_v23 = vsel %vm3930_vm11, %v3906_v33, %v3920_v40  ;;  %v12998_v53 = vld [vmem:[#allocation52_spill] sm:$0xff] }
 0x4ab   : > { %v3932_v29 = vsel %vm3930_vm11, %v12791_v60, %v12789_v20  ;;  %12797 = vst [vmem:[#allocation68_spill] sm:$0xff] %v10412_v39  ;;  %v12798_v49 = vmov %v12791_v60  ;;  %v10432_v10 = vsel %vm3930_vm11, %v3907_v35, %v3921_v18  ;;  %v10436_v63 = vsel %vm3930_vm11, %v3908_v55, %v3922_v41 }
 0x4ac   : > { %v10408_v46 = vsel %vm3930_vm11, %v12795_v61, %v12793_v56  ;;  %v3946_v60 = vsel %vm3930_vm11, %v12789_v20, %v12798_v49  ;;  %v12799_v31 = vmov %v12795_v61  ;;  %12800 = vst [vmem:[#allocation283_spill] sm:$0xff] %v10436_v63  ;;  %v3948_v27 = vsel %vm3930_vm11, %v3919_v0, %v3905_v32 }
 0x4ad   : > { %12796 = vst [vmem:[#allocation100_spill] sm:$0xff] %v10408_v46  ;;  %v3947_v61 = vsel %vm3930_vm11, %v12793_v56, %v12799_v31  ;;  %v3949_v1 = vsel %vm3930_vm11, %v3920_v40, %v3906_v33  ;;  %v3950_v51 = vsel %vm3930_vm11, %v3921_v18, %v3907_v35  ;;  %v3951_v31 = vsel %vm3930_vm11, %v3922_v41, %v3908_v55  ;;  %v12806_v55 = vld [vmem:[#allocation42_spill] sm:$0xff]  ;;  %v12807_v18 = vld [vmem:[#allocation125_spill] sm:$0xff] }
 0x4ae   : > { %v3974_v49 = vsel %vm3964_vm12, %v3946_v60, 0.0  ;;  %v10450_v20 = vsel %vm3964_vm12, %v3947_v61, 0.0  ;;  %v10454_v56 = vsel %vm3964_vm12, %v3948_v27, 0.0  ;;  %v10458_v32 = vsel %vm3964_vm12, %v3949_v1, 0.0  ;;  %v12808_v60 = vld [vmem:[#allocation126_spill] sm:$0xff] }
 0x4af   : > { %12802 = vst [vmem:[#allocation162_spill] sm:$0xff] %v10450_v20  ;;  %12803 = vst [vmem:[#allocation176_spill] sm:$0xff] %v10454_v56  ;;  %v10462_v35 = vsel %vm3964_vm12, %v3950_v51, 0.0  ;;  %v10466_v33 = vsel %vm3964_vm12, %v3951_v31, 0.0  ;;  %v4005_v0 = vmul.f32 %v12806_v55, %v3932_v29  ;;  %v4006_v40 = vmul.f32 %v12806_v55, %v3974_v49  ;;  %v5892_v27 = vld [vmem:[#allocation11 + $0x8] sm:$0x7f] }
 0x4b0   : > { %12804 = vst [vmem:[#allocation177_spill] sm:$0xff] %v10462_v35  ;;  %12805 = vst [vmem:[#allocation102_spill] sm:$0xff] %v10466_v33  ;;  %v4019_v41 = vadd.f32 %v12807_v18, %v3886_v24  ;;  %v4020_v61 = vadd.f32 %v12808_v60, %v3887_v17  ;;  %v10473_v1 = vrot.slane %v5892_v27, %v12809_v3  ;;  %v12814_v17 = vld [vmem:[#allocation95_spill] sm:$0xff]  ;;  %v5894_v60 = vld [vmem:[#allocation11 + $0x30] sm:$0x7f] }
 0x4b1   : > { %v10476_v51 = vrot.slane %v5893_v22, %v12809_v3  ;;  %v10480_v31 = vrot.slane %v12776_v47, %v12809_v3  ;;  %v10484_v7 = vrot.slane %v10350_v25, %v12809_v3  ;;  %v4021_v55 = vadd.f32 %v4005_v0, %v3888_v16 }
 0x4b2   : > { %12810 = vst [vmem:[#allocation101_spill] sm:$0xff] %v10473_v1  ;;  %v4022_v24 = vadd.f32 %v4006_v40, %v3889_v21  ;;  %v10488_v18 = vrot.slane %v12814_v17, %v12809_v3  ;;  %v10491_v27 = vrot.slane %v5894_v60, %v12809_v3  ;;  %v4039_v22 = vmul.f32 %v10473_v1, %v3932_v29 }
 0x4b3   : > { %12811 = vst [vmem:[#allocation178_spill] sm:$0xff] %v10476_v51  ;;  %12812 = vst [vmem:[#allocation180_spill] sm:$0xff] %v10480_v31  ;;  %v4040_v2 = vmul.f32 %v10473_v1, %v3974_v49  ;;  %v4041_v47 = vmul.f32 %v10473_v1, %v10408_v46  ;;  %v4042_v25 = vmul.f32 %v10473_v1, %v10450_v20 }
 0x4b4   : > { %12813 = vst [vmem:[#allocation69_spill] sm:$0xff] %v10484_v7  ;;  %12815 = vst [vmem:[#allocation147_spill] sm:$0xff] %v10488_v18  ;;  %v4075_v16 = vmul.f32 %v10476_v51, %v10408_v46  ;;  %v4076_v21 = vmul.f32 %v10476_v51, %v10450_v20  ;;  %v4077_v3 = vmul.f32 %v10476_v51, %v10412_v39 }
 0x4b5   : > { %12816 = vst [vmem:[#allocation148_spill] sm:$0xff] %v10491_v27  ;;  %v4078_v29 = vmul.f32 %v10476_v51, %v10454_v56  ;;  %v4055_v0 = vadd.f32 %v4039_v22, %v4019_v41  ;;  %v4056_v49 = vadd.f32 %v4040_v2, %v4020_v61  ;;  %v4057_v40 = vadd.f32 %v4041_v47, %v4021_v55  ;;  %v12818_v47 = vld [vmem:[#allocation222_spill] sm:$0xff] }
 0x4b6   : > { %v4058_v17 = vadd.f32 %v4042_v25, %v4022_v24  ;;  %v4111_v60 = vmul.f32 %v10480_v31, %v10412_v39  ;;  %v4112_v1 = vmul.f32 %v10480_v31, %v10454_v56  ;;  %v4147_v46 = vmul.f32 %v10484_v7, %v10416_v23  ;;  %v12817_v24 = vld [vmem:[#allocation167_spill] sm:$0xff] }
 0x4b7   : > { %v4148_v20 = vmul.f32 %v10484_v7, %v10458_v32  ;;  %v4091_v58 = vadd.f32 %v4075_v16, %v4055_v0  ;;  %v4092_v8 = vadd.f32 %v4076_v21, %v4056_v49  ;;  %v4183_v41 = vmul.f32 %v10488_v18, %v10432_v10 }
 0x4b8   : > { %v4184_v2 = vmul.f32 %v10488_v18, %v10462_v35  ;;  %v4219_v55 = vmul.f32 %v10491_v27, %v10436_v63  ;;  %v4220_v61 = vmul.f32 %v10491_v27, %v10466_v33  ;;  %v4515_v22 = vadd.f32 1.0, %v12817_v24 }
 0x4b9   : > { %v4516_v25 = vadd.f32 1.0, %v12818_v47  ;;  %v4127_v51 = vadd.f32 %v4111_v60, %v4091_v58  ;;  %v4128_v56 = vadd.f32 %v4112_v1, %v4092_v8  ;;  %v3909_v16 = vrot.slane %v12587_v36, 3  ;;  %v12820_v47 = vld [vmem:[#allocation111_spill] sm:$0xff] }
 0x4ba   : > { %v3923_v21 = vrot.slane %v12588_v15, 3  ;;  %v4531_v0 = vmul.f32 0.5, %v4515_v22  ;;  %v4093_v39 = vadd.f32 %v4077_v3, %v4057_v40  ;;  %v4094_v37 = vadd.f32 %v4078_v29, %v4058_v17  ;;  %v12821_v8 = vld [vmem:[#allocation155_spill] sm:$0xff] }
 0x4bb   : > { %v4532_v49 = vmul.f32 0.5, %v4516_v25  ;;  %v4163_v9 = vadd.f32 %v4147_v46, %v4127_v51  ;;  %v4164_v54 = vadd.f32 %v4148_v20, %v4128_v56  ;;  %v4113_v3 = vmul.f32 %v10480_v31, %v10416_v23 }
 0x4bc   : > { %v10529_v34 = vsel %vm3930_vm11, %v3909_v16, %v3923_v21  ;;  %v3952_v24 = vsel %vm3930_vm11, %v3923_v21, %v3909_v16  ;;  %v4547_v58 = vmul.f32 %v4531_v0, %v12820_v47  ;;  %v4114_v56 = vmul.f32 %v10480_v31, %v10458_v32 }
 0x4bd   : > { %12819 = vst [vmem:[#allocation181_spill] sm:$0xff] %v10529_v34  ;;  %v4548_v1 = vmul.f32 %v4532_v49, %v12821_v8  ;;  %v10537_v60 = vsel %vm3964_vm12, %v3952_v24, 0.0  ;;  %v4199_v46 = vadd.f32 %v4183_v41, %v4163_v9  ;;  %v4200_v20 = vadd.f32 %v4184_v2, %v4164_v54  ;;  %v12825_v8 = vld [vmem:[#allocation163_spill] sm:$0xff] }
 0x4be   : > { %12822 = vst [vmem:[#allocation182_spill] sm:$0xff] %v10537_v60  ;;  %v4149_v51 = vmul.f32 %v10484_v7, %v10432_v10  ;;  %v4129_v29 = vadd.f32 %v4113_v3, %v4093_v39  ;;  %v4150_v40 = vmul.f32 %v10484_v7, %v10462_v35  ;;  %v4185_v17 = vmul.f32 %v10488_v18, %v10436_v63  ;;  %v12823_v39 = vld [vmem:[#allocation63_spill] sm:$0xff] }
 0x4bf   : > { %v4186_v22 = vmul.f32 %v10488_v18, %v10466_v33  ;;  %v4235_v25 = vadd.f32 %v4219_v55, %v4199_v46  ;;  %v4236_v16 = vadd.f32 %v4220_v61, %v4200_v20  ;;  %v4130_v9 = vadd.f32 %v4114_v56, %v4094_v37  ;;  %v12824_v55 = vld [vmem:[#allocation64_spill] sm:$0xff]  ;;  %v12826_v46 = vld [vmem:[#allocation165_spill] sm:$0xff] }
 0x4c0   : > { %v4221_v54 = vmul.f32 %v10491_v27, %v10529_v34  ;;  %v4165_v41 = vadd.f32 %v4149_v51, %v4129_v29  ;;  %v4222_v2 = vmul.f32 %v10491_v27, %v10537_v60  ;;  %v3032_v21 = vmul.f32 %v12823_v39, %v12522_v11 }
 0x4c1   : > { %v3033_v0 = vmul.f32 %v12823_v39, %v12460_v59  ;;  %v4563_v49 = vmul.f32 %v4547_v58, %v4235_v25  ;;  %v4564_v24 = vmul.f32 %v4548_v1, %v4236_v16  ;;  %v4166_v47 = vadd.f32 %v4150_v40, %v4130_v9  ;;  %v12828_v16 = vld [vmem:[#allocation218_spill] sm:$0xff] }
 0x4c2   : > { %v3068_v61 = vmul.f32 %v12824_v55, %v12586_v14  ;;  %v4201_v37 = vadd.f32 %v4185_v17, %v4165_v41  ;;  %v3048_v3 = vadd.f32 %v3032_v21, %v12825_v8  ;;  %v3069_v56 = vmul.f32 %v12824_v55, %v12589_v26  ;;  %v12827_v26 = vld [vmem:[#allocation214_spill] sm:$0xff] }
 0x4c3   : > { %v3049_v20 = vadd.f32 %v3033_v0, %v12826_v46  ;;  %v4579_v51 = vpack.c.bf16 %v4564_v24, %v4563_v49  ;;  %v4202_v29 = vadd.f32 %v4186_v22, %v4166_v47  ;;  %v3104_v11 = vmul.f32 %v12613_v30, %v12525_v13  ;;  %v12829_v41 = vld [vmem:[#allocation226_spill] sm:$0xff]  ;;  %v12831_v24 = vld [vmem:[#allocation233_spill] sm:$0xff] }
 0x4c4   : > { %v3105_v59 = vmul.f32 %v12613_v30, %v12521_v43  ;;  %v4237_v58 = vadd.f32 %v4221_v54, %v4201_v37  ;;  %v3084_v1 = vadd.f32 %v3068_v61, %v3048_v3  ;;  %v3140_v14 = vmul.f32 %v12617_v28, %v12587_v36  ;;  %v12830_v0 = vld [vmem:[#allocation58_spill] sm:$0xff] }
 0x4c5   : > { %v3085_v40 = vadd.f32 %v3069_v56, %v3049_v20  ;;  %5449 = vmatprep.mubr.bf16.mxu1 %v4579_v51  ;;  %v4238_v17 = vadd.f32 %v4222_v2, %v4202_v29  ;;  %v3141_v25 = vmul.f32 %v12617_v28, %v12588_v15  ;;  %v3176_v22 = vmul.f32 %v12621_v44, %v12827_v26 }
 0x4c6   : > { %v3177_v9 = vmul.f32 %v12621_v44, %v12828_v16  ;;  %v4565_v39 = vmul.f32 %v12829_v41, %v4237_v58  ;;  %v3120_v21 = vadd.f32 %v3104_v11, %v3084_v1  ;;  %v3345_v49 = vmul.f32 %v12830_v0, %v10214_v42  ;;  %v12832_v11 = vld [vmem:[#allocation87_spill] sm:$0xff] }
 0x4c7   : > { %v3121_v54 = vadd.f32 %v3105_v59, %v3085_v40  ;;  %v4566_v47 = vmul.f32 %v12831_v24, %v4238_v17  ;;  %v3346_v2 = vmul.f32 %v12830_v0, %v10220_v38  ;;  %v3381_v61 = vmul.f32 %v12639_v50, %v10227_v19  ;;  %v12833_v40 = vld [vmem:[#allocation240_spill] sm:$0xff] }
 0x4c8   : > { %v3382_v37 = vmul.f32 %v12639_v50, %v10237_v4  ;;  %v3156_v8 = vadd.f32 %v3140_v14, %v3120_v21  ;;  %v3417_v46 = vmul.f32 %v9892_v57, %v10231_v62  ;;  %v3418_v20 = vmul.f32 %v9892_v57, %v10244_v45  ;;  %v12834_v17 = vld [vmem:[#allocation76_spill] sm:$0xff]  ;;  %v12851_v45 = vld [vmem:[#allocation118_spill] sm:$0xff] }
 0x4c9   : > { %v3157_v3 = vadd.f32 %v3141_v25, %v3121_v54  ;;  %v4580_v56 = vpack.c.bf16 %v4566_v47, %v4565_v39  ;;  %v3453_v51 = vmul.f32 %v12749_v12, %v12752_v6  ;;  %v3454_v29 = vmul.f32 %v12749_v12, %v12753_v48  ;;  %v12835_v25 = vld [vmem:[#allocation88_spill] sm:$0xff]  ;;  %v12836_v39 = vld [vmem:[#allocation285_spill] sm:$0xff]  ;;  %v12852_v62 = vld [vmem:[#allocation66_spill] sm:$0xff] }
 0x4ca   : > { %v3489_v59 = vmul.f32 %v12832_v11, %v12756_v5  ;;  %v3192_v58 = vadd.f32 %v3176_v22, %v3156_v8  ;;  %v3490_v14 = vmul.f32 %v12832_v11, %v12833_v40  ;;  %v10601_v41 = vmul.f32 %v12835_v25, %v12834_v17  ;;  %v12837_v47 = vld [vmem:[#allocation53_spill] sm:$0xff]  ;;  %v12838_v12 = vld [vmem:[#allocation60_spill] sm:$0xff]  ;;  %v12840_v11 = vld [vmem:[#allocation186_spill] sm:$0xff] }
 0x4cb   : > { %v3193_v1 = vadd.f32 %v3177_v9, %v3157_v3  ;;  %5450 = vmatmul.mubr.bf16.vlgmr.msra.gmra.mxu1 %v4580_v56  ;;  %v10605_v21 = vmul.f32 %v12835_v25, %v12836_v39  ;;  %v3561_v54 = vrot.slane %v12827_v26, 2  ;;  %v3575_v24 = vrot.slane %v12828_v16, 2  ;;  %v5895_v9 = vld [vmem:[#allocation13 + $0x38] sm:$0xff]   ;;  %v12839_v8 = vld [vmem:[#allocation184_spill] sm:$0xff]  ;;  %v12841_v40 = vld [vmem:[#allocation54_spill] sm:$0xff] }
 0x4cc   : > { %v10611_v22 = vmul.f32 %v12838_v12, %v12837_v47  ;;  %5505 = vmatpush3.bf16.msra.mxu1 %v5895_v9  ;;  %v3325_v3 = vadd.f32 %v12839_v8, %v3192_v58  ;;  %v10617_v56 = vmul.f32 %v12838_v12, %v12841_v40  ;;  %v12842_v25 = vld [vmem:[#allocation142_spill] sm:$0xff]  ;;  %v12843_v39 = vld [vmem:[#allocation71_spill] sm:$0xff]  ;;  %v5896_v48 = vld [vmem:[#allocation13 + $0x30] sm:$0xff]  }
 0x4cd   : > { %v3326_v17 = vadd.f32 %v12840_v11, %v3193_v1  ;;  %v10621_v5 = vmul.f32 %v12843_v39, %v12842_v25  ;;  %5498 = vmatprep.subr.bf16.mxu1 %v5896_v48  ;;  %v10625_v47 = vsel %vm3581_vm4, %v3561_v54, %v3575_v24  ;;  %v3604_v9 = vsel %vm3581_vm4, %v3575_v24, %v3561_v54  ;;  %v12845_v58 = vld [vmem:[#allocation55_spill] sm:$0xff]  ;;  %v12846_v1 = vld [vmem:[#allocation141_spill] sm:$0xff]  ;;  %v12861_v57 = vld [vmem:[#allocation42_spill] sm:$0xff] }
 0x4ce   : > { %12844 = vst [vmem:[#allocation150_spill] sm:$0xff] %v10625_v47  ;;  %v10631_v11 = vmul.f32 %v12843_v39, %v12845_v58  ;;  %v12847_v8 = vld [vmem:[#allocation119_spill] sm:$0xff]  ;;  %v3361_v40 = vadd.f32 %v3345_v49, %v3325_v3  ;;  %v10639_v6 = vsel %vm3615_vm10, %v3604_v9, 0.0  ;;  %v12854_v39 = vld [vmem:[#allocation174_spill] sm:$0xff] }
 0x4cf   : > { %v10635_v12 = vmul.f32 %v12847_v8, %v12846_v1  ;;  %v3362_v25 = vadd.f32 %v3346_v2, %v3326_v17  ;;  %12850 = vst [vmem:[#allocation81_spill] sm:$0xff] %v10639_v6  ;;  %v10643_v50 = vmul.f32 %v12847_v8, %v12851_v45  ;;  %v12853_v54 = vld [vmem:[#allocation99_spill] sm:$0xff]  ;;  %v12855_v1 = vld [vmem:[#allocation294_spill] sm:$0xff]  ;;  %v12859_v8 = vld [vmem:[#allocation89_spill] sm:$0xff] }
 0x4d0   : > { %v10647_v24 = vmul.f32 %v12853_v54, %v12852_v62  ;;  %v10651_v58 = vmul.f32 %v12853_v54, %v12854_v39  ;;  %v12858_v2 = vld [vmem:[#allocation138_spill] sm:$0xff]  ;;  %5506 = vmatpush3.bf16.msra.mxu1 %v5896_v48  ;;  %v3397_v3 = vadd.f32 %v3381_v61, %v3361_v40  ;;  %v10663_v45 = vmul.f32 %v12859_v8, %v10625_v47  ;;  %v12860_v39 = vld [vmem:[#allocation100_spill] sm:$0xff]  ;;  %v5897_v61 = vld [vmem:[#allocation13 + $0x28] sm:$0xff]  }
 0x4d1   : > { %12848 = vst [vmem:[#allocation149_spill] sm:$0xff] %v10635_v12  ;;  %v12856_v12 = vld [vmem:[#allocation96_spill] sm:$0xff]  ;;  %v3398_v9 = vadd.f32 %v3382_v37, %v3362_v25  ;;  %v10667_v62 = vmul.f32 %v12859_v8, %v10639_v6  ;;  %v3910_v54 = vrot.slane %v12827_v26, 3  ;;  %5499 = vmatprep.subr.bf16.mxu1 %v5897_v61  ;;  %v12865_v47 = vld [vmem:[#allocation101_spill] sm:$0xff] }
 0x4d2   : > { %v10655_v49 = vmul.f32 %v12856_v12, %v12855_v1  ;;  %v10659_v17 = vmul.f32 %v12856_v12, %v12858_v2  ;;  %v3924_v1 = vrot.slane %v12828_v16, 3  ;;  %v12862_v12 = vld [vmem:[#allocation162_spill] sm:$0xff]  ;;  %v3433_v37 = vadd.f32 %v3417_v46, %v3397_v3  ;;  %v12864_v25 = vld [vmem:[#allocation68_spill] sm:$0xff] }
 0x4d3   : > { %v10677_v48 = vmul.f32 %v12861_v57, %v12862_v12  ;;  %v3434_v40 = vadd.f32 %v3418_v20, %v3398_v9  ;;  %v10681_v8 = vmul.f32 %v12865_v47, %v12864_v25  ;;  %v12866_v6 = vld [vmem:[#allocation176_spill] sm:$0xff] }
 0x4d4   : > { %12857 = vst [vmem:[#allocation151_spill] sm:$0xff] %v10655_v49  ;;  %v10673_v49 = vmul.f32 %v12861_v57, %v12860_v39  ;;  %v10685_v2 = vmul.f32 %v12865_v47, %v12866_v6  ;;  %v10689_v39 = vsel %vm3930_vm11, %v3910_v54, %v3924_v1  ;;  %v3953_v12 = vsel %vm3930_vm11, %v3924_v1, %v3910_v54  ;;  %v12868_v57 = vld [vmem:[#allocation178_spill] sm:$0xff] }
 0x4d5   : > { %12863 = vst [vmem:[#allocation152_spill] sm:$0xff] %v10677_v48  ;;  %12867 = vst [vmem:[#allocation259_spill] sm:$0xff] %v10689_v39  ;;  %v10695_v48 = vmul.f32 %v12868_v57, %v10416_v23  ;;  %v10699_v46 = vmul.f32 %v12868_v57, %v10458_v32  ;;  %v3469_v20 = vadd.f32 %v3453_v51, %v3433_v37  ;;  %v10703_v9 = vsel %vm3964_vm12, %v3953_v12, 0.0  ;;  %v5898_v37 = vld [vmem:[#allocation13 + $0x20] sm:$0xff]  }
 0x4d6   : > { %v3470_v3 = vadd.f32 %v3454_v29, %v3434_v40  ;;  %12869 = vst [vmem:[#allocation255_spill] sm:$0xff] %v10703_v9  ;;  %v10707_v47 = vmul.f32 %v10480_v31, %v10432_v10  ;;  %5507 = vmatpush3.bf16.msra.mxu1 %v5897_v61  ;;  %v10711_v1 = vmul.f32 %v10480_v31, %v10462_v35 }
 0x4d7   : > { %v10715_v54 = vmul.f32 %v10484_v7, %v10436_v63  ;;  %v10719_v51 = vmul.f32 %v10484_v7, %v10466_v33  ;;  %v10723_v29 = vmul.f32 %v10488_v18, %v10529_v34  ;;  %5500 = vmatprep.subr.bf16.mxu1 %v5898_v37  ;;  %v3505_v40 = vadd.f32 %v3489_v59, %v3469_v20  ;;  %v12871_v33 = vld [vmem:[#allocation235_spill] sm:$0xff]  ;;  %v12872_v34 = vld [vmem:[#allocation244_spill] sm:$0xff] }
 0x4d8   : > { %v3506_v61 = vadd.f32 %v3490_v14, %v3470_v3  ;;  %v10727_v12 = vmul.f32 %v10488_v18, %v10537_v60  ;;  %v10731_v31 = vmul.f32 %v10491_v27, %v10689_v39  ;;  %v10735_v7 = vmul.f32 %v10491_v27, %v10703_v9  ;;  %v12873_v39 = vld [vmem:[#allocation245_spill] sm:$0xff] }
 0x4d9   : > { %v4519_v63 = vadd.f32 1.0, %v12871_v33  ;;  %v4520_v35 = vadd.f32 1.0, %v12872_v34  ;;  %v3070_v59 = vmul.f32 %v12824_v55, %v12525_v13  ;;  %v3541_v14 = vadd.f32 %v10601_v41, %v3505_v40  ;;  %v5899_v60 = vld [vmem:[#allocation13 + $0x18] sm:$0xff]   ;;  %v12874_v13 = vld [vmem:[#allocation194_spill] sm:$0xff]  ;;  %v12875_v40 = vld [vmem:[#allocation199_spill] sm:$0xff] }
 0x4da   : > { %12870 = vst [vmem:[#allocation83_spill] sm:$0xff] %v10735_v7  ;;  %v3542_v20 = vadd.f32 %v10605_v21, %v3506_v61  ;;  %v3071_v3 = vmul.f32 %v12824_v55, %v12521_v43  ;;  %v3106_v18 = vmul.f32 %v12613_v30, %v12587_v36  ;;  %5508 = vmatpush3.bf16.msra.mxu1 %v5898_v37  ;;  %v12876_v61 = vld [vmem:[#allocation51_spill] sm:$0xff]  ;;  %v12877_v36 = vld [vmem:[#allocation189_spill] sm:$0xff] }
 0x4db   : > { %v4535_v27 = vmul.f32 0.5, %v4519_v63  ;;  %v4536_v9 = vmul.f32 0.5, %v4520_v35  ;;  %v3086_v33 = vadd.f32 %v3070_v59, %v12873_v39  ;;  %v3107_v34 = vmul.f32 %v12613_v30, %v12588_v15  ;;  %5501 = vmatprep.subr.bf16.mxu1 %v5899_v60  ;;  %v12878_v63 = vld [vmem:[#allocation197_spill] sm:$0xff]  ;;  %v12891_v30 = vld [vmem:[#allocation240_spill] sm:$0xff] }
 0x4dc   : > { %v3674_v41 = vadd.f32 %v12874_v13, %v3541_v14  ;;  %v3675_v21 = vadd.f32 %v12875_v40, %v3542_v20  ;;  %v3087_v7 = vadd.f32 %v3071_v3, %v12876_v61  ;;  %v3142_v43 = vmul.f32 %v12617_v28, %v12827_v26  ;;  %v12879_v20 = vld [vmem:[#allocation213_spill] sm:$0xff]  ;;  %v12880_v13 = vld [vmem:[#allocation215_spill] sm:$0xff] }
 0x4dd   : > { %v10756_v55 = vmul.f32 %v4535_v27, %v12877_v36  ;;  %v10759_v35 = vmul.f32 %v4536_v9, %v12878_v63  ;;  %v3122_v39 = vadd.f32 %v3106_v18, %v3086_v33  ;;  %v3143_v15 = vmul.f32 %v12617_v28, %v12828_v16  ;;  %v12881_v9 = vld [vmem:[#allocation57_spill] sm:$0xff]  ;;  %v5900_v16 = vld [vmem:[#allocation13 + $0x10] sm:$0xff]   ;;  %v12887_v63 = vld [vmem:[#allocation135_spill] sm:$0xff] }
 0x4de   : > { %v3710_v37 = vadd.f32 %v10611_v22, %v3674_v41  ;;  %v3711_v59 = vadd.f32 %v10617_v56, %v3675_v21  ;;  %v3123_v14 = vadd.f32 %v3107_v34, %v3087_v7  ;;  %v3178_v3 = vmul.f32 %v12621_v44, %v12879_v20  ;;  %5509 = vmatpush3.bf16.msra.mxu1 %v5899_v60  ;;  %v12882_v34 = vld [vmem:[#allocation288_spill] sm:$0xff]  ;;  %v12883_v41 = vld [vmem:[#allocation70_spill] sm:$0xff]  ;;  %v12885_v61 = vld [vmem:[#allocation149_spill] sm:$0xff] }
 0x4df   : > { %v3158_v26 = vadd.f32 %v3142_v43, %v3122_v39  ;;  %v3179_v27 = vmul.f32 %v12621_v44, %v12880_v13  ;;  %v3311_v40 = vmul.f32 %v12881_v9, %v10214_v42  ;;  %v3312_v18 = vmul.f32 %v12881_v9, %v10220_v38  ;;  %5502 = vmatprep.subr.bf16.mxu1 %v5900_v16  ;;  %v12884_v21 = vld [vmem:[#allocation212_spill] sm:$0xff] }
 0x4e0   : > { %v3746_v22 = vadd.f32 %v10621_v5, %v3710_v37  ;;  %v3747_v7 = vadd.f32 %v10631_v11, %v3711_v59  ;;  %v3159_v56 = vadd.f32 %v3143_v15, %v3123_v14  ;;  %v3347_v60 = vmul.f32 %v12830_v0, %v10227_v19  ;;  %v12886_v11 = vld [vmem:[#allocation241_spill] sm:$0xff]  ;;  %v12888_v37 = vld [vmem:[#allocation82_spill] sm:$0xff]  ;;  %v12889_v14 = vld [vmem:[#allocation239_spill] sm:$0xff] }
 0x4e1   : > { %v3194_v33 = vadd.f32 %v3178_v3, %v3158_v26  ;;  %v3348_v44 = vmul.f32 %v12830_v0, %v10237_v4  ;;  %v3383_v42 = vmul.f32 %v12883_v41, %v12882_v34  ;;  %v3384_v38 = vmul.f32 %v12883_v41, %v12884_v21  ;;  %v12890_v3 = vld [vmem:[#allocation84_spill] sm:$0xff]  ;;  %v5901_v41 = vld [vmem:[#allocation13 + $0x8] sm:$0xff]  }
 0x4e2   : > { %v3782_v43 = vadd.f32 %v12885_v61, %v3746_v22  ;;  %v3783_v5 = vadd.f32 %v10643_v50, %v3747_v7  ;;  %v3195_v36 = vadd.f32 %v3179_v27, %v3159_v56  ;;  %v3419_v39 = vmul.f32 %v12887_v63, %v12886_v11  ;;  %5510 = vmatpush3.bf16.msra.mxu1 %v5900_v16  ;;  %v12892_v7 = vld [vmem:[#allocation76_spill] sm:$0xff]  ;;  %v12893_v56 = vld [vmem:[#allocation87_spill] sm:$0xff]  ;;  %v12897_v11 = vld [vmem:[#allocation202_spill] sm:$0xff] }
 0x4e3   : > { %v3327_v15 = vadd.f32 %v3311_v40, %v3194_v33  ;;  %v3420_v59 = vmul.f32 %v12887_v63, %v12888_v37  ;;  %v3455_v26 = vmul.f32 %v12890_v3, %v12889_v14  ;;  %v3456_v0 = vmul.f32 %v12890_v3, %v12891_v30  ;;  %5503 = vmatprep.subr.bf16.mxu1 %v5901_v41  ;;  %v12894_v33 = vld [vmem:[#allocation285_spill] sm:$0xff]  ;;  %v12895_v63 = vld [vmem:[#allocation242_spill] sm:$0xff]  ;;  %v12896_v37 = vld [vmem:[#allocation88_spill] sm:$0xff] }
 0x4e4   : > { %v3818_v22 = vadd.f32 %v10647_v24, %v3782_v43  ;;  %v3819_v50 = vadd.f32 %v10651_v58, %v3783_v5  ;;  %v3328_v27 = vadd.f32 %v3312_v18, %v3195_v36  ;;  %v3491_v16 = vmul.f32 %v12893_v56, %v12892_v7  ;;  %v12898_v30 = vld [vmem:[#allocation151_spill] sm:$0xff]  ;;  %v12899_v5 = vld [vmem:[#allocation53_spill] sm:$0xff]  ;;  %v12900_v36 = vld [vmem:[#allocation40_spill] sm:$0xff] }
 0x4e5   : > { %v3363_v40 = vadd.f32 %v3347_v60, %v3327_v15  ;;  %v3492_v61 = vmul.f32 %v12893_v56, %v12894_v33  ;;  %v3527_v14 = vmul.f32 %v12896_v37, %v12895_v63  ;;  %v3528_v3 = vmul.f32 %v12896_v37, %v12897_v11  ;;  %v12901_v56 = vld [vmem:[#allocation54_spill] sm:$0xff]  ;;  %v12912_v11 = vld [vmem:[#allocation119_spill] sm:$0xff] }
 0x4e6   : > { %v3854_v21 = vadd.f32 %v12898_v30, %v3818_v22  ;;  %v3855_v24 = vadd.f32 %v10659_v17, %v3819_v50  ;;  %v3364_v43 = vadd.f32 %v3348_v44, %v3328_v27  ;;  %v3562_v58 = vrot.slane %v12879_v20, 2  ;;  %5511 = vmatpush3.bf16.msra.mxu1 %v5901_v41  ;;  %v5902_v33 = vld [vmem:[#allocation13] sm:$0xff]   ;;  %v12903_v22 = vld [vmem:[#allocation60_spill] sm:$0xff] }
 0x4e7   : > { %v3399_v18 = vadd.f32 %v3383_v42, %v3363_v40  ;;  %v3576_v60 = vrot.slane %v12880_v13, 2  ;;  %v3660_v15 = vmul.f32 %v12900_v36, %v12899_v5  ;;  %v3661_v63 = vmul.f32 %v12900_v36, %v12901_v56  ;;  %5504 = vmatprep.subr.bf16.mxu1 %v5902_v33  ;;  %v12902_v44 = vld [vmem:[#allocation142_spill] sm:$0xff]  ;;  %v12904_v40 = vld [vmem:[#allocation55_spill] sm:$0xff] }
 0x4e8   : > { %v3890_v37 = vadd.f32 %v10663_v45, %v3854_v21  ;;  %v3891_v30 = vadd.f32 %v10667_v62, %v3855_v24  ;;  %v3400_v17 = vadd.f32 %v3384_v38, %v3364_v43  ;;  %v3696_v50 = vmul.f32 %v12903_v22, %v12902_v44  ;;  %v12905_v45 = vld [vmem:[#allocation152_spill] sm:$0xff]  ;;  %v12908_v43 = vld [vmem:[#allocation141_spill] sm:$0xff]  ;;  %v12910_v44 = vld [vmem:[#allocation118_spill] sm:$0xff] }
 0x4e9   : > { %v3435_v41 = vadd.f32 %v3419_v39, %v3399_v18  ;;  %v10817_v42 = vsel %vm3581_vm4, %v3562_v58, %v3576_v60  ;;  %v3605_v27 = vsel %vm3581_vm4, %v3576_v60, %v3562_v58  ;;  %v3697_v56 = vmul.f32 %v12903_v22, %v12904_v40  ;;  %v12909_v18 = vld [vmem:[#allocation71_spill] sm:$0xff]  ;;  %v12911_v60 = vld [vmem:[#allocation66_spill] sm:$0xff] }
 0x4ea   : > { %v4023_v5 = vadd.f32 %v10673_v49, %v3890_v37  ;;  %v4024_v21 = vadd.f32 %v12905_v45, %v3891_v30  ;;  %v3436_v62 = vadd.f32 %v3420_v59, %v3400_v17  ;;  %v10827_v24 = vsel %vm3615_vm10, %v3605_v27, 0.0  ;;  %5512 = vmatpush3.bf16.msra.mxu1 %v5902_v33  ;;  %v12913_v30 = vld [vmem:[#allocation174_spill] sm:$0xff] }
 0x4eb   : > { %12907 = vst [vmem:[#allocation260_spill] sm:$0xff] %v10827_v24  ;;  %v3471_v39 = vadd.f32 %v3455_v26, %v3435_v41  ;;  %v3732_v36 = vmul.f32 %v12909_v18, %v12908_v43  ;;  %v3733_v58 = vmul.f32 %v12909_v18, %v12910_v44  ;;  %v3768_v22 = vmul.f32 %v12912_v11, %v12911_v60  ;;  %v12914_v33 = vld [vmem:[#allocation294_spill] sm:$0xff]  ;;  %v12915_v26 = vld [vmem:[#allocation99_spill] sm:$0xff]  ;;  %v12918_v18 = vld [vmem:[#allocation96_spill] sm:$0xff] }
 0x4ec   : > { %v4059_v49 = vadd.f32 %v10681_v8, %v4023_v5  ;;  %v4060_v37 = vadd.f32 %v10685_v2, %v4024_v21  ;;  %v3472_v59 = vadd.f32 %v3456_v0, %v3436_v62  ;;  %v3769_v17 = vmul.f32 %v12912_v11, %v12913_v30  ;;  %v12916_v45 = vld [vmem:[#allocation138_spill] sm:$0xff]  ;;  %v12919_v2 = vld [vmem:[#allocation81_spill] sm:$0xff] }
 0x4ed   : > { %v3507_v27 = vadd.f32 %v3491_v16, %v3471_v39  ;;  %v3804_v41 = vmul.f32 %v12915_v26, %v12914_v33  ;;  %v3805_v38 = vmul.f32 %v12915_v26, %v12916_v45  ;;  %v12917_v43 = vld [vmem:[#allocation150_spill] sm:$0xff]  ;;  %v3841_v0 = vmul.f32 %v12918_v18, %v12919_v2  ;;  %v12920_v16 = vld [vmem:[#allocation89_spill] sm:$0xff] }
 0x4ee   : > { %v3840_v44 = vmul.f32 %v12918_v18, %v12917_v43  ;;  %v4095_v60 = vadd.f32 %v10695_v48, %v4059_v49  ;;  %v4096_v8 = vadd.f32 %v10699_v46, %v4060_v37  ;;  %v3508_v5 = vadd.f32 %v3492_v61, %v3472_v59  ;;  %v12921_v49 = vld [vmem:[#allocation42_spill] sm:$0xff]  ;;  %v12922_v59 = vld [vmem:[#allocation101_spill] sm:$0xff] }
 0x4ef   : > { %v3543_v21 = vadd.f32 %v3527_v14, %v3507_v27  ;;  %v3876_v62 = vmul.f32 %v12920_v16, %v10817_v42  ;;  %v3877_v39 = vmul.f32 %v12920_v16, %v10827_v24  ;;  %v3911_v26 = vrot.slane %v12879_v20, 3 }
 0x4f0   : > { %v4131_v45 = vadd.f32 %v10707_v47, %v4095_v60  ;;  %v4132_v43 = vadd.f32 %v10711_v1, %v4096_v8  ;;  %v3544_v48 = vadd.f32 %v3528_v3, %v3508_v5  ;;  %v3925_v46 = vrot.slane %v12880_v13, 3  ;;  %v12927_v8 = vld [vmem:[#allocation180_spill] sm:$0xff] }
 0x4f1   : > { %v3676_v61 = vadd.f32 %v3660_v15, %v3543_v21  ;;  %v4009_v37 = vmul.f32 %v12921_v49, %v12864_v25  ;;  %v4010_v14 = vmul.f32 %v12921_v49, %v12866_v6  ;;  %v4045_v27 = vmul.f32 %v12922_v59, %v10416_v23  ;;  %v12928_v21 = vld [vmem:[#allocation102_spill] sm:$0xff] }
 0x4f2   : > { %v4167_v16 = vadd.f32 %v10715_v54, %v4131_v45  ;;  %v4168_v24 = vadd.f32 %v10719_v51, %v4132_v43  ;;  %v3677_v47 = vadd.f32 %v3661_v63, %v3544_v48  ;;  %v10867_v1 = vsel %vm3930_vm11, %v3911_v26, %v3925_v46 }
 0x4f3   : > { %12923 = vst [vmem:[#allocation257_spill] sm:$0xff] %v10867_v1  ;;  %v3712_v3 = vadd.f32 %v3696_v50, %v3676_v61  ;;  %v3954_v15 = vsel %vm3930_vm11, %v3925_v46, %v3911_v26  ;;  %v4046_v25 = vmul.f32 %v12922_v59, %v10458_v32  ;;  %v4081_v6 = vmul.f32 %v12868_v57, %v10432_v10  ;;  %v12925_v50 = vld [vmem:[#allocation177_spill] sm:$0xff]  ;;  %v12926_v26 = vld [vmem:[#allocation283_spill] sm:$0xff] }
 0x4f4   : > { %v4203_v60 = vadd.f32 %v10723_v29, %v4167_v16  ;;  %v4204_v54 = vadd.f32 %v10727_v12, %v4168_v24  ;;  %v3713_v51 = vadd.f32 %v3697_v56, %v3677_v47  ;;  %v10879_v63 = vsel %vm3964_vm12, %v3954_v15, 0.0  ;;  %v12929_v12 = vld [vmem:[#allocation83_spill] sm:$0xff]  ;;  %v12930_v16 = vld [vmem:[#allocation181_spill] sm:$0xff]  ;;  %v12932_v47 = vld [vmem:[#allocation182_spill] sm:$0xff] }
 0x4f5   : > { %12924 = vst [vmem:[#allocation86_spill] sm:$0xff] %v10879_v63  ;;  %v3748_v43 = vadd.f32 %v3732_v36, %v3712_v3  ;;  %v4082_v45 = vmul.f32 %v12868_v57, %v12925_v50  ;;  %v10885_v5 = vmul.f32 %v12927_v8, %v12926_v26  ;;  %v10889_v48 = vmul.f32 %v12927_v8, %v12928_v21  ;;  %v12931_v46 = vld [vmem:[#allocation69_spill] sm:$0xff]  ;;  %v12933_v15 = vld [vmem:[#allocation259_spill] sm:$0xff] }
 0x4f6   : > { %v4239_v29 = vadd.f32 %v10731_v31, %v4203_v60  ;;  %v4240_v56 = vadd.f32 %v12929_v12, %v4204_v54  ;;  %v3749_v24 = vadd.f32 %v3733_v58, %v3713_v51  ;;  %v10895_v61 = vmul.f32 %v12931_v46, %v12930_v16  ;;  %v12934_v57 = vld [vmem:[#allocation147_spill] sm:$0xff]  ;;  %v12936_v54 = vld [vmem:[#allocation148_spill] sm:$0xff]  ;;  %v12937_v12 = vld [vmem:[#allocation254_spill] sm:$0xff] }
 0x4f7   : > { %v3784_v36 = vadd.f32 %v3768_v22, %v3748_v43  ;;  %v10899_v3 = vmul.f32 %v12931_v46, %v12932_v47  ;;  %v10903_v26 = vmul.f32 %v12934_v57, %v12933_v15  ;;  %v12935_v8 = vld [vmem:[#allocation255_spill] sm:$0xff]  ;;  %v10913_v22 = vmul.f32 %v12936_v54, %v10867_v1  ;;  %v12938_v15 = vld [vmem:[#allocation262_spill] sm:$0xff] }
 0x4f8   : > { %v10907_v21 = vmul.f32 %v12934_v57, %v12935_v8  ;;  %v4567_v31 = vmul.f32 %v10756_v55, %v4239_v29  ;;  %v4568_v58 = vmul.f32 %v10759_v35, %v4240_v56  ;;  %v3785_v60 = vadd.f32 %v3769_v17, %v3749_v24 }
 0x4f9   : > { %v3820_v51 = vadd.f32 %v3804_v41, %v3784_v36  ;;  %v10917_v43 = vmul.f32 %v12936_v54, %v10879_v63  ;;  %v4521_v46 = vadd.f32 1.0, %v12937_v12  ;;  %v4522_v47 = vadd.f32 1.0, %v12938_v15  ;;  %v12939_v36 = vld [vmem:[#allocation117_spill] sm:$0xff]  ;;  %v12940_v54 = vld [vmem:[#allocation115_spill] sm:$0xff] }
 0x4fa   : > { %v4581_v57 = vpack.c.bf16 %v4568_v58, %v4567_v31  ;;  %v3821_v8 = vadd.f32 %v3805_v38, %v3785_v60  ;;  %v3144_v55 = vmul.f32 %v12617_v28, %v12879_v20  ;;  %v3145_v35 = vmul.f32 %v12617_v28, %v12880_v13  ;;  %v12941_v58 = vld [vmem:[#allocation203_spill] sm:$0xff]  ;;  %v12942_v28 = vld [vmem:[#allocation205_spill] sm:$0xff] }
 0x4fb   : > { %v3856_v17 = vadd.f32 %v3840_v44, %v3820_v51  ;;  %v4537_v29 = vmul.f32 0.5, %v4521_v46  ;;  %v4538_v56 = vmul.f32 0.5, %v4522_v47  ;;  %v3313_v41 = vmul.f32 %v12881_v9, %v10227_v19  ;;  %v12943_v46 = vld [vmem:[#allocation58_spill] sm:$0xff] }
 0x4fc   : > { %5453 = vmatprep.mubr.bf16.mxu1 %v4581_v57  ;;  %v3857_v24 = vadd.f32 %v3841_v0, %v3821_v8  ;;  %v3160_v12 = vadd.f32 %v3144_v55, %v12939_v36  ;;  %v3161_v15 = vadd.f32 %v3145_v35, %v12940_v54  ;;  %v3314_v38 = vmul.f32 %v12881_v9, %v10237_v4  ;;  %v12944_v57 = vld [vmem:[#allocation231_spill] sm:$0xff]  ;;  %v12945_v8 = vld [vmem:[#allocation264_spill] sm:$0xff]  ;;  %v12947_v4 = vld [vmem:[#allocation241_spill] sm:$0xff] }
 0x4fd   : > { %v3892_v31 = vadd.f32 %v3876_v62, %v3856_v17  ;;  %v10932_v60 = vmul.f32 %v4537_v29, %v12941_v58  ;;  %v10935_v44 = vmul.f32 %v4538_v56, %v12942_v28  ;;  %v3349_v47 = vmul.f32 %v12943_v46, %v12882_v34  ;;  %v12946_v55 = vld [vmem:[#allocation212_spill] sm:$0xff]  ;;  %v12948_v62 = vld [vmem:[#allocation70_spill] sm:$0xff]  ;;  %v12950_v56 = vld [vmem:[#allocation239_spill] sm:$0xff] }
 0x4fe   : > { %v3893_v19 = vadd.f32 %v3877_v39, %v3857_v24  ;;  %v3196_v0 = vadd.f32 %v12944_v57, %v3160_v12  ;;  %v3197_v51 = vadd.f32 %v12945_v8, %v3161_v15  ;;  %v3350_v54 = vmul.f32 %v12943_v46, %v12946_v55  ;;  %v12949_v29 = vld [vmem:[#allocation82_spill] sm:$0xff]  ;;  %v12951_v58 = vld [vmem:[#allocation135_spill] sm:$0xff]  ;;  %v12952_v24 = vld [vmem:[#allocation240_spill] sm:$0xff] }
 0x4ff   : > { %v4025_v35 = vadd.f32 %v4009_v37, %v3892_v31  ;;  %v3385_v17 = vmul.f32 %v12948_v62, %v12947_v4  ;;  %v3386_v36 = vmul.f32 %v12948_v62, %v12949_v29  ;;  %v3421_v28 = vmul.f32 %v12951_v58, %v12950_v56  ;;  %v12953_v57 = vld [vmem:[#allocation84_spill] sm:$0xff]  ;;  %v12954_v37 = vld [vmem:[#allocation285_spill] sm:$0xff]  ;;  %v12955_v46 = vld [vmem:[#allocation242_spill] sm:$0xff] }
 0x500   : > { %v4026_v9 = vadd.f32 %v4010_v14, %v3893_v19  ;;  %v3329_v34 = vadd.f32 %v3313_v41, %v3196_v0  ;;  %v3330_v39 = vadd.f32 %v3314_v38, %v3197_v51  ;;  %v3422_v12 = vmul.f32 %v12951_v58, %v12952_v24  ;;  %v12956_v4 = vld [vmem:[#allocation87_spill] sm:$0xff]  ;;  %v12957_v56 = vld [vmem:[#allocation202_spill] sm:$0xff]  ;;  %v12959_v19 = vld [vmem:[#allocation88_spill] sm:$0xff] }
 0x501   : > { %v4061_v15 = vadd.f32 %v4045_v27, %v4025_v35  ;;  %v3457_v8 = vmul.f32 %v12953_v57, %v12892_v7  ;;  %v3458_v31 = vmul.f32 %v12953_v57, %v12954_v37  ;;  %v3493_v55 = vmul.f32 %v12956_v4, %v12955_v46  ;;  %v12958_v38 = vld [vmem:[#allocation286_spill] sm:$0xff]  ;;  %v12960_v27 = vld [vmem:[#allocation243_spill] sm:$0xff]  ;;  %v12961_v35 = vld [vmem:[#allocation221_spill] sm:$0xff] }
 0x502   : > { %v4062_v62 = vadd.f32 %v4046_v25, %v4026_v9  ;;  %v3365_v29 = vadd.f32 %v3349_v47, %v3329_v34  ;;  %v3366_v13 = vadd.f32 %v3350_v54, %v3330_v39  ;;  %v3494_v14 = vmul.f32 %v12956_v4, %v12957_v56  ;;  %v12962_v24 = vld [vmem:[#allocation232_spill] sm:$0xff]  ;;  %v12963_v34 = vld [vmem:[#allocation142_spill] sm:$0xff]  ;;  %v12965_v54 = vld [vmem:[#allocation141_spill] sm:$0xff] }
 0x503   : > { %v4097_v41 = vadd.f32 %v4081_v6, %v4061_v15  ;;  %v3529_v0 = vmul.f32 %v12959_v19, %v12958_v38  ;;  %v3530_v51 = vmul.f32 %v12959_v19, %v12960_v27  ;;  %v3563_v58 = vrot.slane %v12961_v35, 2  ;;  %v12964_v25 = vld [vmem:[#allocation40_spill] sm:$0xff] }
 0x504   : > { %v4098_v7 = vadd.f32 %v4082_v45, %v4062_v62  ;;  %v3401_v57 = vadd.f32 %v3385_v17, %v3365_v29  ;;  %v3402_v37 = vadd.f32 %v3386_v36, %v3366_v13  ;;  %v3577_v46 = vrot.slane %v12962_v24, 2  ;;  %v12966_v39 = vld [vmem:[#allocation60_spill] sm:$0xff]  ;;  %v12967_v62 = vld [vmem:[#allocation118_spill] sm:$0xff]  ;;  %v12969_v29 = vld [vmem:[#allocation71_spill] sm:$0xff] }
 0x505   : > { %v4133_v9 = vadd.f32 %v10885_v5, %v4097_v41  ;;  %v3662_v47 = vmul.f32 %v12964_v25, %v12963_v34  ;;  %v3663_v6 = vmul.f32 %v12964_v25, %v12904_v40  ;;  %v3698_v15 = vmul.f32 %v12966_v39, %v12965_v54  ;;  %v12968_v40 = vld [vmem:[#allocation66_spill] sm:$0xff] }
 0x506   : > { %v4134_v19 = vadd.f32 %v10889_v48, %v4098_v7  ;;  %v3437_v27 = vadd.f32 %v3421_v28, %v3401_v57  ;;  %v3438_v4 = vadd.f32 %v3422_v12, %v3402_v37  ;;  %v10975_v13 = vsel %vm3581_vm4, %v3563_v58, %v3577_v46 }
 0x507   : > { %v4169_v45 = vadd.f32 %v10895_v61, %v4133_v9  ;;  %v3606_v5 = vsel %vm3581_vm4, %v3577_v46, %v3563_v58  ;;  %v3699_v17 = vmul.f32 %v12966_v39, %v12967_v62  ;;  %v3734_v36 = vmul.f32 %v12969_v29, %v12968_v40  ;;  %v12971_v58 = vld [vmem:[#allocation138_spill] sm:$0xff] }
 0x508   : > { %v4170_v41 = vadd.f32 %v10899_v3, %v4134_v19  ;;  %v3473_v7 = vadd.f32 %v3457_v8, %v3437_v27  ;;  %v3474_v48 = vadd.f32 %v3458_v31, %v3438_v4  ;;  %v10987_v12 = vsel %vm3615_vm10, %v3606_v5, 0.0  ;;  %v12972_v4 = vld [vmem:[#allocation150_spill] sm:$0xff]  ;;  %v12973_v31 = vld [vmem:[#allocation99_spill] sm:$0xff] }
 0x509   : > { %v4205_v57 = vadd.f32 %v10903_v26, %v4169_v45  ;;  %v3735_v61 = vmul.f32 %v12969_v29, %v12913_v30  ;;  %v3770_v46 = vmul.f32 %v12912_v11, %v12914_v33  ;;  %v3771_v37 = vmul.f32 %v12912_v11, %v12971_v58  ;;  %v12974_v45 = vld [vmem:[#allocation260_spill] sm:$0xff] }
 0x50a   : > { %v4206_v9 = vadd.f32 %v10907_v21, %v4170_v41  ;;  %v3509_v3 = vadd.f32 %v3493_v55, %v3473_v7  ;;  %v3510_v8 = vadd.f32 %v3494_v14, %v3474_v48  ;;  %v3806_v27 = vmul.f32 %v12973_v31, %v12972_v4  ;;  %v12975_v55 = vld [vmem:[#allocation89_spill] sm:$0xff] }
 0x50b   : > { %v4241_v34 = vadd.f32 %v10913_v22, %v4205_v57  ;;  %v3807_v26 = vmul.f32 %v12973_v31, %v12919_v2  ;;  %v3842_v19 = vmul.f32 %v12918_v18, %v10817_v42  ;;  %v3843_v5 = vmul.f32 %v12918_v18, %v12974_v45 }
 0x50c   : > { %v4242_v11 = vadd.f32 %v10917_v43, %v4206_v9  ;;  %v3545_v58 = vadd.f32 %v3529_v0, %v3509_v3  ;;  %v3546_v21 = vadd.f32 %v3530_v51, %v3510_v8  ;;  %v3878_v14 = vmul.f32 %v12975_v55, %v10975_v13  ;;  %v12980_v3 = vld [vmem:[#allocation102_spill] sm:$0xff] }
 0x50d   : > { %v4569_v41 = vmul.f32 %v10932_v60, %v4241_v34  ;;  %v3879_v22 = vmul.f32 %v12975_v55, %v10987_v12  ;;  %v3912_v7 = vrot.slane %v12961_v35, 3  ;;  %v3926_v48 = vrot.slane %v12962_v24, 3 }
 0x50e   : > { %v4570_v57 = vmul.f32 %v10935_v44, %v4242_v11  ;;  %v3678_v31 = vadd.f32 %v3662_v47, %v3545_v58  ;;  %v3679_v18 = vadd.f32 %v3663_v6, %v3546_v21  ;;  %v4011_v43 = vmul.f32 %v12921_v49, %v10416_v23  ;;  %v12978_v6 = vld [vmem:[#allocation283_spill] sm:$0xff]  ;;  %v12979_v58 = vld [vmem:[#allocation178_spill] sm:$0xff] }
 0x50f   : > { %v11019_v0 = vsel %vm3930_vm11, %v3912_v7, %v3926_v48  ;;  %v3955_v60 = vsel %vm3930_vm11, %v3926_v48, %v3912_v7  ;;  %v4012_v51 = vmul.f32 %v12921_v49, %v10458_v32  ;;  %v4047_v24 = vmul.f32 %v12922_v59, %v10432_v10  ;;  %v12981_v32 = vld [vmem:[#allocation180_spill] sm:$0xff]  ;;  %v12983_v21 = vld [vmem:[#allocation259_spill] sm:$0xff] }
 0x510   : > { %12976 = vst [vmem:[#allocation49_spill] sm:$0xff] %v11019_v0  ;;  %v4582_v35 = vpack.c.bf16 %v4570_v57, %v4569_v41  ;;  %v3714_v11 = vadd.f32 %v3698_v15, %v3678_v31  ;;  %v3715_v44 = vadd.f32 %v3699_v17, %v3679_v18  ;;  %v11029_v47 = vsel %vm3964_vm12, %v3955_v60, 0.0  ;;  %v12982_v17 = vld [vmem:[#allocation182_spill] sm:$0xff]  ;;  %v12984_v41 = vld [vmem:[#allocation69_spill] sm:$0xff]  ;;  %v12985_v48 = vld [vmem:[#allocation255_spill] sm:$0xff] }
 0x511   : > { %12977 = vst [vmem:[#allocation289_spill] sm:$0xff] %v11029_v47  ;;  %v4048_v23 = vmul.f32 %v12922_v59, %v12925_v50  ;;  %v4083_v9 = vmul.f32 %v12979_v58, %v12978_v6  ;;  %v4084_v8 = vmul.f32 %v12979_v58, %v12980_v3  ;;  %v11039_v34 = vmul.f32 %v12981_v32, %v12930_v16  ;;  %v12986_v60 = vld [vmem:[#allocation147_spill] sm:$0xff]  ;;  %v12995_v59 = vld [vmem:[#allocation57_spill] sm:$0xff] }
 0x512   : > { %5454 = vmatmul.mubr.bf16.gmra.mxu1 %v4582_v35  ;;  %v3750_v15 = vadd.f32 %v3734_v36, %v3714_v11  ;;  %v3751_v18 = vadd.f32 %v3735_v61, %v3715_v44  ;;  %v11043_v31 = vmul.f32 %v12981_v32, %v12982_v17  ;;  %v11047_v7 = vmul.f32 %v12984_v41, %v12983_v21  ;;  %v12987_v61 = vld [vmem:[#allocation148_spill] sm:$0xff]  ;;  %v12993_v3 = vld [vmem:[#allocation215_spill] sm:$0xff] }
 0x513   : > { %v11051_v57 = vmul.f32 %v12984_v41, %v12985_v48  ;;  %v11055_v58 = vmul.f32 %v12986_v60, %v10867_v1  ;;  %v11059_v36 = vmul.f32 %v12986_v60, %v10879_v63  ;;  %v11063_v35 = vmul.f32 %v12987_v61, %v11019_v0  ;;  %v12990_v41 = vld [vmem:[#allocation277_spill] sm:$0xff]  ;;  %v12991_v21 = vld [vmem:[#allocation48_spill] sm:$0xff] }
 0x514   : > { %v3786_v11 = vadd.f32 %v3770_v46, %v3750_v15  ;;  %v3787_v44 = vadd.f32 %v3771_v37, %v3751_v18  ;;  %v11067_v32 = vmul.f32 %v12987_v61, %v11029_v47  ;;  %v4523_v48 = vadd.f32 1.0, %v12990_v41  ;;  %v12992_v1 = vld [vmem:[#allocation72_spill] sm:$0xff] }
 0x515   : > { %12988 = vst [vmem:[#allocation261_spill] sm:$0xff] %v11063_v35  ;;  %v4524_v17 = vadd.f32 1.0, %v12991_v21  ;;  %v3110_v16 = vmul.f32 %v12992_v1, %v12879_v20  ;;  %v3111_v60 = vmul.f32 %v12992_v1, %v12993_v3  ;;  %v12994_v63 = vld [vmem:[#allocation288_spill] sm:$0xff]  ;;  %v13000_v35 = vld [vmem:[#allocation58_spill] sm:$0xff]  ;;  %v13001_v1 = vld [vmem:[#allocation217_spill] sm:$0xff] }
 0x516   : > { %12989 = vst [vmem:[#allocation258_spill] sm:$0xff] %v11067_v32  ;;  %v3315_v0 = vmul.f32 %v12995_v59, %v12994_v63  ;;  %v3822_v6 = vadd.f32 %v3806_v27, %v3786_v11  ;;  %v3823_v46 = vadd.f32 %v3807_v26, %v3787_v44  ;;  %v4539_v37 = vmul.f32 0.5, %v4523_v48  ;;  %v12996_v15 = vld [vmem:[#allocation212_spill] sm:$0xff]  ;;  %v12999_v32 = vld [vmem:[#allocation241_spill] sm:$0xff]  ;;  %v13002_v63 = vld [vmem:[#allocation82_spill] sm:$0xff] }
 0x517   : > { %v3316_v18 = vmul.f32 %v12995_v59, %v12996_v15  ;;  %v4540_v61 = vmul.f32 0.5, %v4524_v17  ;;  %v12997_v47 = vld [vmem:[#allocation132_spill] sm:$0xff]  ;;  %v3127_v21 = vadd.f32 %v3111_v60, %v12998_v53  ;;  %v3351_v20 = vmul.f32 %v13000_v35, %v12999_v32  ;;  %v13003_v26 = vld [vmem:[#allocation234_spill] sm:$0xff]  ;;  %v13005_v11 = vld [vmem:[#allocation263_spill] sm:$0xff] }
 0x518   : > { %v3126_v41 = vadd.f32 %v3110_v16, %v12997_v47  ;;  %v3858_v50 = vadd.f32 %v3842_v19, %v3822_v6  ;;  %v3859_v49 = vadd.f32 %v3843_v5, %v3823_v46  ;;  %v11084_v3 = vmul.f32 %v4539_v37, %v13001_v1  ;;  %v13004_v59 = vld [vmem:[#allocation228_spill] sm:$0xff]  ;;  %v13006_v47 = vld [vmem:[#allocation239_spill] sm:$0xff]  ;;  %v13007_v53 = vld [vmem:[#allocation70_spill] sm:$0xff] }
 0x519   : > { %v3352_v27 = vmul.f32 %v13000_v35, %v13002_v63  ;;  %v11089_v48 = vmul.f32 %v4540_v61, %v13003_v26  ;;  %v3163_v16 = vadd.f32 %v13005_v11, %v3127_v21  ;;  %v3387_v60 = vmul.f32 %v13007_v53, %v13006_v47  ;;  %v13008_v19 = vld [vmem:[#allocation240_spill] sm:$0xff]  ;;  %v13010_v46 = vld [vmem:[#allocation135_spill] sm:$0xff]  ;;  %v13012_v1 = vld [vmem:[#allocation237_spill] sm:$0xff] }
 0x51a   : > { %v3162_v17 = vadd.f32 %v13004_v59, %v3126_v41  ;;  %v3894_v44 = vadd.f32 %v3878_v14, %v3858_v50  ;;  %v3895_v32 = vadd.f32 %v3879_v22, %v3859_v49  ;;  %v3388_v5 = vmul.f32 %v13007_v53, %v13008_v19  ;;  %v13009_v6 = vld [vmem:[#allocation76_spill] sm:$0xff]  ;;  %v13013_v63 = vld [vmem:[#allocation285_spill] sm:$0xff]  ;;  %v13014_v26 = vld [vmem:[#allocation242_spill] sm:$0xff] }
 0x51b   : > { %v3423_v37 = vmul.f32 %v13010_v46, %v13009_v6  ;;  %v13011_v15 = vld [vmem:[#allocation224_spill] sm:$0xff]  ;;  %v3199_v61 = vadd.f32 %v13012_v1, %v3163_v16  ;;  %v3424_v41 = vmul.f32 %v13010_v46, %v13013_v63  ;;  %v13016_v50 = vld [vmem:[#allocation87_spill] sm:$0xff]  ;;  %v3700_v63 = vmul.f32 %v12966_v39, %v12968_v40 }
 0x51c   : > { %v3198_v35 = vadd.f32 %v13011_v15, %v3162_v17  ;;  %v13015_v21 = vld [vmem:[#allocation84_spill] sm:$0xff]  ;;  %v4027_v11 = vadd.f32 %v4011_v43, %v3894_v44  ;;  %v4028_v47 = vadd.f32 %v4012_v51, %v3895_v32  ;;  %v3495_v14 = vmul.f32 %v13016_v50, %v12958_v38  ;;  %v13017_v19 = vld [vmem:[#allocation243_spill] sm:$0xff] }
 0x51d   : > { %v3459_v59 = vmul.f32 %v13015_v21, %v13014_v26  ;;  %v3460_v49 = vmul.f32 %v13015_v21, %v12957_v56  ;;  %v3332_v53 = vadd.f32 %v3316_v18, %v3199_v61  ;;  %v3496_v17 = vmul.f32 %v13016_v50, %v13017_v19  ;;  %v13018_v16 = vld [vmem:[#allocation219_spill] sm:$0xff]  ;;  %v13020_v15 = vld [vmem:[#allocation216_spill] sm:$0xff] }
 0x51e   : > { %v3331_v22 = vadd.f32 %v3315_v0, %v3198_v35  ;;  %v13019_v6 = vrot.slane %v13018_v16, 2  ;;  %v13021_v46 = vrot.slane %v13020_v15, 2  ;;  %v4063_v43 = vadd.f32 %v4047_v24, %v4027_v11 }
 0x51f   : > { %v4064_v51 = vadd.f32 %v4048_v23, %v4028_v47  ;;  %v3664_v0 = vmul.f32 %v12964_v25, %v12965_v54  ;;  %v3368_v32 = vadd.f32 %v3352_v27, %v3332_v53  ;;  %v3665_v24 = vmul.f32 %v12964_v25, %v12967_v62  ;;  %v13025_v62 = vld [vmem:[#allocation119_spill] sm:$0xff]  ;;  %v13027_v47 = vld [vmem:[#allocation96_spill] sm:$0xff] }
 0x520   : > { %v11117_v1 = vsel %vm3581_vm4, %v13021_v46, %v13019_v6  ;;  %v13022_v56 = vmov %v13021_v46  ;;  %v13023_v44 = vmov %v13019_v6  ;;  %v3367_v18 = vadd.f32 %v3351_v20, %v3331_v22  ;;  %v13024_v20 = vld [vmem:[#allocation138_spill] sm:$0xff] }
 0x521   : > { %v3607_v38 = vsel %vm3581_vm4, %v13023_v44, %v13022_v56  ;;  %v4099_v23 = vadd.f32 %v4083_v9, %v4063_v43  ;;  %v4100_v61 = vadd.f32 %v4084_v8, %v4064_v51  ;;  %v3701_v26 = vmul.f32 %v12966_v39, %v12913_v30  ;;  %v13029_v56 = vld [vmem:[#allocation177_spill] sm:$0xff] }
 0x522   : > { %v11129_v35 = vsel %vm3615_vm10, %v3607_v38, 0.0  ;;  %v3403_v21 = vadd.f32 %v3387_v60, %v3367_v18  ;;  %v3404_v11 = vadd.f32 %v3388_v5, %v3368_v32  ;;  %v3736_v54 = vmul.f32 %v12969_v29, %v12914_v33  ;;  %v13026_v60 = vld [vmem:[#allocation99_spill] sm:$0xff]  ;;  %v13030_v38 = vld [vmem:[#allocation261_spill] sm:$0xff]  ;;  %v13031_v32 = vld [vmem:[#allocation258_spill] sm:$0xff] }
 0x523   : > { %v3737_v28 = vmul.f32 %v12969_v29, %v13024_v20  ;;  %v4135_v27 = vadd.f32 %v11039_v34, %v4099_v23  ;;  %v4136_v25 = vadd.f32 %v11043_v31, %v4100_v61  ;;  %v3772_v9 = vmul.f32 %v13025_v62, %v12972_v4 }
 0x524   : > { %v3773_v40 = vmul.f32 %v13025_v62, %v12919_v2  ;;  %v3439_v8 = vadd.f32 %v3423_v37, %v3403_v21  ;;  %v3440_v30 = vadd.f32 %v3424_v41, %v3404_v11  ;;  %v11149_v5 = vmul.f32 %v13026_v60, %v10817_v42  ;;  %v13036_v21 = vld [vmem:[#allocation283_spill] sm:$0xff]  ;;  %v13037_v11 = vld [vmem:[#allocation101_spill] sm:$0xff] }
 0x525   : > { %v11153_v33 = vmul.f32 %v13026_v60, %v12974_v45  ;;  %v4171_v34 = vadd.f32 %v11047_v7, %v4135_v27  ;;  %v4172_v31 = vadd.f32 %v11051_v57, %v4136_v25  ;;  %v11159_v50 = vmul.f32 %v13027_v47, %v10975_v13 }
 0x526   : > { %v11163_v37 = vmul.f32 %v13027_v47, %v10987_v12  ;;  %v3475_v41 = vadd.f32 %v3459_v59, %v3439_v8  ;;  %v3476_v22 = vadd.f32 %v3460_v49, %v3440_v30  ;;  %v11167_v53 = vmul.f32 %v12975_v55, %v11117_v1  ;;  %v13028_v59 = vld [vmem:[#allocation42_spill] sm:$0xff] }
 0x527   : > { %v11171_v19 = vmul.f32 %v12975_v55, %v11129_v35  ;;  %v4207_v7 = vadd.f32 %v11055_v58, %v4171_v34  ;;  %v4208_v57 = vadd.f32 %v11059_v36, %v4172_v31  ;;  %v3913_v6 = vrot.slane %v13020_v15, 3  ;;  %v13033_v15 = vld [vmem:[#allocation272_spill] sm:$0xff]  ;;  %v13038_v8 = vld [vmem:[#allocation102_spill] sm:$0xff]  ;;  %v13039_v34 = vld [vmem:[#allocation181_spill] sm:$0xff] }
 0x528   : > { %v3927_v46 = vrot.slane %v13018_v16, 3  ;;  %v3511_v43 = vadd.f32 %v3495_v14, %v3475_v41  ;;  %v3512_v51 = vadd.f32 %v3496_v17, %v3476_v22  ;;  %v11179_v49 = vmul.f32 %v13028_v59, %v10432_v10  ;;  %v13032_v17 = vld [vmem:[#allocation271_spill] sm:$0xff]  ;;  %v13040_v31 = vld [vmem:[#allocation178_spill] sm:$0xff] }
 0x529   : > { %v11183_v44 = vmul.f32 %v13028_v59, %v13029_v56  ;;  %v4243_v18 = vadd.f32 %v13030_v38, %v4207_v7  ;;  %v4244_v58 = vadd.f32 %v13031_v32, %v4208_v57  ;;  %v11201_v20 = vmul.f32 %v13037_v11, %v13036_v21  ;;  %v13041_v57 = vld [vmem:[#allocation182_spill] sm:$0xff]  ;;  %v13048_v38 = vld [vmem:[#allocation257_spill] sm:$0xff] }
 0x52a   : > { %v11189_v36 = vsel %vm3930_vm11, %v3913_v6, %v3927_v46  ;;  %v3956_v14 = vsel %vm3930_vm11, %v3927_v46, %v3913_v6  ;;  %v3547_v16 = vadd.f32 %v13032_v17, %v3511_v43  ;;  %v3548_v10 = vadd.f32 %v13033_v15, %v3512_v51  ;;  %v13043_v46 = vld [vmem:[#allocation259_spill] sm:$0xff]  ;;  %v13044_v43 = vld [vmem:[#allocation180_spill] sm:$0xff]  ;;  %v13053_v17 = vld [vmem:[#allocation49_spill] sm:$0xff] }
 0x52b   : > { %v11197_v61 = vsel %vm3964_vm12, %v3956_v14, 0.0  ;;  %v4571_v27 = vmul.f32 %v11084_v3, %v4243_v18  ;;  %v4572_v25 = vmul.f32 %v11089_v48, %v4244_v58  ;;  %v11207_v30 = vmul.f32 %v13037_v11, %v13038_v8  ;;  %v13046_v48 = vld [vmem:[#allocation255_spill] sm:$0xff]  ;;  %v13049_v18 = vld [vmem:[#allocation69_spill] sm:$0xff]  ;;  %v13051_v58 = vld [vmem:[#allocation86_spill] sm:$0xff] }
 0x52c   : > { %13035 = vst [vmem:[#allocation45_spill] sm:$0xff] %v11197_v61  ;;  %v11211_v41 = vmul.f32 %v13040_v31, %v13039_v34  ;;  %v3680_v22 = vadd.f32 %v3664_v0, %v3547_v16  ;;  %v3681_v7 = vadd.f32 %v3665_v24, %v3548_v10  ;;  %v11215_v6 = vmul.f32 %v13040_v31, %v13041_v57  ;;  %v13054_v16 = vld [vmem:[#allocation147_spill] sm:$0xff]  ;;  %v13056_v10 = vld [vmem:[#allocation289_spill] sm:$0xff] }
 0x52d   : > { %v11219_v51 = vmul.f32 %v13044_v43, %v13043_v46  ;;  %v4583_v3 = vpack.c.bf16 %v4572_v25, %v4571_v27  ;;  %v11223_v56 = vmul.f32 %v13044_v43, %v13046_v48  ;;  %v11227_v32 = vmul.f32 %v13049_v18, %v13048_v38  ;;  %v13058_v25 = vld [vmem:[#allocation148_spill] sm:$0xff] }
 0x52e   : > { %13042 = vst [vmem:[#allocation157_spill] sm:$0xff] %v11215_v6  ;;  %v11231_v0 = vmul.f32 %v13049_v18, %v13051_v58  ;;  %v3716_v24 = vadd.f32 %v3700_v63, %v3680_v22  ;;  %v3717_v14 = vadd.f32 %v3701_v26, %v3681_v7  ;;  %v11235_v15 = vmul.f32 %v13054_v16, %v13053_v17  ;;  %v13062_v26 = vld [vmem:[#allocation80_spill] sm:$0xff] }
 0x52f   : > { %13045 = vst [vmem:[#allocation207_spill] sm:$0xff] %v11219_v51  ;;  %13047 = vst [vmem:[#allocation211_spill] sm:$0xff] %v11223_v56  ;;  %v11239_v27 = vmul.f32 %v13054_v16, %v13056_v10  ;;  %5457 = vmatprep.mubr.bf16.mxu1 %v4583_v3  ;;  %v11243_v39 = vmul.f32 %v13058_v25, %v11189_v36  ;;  %v4526_v22 = vadd.f32 1.0, %v13062_v26 }
 0x530   : > { %13050 = vst [vmem:[#allocation206_spill] sm:$0xff] %v11227_v32  ;;  %13052 = vst [vmem:[#allocation92_spill] sm:$0xff] %v11231_v0  ;;  %v11247_v32 = vmul.f32 %v13058_v25, %v11197_v61  ;;  %v13061_v0 = vld [vmem:[#allocation160_spill] sm:$0xff]  ;;  %v3752_v7 = vadd.f32 %v3736_v54, %v3716_v24  ;;  %v3753_v56 = vadd.f32 %v3737_v28, %v3717_v14  ;;  %v13064_v54 = vld [vmem:[#allocation77_spill] sm:$0xff] }
 0x531   : > { %13055 = vst [vmem:[#allocation116_spill] sm:$0xff] %v11235_v15  ;;  %13057 = vst [vmem:[#allocation90_spill] sm:$0xff] %v11239_v27  ;;  %v4525_v63 = vadd.f32 1.0, %v13061_v0  ;;  %v3738_v15 = vmul.f32 %v12969_v29, %v12972_v4  ;;  %v3739_v3 = vmul.f32 %v12969_v29, %v12919_v2  ;;  %v4542_v51 = vmul.f32 0.5, %v4526_v22  ;;  %v13063_v61 = vld [vmem:[#allocation140_spill] sm:$0xff]  ;;  %v13065_v24 = vld [vmem:[#allocation265_spill] sm:$0xff] }
 0x532   : > { %13059 = vst [vmem:[#allocation93_spill] sm:$0xff] %v11243_v39  ;;  %13060 = vst [vmem:[#allocation131_spill] sm:$0xff] %v11247_v32  ;;  %v3774_v39 = vmul.f32 %v13025_v62, %v10817_v42  ;;  %v3775_v32 = vmul.f32 %v13025_v62, %v12974_v45  ;;  %v3788_v25 = vadd.f32 %v3772_v9, %v3752_v7  ;;  %v13066_v4 = vld [vmem:[#allocation171_spill] sm:$0xff] }
 0x533   : > { %v4541_v27 = vmul.f32 0.5, %v4525_v63  ;;  %v3789_v0 = vadd.f32 %v3773_v40, %v3753_v56  ;;  %v3754_v26 = vadd.f32 %v3738_v15, %v13063_v61  ;;  %v3755_v28 = vadd.f32 %v3739_v3, %v13064_v54 }
 0x534   : > { %v11265_v6 = vmul.f32 %v4542_v51, %v13066_v4  ;;  %v3810_v63 = vmul.f32 %v13026_v60, %v10975_v13  ;;  %v3811_v22 = vmul.f32 %v13026_v60, %v10987_v12  ;;  %v3824_v62 = vadd.f32 %v11149_v5, %v3788_v25  ;;  %v13067_v4 = vld [vmem:[#allocation98_spill] sm:$0xff] }
 0x535   : > { %v11262_v14 = vmul.f32 %v4541_v27, %v13065_v24  ;;  %v3825_v9 = vadd.f32 %v11153_v33, %v3789_v0  ;;  %v3790_v40 = vadd.f32 %v3774_v39, %v3754_v26  ;;  %v3791_v61 = vadd.f32 %v3775_v32, %v3755_v28  ;;  %v13068_v27 = vld [vmem:[#allocation137_spill] sm:$0xff] }
 0x536   : > { %v3846_v56 = vmul.f32 %v13027_v47, %v11117_v1  ;;  %v3847_v15 = vmul.f32 %v13027_v47, %v11129_v35  ;;  %v3882_v51 = vmul.f32 %v12975_v55, %v13067_v4  ;;  %v3883_v7 = vmul.f32 %v12975_v55, %v13068_v27  ;;  %v13069_v39 = vld [vmem:[#allocation273_spill] sm:$0xff] }
 0x537   : > { %v3860_v3 = vadd.f32 %v11159_v50, %v3824_v62  ;;  %v3861_v5 = vadd.f32 %v11163_v37, %v3825_v9  ;;  %v3826_v25 = vadd.f32 %v3810_v63, %v3790_v40  ;;  %v3827_v33 = vadd.f32 %v3811_v22, %v3791_v61  ;;  %v13070_v0 = vld [vmem:[#allocation281_spill] sm:$0xff] }
 0x538   : > { %v3914_v32 = vrot.slane %v13069_v39, 3  ;;  %v3928_v26 = vrot.slane %v13070_v0, 3  ;;  %v4015_v54 = vmul.f32 %v13028_v59, %v13036_v21  ;;  %v4016_v28 = vmul.f32 %v13028_v59, %v13038_v8  ;;  %v13074_v39 = vld [vmem:[#allocation45_spill] sm:$0xff]  ;;  %v13075_v0 = vld [vmem:[#allocation148_spill] sm:$0xff] }
 0x539   : > { %v3896_v24 = vadd.f32 %v11167_v53, %v3860_v3  ;;  %v3897_v55 = vadd.f32 %v11171_v19, %v3861_v5  ;;  %v3862_v27 = vadd.f32 %v3846_v56, %v3826_v25  ;;  %v3863_v62 = vadd.f32 %v3847_v15, %v3827_v33  ;;  %v13073_v25 = vld [vmem:[#allocation157_spill] sm:$0xff] }
 0x53a   : > { %v11293_v50 = vsel %vm3930_vm11, %v3914_v32, %v3928_v26  ;;  %v3957_v37 = vsel %vm3930_vm11, %v3928_v26, %v3914_v32  ;;  %v4051_v63 = vmul.f32 %v13037_v11, %v13039_v34  ;;  %v4052_v21 = vmul.f32 %v13037_v11, %v13041_v57 }
 0x53b   : > { %13071 = vst [vmem:[#allocation46_spill] sm:$0xff] %v11293_v50  ;;  %v4029_v8 = vadd.f32 %v11179_v49, %v3896_v24  ;;  %v4030_v53 = vadd.f32 %v11183_v44, %v3897_v55  ;;  %v3898_v19 = vadd.f32 %v3882_v51, %v3862_v27  ;;  %v3899_v22 = vadd.f32 %v3883_v7, %v3863_v62  ;;  %v13077_v62 = vld [vmem:[#allocation207_spill] sm:$0xff] }
 0x53c   : > { %v11305_v9 = vsel %vm3964_vm12, %v3957_v37, 0.0  ;;  %v4087_v40 = vmul.f32 %v13040_v31, %v13043_v46  ;;  %v4088_v61 = vmul.f32 %v13040_v31, %v13046_v48  ;;  %v4123_v56 = vmul.f32 %v13044_v43, %v13048_v38 }
 0x53d   : > { %13072 = vst [vmem:[#allocation166_spill] sm:$0xff] %v11305_v9  ;;  %v4065_v15 = vadd.f32 %v11201_v20, %v4029_v8  ;;  %v4066_v49 = vadd.f32 %v11207_v30, %v4030_v53  ;;  %v4031_v55 = vadd.f32 %v4015_v54, %v3898_v19  ;;  %v4032_v44 = vadd.f32 %v4016_v28, %v3899_v22  ;;  %v13076_v28 = vld [vmem:[#allocation247_spill] sm:$0xff] }
 0x53e   : > { %v4124_v51 = vmul.f32 %v13044_v43, %v13051_v58  ;;  %v4159_v27 = vmul.f32 %v13049_v18, %v13053_v17  ;;  %v4160_v7 = vmul.f32 %v13049_v18, %v13056_v10  ;;  %v4195_v3 = vmul.f32 %v13054_v16, %v11189_v36  ;;  %v13078_v8 = vld [vmem:[#allocation211_spill] sm:$0xff] }
 0x53f   : > { %v4101_v5 = vadd.f32 %v11211_v41, %v4065_v15  ;;  %v4102_v20 = vadd.f32 %v13073_v25, %v4066_v49  ;;  %v4067_v33 = vadd.f32 %v4051_v63, %v4031_v55  ;;  %v4068_v30 = vadd.f32 %v4052_v21, %v4032_v44  ;;  %v13079_v22 = vld [vmem:[#allocation287_spill] sm:$0xff]  ;;  %v13080_v15 = vld [vmem:[#allocation150_spill] sm:$0xff]  ;;  %v13081_v49 = vld [vmem:[#allocation60_spill] sm:$0xff] }
 0x540   : > { %v4196_v32 = vmul.f32 %v13054_v16, %v13074_v39  ;;  %v4231_v26 = vmul.f32 %v13075_v0, %v11293_v50  ;;  %v4232_v54 = vmul.f32 %v13075_v0, %v11305_v9  ;;  %v4527_v24 = vadd.f32 1.0, %v13076_v28  ;;  %v13082_v25 = vld [vmem:[#allocation206_spill] sm:$0xff]  ;;  %v13083_v0 = vld [vmem:[#allocation92_spill] sm:$0xff] }
 0x541   : > { %v4137_v37 = vadd.f32 %v13077_v62, %v4101_v5  ;;  %v4138_v53 = vadd.f32 %v13078_v8, %v4102_v20  ;;  %v4103_v41 = vadd.f32 %v4087_v40, %v4067_v33  ;;  %v4104_v19 = vadd.f32 %v4088_v61, %v4068_v30  ;;  %v13084_v62 = vld [vmem:[#allocation97_spill] sm:$0xff]  ;;  %v13086_v33 = vld [vmem:[#allocation144_spill] sm:$0xff] }
 0x542   : > { %v4528_v63 = vadd.f32 1.0, %v13079_v22  ;;  %v4543_v21 = vmul.f32 0.5, %v4527_v24  ;;  %v3704_v55 = vmul.f32 %v13081_v49, %v13080_v15  ;;  %v3705_v44 = vmul.f32 %v13081_v49, %v12919_v2  ;;  %v13085_v40 = vld [vmem:[#allocation173_spill] sm:$0xff]  ;;  %v13087_v24 = vld [vmem:[#allocation116_spill] sm:$0xff]  ;;  %v13088_v22 = vld [vmem:[#allocation90_spill] sm:$0xff] }
 0x543   : > { %v4173_v16 = vadd.f32 %v13082_v25, %v4137_v37  ;;  %v4174_v9 = vadd.f32 %v13083_v0, %v4138_v53  ;;  %v4139_v28 = vadd.f32 %v4123_v56, %v4103_v41  ;;  %v4140_v50 = vadd.f32 %v4124_v51, %v4104_v19  ;;  %v13089_v2 = vld [vmem:[#allocation67_spill] sm:$0xff]  ;;  %v13091_v53 = vld [vmem:[#allocation93_spill] sm:$0xff] }
 0x544   : > { %v4544_v5 = vmul.f32 0.5, %v4528_v63  ;;  %v4559_v20 = vmul.f32 %v4543_v21, %v13084_v62  ;;  %v3720_v61 = vadd.f32 %v3704_v55, %v13085_v40  ;;  %v3721_v30 = vadd.f32 %v3705_v44, %v13086_v33  ;;  %v13090_v51 = vld [vmem:[#allocation119_spill] sm:$0xff]  ;;  %v13100_v33 = vld [vmem:[#allocation282_spill] sm:$0xff] }
 0x545   : > { %v4209_v8 = vadd.f32 %v13087_v24, %v4173_v16  ;;  %v4210_v15 = vadd.f32 %v13088_v22, %v4174_v9  ;;  %v4175_v23 = vadd.f32 %v4159_v27, %v4139_v28  ;;  %v4176_v39 = vadd.f32 %v4160_v7, %v4140_v50  ;;  %v13092_v19 = vld [vmem:[#allocation131_spill] sm:$0xff]  ;;  %v13102_v24 = vld [vmem:[#allocation161_spill] sm:$0xff]  ;;  %v11383_v22 = vpop.f32.mrf.mxu0 }
 0x546   : > { %v4560_v49 = vmul.f32 %v4544_v5, %v13089_v2  ;;  %v3740_v0 = vmul.f32 %v12969_v29, %v10817_v42  ;;  %v3741_v56 = vmul.f32 %v12969_v29, %v12974_v45  ;;  %v3776_v37 = vmul.f32 %v13090_v51, %v10975_v13 }
 0x547   : > { %v4245_v41 = vadd.f32 %v13091_v53, %v4209_v8  ;;  %v4246_v63 = vadd.f32 %v13092_v19, %v4210_v15  ;;  %v4211_v16 = vadd.f32 %v4195_v3, %v4175_v23  ;;  %v4212_v21 = vadd.f32 %v4196_v32, %v4176_v39  ;;  %v13093_v3 = vld [vmem:[#allocation274_spill] sm:$0xff]  ;;  %v13095_v32 = vld [vmem:[#allocation268_spill] sm:$0xff] }
 0x548   : > { %v3756_v9 = vadd.f32 %v3740_v0, %v3720_v61  ;;  %v3757_v27 = vadd.f32 %v3741_v56, %v3721_v30  ;;  %v3777_v50 = vmul.f32 %v13090_v51, %v10987_v12  ;;  %v3812_v42 = vmul.f32 %v13026_v60, %v11117_v1  ;;  %v1835_v0 = vpop.f32.mrf.mxu0 }
 0x549   : > { %v4573_v7 = vmul.f32 %v11262_v14, %v4245_v41  ;;  %v4574_v29 = vmul.f32 %v11265_v6, %v4246_v63  ;;  %v4247_v45 = vadd.f32 %v4231_v26, %v4211_v16  ;;  %v4248_v13 = vadd.f32 %v4232_v54, %v4212_v21  ;;  %v13103_v41 = vld [vmem:[#allocation252_spill] sm:$0xff]  ;;  %v13104_v63 = vld [vmem:[#allocation85_spill] sm:$0xff] }
 0x54a   : > { %v3792_v55 = vadd.f32 %v3776_v37, %v3756_v9  ;;  %v3793_v44 = vadd.f32 %v3777_v50, %v3757_v27  ;;  %v3813_v23 = vmul.f32 %v13026_v60, %v11129_v35  ;;  %v13094_v39 = vrot.slane %v13093_v3, 3  ;;  %v13099_v60 = vld [vmem:[#allocation137_spill] sm:$0xff]  ;;  %v5432_v27 = vpop.f32.mrf.mxu0  ;;  %v13110_v3 = vld [vmem:[#allocation46_spill] sm:$0xff] }
 0x54b   : > { %v13096_v25 = vrot.slane %v13095_v32, 3  ;;  %v4584_v28 = vpack.c.bf16 %v4574_v29, %v4573_v7  ;;  %v4575_v1 = vmul.f32 %v4559_v20, %v4247_v45  ;;  %v4576_v5 = vmul.f32 %v4560_v49, %v4248_v13  ;;  %v13101_v20 = vld [vmem:[#allocation89_spill] sm:$0xff]  ;;  %v13106_v7 = vld [vmem:[#allocation248_spill] sm:$0xff] }
 0x54c   : > { %v13098_v6 = vmov %v13094_v39  ;;  %v3848_v35 = vmul.f32 %v13027_v47, %v13067_v4  ;;  %v3849_v54 = vmul.f32 %v13027_v47, %v13099_v60  ;;  %v3828_v62 = vadd.f32 %v3812_v42, %v3792_v55  ;;  %v13105_v50 = vld [vmem:[#allocation209_spill] sm:$0xff] }
 0x54d   : > { %v3944_v12 = vsel %vm3930_vm11, %v13096_v25, %v13094_v39  ;;  %v13097_v14 = vmov %v13096_v25  ;;  %v3829_v40 = vadd.f32 %v3813_v23, %v3793_v44  ;;  %5458 = vmatmul.mubr.bf16.gmra.mxu1 %v4584_v28  ;;  %v4585_v61 = vpack.c.bf16 %v4576_v5, %v4575_v1  ;;  %v13108_v44 = vld [vmem:[#allocation253_spill] sm:$0xff]  ;;  %v13111_v39 = vld [vmem:[#allocation147_spill] sm:$0xff]  ;;  %v13112_v25 = vld [vmem:[#allocation166_spill] sm:$0xff]  ;;  %v1838_v1 = vpop.f32.mrf.mxu0 }
 0x54e   : > { %v3958_v26 = vsel %vm3930_vm11, %v13098_v6, %v13097_v14  ;;  %v3884_v30 = vmul.f32 %v13101_v20, %v13100_v33  ;;  %v3885_v8 = vmul.f32 %v13101_v20, %v13102_v24  ;;  %v3864_v52 = vadd.f32 %v3848_v35, %v3828_v62  ;;  %v13116_v20 = vld [vmem:[#allocation170_spill] sm:$0xff] }
 0x54f   : > { %v3865_v15 = vadd.f32 %v3849_v54, %v3829_v40  ;;  %5461 = vmatprep.mubr.bf16.mxu1 %v4585_v61  ;;  %v4017_v47 = vmul.f32 %v13028_v59, %v13039_v34  ;;  %v4018_v49 = vmul.f32 %v13028_v59, %v13041_v57  ;;  %v4053_v37 = vmul.f32 %v13037_v11, %v13043_v46  ;;  %v13114_v54 = vld [vmem:[#allocation172_spill] sm:$0xff] }
 0x550   : > { %v3900_v2 = vadd.f32 %v3884_v30, %v3864_v52  ;;  %v4054_v53 = vmul.f32 %v13037_v11, %v13046_v48  ;;  %v4359_v19 = vadd.f32 1.0, %v13103_v41  ;;  %v4360_v16 = vadd.f32 1.0, %v13104_v63  ;;  %v13115_v61 = vld [vmem:[#allocation148_spill] sm:$0xff]  ;;  %v13120_v63 = vld [vmem:[#allocation251_spill] sm:$0xff] }
 0x551   : > { %v3901_v4 = vadd.f32 %v3885_v8, %v3865_v15  ;;  %v4089_v34 = vmul.f32 %v13040_v31, %v13048_v38  ;;  %v4090_v59 = vmul.f32 %v13040_v31, %v13051_v58  ;;  %v4125_v57 = vmul.f32 %v13044_v43, %v13053_v17  ;;  %v13107_v58 = vld [vmem:[#allocation45_spill] sm:$0xff]  ;;  %v13117_v8 = vld [vmem:[#allocation175_spill] sm:$0xff] }
 0x552   : > { %v4033_v56 = vadd.f32 %v4017_v47, %v3900_v2  ;;  %v4126_v46 = vmul.f32 %v13044_v43, %v13056_v10  ;;  %v4529_v42 = vadd.f32 1.0, %v13105_v50  ;;  %v4530_v29 = vadd.f32 1.0, %v13106_v7  ;;  %v5483_v50 = vpop.f32.mrf.mxu0 }
 0x553   : > { %v4034_v51 = vadd.f32 %v4018_v49, %v3901_v4  ;;  %v4375_v45 = vmul.f32 0.5, %v4359_v19  ;;  %v4376_v13 = vmul.f32 0.5, %v4360_v16  ;;  %v4161_v31 = vmul.f32 %v13049_v18, %v11189_v36  ;;  %v13113_v36 = vld [vmem:[#allocation159_spill] sm:$0xff]  ;;  %v13118_v4 = vld [vmem:[#allocation145_spill] sm:$0xff]  ;;  %v13119_v49 = vld [vmem:[#allocation246_spill] sm:$0xff] }
 0x554   : > { %v4069_v21 = vadd.f32 %v4053_v37, %v4033_v56  ;;  %v4162_v17 = vmul.f32 %v13049_v18, %v13107_v58  ;;  %v4362_v23 = vadd.f32 1.0, %v13108_v44  ;;  %v3998_v10 = vsel %vm3964_vm12, %v3958_v26, 0.0 }
 0x555   : > { %v4070_v9 = vadd.f32 %v4054_v53, %v4034_v51  ;;  %v4197_v32 = vmul.f32 %v13111_v39, %v13110_v3  ;;  %v4198_v28 = vmul.f32 %v13111_v39, %v13112_v25  ;;  %v4545_v6 = vmul.f32 0.5, %v4529_v42  ;;  %v4846_v42 = vpop.f32.mrf.mxu0  ;;  %v5905_v25 = vld [vmem:[%s6728_s7 + $0x18] sm:$0xff] }
 0x556   : > { %v4105_v11 = vadd.f32 %v4089_v34, %v4069_v21  ;;  %v4546_v35 = vmul.f32 0.5, %v4530_v29  ;;  %v4361_v60 = vadd.f32 1.0, %v13113_v36  ;;  %v4392_v18 = vmul.f32 %v4376_v13, %v13114_v54  ;;  %v13121_v34 = vld [vmem:[#allocation139_spill] sm:$0xff] }
 0x557   : > { %v4106_v48 = vadd.f32 %v4090_v59, %v4070_v9  ;;  %v4233_v33 = vmul.f32 %v13115_v61, %v3944_v12  ;;  %v4234_v26 = vmul.f32 %v13115_v61, %v3998_v10  ;;  %v4391_v30 = vmul.f32 %v4375_v45, %v13116_v20  ;;  %v11433_v29 = vld [vmem:[%s13122_s13] ss:$0 sm:$0xff]  ;;  %v5484_v45 = vpop.f32.mrf.mxu0  ;;  %s6137_s13 = sshll.u32 %s6314_s11, 4  ;;  %s6138_s13 = int_to_ptr.vmem [resolvable:$false] %s6137_s13 }
 0x558   : > { %v4141_v55 = vadd.f32 %v4125_v57, %v4105_v11  ;;  %v4378_v24 = vmul.f32 0.5, %v4362_v23  ;;  %v1839_v52 = vadd.f32 %v1838_v1, %v13117_v8  ;;  %v4561_v47 = vmul.f32 %v4545_v6, %v13118_v4  ;;  %v5904_v10 = vld [vmem:[%s6728_s7] sm:$0xff]  ;;  %s6139_s0 = scalar_lea.vmem %s6138_s13, 4096  ;;  %p6140_p0 = scmp.lt.s32.totalorder %s11486_s10, %s6138_s13 }
 0x559   : > { %v4142_v38 = vadd.f32 %v4126_v46, %v4106_v48  ;;  %v4562_v56 = vmul.f32 %v4546_v35, %v13119_v49  ;;  %v1836_v51 = vadd.f32 %v1835_v0, %v13117_v8  ;;  %v4377_v53 = vmul.f32 0.5, %v4361_v60  ;;  %v4849_v23 = vpop.f32.mrf.mxu0  ;;  %p6141_p3 = scmp.lt.s32.totalorder %s6139_s0, %s6133_s5 }
 0x55a   : > { %v4177_v5 = vadd.f32 %v4161_v31, %v4141_v55  ;;  %v4408_v37 = vmul.f32 %v4392_v18, %v1839_v52  ;;  %v4394_v16 = vmul.f32 %v4378_v24, %v13120_v63  ;;  %v1847_v57 = vadd.f32 %v5432_v27, %v13117_v8  ;;  %v5903_v31 = vld [vmem:[%s6728_s7 + $0x10] sm:$0xff]  ;;  %v5908_v52 = vld [vmem:[%s6728_s7 + $0x20] sm:$0xff] }
 0x55b   : > { %v4178_v14 = vadd.f32 %v4162_v17, %v4142_v38  ;;  %v4407_v12 = vmul.f32 %v4391_v30, %v1836_v51  ;;  %v4393_v59 = vmul.f32 %v4377_v53, %v13121_v34  ;;  %v1844_v46 = vadd.f32 %v11383_v22, %v13117_v8  ;;  %v5487_v6 = vpop.f32.mrf.mxu0  ;;  %v5910_v51 = vld [vmem:[%s6728_s7 + $0x28] sm:$0xff]  ;;  %p6142_p12 = por %p6141_p3, %p6140_p0 }
 0x55c   : > { %v4213_v62 = vadd.f32 %v4197_v32, %v4177_v5  ;;  %v4410_v0 = vmul.f32 %v4394_v16, %v1847_v57  ;;  %v5906_v5 = vld [vmem:[%s6728_s7 + $0x8] sm:$0xff] }
 0x55d   : > { %v4214_v40 = vadd.f32 %v4198_v28, %v4178_v14  ;;  %v4417_v9 = vpack.c.bf16 %v4408_v37, %v4407_v12  ;;  %v4409_v11 = vmul.f32 %v4393_v59, %v1844_v46  ;;  %v4862_v35 = vpop.f32.mrf.mxu0  ;;  %v5911_v59 = vld [vmem:[%s6728_s7 + $0x50] sm:$0xff]  ;;  %p6143_p10 = pnand %p6142_p12, %p6136_p4 }
 0x55e   : > { %v4249_v15 = vadd.f32 %v4233_v33, %v4213_v62  ;;  %v5907_v33 = vld [vmem:[%s6728_s7 + $0x30] sm:$0xff] }
 0x55f   : > { %v4250_v2 = vadd.f32 %v4234_v26, %v4214_v40  ;;  %v4418_v48 = vpack.c.bf16 %v4410_v0, %v4409_v11  ;;  %v5488_v54 = vpop.f32.mrf.mxu0 }
 0x560   : > { %v4577_v41 = vmul.f32 %v4561_v47, %v4249_v15  ;;  %v5909_v47 = vld [vmem:[%s6728_s7 + $0x38] sm:$0xff] }
 0x561   : > { %v4578_v19 = vmul.f32 %v4562_v56, %v4250_v2  ;;  %v4865_v24 = vpop.f32.mrf.mxu0 }
 0x563   : > { %v4586_v21 = vpack.c.bf16 %v4578_v19, %v4577_v41  ;;  %v5491_v53 = vpop.f32.mrf.mxu0 }
 0x565   : > { %5462 = vmatmul.mubr.bf16.gmra.mxu1 %v4586_v21  ;;  %v4878_v41 = vpop.f32.mrf.mxu0 }
 0x566   : > { %5493 = vmatprep.mubr.bf16.mxu1 %v4417_v9 }
 0x567   : > { %v5492_v63 = vpop.f32.mrf.mxu0 }
 0x569   : > { %v4881_v11 = vpop.f32.mrf.mxu0 }
 0x56d   : > { %5494 = vmatmul.mubr.bf16.vlgmr.msra.gmra.mxu1 %v4418_v48 }
 0x58b   : > { %v5451_v7 = vpop.f32.mrf.mxu1 }
 0x58c   : > { %v4855_v27 = vadd.f32 %v5483_v50, %v5451_v7  ;;  %v5912_v50 = vld [vmem:[%s6728_s7 + $0x40] sm:$0xff] }
 0x58d   : > { %v4701_v13 = vpop.f32.mrf.mxu1 }
 0x58e   : > { %v4918_v55 = vadd.f32 %v11433_v29, %v4855_v27  ;;  %v4847_v22 = vadd.f32 %v4846_v42, %v4701_v13 }
 0x58f   : > { %v5452_v38 = vpop.f32.mrf.mxu1 }
 0x590   : > { %v4934_v58 = vadd.f32 %v5903_v31, %v4918_v55  ;;  %v4916_v17 = vadd.f32 %v11433_v29, %v4847_v22  ;;  %v4858_v44 = vadd.f32 %v5484_v45, %v5452_v38  ;;  %v5913_v45 = vld [vmem:[%s6728_s7 + $0x58] sm:$0xff]  ;;  %v5914_v22 = vld [vmem:[%s6728_s7 + $0x48] sm:$0xff] }
 0x591   : > { %v4704_v43 = vpop.f32.mrf.mxu1 }
 0x592   : > { %4950 = vst [vmem:[%s11439_s1 + $0x10] sm:$0xff] %v4934_v58  ;;  %v4932_v3 = vadd.f32 %v5904_v10, %v4916_v17  ;;  %v4919_v39 = vadd.f32 %v11433_v29, %v4858_v44  ;;  %v4850_v32 = vadd.f32 %v4849_v23, %v4704_v43 }
 0x594   : > { %4948 = vst [vmem:[%s11439_s1] sm:$0xff] %v4932_v3  ;;  %v4935_v28 = vadd.f32 %v5905_v25, %v4919_v39  ;;  %v4917_v1 = vadd.f32 %v11433_v29, %v4850_v32  ;;  %v5915_v25 = vld [vmem:[%s6728_s7 + $0x70] sm:$0xff] }
 0x596   : > { %4951 = vst [vmem:[%s11439_s1 + $0x18] sm:$0xff] %v4935_v28  ;;  %v4933_v14 = vadd.f32 %v5906_v5, %v4917_v1 }
 0x598   : > { %4949 = vst [vmem:[%s11439_s1 + $0x8] sm:$0xff] %v4933_v14 }
 0x5d2   : > { %v5455_v36 = vpop.f32.mrf.mxu1 }
 0x5d3   : > { %v4871_v60 = vadd.f32 %v5487_v6, %v5455_v36  ;;  %v5916_v6 = vld [vmem:[%s6728_s7 + $0x60] sm:$0xff] }
 0x5d4   : > { %v4717_v18 = vpop.f32.mrf.mxu1 }
 0x5d5   : > { %v4922_v62 = vadd.f32 %v11433_v29, %v4871_v60  ;;  %v4863_v40 = vadd.f32 %v4862_v35, %v4717_v18 }
 0x5d6   : > { %v5456_v61 = vpop.f32.mrf.mxu1 }
 0x5d7   : > { %v4938_v26 = vadd.f32 %v5907_v33, %v4922_v62  ;;  %v4920_v20 = vadd.f32 %v11433_v29, %v4863_v40  ;;  %v4874_v30 = vadd.f32 %v5488_v54, %v5456_v61  ;;  %v5917_v54 = vld [vmem:[%s6728_s7 + $0x78] sm:$0xff]  ;;  %v5918_v40 = vld [vmem:[%s6728_s7 + $0x68] sm:$0xff] }
 0x5d8   : > { %v4720_v8 = vpop.f32.mrf.mxu1 }
 0x5d9   : > { %4954 = vst [vmem:[%s11439_s1 + $0x30] sm:$0xff] %v4938_v26  ;;  %v4936_v15 = vadd.f32 %v5908_v52, %v4920_v20  ;;  %v4923_v2 = vadd.f32 %v11433_v29, %v4874_v30  ;;  %v4866_v4 = vadd.f32 %v4865_v24, %v4720_v8 }
 0x5db   : > { %4952 = vst [vmem:[%s11439_s1 + $0x20] sm:$0xff] %v4936_v15  ;;  %v4939_v49 = vadd.f32 %v5909_v47, %v4923_v2  ;;  %v4921_v56 = vadd.f32 %v11433_v29, %v4866_v4 }
 0x5dd   : > { %4955 = vst [vmem:[%s11439_s1 + $0x38] sm:$0xff] %v4939_v49  ;;  %v4937_v37 = vadd.f32 %v5910_v51, %v4921_v56 }
 0x5df   : > { %4953 = vst [vmem:[%s11439_s1 + $0x28] sm:$0xff] %v4937_v37 }
 0x60d   : > { %v5459_v19 = vpop.f32.mrf.mxu1 }
 0x60e   : > { %v4887_v12 = vadd.f32 %v5491_v53, %v5459_v19 }
 0x60f   : > { %v4733_v16 = vpop.f32.mrf.mxu1 }
 0x610   : > { %v4926_v21 = vadd.f32 %v11433_v29, %v4887_v12  ;;  %v4879_v9 = vadd.f32 %v4878_v41, %v4733_v16 }
 0x611   : > { %v5460_v34 = vpop.f32.mrf.mxu1 }
 0x612   : > { %v4942_v57 = vadd.f32 %v5911_v59, %v4926_v21  ;;  %v4924_v46 = vadd.f32 %v11433_v29, %v4879_v9  ;;  %v4890_v0 = vadd.f32 %v5492_v63, %v5460_v34 }
 0x613   : > { %v4736_v48 = vpop.f32.mrf.mxu1 }
 0x614   : > { %4958 = vst [vmem:[%s11439_s1 + $0x50] sm:$0xff] %v4942_v57  ;;  %v4940_v42 = vadd.f32 %v5912_v50, %v4924_v46  ;;  %v4927_v7 = vadd.f32 %v11433_v29, %v4890_v0  ;;  %v4882_v27 = vadd.f32 %v4881_v11, %v4736_v48 }
 0x616   : > { %4956 = vst [vmem:[%s11439_s1 + $0x40] sm:$0xff] %v4940_v42  ;;  %v4943_v13 = vadd.f32 %v5913_v45, %v4927_v7  ;;  %v4925_v55 = vadd.f32 %v11433_v29, %v4882_v27 }
 0x618   : > { %4959 = vst [vmem:[%s11439_s1 + $0x58] sm:$0xff] %v4943_v13  ;;  %v4941_v38 = vadd.f32 %v5914_v22, %v4925_v55 }
 0x61a   : > { %4957 = vst [vmem:[%s11439_s1 + $0x48] sm:$0xff] %v4941_v38 }
 0x625   : > { %v5463_v31 = vpop.f32.mrf.mxu1 }
 0x627   : > { %v4749_v58 = vpop.f32.mrf.mxu1 }
 0x629   : > { %v5464_v17 = vpop.f32.mrf.mxu1 }
 0x62b   : > { %v4752_v44 = vpop.f32.mrf.mxu1 }
 0x62d   : > { %v5495_v23 = vpop.f32.mrf.mxu1 }
 0x62e   : > { %v4903_v43 = vadd.f32 %v5495_v23, %v5463_v31 }
 0x62f   : > { %v4894_v10 = vpop.f32.mrf.mxu1 }
 0x630   : > { %v4930_v3 = vadd.f32 %v11433_v29, %v4903_v43  ;;  %v4895_v39 = vadd.f32 %v4894_v10, %v4749_v58 }
 0x631   : > { %v5496_v32 = vpop.f32.mrf.mxu1 }
 0x632   : > { %v4946_v28 = vadd.f32 %v5915_v25, %v4930_v3  ;;  %v4928_v1 = vadd.f32 %v11433_v29, %v4895_v39  ;;  %v4906_v5 = vadd.f32 %v5496_v32, %v5464_v17 }
 0x633   : > { %v4897_v14 = vpop.f32.mrf.mxu1 }
 0x634   : > { %4962 = vst [vmem:[%s11439_s1 + $0x70] sm:$0xff] %v4946_v28  ;;  %v4944_v35 = vadd.f32 %v5916_v6, %v4928_v1  ;;  %v4931_v36 = vadd.f32 %v11433_v29, %v4906_v5  ;;  %v4898_v60 = vadd.f32 %v4897_v14, %v4752_v44 }
 0x636   : > { %4960 = vst [vmem:[%s11439_s1 + $0x60] sm:$0xff] %v4944_v35  ;;  %v4947_v18 = vadd.f32 %v5917_v54, %v4931_v36  ;;  %v4929_v62 = vadd.f32 %v11433_v29, %v4898_v60 }
 0x638   : > { %4963 = vst [vmem:[%s11439_s1 + $0x78] sm:$0xff] %v4947_v18  ;;  %v4945_v61 = vadd.f32 %v5918_v40, %v4929_v62 }
 0x63a   : > { %4961 = vst [vmem:[%s11439_s1 + $0x68] sm:$0xff] %v4945_v61 }
 0x63b   : > { %6146 = shalt.err (!%p6143_p10)
}
 0x63c   : > { %s6147_s23 = scalar_lea.hbm %s11493_s30, 2048  ;;  %s6151_s1 = scalar_lea.hbm %s13126_s2, 8192 }
 0x63d   : > { %p6148_p13 = scmp.ne.s32.totalorder %s11493_s30, %s6147_s23  ;;  %p6152_p2 = scmp.lt.s32.totalorder %s11493_s30, %s13126_s2 }
 0x63e   : > { %p6153_p8 = scmp.lt.s32.totalorder %s6151_s1, %s6147_s23 }
 0x63f   : > { %p6149_p7 = pnand %p6148_p13, %p13127_p1 }
 0x640   : > { %p6154_p11 = por %p6153_p8, %p6152_p2 }
 0x641   : > { %p6150_p5 = pneg %p6149_p7 }
 0x643   : > { %p6155_p6 = pnand %p6154_p11, %p6150_p5 }
 0x645   : > { %6158 = shalt.err (!%p6155_p6)
}
 0x646   : > { %s6315_s3 = smov 128   ;;  %s6316_s15 = smov 8  }
 0x647   : > { %5539 = dma.vmem_to_hbm [thread:$0]  (%p13127_p1), %s11486_s10, 2048, %s11493_s30, %s11498_s6, %s6315_s3, %s6315_s3, %s6316_s15  }
 0x648 PF: > { %s13128_s28 = sld [smem:[#allocation27_spill]]  ;;  %p5582_p9 = scmp.ge.s32.totalorder %s6297_s26, 2 }
 0x649   : > { %s13129_s22 = sld [smem:[#allocation36_spill]] }
 0x64e   : > { %s4996_s19 = sand.u32 1, %s13128_s28  }
 0x64f   : > { %p13130_p4 = scmp.ne.s32.totalorder %s13129_s22, 0  ;;  %s4997_s5 = scalar_lea.sflag [#allocation4], %s4996_s19 }
 0x651   : > { %p5568_p0 = pnand %p5582_p9, %p13130_p4 }
 0x653   : > { %p5569_p3 = pneg %p5568_p0 }
 0x655   : > { %6240 = dma.done.wait (%p5569_p3), %s4997_s5, 2048  }
 0x656   : > { %6242 = vsyncadd (%p5569_p3), %s4997_s5, 4294965248  ;;  %s36_s26 = sadd.s32 1, %s6297_s26   ;;  %s13132_s18 = sld [smem:[#allocation25_spill]] }
 0x657   : > { %p11526_p12 = scmp.ge.s32.totalorder %s36_s26, 6   ;;  %s13133_s30 = sld [smem:[#allocation26_spill]] }
 0x658   : > { %s13134_s16 = sld [smem:[#allocation28_spill]]  ;;  %s13136_s10 = smov %s13160_s29 }
 0x659   : > { %s13135_s17 = sld [smem:[#allocation29_spill]]  ;;  %s13140_s15 = smov %s13166_s12 }
 0x65a   : > { %s13137_s6 = sld [smem:[#allocation33_spill]]  ;;  %s13142_s19 = smov %s6273_s20 }
 0x65b   : > { %s13138_s13 = sld [smem:[#allocation37_spill]]  ;;  %s13143_s20 = smov %s6277_s21 }
 0x65c   : > { %s13139_s29 = smov %s13132_s18  ;;  %s13141_s18 = smov %s13136_s10 }
 0x65d   : > { %s13144_s21 = smov %s6641_s4  ;;  %s13145_s22 = smov %s6289_s24 }
 0x65e   : > { %s13146_s23 = smov %s6293_s25  ;;  %35 = sbr.rel (!%p11526_p12) target bundleno = 31 (0x1f), region = 166 }
 0x660   : > { %s13147_s24 = smov %s13137_s6 }
 0x661   : > { %s13148_s25 = smov %s13138_s13 }
 0x663   :  { %5002 = vsyncpa [#allocation3], 1 }
 0x664   :  { %5004 = vsyncpa [#allocation3 + $0x1], 1 }
 0x665   :  { %5005 = vsyncpa [#allocation6], 1 }
 0x666   :  { %5007 = vsyncpa [#allocation6 + $0x1], 1 }
 0x667   :  { %5008 = vsyncpa [#allocation9], 1 }
 0x668   :  { %5009 = vsyncpa [#allocation12], 1 }
 0x669   :  { %5010 = vsyncpa [#allocation15], 1 }
 0x66a   :  { %5011 = vsyncpa [#allocation4], 1 }
 0x66b   :  { %5013 = vsyncpa [#allocation4 + $0x1], 1 }

</bundles_post_ra>
